<compile_context>
chip_gen: v7x
topology: tpu7x:2x2x1
jax: 0.10.0
libtpu: 0.0.40
codegen_flags: <defaults>
</compile_context>

<pallas_src>
import numpy as np
import jax
import jax.numpy as jnp
from jax import lax
from jax.experimental import pallas as pl
from jax.experimental.pallas import tpu as pltpu


def _round_up(v, m):
    return ((v + m - 1) // m) * m


def _conv3x3_same_mat(w, hh, ww):
    """PyTorch Conv2d(cin->cout, k=3, padding=1) as a dense matrix.

    A[co*hh*ww + p_out, ci*hh*ww + p_in] = w[co, ci, dy, dx] for every
    in-bounds tap (zero 'same' padding, cross-correlation), so out = A @ in.
    """
    cout, cin = w.shape[0], w.shape[1]
    hw = hh * ww
    a = np.zeros((cout * hw, cin * hw), np.float32)
    co_off = np.arange(cout)[:, None] * hw
    ci_off = np.arange(cin)[None, :] * hw
    for dy in range(3):
        for dx in range(3):
            wt = w[:, :, dy, dx]                               # (cout, cin)
            for h in range(hh):
                hi = h + dy - 1
                if hi < 0 or hi >= hh:
                    continue
                for wc in range(ww):
                    wi = wc + dx - 1
                    if wi < 0 or wi >= ww:
                        continue
                    a[co_off + (h * ww + wc), ci_off + (hi * ww + wi)] = wt
    return a


def _avgpool2_mat(c, hh, ww):
    """2x2 average pool (stride 2) over c channels as a channel-diagonal dense
    matrix (c*(hh//2)*(ww//2), c*hh*ww); entries are 0.25 (bf16-exact)."""
    ho, wo = hh // 2, ww // 2
    m = np.zeros((c * ho * wo, c * hh * ww), np.float32)
    co = np.arange(c) * (ho * wo)
    ci = np.arange(c) * (hh * ww)
    for i in range(ho):
        for j in range(wo):
            q = i * wo + j
            for a in range(2):
                for b in range(2):
                    m[co + q, ci + (2 * i + a) * ww + (2 * j + b)] = 0.25
    return m


# ----------------------------------------------------------------------------
# TripletModel.forward: fused embedding CNN as one Pallas kernel.
# ----------------------------------------------------------------------------
def triplet_model_forward(x_nchw, params, block_b=None):
    w1, b1, w2, b2, wl, bl = [np.asarray(p, dtype=np.float32) for p in params]
    n, cin, hh, ww = x_nchw.shape
    assert cin == 1 and hh % 4 == 0 and ww % 4 == 0
    hw = hh * ww
    c1, c2, emb = w1.shape[0], w2.shape[0], wl.shape[0]
    h2d, w2d = hh // 2, ww // 2
    hw2 = h2d * w2d
    p2n = (hh // 4) * (ww // 4)
    assert wl.shape[1] == c2 * p2n

    # ---- host-side weight folding (weights only, fixed size) ---------------
    a1 = _conv3x3_same_mat(w1, hh, ww)            # (c1*hw,  cin*hw)
    p1 = _avgpool2_mat(c1, hh, ww)                # (c1*hw2, c1*hw)
    a2 = _conv3x3_same_mat(w2, h2d, w2d)          # (c2*hw2, c1*hw2)
    p2 = _avgpool2_mat(c2, h2d, w2d)              # (c2*p2n, c2*hw2)

    k1 = hw + 8           # input rows: hw pixels + ones-row + 7 zero rows
    r1 = c1 * hw + 8      # h1 rows:    (c,p) + ones-row + 7 zero rows
    r2 = c2 * hw2 + 8     # h2 rows:    (c,q) + ones-row + 7 zero rows

    c1e = np.zeros((r1, k1), np.float32)
    c1e[:c1 * hw, :hw] = a1
    c1e[:c1 * hw, hw] = np.repeat(b1, hw)         # bias via the ones-row
    c1e[c1 * hw, hw] = 1.0                        # re-emit the ones-row

    m2e = np.zeros((r2, r1), np.float32)
    m2e[:c2 * hw2, :c1 * hw] = a2 @ p1            # conv2 o avgpool1
    m2e[:c2 * hw2, c1 * hw] = np.repeat(b2, hw2)
    m2e[c2 * hw2, c1 * hw] = 1.0

    le = np.zeros((emb, r2), np.float32)
    le[:, :c2 * hw2] = wl @ p2                    # linear o flatten o avgpool2
    le[:, c2 * hw2] = bl

    c1e = jnp.asarray(c1e, jnp.bfloat16)          # 1.08 MB
    m2e = jnp.asarray(m2e, jnp.bfloat16)          # 4.26 MB
    le = jnp.asarray(le, jnp.bfloat16)            # 0.07 MB

    # ---- batch blocking: images on lanes ------------------------------------
    if block_b is None:
        if n <= 16:
            block_b = _round_up(n, 8)                          # one padded step
        else:
            # >=2 grid steps (v7x megacore), at most 128 lanes per step.
            block_b = min(128, _round_up(pl.cdiv(n, 2), 8))
    n_pad = _round_up(n, block_b)
    nb = n_pad // block_b

    # host-side layout plumbing: (N,1,H,W) -> pixels on sublanes, images on lanes
    x_t = jnp.transpose(x_nchw.reshape(n, hw))                 # (hw, n)
    x_t = jnp.pad(x_t, ((0, 0), (0, n_pad - n)))
    ones_row = jnp.ones((1, n_pad), x_t.dtype)
    zero_rows = jnp.zeros((k1 - hw - 1, n_pad), x_t.dtype)
    x_in = jnp.concatenate([x_t, ones_row, zero_rows], axis=0).astype(jnp.bfloat16)

    # ---- kernel: 3 MXU matmuls + 2 f32 ReLUs + 1 dense store per step ------
    def kernel(x_ref, c1_ref, m2_ref, l_ref, o_ref):
        h1 = jnp.dot(c1_ref[...], x_ref[...],
                     preferred_element_type=jnp.float32)       # (r1, B) f32
        h1 = jnp.maximum(h1, 0.0).astype(jnp.bfloat16)
        h2 = jnp.dot(m2_ref[...], h1,
                     preferred_element_type=jnp.float32)       # (r2, B) f32
        h2 = jnp.maximum(h2, 0.0).astype(jnp.bfloat16)
        y = jnp.dot(l_ref[...], h2,
                    preferred_element_type=jnp.float32)        # (emb, B) f32
        o_ref[...] = y                                         # lane-dense slab

    out = pl.pallas_call(
        kernel,
        out_shape=jax.ShapeDtypeStruct((emb, n_pad), jnp.float32),
        grid=(nb,),
        in_specs=[
            pl.BlockSpec((k1, block_b), lambda i: (0, i)),     # x: lane-blocked
            pl.BlockSpec(c1e.shape, lambda i: (0, 0)),         # constants:
            pl.BlockSpec(m2e.shape, lambda i: (0, 0)),         #   fetched once
            pl.BlockSpec(le.shape, lambda i: (0, 0)),
        ],
        out_specs=pl.BlockSpec((emb, block_b), lambda i: (0, i)),
        compiler_params=pltpu.CompilerParams(
            dimension_semantics=("parallel",),
            vmem_limit_bytes=32 * 1024 * 1024),
    )(x_in, c1e, m2e, le)

    return jnp.transpose(out)[:n]                              # (n, emb)


# ----------------------------------------------------------------------------
# Pure-JAX reference (mirrors the PyTorch module exactly, NCHW).
# ----------------------------------------------------------------------------
def reference_forward(x_nchw, params):
    w1, b1, w2, b2, wl, bl = params

    def conv_relu(x, w, b):
        y = lax.conv_general_dilated(
            x, w, window_strides=(1, 1), padding="SAME",
            dimension_numbers=("NCHW", "OIHW", "NCHW"))
        return jax.nn.relu(y + b[None, :, None, None])

    def pool(x):
        n, c, hh, ww = x.shape
        return x.reshape(n, c, hh // 2, 2, ww // 2, 2).mean(axis=(3, 5))

    y = pool(conv_relu(x_nchw, w1, b1))
    y = pool(conv_relu(y, w2, b2))
    f = y.reshape(y.shape[0], -1)                       # PyTorch flatten (C,H,W)
    return f @ wl.T + bl[None, :]


# ----------------------------------------------------------------------------
# Deterministic parameter init (PyTorch layouts).
# ----------------------------------------------------------------------------
def init_params(key, cin=1, c1=8, c2=16, hh=16, ww=16, emb=32):
    ks = jax.random.split(key, 6)
    w1 = jax.random.normal(ks[0], (c1, cin, 3, 3), jnp.float32) / np.sqrt(9 * cin)
    b1 = 0.1 * jax.random.normal(ks[1], (c1,), jnp.float32)
    w2 = jax.random.normal(ks[2], (c2, c1, 3, 3), jnp.float32) / np.sqrt(9 * c1)
    b2 = 0.1 * jax.random.normal(ks[3], (c2,), jnp.float32)
    feat = c2 * (hh // 4) * (ww // 4)
    wl = jax.random.normal(ks[4], (emb, feat), jnp.float32) / np.sqrt(feat)
    bl = 0.1 * jax.random.normal(ks[5], (emb,), jnp.float32)
    return (w1, b1, w2, b2, wl, bl)


if __name__ == "__main__":
    key = jax.random.PRNGKey(0)
    kx, kp = jax.random.split(key)
    x = jax.random.normal(kx, (2, 1, 16, 16), jnp.float32)   # NCHW drawings
    params = init_params(kp)

    out = jax.block_until_ready(triplet_model_forward(x, params))

    ref = reference_forward(x, params)
    assert out.shape == (2, 32)
    # bf16 MXU operands with f32 accumulation (intentional precision choice).
    np.testing.assert_allclose(np.asarray(out), np.asarray(ref),
                               rtol=4e-2, atol=4e-2)
    print("KERNEL_OK")
</pallas_src>

<mosaic_0001>
module attributes {stable_mosaic.version = 11 : i64} {
  func.func @kernel(%arg0: i32, %arg1: memref<264x8xbf16, #tpu.memory_space<vmem>>, %arg2: memref<2056x264xbf16, #tpu.memory_space<vmem>>, %arg3: memref<1032x2056xbf16, #tpu.memory_space<vmem>>, %arg4: memref<32x1032xbf16, #tpu.memory_space<vmem>>, %arg5: memref<32x8xf32, #tpu.memory_space<vmem>>) attributes {dimension_semantics = [#tpu.dimension_semantics<parallel>], iteration_bounds = array<i64: 1>, scalar_prefetch = 0 : i64, scratch_operands = 0 : i64, tpu.core_type = #tpu.core_type<tc>, window_params = [{transform_indices = @transform_0, window_bounds = array<i64: 264, 8>}, {pipeline_mode = #tpu.pipeline_mode<synchronous>, transform_indices = @transform_1, window_bounds = array<i64: 2056, 264>}, {pipeline_mode = #tpu.pipeline_mode<synchronous>, transform_indices = @transform_2, window_bounds = array<i64: 1032, 2056>}, {pipeline_mode = #tpu.pipeline_mode<synchronous>, transform_indices = @transform_3, window_bounds = array<i64: 32, 1032>}, {transform_indices = @transform_4, window_bounds = array<i64: 32, 8>}]} {
    %c0 = arith.constant 0 : index
    %c0_0 = arith.constant 0 : index
    %0 = vector.load %arg2[%c0, %c0_0] : memref<2056x264xbf16, #tpu.memory_space<vmem>>, vector<2056x264xbf16>
    %c0_1 = arith.constant 0 : index
    %c0_2 = arith.constant 0 : index
    %1 = vector.load %arg1[%c0_1, %c0_2] : memref<264x8xbf16, #tpu.memory_space<vmem>>, vector<264x8xbf16>
    %cst = arith.constant dense<0.000000e+00> : vector<2056x8xf32>
    %2 = tpu.matmul %0, %1, %cst {dimension_numbers = #tpu.dot_dimension_numbers<[1], [0], [0], [1], [0, 0, 1, 1], [], []>} : vector<2056x264xbf16>, vector<264x8xbf16>, vector<2056x8xf32> -> vector<2056x8xf32>
    %cst_3 = arith.constant 0.000000e+00 : f32
    %3 = vector.broadcast %cst_3 : f32 to vector<2056x8xf32>
    %4 = arith.maximumf %2, %3 : vector<2056x8xf32>
    %5 = arith.truncf %4 : vector<2056x8xf32> to vector<2056x8xbf16>
    %c0_4 = arith.constant 0 : index
    %c0_5 = arith.constant 0 : index
    %6 = vector.load %arg3[%c0_4, %c0_5] : memref<1032x2056xbf16, #tpu.memory_space<vmem>>, vector<1032x2056xbf16>
    %cst_6 = arith.constant dense<0.000000e+00> : vector<1032x8xf32>
    %7 = tpu.matmul %6, %5, %cst_6 {dimension_numbers = #tpu.dot_dimension_numbers<[1], [0], [0], [1], [0, 0, 1, 1], [], []>} : vector<1032x2056xbf16>, vector<2056x8xbf16>, vector<1032x8xf32> -> vector<1032x8xf32>
    %cst_7 = arith.constant 0.000000e+00 : f32
    %8 = vector.broadcast %cst_7 : f32 to vector<1032x8xf32>
    %9 = arith.maximumf %7, %8 : vector<1032x8xf32>
    %10 = arith.truncf %9 : vector<1032x8xf32> to vector<1032x8xbf16>
    %c0_8 = arith.constant 0 : index
    %c0_9 = arith.constant 0 : index
    %11 = vector.load %arg4[%c0_8, %c0_9] : memref<32x1032xbf16, #tpu.memory_space<vmem>>, vector<32x1032xbf16>
    %cst_10 = arith.constant dense<0.000000e+00> : vector<32x8xf32>
    %12 = tpu.matmul %11, %10, %cst_10 {dimension_numbers = #tpu.dot_dimension_numbers<[1], [0], [0], [1], [0, 0, 1, 1], [], []>} : vector<32x1032xbf16>, vector<1032x8xbf16>, vector<32x8xf32> -> vector<32x8xf32>
    %c0_11 = arith.constant 0 : index
    %c0_12 = arith.constant 0 : index
    %13 = vector.load %arg5[%c0_11, %c0_12] : memref<32x8xf32, #tpu.memory_space<vmem>>, vector<32x8xf32>
    tpu.vector_store %arg5[%c0_11, %c0_12], %12 {strides = array<i32>} : memref<32x8xf32, #tpu.memory_space<vmem>>, vector<32x8xf32>,
    return
  }
  func.func @transform_0(%arg0: i32) -> (i32, i32) {
    %c0_i32 = arith.constant 0 : i32
    %c0_i32_0 = arith.constant 0 : i32
    return %c0_i32, %arg0 : i32, i32
  }
  func.func @transform_1(%arg0: i32) -> (i32, i32) {
    %c0_i32 = arith.constant 0 : i32
    %c0_i32_0 = arith.constant 0 : i32
    %c0_i32_1 = arith.constant 0 : i32
    return %c0_i32, %c0_i32_0 : i32, i32
  }
  func.func @transform_2(%arg0: i32) -> (i32, i32) {
    %c0_i32 = arith.constant 0 : i32
    %c0_i32_0 = arith.constant 0 : i32
    %c0_i32_1 = arith.constant 0 : i32
    return %c0_i32, %c0_i32_0 : i32, i32
  }
  func.func @transform_3(%arg0: i32) -> (i32, i32) {
    %c0_i32 = arith.constant 0 : i32
    %c0_i32_0 = arith.constant 0 : i32
    %c0_i32_1 = arith.constant 0 : i32
    return %c0_i32, %c0_i32_0 : i32, i32
  }
  func.func @transform_4(%arg0: i32) -> (i32, i32) {
    %c0_i32 = arith.constant 0 : i32
    %c0_i32_0 = arith.constant 0 : i32
    return %c0_i32, %arg0 : i32, i32
  }
}

</mosaic_0001>

<bundles_post_ra>
// kernel: tpu_custom_call.1
= control target key start
LH: loop header
LB: loop body
LE: loop exit
PB: predicated region body
PF: predicated region fallthrough
CT: control target
= control target key end

     0   :  { %9 = vsyncpa [#allocation3], 0  ;;  %s25278_s15 = smov [#allocation2]   ;;  %s28614_s0 = inlined_call_operand.vmem [shape: bf16[264,8], index: 0, kind: input, shape index: {}]   ;;  %s28615_s1 = inlined_call_operand.vmem [shape: bf16[2056,264], index: 1, kind: input, shape index: {}]   ;;  %s28616_s2 = inlined_call_operand.hbm [shape: bf16[1032,2056], index: 2, kind: input, shape index: {}]   ;;  %s28617_s3 = inlined_call_operand.vmem [shape: bf16[32,1032], index: 3, kind: input, shape index: {}]   ;;  %s28618_s4 = inlined_call_operand.vmem [shape: f32[32,8], index: 4, kind: output, shape index: {}]  }
   0x1   :  { %s19_s16 = sshll.u32 %s25278_s15, 4  ;;  %s25254_s19 = scalar_lea.hbm %s28616_s2, 140352  ;;  %s20_s16 = int_to_ptr.vmem [resolvable:$true] %s19_s16 }
   0x2   :  { %p25255_p0 = scmp.ne.s32.totalorder %s28616_s2, %s25254_s19  ;;  %p25258_p1 = scmp.lt.u32.totalorder %s25254_s19, %s28616_s2 }
   0x4   :  { %p25260_p2 = pnand %p25258_p1, %p25255_p0 }
   0x6   :  { %25263 = shalt.err (!%p25260_p2)
}
   0x7   :  { %s25264_s24 = scalar_lea.vmem %s20_s16, 140352  ;;  %p25269_p4 = scmp.lt.s32.totalorder %s20_s16, %s20_s16 }
   0x8   :  { %p25265_p3 = scmp.ne.s32.totalorder %s20_s16, %s25264_s24  ;;  %p25270_p5 = scmp.lt.s32.totalorder %s25264_s24, %s25264_s24 }
   0xa   :  { %p25271_p6 = por %p25270_p5, %p25269_p4 }
   0xc   :  { %p25272_p7 = pnand %p25271_p6, %p25265_p3 }
   0xe   :  { %25275 = shalt.err (!%p25272_p7)
}
   0xf   :  { %s25279_s25 = smov 1088   ;;  %s25280_s26 = smov 68  }
  0x10   :  { %25 = dma.hbm_to_vmem [thread:$0]  %s28616_s2, 140352, %s20_s16, [#allocation3], %s25279_s25, %s25279_s25, %s25280_s26  }
  0x11   :  { %25276 = dma.done.wait [#allocation3], 140352  }
  0x12   :  { %25277 = vsyncadd [#allocation3], 4294826944  ;;  %v28619_v0 = vmov 0   ;;  %v23079_v1 = vld [vmem:[%s28614_s0] sm:$0xff]   ;;  %v23080_v2 = vld [vmem:[%s28614_s0 + $0x8] sm:$0xff]   ;;  %vm2996_vm0 = vcmask 1043456  }
  0x13   :  { %3000 = vmatprep.subr.bf16.mxu0 %v28619_v0  ;;  %20727 = vmatprep.subr.bf16.mxu1 %v28619_v0  ;;  %v23081_v3 = vld [vmem:[%s28614_s0 + $0x10] sm:$0xff]   ;;  %v23082_v4 = vld [vmem:[%s28614_s0 + $0x18] sm:$0xff]   ;;  %v23083_v5 = vld [vmem:[%s28614_s0 + $0x20] sm:$0xff]   ;;  %v28621_v21 = vmov 0.0   ;;  %vm25283_vm1 = vmmov 0   ;;  %vm2608_vm2 = vcmask 64512  }
  0x14   :  { %3001 = vmatpush1.bf16.msra.mxu0 %v23079_v1  ;;  %v23097_v6 = vld [vmem:[%s28615_s1 + $0x4] ss:$12 sps:$4 sm:$0xff]   ;;  %v23084_v7 = vld [vmem:[%s28614_s0 + $0x28] sm:$0xff]   ;;  %v23086_v9 = vld [vmem:[%s28614_s0 + $0x38] sm:$0xff]  }
  0x15   :  { %3002 = vmatprep.subr.bf16.mxu0 %v28619_v0  ;;  %3032 = vmatprep.mubr.bf16.mxu0 %v23097_v6  ;;  %v23085_v8 = vld [vmem:[%s28614_s0 + $0x30] sm:$0xff]   ;;  %v23087_v10 = vld [vmem:[%s28614_s0 + $0x40] sm:$0xff]   ;;  %v23088_v11 = vld [vmem:[%s28614_s0 + $0x48] sm:$0xff]  }
  0x16   :  { %v23089_v12 = vld [vmem:[%s28614_s0 + $0x50] sm:$0xff]   ;;  %v23090_v13 = vld [vmem:[%s28614_s0 + $0x58] sm:$0xff]   ;;  %v23091_v14 = vld [vmem:[%s28614_s0 + $0x60] sm:$0xff]  }
  0x17   :  { %v23092_v15 = vld [vmem:[%s28614_s0 + $0x68] sm:$0xff]   ;;  %v23093_v16 = vld [vmem:[%s28614_s0 + $0x70] sm:$0xff]   ;;  %v23094_v17 = vld [vmem:[%s28614_s0 + $0x78] sm:$0xff]  }
  0x18   :  { %3003 = vmatpush1.bf16.msra.mxu0 %v23080_v2  ;;  %v23098_v18 = vld [vmem:[%s28614_s0 + $0x80] ss:$0 sps:$4 sm:$0xff]   ;;  %v23099_v20 = vld [vmem:[%s28615_s1 + $0x1c] ss:$12 sps:$4 sm:$0xff]   ;;  %v23101_v23 = vld [vmem:[%s28615_s1 + $0x18] ss:$12 sps:$4 sm:$0xff]  }
  0x19   :  { %3004 = vmatprep.subr.bf16.mxu0 %v28619_v0  ;;  %v23095_v19 = vld [vmem:[%s28615_s1] ss:$12 sps:$4 sm:$0xff]   ;;  %v2998_v22 = vsel %vm2996_vm0, %v23098_v18, 0  ;;  %v23104_v25 = vld [vmem:[%s28615_s1 + $0x30] ss:$12 sps:$4 sm:$0xff]  }
  0x1a   :  { %v23102_v24 = vld [vmem:[%s28615_s1 + $0x34] ss:$12 sps:$4 sm:$0xff]   ;;  %v23105_v26 = vld [vmem:[%s28615_s1 + $0x4c] ss:$12 sps:$4 sm:$0xff]   ;;  %v23108_v28 = vld [vmem:[%s28615_s1 + $0x64] ss:$12 sps:$4 sm:$0xff]  }
  0x1b   :  { %v23107_v27 = vld [vmem:[%s28615_s1 + $0x48] ss:$12 sps:$4 sm:$0xff]   ;;  %v23110_v29 = vld [vmem:[%s28615_s1 + $0x60] ss:$12 sps:$4 sm:$0xff]   ;;  %v23113_v31 = vld [vmem:[%s28615_s1 + $0x78] ss:$12 sps:$4 sm:$0xff]  }
  0x1c   :  { %3005 = vmatpush1.bf16.msra.mxu0 %v23081_v3  ;;  %v23111_v30 = vld [vmem:[%s28615_s1 + $0x7c] ss:$12 sps:$4 sm:$0xff]   ;;  %v23114_v32 = vld [vmem:[%s28615_s1 + $0x94] ss:$12 sps:$4 sm:$0xff]   ;;  %v23117_v34 = vld [vmem:[%s28615_s1 + $0xac] ss:$12 sps:$4 sm:$0xff]  }
  0x1d   :  { %3006 = vmatprep.subr.bf16.mxu0 %v28619_v0  ;;  %v23116_v33 = vld [vmem:[%s28615_s1 + $0x90] ss:$12 sps:$4 sm:$0xff]   ;;  %v23119_v35 = vld [vmem:[%s28615_s1 + $0xa8] ss:$12 sps:$4 sm:$0xff]   ;;  %v23122_v37 = vld [vmem:[%s28615_s1 + $0xc0] ss:$12 sps:$4 sm:$0xff]  }
  0x1e   :  { %v23120_v36 = vld [vmem:[%s28615_s1 + $0xc4] ss:$12 sps:$4 sm:$0xff]   ;;  %v23123_v38 = vld [vmem:[%s28615_s1 + $0xdc] ss:$12 sps:$4 sm:$0xff]   ;;  %v23126_v40 = vld [vmem:[%s28615_s1 + $0xf4] ss:$12 sps:$4 sm:$0xff]  }
  0x1f   :  { %v23125_v39 = vld [vmem:[%s28615_s1 + $0xd8] ss:$12 sps:$4 sm:$0xff]   ;;  %v23128_v41 = vld [vmem:[%s28615_s1 + $0xf0] ss:$12 sps:$4 sm:$0xff]   ;;  %v23131_v43 = vld [vmem:[%s28615_s1 + $0x108] ss:$12 sps:$4 sm:$0xff]  }
  0x20   :  { %3007 = vmatpush1.bf16.msra.mxu0 %v23082_v4  ;;  %v23129_v42 = vld [vmem:[%s28615_s1 + $0x10c] ss:$12 sps:$4 sm:$0xff]   ;;  %v23132_v44 = vld [vmem:[%s28615_s1 + $0x124] ss:$12 sps:$4 sm:$0xff]   ;;  %v23135_v46 = vld [vmem:[%s28615_s1 + $0x13c] ss:$12 sps:$4 sm:$0xff]  }
  0x21   :  { %3008 = vmatprep.subr.bf16.mxu0 %v28619_v0  ;;  %v23134_v45 = vld [vmem:[%s28615_s1 + $0x120] ss:$12 sps:$4 sm:$0xff]   ;;  %v23137_v47 = vld [vmem:[%s28615_s1 + $0x138] ss:$12 sps:$4 sm:$0xff]   ;;  %v23140_v49 = vld [vmem:[%s28615_s1 + $0x150] ss:$12 sps:$4 sm:$0xff]  }
  0x22   :  { %v23138_v48 = vld [vmem:[%s28615_s1 + $0x154] ss:$12 sps:$4 sm:$0xff]   ;;  %v23141_v50 = vld [vmem:[%s28615_s1 + $0x16c] ss:$12 sps:$4 sm:$0xff]   ;;  %v23144_v52 = vld [vmem:[%s28615_s1 + $0x184] ss:$12 sps:$4 sm:$0xff]  }
  0x23   :  { %v23143_v51 = vld [vmem:[%s28615_s1 + $0x168] ss:$12 sps:$4 sm:$0xff]   ;;  %v23146_v53 = vld [vmem:[%s28615_s1 + $0x180] ss:$12 sps:$4 sm:$0xff]   ;;  %v23149_v55 = vld [vmem:[%s28615_s1 + $0x198] ss:$12 sps:$4 sm:$0xff]  }
  0x24   :  { %3009 = vmatpush1.bf16.msra.mxu0 %v23083_v5  ;;  %v23147_v54 = vld [vmem:[%s28615_s1 + $0x19c] ss:$12 sps:$4 sm:$0xff]   ;;  %v23150_v56 = vld [vmem:[%s28615_s1 + $0x1b4] ss:$12 sps:$4 sm:$0xff]   ;;  %v23153_v58 = vld [vmem:[%s28615_s1 + $0x1cc] ss:$12 sps:$4 sm:$0xff]  }
  0x25   :  { %3010 = vmatprep.subr.bf16.mxu0 %v28619_v0  ;;  %v23152_v57 = vld [vmem:[%s28615_s1 + $0x1b0] ss:$12 sps:$4 sm:$0xff]   ;;  %v23155_v59 = vld [vmem:[%s28615_s1 + $0x1c8] ss:$12 sps:$4 sm:$0xff]   ;;  %v23158_v61 = vld [vmem:[%s28615_s1 + $0x1e0] ss:$12 sps:$4 sm:$0xff]  }
  0x26   :  { %v23156_v60 = vld [vmem:[%s28615_s1 + $0x1e4] ss:$12 sps:$4 sm:$0xff]   ;;  %v23159_v62 = vld [vmem:[%s28615_s1 + $0x1fc] ss:$12 sps:$4 sm:$0xff]   ;;  %v23162_v1 = vld [vmem:[%s28615_s1 + $0x214] ss:$12 sps:$4 sm:$0xff]  }
  0x27   :  { %v23161_v63 = vld [vmem:[%s28615_s1 + $0x1f8] ss:$12 sps:$4 sm:$0xff]   ;;  %v23164_v2 = vld [vmem:[%s28615_s1 + $0x210] ss:$12 sps:$4 sm:$0xff]   ;;  %v23167_v4 = vld [vmem:[%s28615_s1 + $0x228] ss:$12 sps:$4 sm:$0xff]  }
  0x28   :  { %3011 = vmatpush1.bf16.msra.mxu0 %v23084_v7  ;;  %v23165_v3 = vld [vmem:[%s28615_s1 + $0x22c] ss:$12 sps:$4 sm:$0xff]   ;;  %v23168_v5 = vld [vmem:[%s28615_s1 + $0x244] ss:$12 sps:$4 sm:$0xff]   ;;  %v23171_v7 = vld [vmem:[%s28615_s1 + $0x25c] ss:$12 sps:$4 sm:$0xff]  }
  0x29   :  { %3012 = vmatprep.subr.bf16.mxu0 %v28619_v0  ;;  %v23170_v6 = vld [vmem:[%s28615_s1 + $0x240] ss:$12 sps:$4 sm:$0xff]   ;;  %v23188_v18 = vld [vmem:[%s28615_s1 + $0x2d0] ss:$12 sps:$4 sm:$0xff]  }
  0x2c   :  { %3013 = vmatpush1.bf16.msra.mxu0 %v23085_v8  ;;  %v23173_v8 = vld [vmem:[%s28615_s1 + $0x258] ss:$12 sps:$4 sm:$0xff]  }
  0x2d   :  { %3014 = vmatprep.subr.bf16.mxu0 %v28619_v0 }
  0x30   :  { %3015 = vmatpush1.bf16.msra.mxu0 %v23086_v9  ;;  %v23174_v9 = vld [vmem:[%s28615_s1 + $0x274] ss:$12 sps:$4 sm:$0xff]  }
  0x31   :  { %3016 = vmatprep.subr.bf16.mxu0 %v28619_v0 }
  0x34   :  { %3017 = vmatpush1.bf16.msra.mxu0 %v23087_v10  ;;  %v23176_v10 = vld [vmem:[%s28615_s1 + $0x270] ss:$12 sps:$4 sm:$0xff]  }
  0x35   :  { %3018 = vmatprep.subr.bf16.mxu0 %v28619_v0 }
  0x38   :  { %3019 = vmatpush1.bf16.msra.mxu0 %v23088_v11  ;;  %v23177_v11 = vld [vmem:[%s28615_s1 + $0x28c] ss:$12 sps:$4 sm:$0xff]  }
  0x39   :  { %3020 = vmatprep.subr.bf16.mxu0 %v28619_v0 }
  0x3c   :  { %3021 = vmatpush1.bf16.msra.mxu0 %v23089_v12  ;;  %v23179_v12 = vld [vmem:[%s28615_s1 + $0x288] ss:$12 sps:$4 sm:$0xff]  }
  0x3d   :  { %3022 = vmatprep.subr.bf16.mxu0 %v28619_v0 }
  0x40   :  { %3023 = vmatpush1.bf16.msra.mxu0 %v23090_v13  ;;  %v23180_v13 = vld [vmem:[%s28615_s1 + $0x2a4] ss:$12 sps:$4 sm:$0xff]  }
  0x41   :  { %3024 = vmatprep.subr.bf16.mxu0 %v28619_v0 }
  0x44   :  { %3025 = vmatpush1.bf16.msra.mxu0 %v23091_v14  ;;  %v23182_v14 = vld [vmem:[%s28615_s1 + $0x2a0] ss:$12 sps:$4 sm:$0xff]  }
  0x45   :  { %3026 = vmatprep.subr.bf16.mxu0 %v28619_v0 }
  0x48   :  { %3027 = vmatpush1.bf16.msra.mxu0 %v23092_v15  ;;  %v23183_v15 = vld [vmem:[%s28615_s1 + $0x2bc] ss:$12 sps:$4 sm:$0xff]  }
  0x49   :  { %3028 = vmatprep.subr.bf16.mxu0 %v28619_v0 }
  0x4c   :  { %3029 = vmatpush1.bf16.msra.mxu0 %v23093_v16  ;;  %v23185_v16 = vld [vmem:[%s28615_s1 + $0x2b8] ss:$12 sps:$4 sm:$0xff]  }
  0x4d   :  { %3030 = vmatprep.subr.bf16.mxu0 %v28619_v0 }
  0x50   :  { %3031 = vmatpush1.bf16.msra.mxu0 %v23094_v17  ;;  %v23186_v17 = vld [vmem:[%s28615_s1 + $0x2d4] ss:$12 sps:$4 sm:$0xff]  }
  0x51   :  { %19941 = vmatprep.subr.bf16.mxu0 %v28621_v21 }
  0x53   :  { %3033 = vmatmul.mubr.bf16.vlgmr.msra.gmra.mrb[0].mxu0 %v23095_v19  ;;  %v23189_v19 = vld [vmem:[%s28615_s1 + $0x2ec] ss:$12 sps:$4 sm:$0xff]  }
  0x54   :  { %19942 = vmatpush3.bf16.msra.mxu0 %v2998_v22  ;;  %3040 = vmatprep.mubr.bf16.mxu0 %v23099_v20  ;;  %v23191_v20 = vld [vmem:[%s28615_s1 + $0x2e8] ss:$12 sps:$4 sm:$0xff]   ;;  %v23192_v22 = vld [vmem:[%s28615_s1 + $0x304] ss:$12 sps:$4 sm:$0xff]  }
  0x55   :  { %12372 = vmatprep.subr.bf16.mxu0 %v28619_v0 }
  0x5b   :  { %3041 = vmatmul.mubr.bf16.gmra.mrb[4].mxu0 %v23101_v23  ;;  %v23194_v23 = vld [vmem:[%s28615_s1 + $0x300] ss:$12 sps:$4 sm:$0xff]  }
  0x5c   :  { %3048 = vmatprep.mubr.bf16.mxu0 %v23102_v24  ;;  %v23195_v24 = vld [vmem:[%s28615_s1 + $0x31c] ss:$12 sps:$4 sm:$0xff]  }
  0x63   :  { %3049 = vmatmul.mubr.bf16.gmra.mrb[8].mxu0 %v23104_v25  ;;  %v23197_v25 = vld [vmem:[%s28615_s1 + $0x318] ss:$12 sps:$4 sm:$0xff]  }
  0x64   :  { %3056 = vmatprep.mubr.bf16.mxu0 %v23105_v26  ;;  %v23198_v26 = vld [vmem:[%s28615_s1 + $0x334] ss:$12 sps:$4 sm:$0xff]  }
  0x6b   :  { %3057 = vmatmul.mubr.bf16.gmra.mrb[12].mxu0 %v23107_v27  ;;  %v23200_v27 = vld [vmem:[%s28615_s1 + $0x330] ss:$12 sps:$4 sm:$0xff]  }
  0x6c   :  { %3064 = vmatprep.mubr.bf16.mxu0 %v23108_v28  ;;  %v23201_v28 = vld [vmem:[%s28615_s1 + $0x34c] ss:$12 sps:$4 sm:$0xff]  }
  0x73   :  { %3065 = vmatmul.mubr.bf16.gmra.mrb[16].mxu0 %v23110_v29  ;;  %v23203_v29 = vld [vmem:[%s28615_s1 + $0x348] ss:$12 sps:$4 sm:$0xff]  }
  0x74   :  { %3072 = vmatprep.mubr.bf16.mxu0 %v23111_v30  ;;  %v23204_v30 = vld [vmem:[%s28615_s1 + $0x364] ss:$12 sps:$4 sm:$0xff]  }
  0x7b   :  { %3073 = vmatmul.mubr.bf16.gmra.mrb[20].mxu0 %v23113_v31  ;;  %v23206_v31 = vld [vmem:[%s28615_s1 + $0x360] ss:$12 sps:$4 sm:$0xff]  }
  0x7c   :  { %3080 = vmatprep.mubr.bf16.mxu0 %v23114_v32  ;;  %v23207_v32 = vld [vmem:[%s28615_s1 + $0x37c] ss:$12 sps:$4 sm:$0xff]  }
  0x83   :  { %3081 = vmatmul.mubr.bf16.gmra.mrb[24].mxu0 %v23116_v33  ;;  %v23209_v33 = vld [vmem:[%s28615_s1 + $0x378] ss:$12 sps:$4 sm:$0xff]  }
  0x84   :  { %3088 = vmatprep.mubr.bf16.mxu0 %v23117_v34  ;;  %v23210_v34 = vld [vmem:[%s28615_s1 + $0x394] ss:$12 sps:$4 sm:$0xff]  }
  0x8b   :  { %3089 = vmatmul.mubr.bf16.gmra.mrb[28].mxu0 %v23119_v35  ;;  %v23212_v35 = vld [vmem:[%s28615_s1 + $0x390] ss:$12 sps:$4 sm:$0xff]  }
  0x8c   :  { %3096 = vmatprep.mubr.bf16.mxu0 %v23120_v36  ;;  %v23213_v36 = vld [vmem:[%s28615_s1 + $0x3ac] ss:$12 sps:$4 sm:$0xff]  }
  0x93   :  { %3097 = vmatmul.mubr.bf16.gmra.mrb[32].mxu0 %v23122_v37  ;;  %v23215_v37 = vld [vmem:[%s28615_s1 + $0x3a8] ss:$12 sps:$4 sm:$0xff]  }
  0x94   :  { %3104 = vmatprep.mubr.bf16.mxu0 %v23123_v38  ;;  %v23216_v38 = vld [vmem:[%s28615_s1 + $0x3c4] ss:$12 sps:$4 sm:$0xff]  }
  0x9b   :  { %3105 = vmatmul.mubr.bf16.gmra.mrb[36].mxu0 %v23125_v39  ;;  %v23218_v39 = vld [vmem:[%s28615_s1 + $0x3c0] ss:$12 sps:$4 sm:$0xff]  }
  0x9c   :  { %3112 = vmatprep.mubr.bf16.mxu0 %v23126_v40  ;;  %v23219_v40 = vld [vmem:[%s28615_s1 + $0x3dc] ss:$12 sps:$4 sm:$0xff]  }
  0xa3   :  { %3113 = vmatmul.mubr.bf16.gmra.mrb[40].mxu0 %v23128_v41  ;;  %v23221_v41 = vld [vmem:[%s28615_s1 + $0x3d8] ss:$12 sps:$4 sm:$0xff]  }
  0xa4   :  { %3120 = vmatprep.mubr.bf16.mxu0 %v23129_v42  ;;  %v23222_v42 = vld [vmem:[%s28615_s1 + $0x3f4] ss:$12 sps:$4 sm:$0xff]  }
  0xab   :  { %3121 = vmatmul.mubr.bf16.gmra.mrb[44].mxu0 %v23131_v43  ;;  %v23224_v43 = vld [vmem:[%s28615_s1 + $0x3f0] ss:$12 sps:$4 sm:$0xff]  }
  0xac   :  { %3128 = vmatprep.mubr.bf16.mxu0 %v23132_v44  ;;  %v23225_v44 = vld [vmem:[%s28615_s1 + $0x40c] ss:$12 sps:$4 sm:$0xff]  }
  0xb3   :  { %3129 = vmatmul.mubr.bf16.gmra.mrb[48].mxu0 %v23134_v45  ;;  %v23227_v45 = vld [vmem:[%s28615_s1 + $0x408] ss:$12 sps:$4 sm:$0xff]  }
  0xb4   :  { %3136 = vmatprep.mubr.bf16.mxu0 %v23135_v46  ;;  %v23228_v46 = vld [vmem:[%s28615_s1 + $0x424] ss:$12 sps:$4 sm:$0xff]  }
  0xbb   :  { %3137 = vmatmul.mubr.bf16.gmra.mrb[52].mxu0 %v23137_v47  ;;  %v23230_v47 = vld [vmem:[%s28615_s1 + $0x420] ss:$12 sps:$4 sm:$0xff]  }
  0xbc   :  { %3144 = vmatprep.mubr.bf16.mxu0 %v23138_v48  ;;  %v23231_v48 = vld [vmem:[%s28615_s1 + $0x43c] ss:$12 sps:$4 sm:$0xff]  }
  0xc3   :  { %3145 = vmatmul.mubr.bf16.gmra.mrb[56].mxu0 %v23140_v49  ;;  %v23233_v49 = vld [vmem:[%s28615_s1 + $0x438] ss:$12 sps:$4 sm:$0xff]  }
  0xc4   :  { %3152 = vmatprep.mubr.bf16.mxu0 %v23141_v50  ;;  %v23234_v50 = vld [vmem:[%s28615_s1 + $0x454] ss:$12 sps:$4 sm:$0xff]  }
  0xcb   :  { %3153 = vmatmul.mubr.bf16.gmra.mrb[60].mxu0 %v23143_v51  ;;  %v23236_v51 = vld [vmem:[%s28615_s1 + $0x450] ss:$12 sps:$4 sm:$0xff]  }
  0xcc   :  { %3160 = vmatprep.mubr.bf16.mxu0 %v23144_v52  ;;  %v23237_v52 = vld [vmem:[%s28615_s1 + $0x46c] ss:$12 sps:$4 sm:$0xff]  }
  0xd3   :  { %3161 = vmatmul.mubr.bf16.gmra.mrb[64].mxu0 %v23146_v53  ;;  %v23239_v53 = vld [vmem:[%s28615_s1 + $0x468] ss:$12 sps:$4 sm:$0xff]  }
  0xd4   :  { %3168 = vmatprep.mubr.bf16.mxu0 %v23147_v54  ;;  %v23240_v54 = vld [vmem:[%s28615_s1 + $0x484] ss:$12 sps:$4 sm:$0xff]  }
  0xdb   :  { %3169 = vmatmul.mubr.bf16.gmra.mrb[68].mxu0 %v23149_v55  ;;  %v23242_v55 = vld [vmem:[%s28615_s1 + $0x480] ss:$12 sps:$4 sm:$0xff]  }
  0xdc   :  { %3176 = vmatprep.mubr.bf16.mxu0 %v23150_v56  ;;  %v23243_v56 = vld [vmem:[%s28615_s1 + $0x49c] ss:$12 sps:$4 sm:$0xff]  }
  0xe3   :  { %3177 = vmatmul.mubr.bf16.gmra.mrb[72].mxu0 %v23152_v57  ;;  %v23245_v57 = vld [vmem:[%s28615_s1 + $0x498] ss:$12 sps:$4 sm:$0xff]  }
  0xe4   :  { %3184 = vmatprep.mubr.bf16.mxu0 %v23153_v58  ;;  %v23246_v58 = vld [vmem:[%s28615_s1 + $0x4b4] ss:$12 sps:$4 sm:$0xff]  }
  0xeb   :  { %3185 = vmatmul.mubr.bf16.gmra.mrb[76].mxu0 %v23155_v59  ;;  %v23248_v59 = vld [vmem:[%s28615_s1 + $0x4b0] ss:$12 sps:$4 sm:$0xff]  }
  0xec   :  { %3192 = vmatprep.mubr.bf16.mxu0 %v23156_v60  ;;  %v23249_v60 = vld [vmem:[%s28615_s1 + $0x4cc] ss:$12 sps:$4 sm:$0xff]  }
  0xf3   :  { %3193 = vmatmul.mubr.bf16.gmra.mrb[80].mxu0 %v23158_v61  ;;  %v23251_v61 = vld [vmem:[%s28615_s1 + $0x4c8] ss:$12 sps:$4 sm:$0xff]  }
  0xf4   :  { %3200 = vmatprep.mubr.bf16.mxu0 %v23159_v62  ;;  %v23252_v62 = vld [vmem:[%s28615_s1 + $0x4e4] ss:$12 sps:$4 sm:$0xff]  }
  0xfb   :  { %3201 = vmatmul.mubr.bf16.gmra.mrb[84].mxu0 %v23161_v63  ;;  %v23254_v63 = vld [vmem:[%s28615_s1 + $0x4e0] ss:$12 sps:$4 sm:$0xff]  }
  0xfc   :  { %3208 = vmatprep.mubr.bf16.mxu0 %v23162_v1  ;;  %v23255_v1 = vld [vmem:[%s28615_s1 + $0x4fc] ss:$12 sps:$4 sm:$0xff]  }
 0x103   :  { %3209 = vmatmul.mubr.bf16.gmra.mrb[88].mxu0 %v23164_v2  ;;  %v23257_v2 = vld [vmem:[%s28615_s1 + $0x4f8] ss:$12 sps:$4 sm:$0xff]  }
 0x104   :  { %3216 = vmatprep.mubr.bf16.mxu0 %v23165_v3  ;;  %v23258_v3 = vld [vmem:[%s28615_s1 + $0x514] ss:$12 sps:$4 sm:$0xff]  }
 0x10b   :  { %3217 = vmatmul.mubr.bf16.gmra.mrb[92].mxu0 %v23167_v4  ;;  %v23260_v4 = vld [vmem:[%s28615_s1 + $0x510] ss:$12 sps:$4 sm:$0xff]  }
 0x10c   :  { %3224 = vmatprep.mubr.bf16.mxu0 %v23168_v5  ;;  %v23261_v5 = vld [vmem:[%s28615_s1 + $0x52c] ss:$12 sps:$4 sm:$0xff]  }
 0x113   :  { %3225 = vmatmul.mubr.bf16.gmra.mrb[96].mxu0 %v23170_v6  ;;  %v23263_v6 = vld [vmem:[%s28615_s1 + $0x528] ss:$12 sps:$4 sm:$0xff]  }
 0x114   :  { %3232 = vmatprep.mubr.bf16.mxu0 %v23171_v7  ;;  %v23264_v7 = vld [vmem:[%s28615_s1 + $0x544] ss:$12 sps:$4 sm:$0xff]  }
 0x11b   :  { %3233 = vmatmul.mubr.bf16.gmra.mrb[100].mxu0 %v23173_v8  ;;  %v23266_v8 = vld [vmem:[%s28615_s1 + $0x540] ss:$12 sps:$4 sm:$0xff]  }
 0x11c   :  { %3240 = vmatprep.mubr.bf16.mxu0 %v23174_v9  ;;  %v23267_v9 = vld [vmem:[%s28615_s1 + $0x55c] ss:$12 sps:$4 sm:$0xff]  }
 0x123   :  { %3241 = vmatmul.mubr.bf16.gmra.mrb[104].mxu0 %v23176_v10  ;;  %v23269_v10 = vld [vmem:[%s28615_s1 + $0x558] ss:$12 sps:$4 sm:$0xff]  }
 0x124   :  { %3248 = vmatprep.mubr.bf16.mxu0 %v23177_v11  ;;  %v23270_v11 = vld [vmem:[%s28615_s1 + $0x574] ss:$12 sps:$4 sm:$0xff]  }
 0x12b   :  { %3249 = vmatmul.mubr.bf16.gmra.mrb[108].mxu0 %v23179_v12  ;;  %v23272_v12 = vld [vmem:[%s28615_s1 + $0x570] ss:$12 sps:$4 sm:$0xff]  }
 0x12c   :  { %3256 = vmatprep.mubr.bf16.mxu0 %v23180_v13  ;;  %v23273_v13 = vld [vmem:[%s28615_s1 + $0x58c] ss:$12 sps:$4 sm:$0xff]  }
 0x133   :  { %3257 = vmatmul.mubr.bf16.gmra.mrb[112].mxu0 %v23182_v14  ;;  %v23275_v14 = vld [vmem:[%s28615_s1 + $0x588] ss:$12 sps:$4 sm:$0xff]  }
 0x134   :  { %3264 = vmatprep.mubr.bf16.mxu0 %v23183_v15  ;;  %v23276_v15 = vld [vmem:[%s28615_s1 + $0x5a4] ss:$12 sps:$4 sm:$0xff]  }
 0x13b   :  { %3265 = vmatmul.mubr.bf16.gmra.mrb[116].mxu0 %v23185_v16  ;;  %v23278_v16 = vld [vmem:[%s28615_s1 + $0x5a0] ss:$12 sps:$4 sm:$0xff]  }
 0x13c   :  { %3272 = vmatprep.mubr.bf16.mxu0 %v23186_v17  ;;  %v23279_v17 = vld [vmem:[%s28615_s1 + $0x5bc] ss:$12 sps:$4 sm:$0xff]  }
 0x143   :  { %3273 = vmatmul.mubr.bf16.gmra.mrb[120].mxu0 %v23188_v18  ;;  %v23281_v18 = vld [vmem:[%s28615_s1 + $0x5b8] ss:$12 sps:$4 sm:$0xff]  }
 0x144   :  { %3280 = vmatprep.mubr.bf16.mxu0 %v23189_v19  ;;  %v23282_v19 = vld [vmem:[%s28615_s1 + $0x5d4] ss:$12 sps:$4 sm:$0xff]  }
 0x14b   :  { %3281 = vmatmul.mubr.bf16.gmra.mrb[124].mxu0 %v23191_v20  ;;  %v23284_v20 = vld [vmem:[%s28615_s1 + $0x5d0] ss:$12 sps:$4 sm:$0xff]  }
 0x14c   :  { %3288 = vmatprep.mubr.bf16.mxu0 %v23192_v22  ;;  %v23285_v22 = vld [vmem:[%s28615_s1 + $0x5ec] ss:$12 sps:$4 sm:$0xff]  }
 0x153   :  { %3289 = vmatmul.mubr.bf16.gmra.mrb[128].mxu0 %v23194_v23  ;;  %v23287_v23 = vld [vmem:[%s28615_s1 + $0x5e8] ss:$12 sps:$4 sm:$0xff]  }
 0x154   :  { %3296 = vmatprep.mubr.bf16.mxu0 %v23195_v24  ;;  %v23290_v24 = vld [vmem:[%s28615_s1 + $0x604] ss:$12 sps:$4 sm:$0xff]  }
 0x15b   :  { %3297 = vmatmul.mubr.bf16.gmra.mrb[132].mxu0 %v23197_v25  ;;  %v23288_v25 = vld [vmem:[%s28615_s1 + $0x600] ss:$12 sps:$4 sm:$0xff]  }
 0x15c   :  { %3304 = vmatprep.mubr.bf16.mxu0 %v23198_v26 }
 0x163   :  { %3305 = vmatmul.mubr.bf16.gmra.mrb[136].mxu0 %v23200_v27 }
 0x164   :  { %3312 = vmatprep.mubr.bf16.mxu0 %v23201_v28 }
 0x16b   :  { %3313 = vmatmul.mubr.bf16.gmra.mrb[140].mxu0 %v23203_v29  ;;  %v23293_v29 = vld [vmem:[%s28615_s1 + $0x61c] ss:$12 sps:$4 sm:$0xff]  }
 0x16c   :  { %3320 = vmatprep.mubr.bf16.mxu0 %v23204_v30 }
 0x173   :  { %3321 = vmatmul.mubr.bf16.gmra.mrb[144].mxu0 %v23206_v31  ;;  %v23291_v31 = vld [vmem:[%s28615_s1 + $0x618] ss:$12 sps:$4 sm:$0xff]  }
 0x174   :  { %3328 = vmatprep.mubr.bf16.mxu0 %v23207_v32 }
 0x17b   :  { %3329 = vmatmul.mubr.bf16.gmra.mrb[148].mxu0 %v23209_v33 }
 0x17c   :  { %3336 = vmatprep.mubr.bf16.mxu0 %v23210_v34 }
 0x183   :  { %3337 = vmatmul.mubr.bf16.gmra.mrb[152].mxu0 %v23212_v35  ;;  %v23296_v35 = vld [vmem:[%s28615_s1 + $0x634] ss:$12 sps:$4 sm:$0xff]  }
 0x184   :  { %3344 = vmatprep.mubr.bf16.mxu0 %v23213_v36 }
 0x18b   :  { %3345 = vmatmul.mubr.bf16.gmra.mrb[156].mxu0 %v23215_v37  ;;  %v23294_v37 = vld [vmem:[%s28615_s1 + $0x630] ss:$12 sps:$4 sm:$0xff]  }
 0x18c   :  { %3352 = vmatprep.mubr.bf16.mxu0 %v23216_v38 }
 0x193   :  { %3353 = vmatmul.mubr.bf16.gmra.mrb[160].mxu0 %v23218_v39 }
 0x194   :  { %3360 = vmatprep.mubr.bf16.mxu0 %v23219_v40 }
 0x19b   :  { %3361 = vmatmul.mubr.bf16.gmra.mrb[164].mxu0 %v23221_v41  ;;  %v23299_v41 = vld [vmem:[%s28615_s1 + $0x64c] ss:$12 sps:$4 sm:$0xff]  }
 0x19c   :  { %3368 = vmatprep.mubr.bf16.mxu0 %v23222_v42 }
 0x1a3   :  { %3369 = vmatmul.mubr.bf16.gmra.mrb[168].mxu0 %v23224_v43  ;;  %v23297_v43 = vld [vmem:[%s28615_s1 + $0x648] ss:$12 sps:$4 sm:$0xff]  }
 0x1a4   :  { %3376 = vmatprep.mubr.bf16.mxu0 %v23225_v44 }
 0x1ab   :  { %3377 = vmatmul.mubr.bf16.gmra.mrb[172].mxu0 %v23227_v45 }
 0x1ac   :  { %3384 = vmatprep.mubr.bf16.mxu0 %v23228_v46 }
 0x1b3   :  { %3385 = vmatmul.mubr.bf16.gmra.mrb[176].mxu0 %v23230_v47  ;;  %v23302_v47 = vld [vmem:[%s28615_s1 + $0x664] ss:$12 sps:$4 sm:$0xff]  }
 0x1b4   :  { %3392 = vmatprep.mubr.bf16.mxu0 %v23231_v48 }
 0x1bb   :  { %3393 = vmatmul.mubr.bf16.gmra.mrb[180].mxu0 %v23233_v49  ;;  %v23300_v49 = vld [vmem:[%s28615_s1 + $0x660] ss:$12 sps:$4 sm:$0xff]  }
 0x1bc   :  { %3400 = vmatprep.mubr.bf16.mxu0 %v23234_v50 }
 0x1c3   :  { %3401 = vmatmul.mubr.bf16.gmra.mrb[184].mxu0 %v23236_v51 }
 0x1c4   :  { %3408 = vmatprep.mubr.bf16.mxu0 %v23237_v52 }
 0x1cb   :  { %3409 = vmatmul.mubr.bf16.gmra.mrb[188].mxu0 %v23239_v53  ;;  %v23305_v53 = vld [vmem:[%s28615_s1 + $0x67c] ss:$12 sps:$4 sm:$0xff]  }
 0x1cc   :  { %3416 = vmatprep.mubr.bf16.mxu0 %v23240_v54 }
 0x1d3   :  { %3417 = vmatmul.mubr.bf16.gmra.mrb[192].mxu0 %v23242_v55  ;;  %v23303_v55 = vld [vmem:[%s28615_s1 + $0x678] ss:$12 sps:$4 sm:$0xff]  }
 0x1d4   :  { %3424 = vmatprep.mubr.bf16.mxu0 %v23243_v56 }
 0x1db   :  { %3425 = vmatmul.mubr.bf16.gmra.mrb[196].mxu0 %v23245_v57 }
 0x1dc   :  { %3432 = vmatprep.mubr.bf16.mxu0 %v23246_v58 }
 0x1e3   :  { %3433 = vmatmul.mubr.bf16.gmra.mrb[200].mxu0 %v23248_v59  ;;  %v23308_v59 = vld [vmem:[%s28615_s1 + $0x694] ss:$12 sps:$4 sm:$0xff]  }
 0x1e4   :  { %3440 = vmatprep.mubr.bf16.mxu0 %v23249_v60 }
 0x1eb   :  { %3441 = vmatmul.mubr.bf16.gmra.mrb[204].mxu0 %v23251_v61  ;;  %v23306_v61 = vld [vmem:[%s28615_s1 + $0x690] ss:$12 sps:$4 sm:$0xff]  }
 0x1ec   :  { %3448 = vmatprep.mubr.bf16.mxu0 %v23252_v62 }
 0x1f3   :  { %3449 = vmatmul.mubr.bf16.gmra.mrb[208].mxu0 %v23254_v63 }
 0x1f4   :  { %3456 = vmatprep.mubr.bf16.mxu0 %v23255_v1 }
 0x1fb   :  { %3457 = vmatmul.mubr.bf16.gmra.mrb[212].mxu0 %v23257_v2  ;;  %v23311_v2 = vld [vmem:[%s28615_s1 + $0x6ac] ss:$12 sps:$4 sm:$0xff]  }
 0x1fc   :  { %3464 = vmatprep.mubr.bf16.mxu0 %v23258_v3 }
 0x203   :  { %3465 = vmatmul.mubr.bf16.gmra.mrb[216].mxu0 %v23260_v4  ;;  %v23309_v4 = vld [vmem:[%s28615_s1 + $0x6a8] ss:$12 sps:$4 sm:$0xff]  }
 0x204   :  { %3472 = vmatprep.mubr.bf16.mxu0 %v23261_v5 }
 0x20b   :  { %3473 = vmatmul.mubr.bf16.gmra.mrb[220].mxu0 %v23263_v6 }
 0x20c   :  { %3480 = vmatprep.mubr.bf16.mxu0 %v23264_v7 }
 0x213   :  { %3481 = vmatmul.mubr.bf16.gmra.mrb[224].mxu0 %v23266_v8  ;;  %v23314_v8 = vld [vmem:[%s28615_s1 + $0x6c4] ss:$12 sps:$4 sm:$0xff]  }
 0x214   :  { %3488 = vmatprep.mubr.bf16.mxu0 %v23267_v9 }
 0x21b   :  { %3489 = vmatmul.mubr.bf16.gmra.mrb[228].mxu0 %v23269_v10  ;;  %v23312_v10 = vld [vmem:[%s28615_s1 + $0x6c0] ss:$12 sps:$4 sm:$0xff]  }
 0x21c   :  { %3496 = vmatprep.mubr.bf16.mxu0 %v23270_v11 }
 0x223   :  { %3497 = vmatmul.mubr.bf16.gmra.mrb[232].mxu0 %v23272_v12 }
 0x224   :  { %3504 = vmatprep.mubr.bf16.mxu0 %v23273_v13 }
 0x22b   :  { %3505 = vmatmul.mubr.bf16.gmra.mrb[236].mxu0 %v23275_v14  ;;  %v23317_v14 = vld [vmem:[%s28615_s1 + $0x6dc] ss:$12 sps:$4 sm:$0xff]  }
 0x22c   :  { %3512 = vmatprep.mubr.bf16.mxu0 %v23276_v15 }
 0x233   :  { %3513 = vmatmul.mubr.bf16.gmra.mrb[240].mxu0 %v23278_v16 }
 0x234   :  { %3520 = vmatprep.mubr.bf16.mxu0 %v23279_v17 }
 0x23b   :  { %3521 = vmatmul.mubr.bf16.gmra.mrb[244].mxu0 %v23281_v18  ;;  %v23315_v18 = vld [vmem:[%s28615_s1 + $0x6d8] ss:$12 sps:$4 sm:$0xff]  }
 0x23c   :  { %3528 = vmatprep.mubr.bf16.mxu0 %v23282_v19 }
 0x243   :  { %3529 = vmatmul.mubr.bf16.gmra.mrb[248].mxu0 %v23284_v20  ;;  %v23320_v20 = vld [vmem:[%s28615_s1 + $0x6f4] ss:$12 sps:$4 sm:$0xff]  }
 0x244   :  { %3536 = vmatprep.mubr.bf16.mxu0 %v23285_v22 }
 0x24b   :  { %3537 = vmatmul.mubr.bf16.gmra.mrb[252].mxu0 %v23287_v23 }
 0x24c   :  { %3544 = vmatprep.mubr.bf16.mxu0 %v23290_v24 }
 0x24e   :  { %v25782_v26 = vpop.f32.mrb[148].mxu0 }
 0x24f   :  { %v3332_v27 = vpop.f32.mrb[149].mxu0 }
 0x250   :  { %v25784_v28 = vpop.f32.mrb[150].mxu0 }
 0x251   :  { %v3335_v30 = vpop.f32.mrb[151].mxu0 }
 0x253   :  { %3545 = vmatmul.mubr.bf16.gmra.mrb[148].mxu0 %v23288_v25  ;;  %v23318_v25 = vld [vmem:[%s28615_s1 + $0x6f0] ss:$12 sps:$4 sm:$0xff]  }
 0x254   :  { %3552 = vmatprep.mubr.bf16.mxu0 %v23293_v29  ;;  %v23323_v29 = vld [vmem:[%s28615_s1 + $0x70c] ss:$12 sps:$4 sm:$0xff]  }
 0x256   :  { %v25792_v32 = vpop.f32.mrb[152].mxu0 }
 0x257   :  { %v3340_v33 = vpop.f32.mrb[153].mxu0 }
 0x258   :  { %v25794_v34 = vpop.f32.mrb[154].mxu0 }
 0x259   :  { %v3343_v36 = vpop.f32.mrb[155].mxu0 }
 0x25b   :  { %3553 = vmatmul.mubr.bf16.gmra.mrb[152].mxu0 %v23291_v31 }
 0x25c   :  { %3560 = vmatprep.mubr.bf16.mxu0 %v23296_v35  ;;  %v23321_v35 = vld [vmem:[%s28615_s1 + $0x708] ss:$12 sps:$4 sm:$0xff]  }
 0x25e   :  { %v25802_v38 = vpop.f32.mrb[156].mxu0 }
 0x25f   :  { %v3348_v39 = vpop.f32.mrb[157].mxu0 }
 0x260   :  { %v25804_v40 = vpop.f32.mrb[158].mxu0 }
 0x261   :  { %v3351_v42 = vpop.f32.mrb[159].mxu0 }
 0x263   :  { %3561 = vmatmul.mubr.bf16.gmra.mrb[156].mxu0 %v23294_v37  ;;  %v23326_v37 = vld [vmem:[%s28615_s1 + $0x724] ss:$12 sps:$4 sm:$0xff]  }
 0x264   :  { %3568 = vmatprep.mubr.bf16.mxu0 %v23299_v41 }
 0x266   :  { %v25812_v44 = vpop.f32.mrb[160].mxu0 }
 0x267   :  { %v3356_v45 = vpop.f32.mrb[161].mxu0 }
 0x268   :  { %v25814_v46 = vpop.f32.mrb[162].mxu0 }
 0x269   :  { %v3359_v48 = vpop.f32.mrb[163].mxu0 }
 0x26b   :  { %3569 = vmatmul.mubr.bf16.gmra.mrb[160].mxu0 %v23297_v43  ;;  %v23324_v43 = vld [vmem:[%s28615_s1 + $0x720] ss:$12 sps:$4 sm:$0xff]  }
 0x26c   :  { %3576 = vmatprep.mubr.bf16.mxu0 %v23302_v47  ;;  %v23329_v47 = vld [vmem:[%s28615_s1 + $0x73c] ss:$12 sps:$4 sm:$0xff]  }
 0x26e   :  { %v25822_v50 = vpop.f32.mrb[164].mxu0 }
 0x26f   :  { %v3364_v51 = vpop.f32.mrb[165].mxu0 }
 0x270   :  { %v25824_v52 = vpop.f32.mrb[166].mxu0 }
 0x271   :  { %v3367_v54 = vpop.f32.mrb[167].mxu0 }
 0x273   :  { %3577 = vmatmul.mubr.bf16.gmra.mrb[164].mxu0 %v23300_v49 }
 0x274   :  { %3584 = vmatprep.mubr.bf16.mxu0 %v23305_v53  ;;  %v23327_v53 = vld [vmem:[%s28615_s1 + $0x738] ss:$12 sps:$4 sm:$0xff]  }
 0x276   :  { %v25832_v56 = vpop.f32.mrb[168].mxu0 }
 0x277   :  { %v3372_v57 = vpop.f32.mrb[169].mxu0 }
 0x278   :  { %v25834_v58 = vpop.f32.mrb[170].mxu0 }
 0x279   :  { %v3375_v60 = vpop.f32.mrb[171].mxu0 }
 0x27b   :  { %3585 = vmatmul.mubr.bf16.gmra.mrb[168].mxu0 %v23303_v55  ;;  %v23332_v55 = vld [vmem:[%s28615_s1 + $0x754] ss:$12 sps:$4 sm:$0xff]  }
 0x27c   :  { %3592 = vmatprep.mubr.bf16.mxu0 %v23308_v59 }
 0x27e   :  { %v25842_v62 = vpop.f32.mrb[172].mxu0 }
 0x27f   :  { %v3380_v63 = vpop.f32.mrb[173].mxu0 }
 0x280   :  { %v25844_v1 = vpop.f32.mrb[174].mxu0 }
 0x281   :  { %v3383_v3 = vpop.f32.mrb[175].mxu0 }
 0x283   :  { %3593 = vmatmul.mubr.bf16.gmra.mrb[172].mxu0 %v23306_v61  ;;  %v23330_v61 = vld [vmem:[%s28615_s1 + $0x750] ss:$12 sps:$4 sm:$0xff]  }
 0x284   :  { %3600 = vmatprep.mubr.bf16.mxu0 %v23311_v2  ;;  %v23335_v2 = vld [vmem:[%s28615_s1 + $0x76c] ss:$12 sps:$4 sm:$0xff]  }
 0x286   :  { %v25852_v5 = vpop.f32.mrb[176].mxu0 }
 0x287   :  { %v3388_v6 = vpop.f32.mrb[177].mxu0 }
 0x288   :  { %v25854_v7 = vpop.f32.mrb[178].mxu0 }
 0x289   :  { %v3391_v9 = vpop.f32.mrb[179].mxu0 }
 0x28b   :  { %3601 = vmatmul.mubr.bf16.gmra.mrb[176].mxu0 %v23309_v4 }
 0x28c   :  { %3608 = vmatprep.mubr.bf16.mxu0 %v23314_v8  ;;  %v23333_v8 = vld [vmem:[%s28615_s1 + $0x768] ss:$12 sps:$4 sm:$0xff]  }
 0x28e   :  { %v25862_v11 = vpop.f32.mrb[180].mxu0 }
 0x28f   :  { %v3396_v12 = vpop.f32.mrb[181].mxu0 }
 0x290   :  { %v25864_v13 = vpop.f32.mrb[182].mxu0 }
 0x291   :  { %v3399_v15 = vpop.f32.mrb[183].mxu0 }
 0x293   :  { %3609 = vmatmul.mubr.bf16.gmra.mrb[180].mxu0 %v23312_v10  ;;  %v23338_v10 = vld [vmem:[%s28615_s1 + $0x784] ss:$12 sps:$4 sm:$0xff]  }
 0x294   :  { %3616 = vmatprep.mubr.bf16.mxu0 %v23317_v14 }
 0x296   :  { %v25869_v16 = vpop.f32.mrb[184].mxu0 }
 0x297   :  { %v3404_v17 = vpop.f32.mrb[185].mxu0 }
 0x298   :  { %v25874_v19 = vpop.f32.mrb[186].mxu0  ;;  %v23336_v17 = vld [vmem:[%s28615_s1 + $0x780] ss:$12 sps:$4 sm:$0xff]  }
 0x299   :  { %v3407_v22 = vpop.f32.mrb[187].mxu0 }
 0x29b   :  { %3617 = vmatmul.mubr.bf16.gmra.mrb[184].mxu0 %v23315_v18 }
 0x29c   :  { %3624 = vmatprep.mubr.bf16.mxu0 %v23320_v20  ;;  %v23341_v20 = vld [vmem:[%s28615_s1 + $0x79c] ss:$12 sps:$4 sm:$0xff]  }
 0x29e   :  { %v25879_v23 = vpop.f32.mrb[188].mxu0 }
 0x29f   :  { %v3412_v24 = vpop.f32.mrb[189].mxu0 }
 0x2a0   :  { %v25884_v27 = vpop.f32.mrb[190].mxu0 }
 0x2a1   :  { %v3415_v30 = vpop.f32.mrb[191].mxu0 }
 0x2a3   :  { %3625 = vmatmul.mubr.bf16.gmra.mrb[188].mxu0 %v23318_v25 }
 0x2a4   :  { %3632 = vmatprep.mubr.bf16.mxu0 %v23323_v29  ;;  %v23339_v29 = vld [vmem:[%s28615_s1 + $0x798] ss:$12 sps:$4 sm:$0xff]  }
 0x2a6   :  { %v25889_v31 = vpop.f32.mrb[192].mxu0 }
 0x2a7   :  { %v3420_v33 = vpop.f32.mrb[193].mxu0 }
 0x2a8   :  { %v25894_v36 = vpop.f32.mrb[194].mxu0  ;;  %v23344_v33 = vld [vmem:[%s28615_s1 + $0x7b4] ss:$12 sps:$4 sm:$0xff]  }
 0x2a9   :  { %v3423_v39 = vpop.f32.mrb[195].mxu0 }
 0x2ab   :  { %3633 = vmatmul.mubr.bf16.gmra.mrb[192].mxu0 %v23321_v35 }
 0x2ac   :  { %3640 = vmatprep.mubr.bf16.mxu0 %v23326_v37 }
 0x2ae   :  { %v25899_v41 = vpop.f32.mrb[196].mxu0 }
 0x2af   :  { %v3428_v42 = vpop.f32.mrb[197].mxu0 }
 0x2b0   :  { %v25904_v45 = vpop.f32.mrb[198].mxu0  ;;  %v23342_v42 = vld [vmem:[%s28615_s1 + $0x7b0] ss:$12 sps:$4 sm:$0xff]  }
 0x2b1   :  { %v3431_v48 = vpop.f32.mrb[199].mxu0 }
 0x2b3   :  { %3641 = vmatmul.mubr.bf16.gmra.mrb[196].mxu0 %v23324_v43 }
 0x2b4   :  { %3648 = vmatprep.mubr.bf16.mxu0 %v23329_v47  ;;  %v23347_v47 = vld [vmem:[%s28615_s1 + $0x7cc] ss:$12 sps:$4 sm:$0xff]  }
 0x2b6   :  { %v25909_v49 = vpop.f32.mrb[200].mxu0 }
 0x2b7   :  { %v3436_v51 = vpop.f32.mrb[201].mxu0 }
 0x2b8   :  { %v25914_v54 = vpop.f32.mrb[202].mxu0 }
 0x2b9   :  { %v3439_v57 = vpop.f32.mrb[203].mxu0 }
 0x2bb   :  { %3649 = vmatmul.mubr.bf16.gmra.mrb[200].mxu0 %v23327_v53 }
 0x2bc   :  { %3656 = vmatprep.mubr.bf16.mxu0 %v23332_v55  ;;  %v23345_v55 = vld [vmem:[%s28615_s1 + $0x7c8] ss:$12 sps:$4 sm:$0xff]  }
 0x2be   :  { %v25919_v59 = vpop.f32.mrb[204].mxu0 }
 0x2bf   :  { %v3444_v60 = vpop.f32.mrb[205].mxu0 }
 0x2c0   :  { %v25924_v63 = vpop.f32.mrb[206].mxu0  ;;  %v23350_v60 = vld [vmem:[%s28615_s1 + $0x7e4] ss:$12 sps:$4 sm:$0xff]  }
 0x2c1   :  { %v3447_v3 = vpop.f32.mrb[207].mxu0 }
 0x2c3   :  { %3657 = vmatmul.mubr.bf16.gmra.mrb[204].mxu0 %v23330_v61 }
 0x2c4   :  { %3664 = vmatprep.mubr.bf16.mxu0 %v23335_v2 }
 0x2c6   :  { %v25929_v4 = vpop.f32.mrb[208].mxu0 }
 0x2c7   :  { %v3452_v6 = vpop.f32.mrb[209].mxu0 }
 0x2c8   :  { %v25934_v9 = vpop.f32.mrb[210].mxu0  ;;  %v23348_v6 = vld [vmem:[%s28615_s1 + $0x7e0] ss:$12 sps:$4 sm:$0xff]  }
 0x2c9   :  { %v3455_v12 = vpop.f32.mrb[211].mxu0 }
 0x2cb   :  { %3665 = vmatmul.mubr.bf16.gmra.mrb[208].mxu0 %v23333_v8 }
 0x2cc   :  { %3672 = vmatprep.mubr.bf16.mxu0 %v23338_v10  ;;  %v23353_v10 = vld [vmem:[%s28615_s1 + $0x7fc] ss:$12 sps:$4 sm:$0xff]  }
 0x2ce   :  { %v25939_v14 = vpop.f32.mrb[212].mxu0 }
 0x2cf   :  { %v3460_v15 = vpop.f32.mrb[213].mxu0 }
 0x2d0   :  { %v25944_v18 = vpop.f32.mrb[214].mxu0 }
 0x2d1   :  { %v3463_v22 = vpop.f32.mrb[215].mxu0 }
 0x2d3   :  { %3673 = vmatmul.mubr.bf16.gmra.mrb[212].mxu0 %v23336_v17 }
 0x2d4   :  { %3680 = vmatprep.mubr.bf16.mxu0 %v23341_v20  ;;  %v23351_v20 = vld [vmem:[%s28615_s1 + $0x7f8] ss:$12 sps:$4 sm:$0xff]  }
 0x2d6   :  { %v25949_v24 = vpop.f32.mrb[216].mxu0 }
 0x2d7   :  { %v3468_v25 = vpop.f32.mrb[217].mxu0 }
 0x2d8   :  { %v25954_v30 = vpop.f32.mrb[218].mxu0  ;;  %v23356_v25 = vld [vmem:[%s28615_s1 + $0x814] ss:$12 sps:$4 sm:$0xff]  }
 0x2d9   :  { %v3471_v35 = vpop.f32.mrb[219].mxu0 }
 0x2db   :  { %3681 = vmatmul.mubr.bf16.gmra.mrb[216].mxu0 %v23339_v29 }
 0x2dc   :  { %3688 = vmatprep.mubr.bf16.mxu0 %v23344_v33 }
 0x2de   :  { %v25959_v37 = vpop.f32.mrb[220].mxu0 }
 0x2df   :  { %v3476_v39 = vpop.f32.mrb[221].mxu0 }
 0x2e0   :  { %v25964_v43 = vpop.f32.mrb[222].mxu0  ;;  %v23354_v39 = vld [vmem:[%s28615_s1 + $0x810] ss:$12 sps:$4 sm:$0xff]  }
 0x2e1   :  { %v3479_v48 = vpop.f32.mrb[223].mxu0 }
 0x2e3   :  { %3689 = vmatmul.mubr.bf16.gmra.mrb[220].mxu0 %v23342_v42 }
 0x2e4   :  { %3696 = vmatprep.mubr.bf16.mxu0 %v23347_v47  ;;  %v23359_v47 = vld [vmem:[%s28615_s1 + $0x82c] ss:$12 sps:$4 sm:$0xff]  }
 0x2e6   :  { %v25969_v51 = vpop.f32.mrb[224].mxu0 }
 0x2e7   :  { %v3484_v53 = vpop.f32.mrb[225].mxu0 }
 0x2e8   :  { %v25974_v57 = vpop.f32.mrb[226].mxu0 }
 0x2e9   :  { %v3487_v61 = vpop.f32.mrb[227].mxu0 }
 0x2eb   :  { %3697 = vmatmul.mubr.bf16.gmra.mrb[224].mxu0 %v23345_v55 }
 0x2ec   :  { %3704 = vmatprep.mubr.bf16.mxu0 %v23350_v60  ;;  %v23357_v60 = vld [vmem:[%s28615_s1 + $0x828] ss:$12 sps:$4 sm:$0xff]  }
 0x2ee   :  { %v25979_v2 = vpop.f32.mrb[228].mxu0 }
 0x2ef   :  { %v3492_v3 = vpop.f32.mrb[229].mxu0 }
 0x2f0   :  { %v25984_v8 = vpop.f32.mrb[230].mxu0  ;;  %v23362_v3 = vld [vmem:[%s28615_s1 + $0x844] ss:$12 sps:$4 sm:$0xff]  }
 0x2f1   :  { %v3495_v12 = vpop.f32.mrb[231].mxu0 }
 0x2f3   :  { %3705 = vmatmul.mubr.bf16.gmra.mrb[228].mxu0 %v23348_v6 }
 0x2f4   :  { %3712 = vmatprep.mubr.bf16.mxu0 %v23353_v10 }
 0x2f6   :  { %v25989_v15 = vpop.f32.mrb[232].mxu0 }
 0x2f7   :  { %v3500_v17 = vpop.f32.mrb[233].mxu0 }
 0x2f8   :  { %v25994_v22 = vpop.f32.mrb[234].mxu0  ;;  %v23360_v17 = vld [vmem:[%s28615_s1 + $0x840] ss:$12 sps:$4 sm:$0xff]  }
 0x2f9   :  { %v3503_v29 = vpop.f32.mrb[235].mxu0 }
 0x2fb   :  { %3713 = vmatmul.mubr.bf16.gmra.mrb[232].mxu0 %v23351_v20 }
 0x2fc   :  { %3720 = vmatprep.mubr.bf16.mxu0 %v23356_v25  ;;  %v23365_v25 = vld [vmem:[%s28615_s1 + $0x85c] ss:$12 sps:$4 sm:$0xff]  }
 0x2fe   :  { %v25999_v33 = vpop.f32.mrb[236].mxu0 }
 0x2ff   :  { %v3508_v35 = vpop.f32.mrb[237].mxu0 }
 0x300   :  { %v26004_v42 = vpop.f32.mrb[238].mxu0 }
 0x301   :  { %v3511_v48 = vpop.f32.mrb[239].mxu0 }
 0x303   :  { %3721 = vmatmul.mubr.bf16.gmra.mrb[236].mxu0 %v23354_v39 }
 0x304   :  { %3728 = vmatprep.mubr.bf16.mxu0 %v23359_v47  ;;  %v23363_v47 = vld [vmem:[%s28615_s1 + $0x858] ss:$12 sps:$4 sm:$0xff]  }
 0x306   :  { %v26009_v53 = vpop.f32.mrb[240].mxu0 }
 0x307   :  { %v3516_v55 = vpop.f32.mrb[241].mxu0 }
 0x308   :  { %v26014_v61 = vpop.f32.mrb[242].mxu0  ;;  %v23368_v55 = vld [vmem:[%s28615_s1 + $0x874] ss:$12 sps:$4 sm:$0xff]  }
 0x309   :  { %v3519_v6 = vpop.f32.mrb[243].mxu0 }
 0x30b   :  { %3729 = vmatmul.mubr.bf16.gmra.mrb[240].mxu0 %v23357_v60 }
 0x30c   :  { %3736 = vmatprep.mubr.bf16.mxu0 %v23362_v3 }
 0x30e   :  { %v26019_v10 = vpop.f32.mrb[244].mxu0 }
 0x30f   :  { %28627 = vst [vmem:[#allocation5_spill] sm:$0xff] %v26019_v10  ;;  %v3524_v12 = vpop.f32.mrb[245].mxu0 }
 0x310   :  { %v26024_v20 = vpop.f32.mrb[246].mxu0  ;;  %v23366_v12 = vld [vmem:[%s28615_s1 + $0x870] ss:$12 sps:$4 sm:$0xff]  }
 0x311   :  { %28628 = vst [vmem:[#allocation6_spill] sm:$0xff] %v26024_v20  ;;  %v3527_v29 = vpop.f32.mrb[247].mxu0 }
 0x313   :  { %3737 = vmatmul.mubr.bf16.gmra.mrb[244].mxu0 %v23360_v17 }
 0x314   :  { %3744 = vmatprep.mubr.bf16.mxu0 %v23365_v25  ;;  %v23371_v25 = vld [vmem:[%s28615_s1 + $0x88c] ss:$12 sps:$4 sm:$0xff]  }
 0x316   :  { %v26029_v35 = vpop.f32.mrb[248].mxu0 }
 0x317   :  { %28629 = vst [vmem:[#allocation7_spill] sm:$0xff] %v26029_v35  ;;  %v3532_v39 = vpop.f32.mrb[249].mxu0 }
 0x318   :  { %v26034_v48 = vpop.f32.mrb[250].mxu0 }
 0x319   :  { %28630 = vst [vmem:[#allocation8_spill] sm:$0xff] %v26034_v48  ;;  %v3535_v60 = vpop.f32.mrb[251].mxu0 }
 0x31b   :  { %3745 = vmatmul.mubr.bf16.gmra.mrb[248].mxu0 %v23363_v47 }
 0x31c   :  { %3752 = vmatprep.mubr.bf16.mxu0 %v23368_v55  ;;  %v23369_v55 = vld [vmem:[%s28615_s1 + $0x888] ss:$12 sps:$4 sm:$0xff]  }
 0x31e   :  { %v26039_v3 = vpop.f32.mrb[252].mxu0 }
 0x31f   :  { %28631 = vst [vmem:[#allocation9_spill] sm:$0xff] %v26039_v3  ;;  %v3540_v6 = vpop.f32.mrb[253].mxu0 }
 0x320   :  { %v26044_v17 = vpop.f32.mrb[254].mxu0  ;;  %v23374_v6 = vld [vmem:[%s28615_s1 + $0x8a4] ss:$12 sps:$4 sm:$0xff]  }
 0x321   :  { %28632 = vst [vmem:[#allocation10_spill] sm:$0xff] %v26044_v17  ;;  %v3543_v29 = vpop.f32.mrb[255].mxu0 }
 0x323   :  { %3753 = vmatmul.mubr.bf16.gmra.mrb[252].mxu0 %v23366_v12 }
 0x324   :  { %3760 = vmatprep.mubr.bf16.mxu0 %v23371_v25  ;;  %v23372_v25 = vld [vmem:[%s28615_s1 + $0x8a0] ss:$12 sps:$4 sm:$0xff]  }
 0x326   :  { %v26049_v39 = vpop.f32.mrb[148].mxu0 }
 0x327   :  { %28633 = vst [vmem:[#allocation11_spill] sm:$0xff] %v26049_v39  ;;  %v3548_v47 = vpop.f32.mrb[149].mxu0 }
 0x328   :  { %v26054_v60 = vpop.f32.mrb[150].mxu0  ;;  %v23377_v47 = vld [vmem:[%s28615_s1 + $0x8bc] ss:$12 sps:$4 sm:$0xff]  }
 0x329   :  { %28634 = vst [vmem:[#allocation12_spill] sm:$0xff] %v26054_v60  ;;  %v3551_v0 = vpop.f32.mrb[151].mxu0 }
 0x32b   :  { %3761 = vmatmul.mubr.bf16.gmra.mrb[148].mxu0 %v23369_v55  ;;  %v23375_v55 = vld [vmem:[%s28615_s1 + $0x8b8] ss:$12 sps:$4 sm:$0xff]  }
 0x32c   :  { %3768 = vmatprep.mubr.bf16.mxu0 %v23374_v6 }
 0x32e   :  { %v26059_v21 = vpop.f32.mrb[152].mxu0 }
 0x32f   :  { %28635 = vst [vmem:[#allocation13_spill] sm:$0xff] %v26059_v21  ;;  %v3556_v12 = vpop.f32.mrb[153].mxu0 }
 0x330   :  { %v26064_v29 = vpop.f32.mrb[154].mxu0  ;;  %v23380_v12 = vld [vmem:[%s28615_s1 + $0x8d4] ss:$12 sps:$4 sm:$0xff]  }
 0x331   :  { %28636 = vst [vmem:[#allocation14_spill] sm:$0xff] %v26064_v29  ;;  %v3559_v60 = vpop.f32.mrb[155].mxu0 }
 0x333   :  { %3769 = vmatmul.mubr.bf16.gmra.mrb[152].mxu0 %v23372_v25  ;;  %v23378_v25 = vld [vmem:[%s28615_s1 + $0x8d0] ss:$12 sps:$4 sm:$0xff]  }
 0x334   :  { %3776 = vmatprep.mubr.bf16.mxu0 %v23377_v47 }
 0x336   :  { %v26069_v39 = vpop.f32.mrb[156].mxu0 }
 0x337   :  { %28637 = vst [vmem:[#allocation15_spill] sm:$0xff] %v26069_v39  ;;  %v3564_v0 = vpop.f32.mrb[157].mxu0 }
 0x338   :  { %v26074_v6 = vpop.f32.mrb[158].mxu0  ;;  %v23383_v0 = vld [vmem:[%s28615_s1 + $0x8ec] ss:$12 sps:$4 sm:$0xff]  }
 0x339   :  { %28638 = vst [vmem:[#allocation16_spill] sm:$0xff] %v26074_v6  ;;  %v3567_v29 = vpop.f32.mrb[159].mxu0 }
 0x33b   :  { %3777 = vmatmul.mubr.bf16.gmra.mrb[156].mxu0 %v23375_v55  ;;  %v23381_v55 = vld [vmem:[%s28615_s1 + $0x8e8] ss:$12 sps:$4 sm:$0xff]  }
 0x33c   :  { %3784 = vmatprep.mubr.bf16.mxu0 %v23380_v12 }
 0x33e   :  { %v26079_v21 = vpop.f32.mrb[160].mxu0 }
 0x33f   :  { %28639 = vst [vmem:[#allocation17_spill] sm:$0xff] %v26079_v21  ;;  %v3572_v60 = vpop.f32.mrb[161].mxu0 }
 0x340   :  { %v26084_v47 = vpop.f32.mrb[162].mxu0  ;;  %v23386_v60 = vld [vmem:[%s28615_s1 + $0x904] ss:$12 sps:$4 sm:$0xff]  }
 0x341   :  { %28640 = vst [vmem:[#allocation18_spill] sm:$0xff] %v26084_v47  ;;  %v3575_v6 = vpop.f32.mrb[163].mxu0 }
 0x343   :  { %3785 = vmatmul.mubr.bf16.gmra.mrb[160].mxu0 %v23378_v25  ;;  %v23384_v25 = vld [vmem:[%s28615_s1 + $0x900] ss:$12 sps:$4 sm:$0xff]  }
 0x344   :  { %3792 = vmatprep.mubr.bf16.mxu0 %v23383_v0 }
 0x346   :  { %v26089_v39 = vpop.f32.mrb[164].mxu0 }
 0x347   :  { %28641 = vst [vmem:[#allocation19_spill] sm:$0xff] %v26089_v39  ;;  %v3580_v29 = vpop.f32.mrb[165].mxu0 }
 0x348   :  { %v26094_v12 = vpop.f32.mrb[166].mxu0  ;;  %v23389_v29 = vld [vmem:[%s28615_s1 + $0x91c] ss:$12 sps:$4 sm:$0xff]  }
 0x349   :  { %28642 = vst [vmem:[#allocation20_spill] sm:$0xff] %v26094_v12  ;;  %v3583_v47 = vpop.f32.mrb[167].mxu0 }
 0x34b   :  { %3793 = vmatmul.mubr.bf16.gmra.mrb[164].mxu0 %v23381_v55  ;;  %v23387_v55 = vld [vmem:[%s28615_s1 + $0x918] ss:$12 sps:$4 sm:$0xff]  }
 0x34c   :  { %3800 = vmatprep.mubr.bf16.mxu0 %v23386_v60 }
 0x34e   :  { %v26099_v21 = vpop.f32.mrb[168].mxu0 }
 0x34f   :  { %28643 = vst [vmem:[#allocation21_spill] sm:$0xff] %v26099_v21  ;;  %v3588_v6 = vpop.f32.mrb[169].mxu0 }
 0x350   :  { %v26104_v0 = vpop.f32.mrb[170].mxu0  ;;  %v23392_v6 = vld [vmem:[%s28615_s1 + $0x934] ss:$12 sps:$4 sm:$0xff]  }
 0x351   :  { %28644 = vst [vmem:[#allocation22_spill] sm:$0xff] %v26104_v0  ;;  %v3591_v12 = vpop.f32.mrb[171].mxu0 }
 0x353   :  { %3801 = vmatmul.mubr.bf16.gmra.mrb[168].mxu0 %v23384_v25  ;;  %v23390_v25 = vld [vmem:[%s28615_s1 + $0x930] ss:$12 sps:$4 sm:$0xff]  }
 0x354   :  { %3808 = vmatprep.mubr.bf16.mxu0 %v23389_v29 }
 0x356   :  { %v26109_v39 = vpop.f32.mrb[172].mxu0 }
 0x357   :  { %28645 = vst [vmem:[#allocation23_spill] sm:$0xff] %v26109_v39  ;;  %v3596_v47 = vpop.f32.mrb[173].mxu0 }
 0x358   :  { %v26114_v60 = vpop.f32.mrb[174].mxu0  ;;  %v23395_v47 = vld [vmem:[%s28615_s1 + $0x94c] ss:$12 sps:$4 sm:$0xff]  }
 0x359   :  { %28646 = vst [vmem:[#allocation24_spill] sm:$0xff] %v26114_v60  ;;  %v3599_v0 = vpop.f32.mrb[175].mxu0 }
 0x35b   :  { %3809 = vmatmul.mubr.bf16.gmra.mrb[172].mxu0 %v23387_v55  ;;  %v23393_v55 = vld [vmem:[%s28615_s1 + $0x948] ss:$12 sps:$4 sm:$0xff]  }
 0x35c   :  { %3816 = vmatprep.mubr.bf16.mxu0 %v23392_v6 }
 0x35e   :  { %v26119_v21 = vpop.f32.mrb[176].mxu0 }
 0x35f   :  { %28647 = vst [vmem:[#allocation25_spill] sm:$0xff] %v26119_v21  ;;  %v3604_v12 = vpop.f32.mrb[177].mxu0 }
 0x360   :  { %v26124_v29 = vpop.f32.mrb[178].mxu0  ;;  %v23398_v12 = vld [vmem:[%s28615_s1 + $0x964] ss:$12 sps:$4 sm:$0xff]  }
 0x361   :  { %28648 = vst [vmem:[#allocation26_spill] sm:$0xff] %v26124_v29  ;;  %v3607_v60 = vpop.f32.mrb[179].mxu0 }
 0x363   :  { %3817 = vmatmul.mubr.bf16.gmra.mrb[176].mxu0 %v23390_v25  ;;  %v23396_v25 = vld [vmem:[%s28615_s1 + $0x960] ss:$12 sps:$4 sm:$0xff]  }
 0x364   :  { %3824 = vmatprep.mubr.bf16.mxu0 %v23395_v47 }
 0x366   :  { %v26129_v39 = vpop.f32.mrb[180].mxu0 }
 0x367   :  { %28649 = vst [vmem:[#allocation27_spill] sm:$0xff] %v26129_v39  ;;  %v3612_v0 = vpop.f32.mrb[181].mxu0 }
 0x368   :  { %v26134_v6 = vpop.f32.mrb[182].mxu0  ;;  %v23401_v0 = vld [vmem:[%s28615_s1 + $0x97c] ss:$12 sps:$4 sm:$0xff]  }
 0x369   :  { %28650 = vst [vmem:[#allocation28_spill] sm:$0xff] %v26134_v6  ;;  %v3615_v29 = vpop.f32.mrb[183].mxu0 }
 0x36b   :  { %3825 = vmatmul.mubr.bf16.gmra.mrb[180].mxu0 %v23393_v55  ;;  %v23399_v55 = vld [vmem:[%s28615_s1 + $0x978] ss:$12 sps:$4 sm:$0xff]  }
 0x36c   :  { %3832 = vmatprep.mubr.bf16.mxu0 %v23398_v12 }
 0x36e   :  { %v26139_v21 = vpop.f32.mrb[184].mxu0 }
 0x36f   :  { %28651 = vst [vmem:[#allocation29_spill] sm:$0xff] %v26139_v21  ;;  %v3620_v60 = vpop.f32.mrb[185].mxu0 }
 0x370   :  { %v26144_v47 = vpop.f32.mrb[186].mxu0  ;;  %v23404_v60 = vld [vmem:[%s28615_s1 + $0x994] ss:$12 sps:$4 sm:$0xff]  }
 0x371   :  { %28652 = vst [vmem:[#allocation30_spill] sm:$0xff] %v26144_v47  ;;  %v3623_v6 = vpop.f32.mrb[187].mxu0 }
 0x373   :  { %3833 = vmatmul.mubr.bf16.gmra.mrb[184].mxu0 %v23396_v25  ;;  %v23402_v25 = vld [vmem:[%s28615_s1 + $0x990] ss:$12 sps:$4 sm:$0xff]  }
 0x374   :  { %3840 = vmatprep.mubr.bf16.mxu0 %v23401_v0 }
 0x376   :  { %v26149_v39 = vpop.f32.mrb[188].mxu0 }
 0x377   :  { %28653 = vst [vmem:[#allocation31_spill] sm:$0xff] %v26149_v39  ;;  %v3628_v29 = vpop.f32.mrb[189].mxu0 }
 0x378   :  { %v26154_v12 = vpop.f32.mrb[190].mxu0  ;;  %v23407_v29 = vld [vmem:[%s28615_s1 + $0x9ac] ss:$12 sps:$4 sm:$0xff]  }
 0x379   :  { %28654 = vst [vmem:[#allocation32_spill] sm:$0xff] %v26154_v12  ;;  %v3631_v47 = vpop.f32.mrb[191].mxu0 }
 0x37b   :  { %3841 = vmatmul.mubr.bf16.gmra.mrb[188].mxu0 %v23399_v55  ;;  %v23405_v55 = vld [vmem:[%s28615_s1 + $0x9a8] ss:$12 sps:$4 sm:$0xff]  }
 0x37c   :  { %3848 = vmatprep.mubr.bf16.mxu0 %v23404_v60 }
 0x37e   :  { %v26159_v21 = vpop.f32.mrb[192].mxu0 }
 0x37f   :  { %28655 = vst [vmem:[#allocation33_spill] sm:$0xff] %v26159_v21  ;;  %v3636_v6 = vpop.f32.mrb[193].mxu0 }
 0x380   :  { %v26164_v0 = vpop.f32.mrb[194].mxu0  ;;  %v23410_v6 = vld [vmem:[%s28615_s1 + $0x9c4] ss:$12 sps:$4 sm:$0xff]  }
 0x381   :  { %28656 = vst [vmem:[#allocation34_spill] sm:$0xff] %v26164_v0  ;;  %v3639_v12 = vpop.f32.mrb[195].mxu0 }
 0x383   :  { %3849 = vmatmul.mubr.bf16.gmra.mrb[192].mxu0 %v23402_v25  ;;  %v23408_v25 = vld [vmem:[%s28615_s1 + $0x9c0] ss:$12 sps:$4 sm:$0xff]  }
 0x384   :  { %3856 = vmatprep.mubr.bf16.mxu0 %v23407_v29 }
 0x386   :  { %v26169_v39 = vpop.f32.mrb[196].mxu0 }
 0x387   :  { %28657 = vst [vmem:[#allocation35_spill] sm:$0xff] %v26169_v39  ;;  %v3644_v47 = vpop.f32.mrb[197].mxu0 }
 0x388   :  { %v26174_v60 = vpop.f32.mrb[198].mxu0  ;;  %v23413_v47 = vld [vmem:[%s28615_s1 + $0x9dc] ss:$12 sps:$4 sm:$0xff]  }
 0x389   :  { %28658 = vst [vmem:[#allocation36_spill] sm:$0xff] %v26174_v60  ;;  %v3647_v0 = vpop.f32.mrb[199].mxu0 }
 0x38b   :  { %3857 = vmatmul.mubr.bf16.gmra.mrb[196].mxu0 %v23405_v55  ;;  %v23411_v55 = vld [vmem:[%s28615_s1 + $0x9d8] ss:$12 sps:$4 sm:$0xff]  }
 0x38c   :  { %3864 = vmatprep.mubr.bf16.mxu0 %v23410_v6 }
 0x38e   :  { %v26179_v21 = vpop.f32.mrb[200].mxu0 }
 0x38f   :  { %28659 = vst [vmem:[#allocation37_spill] sm:$0xff] %v26179_v21  ;;  %v3652_v12 = vpop.f32.mrb[201].mxu0 }
 0x390   :  { %v26184_v29 = vpop.f32.mrb[202].mxu0  ;;  %v23416_v12 = vld [vmem:[%s28615_s1 + $0x9f4] ss:$12 sps:$4 sm:$0xff]  }
 0x391   :  { %28660 = vst [vmem:[#allocation38_spill] sm:$0xff] %v26184_v29  ;;  %v3655_v60 = vpop.f32.mrb[203].mxu0 }
 0x393   :  { %3865 = vmatmul.mubr.bf16.gmra.mrb[200].mxu0 %v23408_v25  ;;  %v23414_v25 = vld [vmem:[%s28615_s1 + $0x9f0] ss:$12 sps:$4 sm:$0xff]  }
 0x394   :  { %3872 = vmatprep.mubr.bf16.mxu0 %v23413_v47 }
 0x396   :  { %v26189_v39 = vpop.f32.mrb[204].mxu0 }
 0x397   :  { %28661 = vst [vmem:[#allocation39_spill] sm:$0xff] %v26189_v39  ;;  %v3660_v0 = vpop.f32.mrb[205].mxu0 }
 0x398   :  { %v26194_v6 = vpop.f32.mrb[206].mxu0  ;;  %v23419_v0 = vld [vmem:[%s28615_s1 + $0xa0c] ss:$12 sps:$4 sm:$0xff]  }
 0x399   :  { %28662 = vst [vmem:[#allocation40_spill] sm:$0xff] %v26194_v6  ;;  %v3663_v29 = vpop.f32.mrb[207].mxu0 }
 0x39b   :  { %3873 = vmatmul.mubr.bf16.gmra.mrb[204].mxu0 %v23411_v55  ;;  %v23417_v55 = vld [vmem:[%s28615_s1 + $0xa08] ss:$12 sps:$4 sm:$0xff]  }
 0x39c   :  { %3880 = vmatprep.mubr.bf16.mxu0 %v23416_v12 }
 0x39e   :  { %v26199_v21 = vpop.f32.mrb[208].mxu0 }
 0x39f   :  { %28663 = vst [vmem:[#allocation41_spill] sm:$0xff] %v26199_v21  ;;  %v3668_v60 = vpop.f32.mrb[209].mxu0 }
 0x3a0   :  { %v26204_v47 = vpop.f32.mrb[210].mxu0  ;;  %v23422_v60 = vld [vmem:[%s28615_s1 + $0xa24] ss:$12 sps:$4 sm:$0xff]  }
 0x3a1   :  { %28664 = vst [vmem:[#allocation42_spill] sm:$0xff] %v26204_v47  ;;  %v3671_v6 = vpop.f32.mrb[211].mxu0 }
 0x3a3   :  { %3881 = vmatmul.mubr.bf16.gmra.mrb[208].mxu0 %v23414_v25  ;;  %v23420_v25 = vld [vmem:[%s28615_s1 + $0xa20] ss:$12 sps:$4 sm:$0xff]  }
 0x3a4   :  { %3888 = vmatprep.mubr.bf16.mxu0 %v23419_v0 }
 0x3a6   :  { %v26209_v39 = vpop.f32.mrb[212].mxu0 }
 0x3a7   :  { %28665 = vst [vmem:[#allocation43_spill] sm:$0xff] %v26209_v39  ;;  %v3676_v29 = vpop.f32.mrb[213].mxu0 }
 0x3a8   :  { %v26214_v12 = vpop.f32.mrb[214].mxu0  ;;  %v23425_v29 = vld [vmem:[%s28615_s1 + $0xa3c] ss:$12 sps:$4 sm:$0xff]  }
 0x3a9   :  { %28666 = vst [vmem:[#allocation44_spill] sm:$0xff] %v26214_v12  ;;  %v3679_v47 = vpop.f32.mrb[215].mxu0 }
 0x3ab   :  { %3889 = vmatmul.mubr.bf16.gmra.mrb[212].mxu0 %v23417_v55  ;;  %v23423_v55 = vld [vmem:[%s28615_s1 + $0xa38] ss:$12 sps:$4 sm:$0xff]  }
 0x3ac   :  { %3896 = vmatprep.mubr.bf16.mxu0 %v23422_v60 }
 0x3ae   :  { %v26219_v21 = vpop.f32.mrb[216].mxu0 }
 0x3af   :  { %28667 = vst [vmem:[#allocation45_spill] sm:$0xff] %v26219_v21  ;;  %v3684_v6 = vpop.f32.mrb[217].mxu0 }
 0x3b0   :  { %v26224_v0 = vpop.f32.mrb[218].mxu0  ;;  %v23428_v6 = vld [vmem:[%s28615_s1 + $0xa54] ss:$12 sps:$4 sm:$0xff]  }
 0x3b1   :  { %28668 = vst [vmem:[#allocation46_spill] sm:$0xff] %v26224_v0  ;;  %v3687_v12 = vpop.f32.mrb[219].mxu0 }
 0x3b3   :  { %3897 = vmatmul.mubr.bf16.gmra.mrb[216].mxu0 %v23420_v25  ;;  %v23426_v25 = vld [vmem:[%s28615_s1 + $0xa50] ss:$12 sps:$4 sm:$0xff]  }
 0x3b4   :  { %3904 = vmatprep.mubr.bf16.mxu0 %v23425_v29 }
 0x3b6   :  { %v26229_v39 = vpop.f32.mrb[220].mxu0 }
 0x3b7   :  { %28669 = vst [vmem:[#allocation47_spill] sm:$0xff] %v26229_v39  ;;  %v3692_v47 = vpop.f32.mrb[221].mxu0 }
 0x3b8   :  { %v26234_v60 = vpop.f32.mrb[222].mxu0  ;;  %v23431_v47 = vld [vmem:[%s28615_s1 + $0xa6c] ss:$12 sps:$4 sm:$0xff]  }
 0x3b9   :  { %28670 = vst [vmem:[#allocation48_spill] sm:$0xff] %v26234_v60  ;;  %v3695_v0 = vpop.f32.mrb[223].mxu0 }
 0x3bb   :  { %3905 = vmatmul.mubr.bf16.gmra.mrb[220].mxu0 %v23423_v55  ;;  %v23429_v55 = vld [vmem:[%s28615_s1 + $0xa68] ss:$12 sps:$4 sm:$0xff]  }
 0x3bc   :  { %3912 = vmatprep.mubr.bf16.mxu0 %v23428_v6 }
 0x3be   :  { %v26239_v21 = vpop.f32.mrb[224].mxu0 }
 0x3bf   :  { %28671 = vst [vmem:[#allocation49_spill] sm:$0xff] %v26239_v21  ;;  %v3700_v12 = vpop.f32.mrb[225].mxu0 }
 0x3c0   :  { %v26244_v29 = vpop.f32.mrb[226].mxu0  ;;  %v23434_v12 = vld [vmem:[%s28615_s1 + $0xa84] ss:$12 sps:$4 sm:$0xff]  }
 0x3c1   :  { %28672 = vst [vmem:[#allocation50_spill] sm:$0xff] %v26244_v29  ;;  %v3703_v60 = vpop.f32.mrb[227].mxu0 }
 0x3c3   :  { %3913 = vmatmul.mubr.bf16.gmra.mrb[224].mxu0 %v23426_v25  ;;  %v23432_v25 = vld [vmem:[%s28615_s1 + $0xa80] ss:$12 sps:$4 sm:$0xff]  }
 0x3c4   :  { %3920 = vmatprep.mubr.bf16.mxu0 %v23431_v47 }
 0x3c6   :  { %v26249_v39 = vpop.f32.mrb[228].mxu0 }
 0x3c7   :  { %28673 = vst [vmem:[#allocation51_spill] sm:$0xff] %v26249_v39  ;;  %v3708_v0 = vpop.f32.mrb[229].mxu0 }
 0x3c8   :  { %v26254_v6 = vpop.f32.mrb[230].mxu0  ;;  %v23437_v0 = vld [vmem:[%s28615_s1 + $0xa9c] ss:$12 sps:$4 sm:$0xff]  }
 0x3c9   :  { %28674 = vst [vmem:[#allocation52_spill] sm:$0xff] %v26254_v6  ;;  %v3711_v29 = vpop.f32.mrb[231].mxu0 }
 0x3cb   :  { %3921 = vmatmul.mubr.bf16.gmra.mrb[228].mxu0 %v23429_v55  ;;  %v23435_v55 = vld [vmem:[%s28615_s1 + $0xa98] ss:$12 sps:$4 sm:$0xff]  }
 0x3cc   :  { %3928 = vmatprep.mubr.bf16.mxu0 %v23434_v12 }
 0x3ce   :  { %v26259_v21 = vpop.f32.mrb[232].mxu0 }
 0x3cf   :  { %28675 = vst [vmem:[#allocation53_spill] sm:$0xff] %v26259_v21  ;;  %v3716_v60 = vpop.f32.mrb[233].mxu0 }
 0x3d0   :  { %v26264_v47 = vpop.f32.mrb[234].mxu0  ;;  %v23440_v60 = vld [vmem:[%s28615_s1 + $0xab4] ss:$12 sps:$4 sm:$0xff]  }
 0x3d1   :  { %28676 = vst [vmem:[#allocation54_spill] sm:$0xff] %v26264_v47  ;;  %v3719_v6 = vpop.f32.mrb[235].mxu0 }
 0x3d3   :  { %3929 = vmatmul.mubr.bf16.gmra.mrb[232].mxu0 %v23432_v25  ;;  %v23438_v25 = vld [vmem:[%s28615_s1 + $0xab0] ss:$12 sps:$4 sm:$0xff]  }
 0x3d4   :  { %3936 = vmatprep.mubr.bf16.mxu0 %v23437_v0 }
 0x3d6   :  { %v26269_v39 = vpop.f32.mrb[236].mxu0 }
 0x3d7   :  { %28677 = vst [vmem:[#allocation55_spill] sm:$0xff] %v26269_v39  ;;  %v3724_v29 = vpop.f32.mrb[237].mxu0 }
 0x3d8   :  { %v26274_v12 = vpop.f32.mrb[238].mxu0  ;;  %v23443_v29 = vld [vmem:[%s28615_s1 + $0xacc] ss:$12 sps:$4 sm:$0xff]  }
 0x3d9   :  { %28678 = vst [vmem:[#allocation56_spill] sm:$0xff] %v26274_v12  ;;  %v3727_v47 = vpop.f32.mrb[239].mxu0 }
 0x3db   :  { %3937 = vmatmul.mubr.bf16.gmra.mrb[236].mxu0 %v23435_v55  ;;  %v23441_v55 = vld [vmem:[%s28615_s1 + $0xac8] ss:$12 sps:$4 sm:$0xff]  }
 0x3dc   :  { %3944 = vmatprep.mubr.bf16.mxu0 %v23440_v60 }
 0x3de   :  { %v26279_v21 = vpop.f32.mrb[240].mxu0 }
 0x3df   :  { %28679 = vst [vmem:[#allocation57_spill] sm:$0xff] %v26279_v21  ;;  %v3732_v6 = vpop.f32.mrb[241].mxu0 }
 0x3e0   :  { %v26284_v0 = vpop.f32.mrb[242].mxu0  ;;  %v23446_v6 = vld [vmem:[%s28615_s1 + $0xae4] ss:$12 sps:$4 sm:$0xff]  }
 0x3e1   :  { %28680 = vst [vmem:[#allocation58_spill] sm:$0xff] %v26284_v0  ;;  %v3735_v12 = vpop.f32.mrb[243].mxu0 }
 0x3e3   :  { %3945 = vmatmul.mubr.bf16.gmra.mrb[240].mxu0 %v23438_v25  ;;  %v23444_v25 = vld [vmem:[%s28615_s1 + $0xae0] ss:$12 sps:$4 sm:$0xff]  }
 0x3e4   :  { %3952 = vmatprep.mubr.bf16.mxu0 %v23443_v29 }
 0x3e6   :  { %v26289_v39 = vpop.f32.mrb[244].mxu0 }
 0x3e7   :  { %28681 = vst [vmem:[#allocation59_spill] sm:$0xff] %v26289_v39  ;;  %v3740_v47 = vpop.f32.mrb[245].mxu0 }
 0x3e8   :  { %v26294_v60 = vpop.f32.mrb[246].mxu0  ;;  %v23449_v47 = vld [vmem:[%s28615_s1 + $0xafc] ss:$12 sps:$4 sm:$0xff]  }
 0x3e9   :  { %28682 = vst [vmem:[#allocation60_spill] sm:$0xff] %v26294_v60  ;;  %v3743_v0 = vpop.f32.mrb[247].mxu0 }
 0x3eb   :  { %3953 = vmatmul.mubr.bf16.gmra.mrb[244].mxu0 %v23441_v55  ;;  %v23447_v55 = vld [vmem:[%s28615_s1 + $0xaf8] ss:$12 sps:$4 sm:$0xff]  }
 0x3ec   :  { %3960 = vmatprep.mubr.bf16.mxu0 %v23446_v6 }
 0x3ee   :  { %v26299_v21 = vpop.f32.mrb[248].mxu0 }
 0x3ef   :  { %28683 = vst [vmem:[#allocation61_spill] sm:$0xff] %v26299_v21  ;;  %v3748_v12 = vpop.f32.mrb[249].mxu0 }
 0x3f0   :  { %v26304_v29 = vpop.f32.mrb[250].mxu0  ;;  %v23452_v12 = vld [vmem:[%s28615_s1 + $0xb14] ss:$12 sps:$4 sm:$0xff]  }
 0x3f1   :  { %28684 = vst [vmem:[#allocation62_spill] sm:$0xff] %v26304_v29  ;;  %v3751_v60 = vpop.f32.mrb[251].mxu0 }
 0x3f3   :  { %3961 = vmatmul.mubr.bf16.gmra.mrb[248].mxu0 %v23444_v25  ;;  %v23450_v25 = vld [vmem:[%s28615_s1 + $0xb10] ss:$12 sps:$4 sm:$0xff]  }
 0x3f4   :  { %3968 = vmatprep.mubr.bf16.mxu0 %v23449_v47 }
 0x3f6   :  { %v26309_v39 = vpop.f32.mrb[252].mxu0 }
 0x3f7   :  { %28685 = vst [vmem:[#allocation63_spill] sm:$0xff] %v26309_v39  ;;  %v3756_v0 = vpop.f32.mrb[253].mxu0 }
 0x3f8   :  { %v26314_v6 = vpop.f32.mrb[254].mxu0  ;;  %v23455_v0 = vld [vmem:[%s28615_s1 + $0xb2c] ss:$12 sps:$4 sm:$0xff]  }
 0x3f9   :  { %28686 = vst [vmem:[#allocation64_spill] sm:$0xff] %v26314_v6  ;;  %v3759_v29 = vpop.f32.mrb[255].mxu0 }
 0x3fb   :  { %3969 = vmatmul.mubr.bf16.gmra.mrb[252].mxu0 %v23447_v55  ;;  %v23453_v55 = vld [vmem:[%s28615_s1 + $0xb28] ss:$12 sps:$4 sm:$0xff]  }
 0x3fc   :  { %3976 = vmatprep.mubr.bf16.mxu0 %v23452_v12 }
 0x3fe   :  { %v26319_v21 = vpop.f32.mrb[148].mxu0 }
 0x3ff   :  { %28687 = vst [vmem:[#allocation65_spill] sm:$0xff] %v26319_v21  ;;  %v3764_v60 = vpop.f32.mrb[149].mxu0 }
 0x400   :  { %v26324_v47 = vpop.f32.mrb[150].mxu0  ;;  %v23458_v60 = vld [vmem:[%s28615_s1 + $0xb44] ss:$12 sps:$4 sm:$0xff]  }
 0x401   :  { %28688 = vst [vmem:[#allocation66_spill] sm:$0xff] %v26324_v47  ;;  %v3767_v6 = vpop.f32.mrb[151].mxu0 }
 0x403   :  { %3977 = vmatmul.mubr.bf16.gmra.mrb[148].mxu0 %v23450_v25  ;;  %v23456_v25 = vld [vmem:[%s28615_s1 + $0xb40] ss:$12 sps:$4 sm:$0xff]  }
 0x404   :  { %3984 = vmatprep.mubr.bf16.mxu0 %v23455_v0 }
 0x406   :  { %v26329_v39 = vpop.f32.mrb[152].mxu0 }
 0x407   :  { %28689 = vst [vmem:[#allocation67_spill] sm:$0xff] %v26329_v39  ;;  %v3772_v29 = vpop.f32.mrb[153].mxu0 }
 0x408   :  { %v26334_v12 = vpop.f32.mrb[154].mxu0  ;;  %v23461_v29 = vld [vmem:[%s28615_s1 + $0xb5c] ss:$12 sps:$4 sm:$0xff]  }
 0x409   :  { %28690 = vst [vmem:[#allocation68_spill] sm:$0xff] %v26334_v12  ;;  %v3775_v47 = vpop.f32.mrb[155].mxu0 }
 0x40b   :  { %3985 = vmatmul.mubr.bf16.gmra.mrb[152].mxu0 %v23453_v55  ;;  %v23459_v55 = vld [vmem:[%s28615_s1 + $0xb58] ss:$12 sps:$4 sm:$0xff]  }
 0x40c   :  { %3992 = vmatprep.mubr.bf16.mxu0 %v23458_v60 }
 0x40e   :  { %v26339_v21 = vpop.f32.mrb[156].mxu0 }
 0x40f   :  { %28691 = vst [vmem:[#allocation69_spill] sm:$0xff] %v26339_v21  ;;  %v3780_v6 = vpop.f32.mrb[157].mxu0 }
 0x410   :  { %v26344_v0 = vpop.f32.mrb[158].mxu0  ;;  %v23464_v6 = vld [vmem:[%s28615_s1 + $0xb74] ss:$12 sps:$4 sm:$0xff]  }
 0x411   :  { %28692 = vst [vmem:[#allocation70_spill] sm:$0xff] %v26344_v0  ;;  %v3783_v12 = vpop.f32.mrb[159].mxu0 }
 0x413   :  { %3993 = vmatmul.mubr.bf16.gmra.mrb[156].mxu0 %v23456_v25  ;;  %v23462_v25 = vld [vmem:[%s28615_s1 + $0xb70] ss:$12 sps:$4 sm:$0xff]  }
 0x414   :  { %4000 = vmatprep.mubr.bf16.mxu0 %v23461_v29 }
 0x416   :  { %v26349_v39 = vpop.f32.mrb[160].mxu0 }
 0x417   :  { %28693 = vst [vmem:[#allocation71_spill] sm:$0xff] %v26349_v39  ;;  %v3788_v47 = vpop.f32.mrb[161].mxu0 }
 0x418   :  { %v26354_v60 = vpop.f32.mrb[162].mxu0  ;;  %v23467_v47 = vld [vmem:[%s28615_s1 + $0xb8c] ss:$12 sps:$4 sm:$0xff]  }
 0x419   :  { %28694 = vst [vmem:[#allocation72_spill] sm:$0xff] %v26354_v60  ;;  %v3791_v0 = vpop.f32.mrb[163].mxu0 }
 0x41b   :  { %4001 = vmatmul.mubr.bf16.gmra.mrb[160].mxu0 %v23459_v55  ;;  %v23465_v55 = vld [vmem:[%s28615_s1 + $0xb88] ss:$12 sps:$4 sm:$0xff]  }
 0x41c   :  { %4008 = vmatprep.mubr.bf16.mxu0 %v23464_v6 }
 0x41e   :  { %v26359_v21 = vpop.f32.mrb[164].mxu0 }
 0x41f   :  { %28695 = vst [vmem:[#allocation73_spill] sm:$0xff] %v26359_v21  ;;  %v3796_v12 = vpop.f32.mrb[165].mxu0 }
 0x420   :  { %v26364_v29 = vpop.f32.mrb[166].mxu0  ;;  %v23470_v12 = vld [vmem:[%s28615_s1 + $0xba4] ss:$12 sps:$4 sm:$0xff]  }
 0x421   :  { %28696 = vst [vmem:[#allocation74_spill] sm:$0xff] %v26364_v29  ;;  %v3799_v60 = vpop.f32.mrb[167].mxu0 }
 0x423   :  { %4009 = vmatmul.mubr.bf16.gmra.mrb[164].mxu0 %v23462_v25  ;;  %v23468_v25 = vld [vmem:[%s28615_s1 + $0xba0] ss:$12 sps:$4 sm:$0xff]  }
 0x424   :  { %4016 = vmatprep.mubr.bf16.mxu0 %v23467_v47 }
 0x426   :  { %v26369_v39 = vpop.f32.mrb[168].mxu0 }
 0x427   :  { %28697 = vst [vmem:[#allocation75_spill] sm:$0xff] %v26369_v39  ;;  %v3804_v0 = vpop.f32.mrb[169].mxu0 }
 0x428   :  { %v26374_v6 = vpop.f32.mrb[170].mxu0  ;;  %v23473_v0 = vld [vmem:[%s28615_s1 + $0xbbc] ss:$12 sps:$4 sm:$0xff]  }
 0x429   :  { %28698 = vst [vmem:[#allocation76_spill] sm:$0xff] %v26374_v6  ;;  %v3807_v29 = vpop.f32.mrb[171].mxu0 }
 0x42b   :  { %4017 = vmatmul.mubr.bf16.gmra.mrb[168].mxu0 %v23465_v55  ;;  %v23471_v55 = vld [vmem:[%s28615_s1 + $0xbb8] ss:$12 sps:$4 sm:$0xff]  }
 0x42c   :  { %4024 = vmatprep.mubr.bf16.mxu0 %v23470_v12 }
 0x42e   :  { %v26379_v21 = vpop.f32.mrb[172].mxu0 }
 0x42f   :  { %28699 = vst [vmem:[#allocation77_spill] sm:$0xff] %v26379_v21  ;;  %v3812_v60 = vpop.f32.mrb[173].mxu0 }
 0x430   :  { %v26384_v47 = vpop.f32.mrb[174].mxu0  ;;  %v23476_v60 = vld [vmem:[%s28615_s1 + $0xbd4] ss:$12 sps:$4 sm:$0xff]  }
 0x431   :  { %28700 = vst [vmem:[#allocation78_spill] sm:$0xff] %v26384_v47  ;;  %v3815_v6 = vpop.f32.mrb[175].mxu0 }
 0x433   :  { %4025 = vmatmul.mubr.bf16.gmra.mrb[172].mxu0 %v23468_v25  ;;  %v23474_v25 = vld [vmem:[%s28615_s1 + $0xbd0] ss:$12 sps:$4 sm:$0xff]  }
 0x434   :  { %4032 = vmatprep.mubr.bf16.mxu0 %v23473_v0 }
 0x436   :  { %v26389_v39 = vpop.f32.mrb[176].mxu0 }
 0x437   :  { %28701 = vst [vmem:[#allocation79_spill] sm:$0xff] %v26389_v39  ;;  %v3820_v29 = vpop.f32.mrb[177].mxu0 }
 0x438   :  { %v26394_v12 = vpop.f32.mrb[178].mxu0  ;;  %v23479_v29 = vld [vmem:[%s28615_s1 + $0xbec] ss:$12 sps:$4 sm:$0xff]  }
 0x439   :  { %28702 = vst [vmem:[#allocation80_spill] sm:$0xff] %v26394_v12  ;;  %v3823_v47 = vpop.f32.mrb[179].mxu0 }
 0x43a   :  { %v544_v47 = vld [vmem:[%s28615_s1 + $0xc00] sm:$0xff] }
 0x43b   :  { %4033 = vmatmul.mubr.bf16.gmra.mrb[176].mxu0 %v23471_v55 }
 0x43c   :  { %4040 = vmatprep.mubr.bf16.mxu0 %v23476_v60 }
 0x43e   :  { %v26399_v21 = vpop.f32.mrb[180].mxu0 }
 0x43f   :  { %28703 = vst [vmem:[#allocation81_spill] sm:$0xff] %v26399_v21  ;;  %v3828_v6 = vpop.f32.mrb[181].mxu0 }
 0x440   :  { %v26404_v0 = vpop.f32.mrb[182].mxu0  ;;  %v23477_v6 = vld [vmem:[%s28615_s1 + $0xbe8] ss:$12 sps:$4 sm:$0xff]  }
 0x441   :  { %28704 = vst [vmem:[#allocation82_spill] sm:$0xff] %v26404_v0  ;;  %v3831_v12 = vpop.f32.mrb[183].mxu0  ;;  %v18292_v0 = vcombine.high %v544_v47, %v544_v47 }
 0x443   :  { %4041 = vmatmul.mubr.bf16.gmra.mrb[180].mxu0 %v23474_v25 }
 0x444   :  { %4048 = vmatprep.mubr.bf16.mxu0 %v23479_v29  ;;  %v18291_v29 = vcombine.low %v544_v47, %v544_v47  ;;  %v23487_v47 = vld [vmem:[%s28615_s1 + $0x80] ss:$12 sps:$4 sm:$0xff]  }
 0x446   :  { %v26412_v55 = vpop.f32.mrb[184].mxu0 }
 0x447   :  { %28705 = vst [vmem:[#allocation83_spill] sm:$0xff] %v26412_v55  ;;  %v3836_v60 = vpop.f32.mrb[185].mxu0 }
 0x448   :  { %v26417_v21 = vpop.f32.mrb[186].mxu0  ;;  %v28709_v60 = vmov 0.0  }
 0x449   :  { %28706 = vst [vmem:[#allocation84_spill] sm:$0xff] %v26417_v21  ;;  %v3839_v39 = vpop.f32.mrb[187].mxu0  ;;  %v23482_v21 = vld [vmem:[%s28615_s1 + $0x8] ss:$12 sps:$4 sm:$0xff]  }
 0x44a   :  { %v23483_v39 = vld [vmem:[%s28615_s1 + $0x20] ss:$12 sps:$4 sm:$0xff]  }
 0x44b   :  { %4049 = vmatmul.mubr.bf16.gmra.mrb[184].mxu0 %v23477_v6  ;;  %v23488_v6 = vld [vmem:[%s28615_s1 + $0x98] ss:$12 sps:$4 sm:$0xff]  }
 0x44c   :  { %4056 = vmatprep.mubr.bf16.mxu0 %v18292_v0  ;;  %v23486_v0 = vld [vmem:[%s28615_s1 + $0x68] ss:$12 sps:$4 sm:$0xff]  }
 0x44e   :  { %v26419_v12 = vpop.f32.mrb[188].mxu0 }
 0x44f   :  { %28707 = vst [vmem:[#allocation85_spill] sm:$0xff] %v26419_v12  ;;  %v3844_v25 = vpop.f32.mrb[189].mxu0  ;;  %v28710_v12 = vmov 0  }
 0x450   :  { %v26421_v17 = vpop.f32.mrb[190].mxu0  ;;  %v23489_v25 = vld [vmem:[%s28615_s1 + $0xb0] ss:$12 sps:$4 sm:$0xff]  }
 0x451   :  { %28708 = vst [vmem:[#allocation86_spill] sm:$0xff] %v26421_v17  ;;  %v3847_v3 = vpop.f32.mrb[191].mxu0 }
 0x452   :  { %v23484_v3 = vld [vmem:[%s28615_s1 + $0x38] ss:$12 sps:$4 sm:$0xff]  }
 0x453   :  { %4057 = vmatmul.mubr.bf16.gmra.mrb[188].mxu0 %v18291_v29  ;;  %v23490_v29 = vld [vmem:[%s28615_s1 + $0xc8] ss:$12 sps:$4 sm:$0xff]  }
 0x454   :  { %19943 = vmatprep.mubr.msk.bf16.mxu0 %vm25283_vm1, %v28709_v60 }
 0x45b   :  { %19944 = vmatmul.mubr.msk.bf16.vlgmr.msra.gmra.mrb[0].mxu0 %vm2608_vm2, %v23482_v21  ;;  %v23485_v21 = vld [vmem:[%s28615_s1 + $0x50] ss:$12 sps:$4 sm:$0xff]  }
 0x45c   :  { %19947 = vmatprep.mubr.msk.bf16.mxu0 %vm25283_vm1, %v28709_v60 }
 0x463   :  { %19948 = vmatmul.mubr.msk.bf16.gmra.mrb[4].mxu0 %vm2608_vm2, %v23483_v39  ;;  %v23491_v39 = vld [vmem:[%s28615_s1 + $0xe0] ss:$12 sps:$4 sm:$0xff]  }
 0x464   :  { %19951 = vmatprep.mubr.msk.bf16.mxu0 %vm25283_vm1, %v28709_v60 }
 0x46b   :  { %19952 = vmatmul.mubr.msk.bf16.gmra.mrb[8].mxu0 %vm2608_vm2, %v23484_v3  ;;  %v23492_v3 = vld [vmem:[%s28615_s1 + $0xf8] ss:$12 sps:$4 sm:$0xff]  }
 0x46c   :  { %19955 = vmatprep.mubr.msk.bf16.mxu0 %vm25283_vm1, %v28709_v60 }
 0x473   :  { %19956 = vmatmul.mubr.msk.bf16.gmra.mrb[12].mxu0 %vm2608_vm2, %v23485_v21  ;;  %v23493_v21 = vld [vmem:[%s28615_s1 + $0x110] ss:$12 sps:$4 sm:$0xff]  }
 0x474   :  { %19959 = vmatprep.mubr.msk.bf16.mxu0 %vm25283_vm1, %v28709_v60 }
 0x47b   :  { %19960 = vmatmul.mubr.msk.bf16.gmra.mrb[16].mxu0 %vm2608_vm2, %v23486_v0  ;;  %v23494_v0 = vld [vmem:[%s28615_s1 + $0x128] ss:$12 sps:$4 sm:$0xff]  }
 0x47c   :  { %19963 = vmatprep.mubr.msk.bf16.mxu0 %vm25283_vm1, %v28709_v60 }
 0x483   :  { %19964 = vmatmul.mubr.msk.bf16.gmra.mrb[20].mxu0 %vm2608_vm2, %v23487_v47  ;;  %v23495_v47 = vld [vmem:[%s28615_s1 + $0x140] ss:$12 sps:$4 sm:$0xff]  }
 0x484   :  { %19967 = vmatprep.mubr.msk.bf16.mxu0 %vm25283_vm1, %v28709_v60 }
 0x48b   :  { %19968 = vmatmul.mubr.msk.bf16.gmra.mrb[24].mxu0 %vm2608_vm2, %v23488_v6  ;;  %v23496_v6 = vld [vmem:[%s28615_s1 + $0x158] ss:$12 sps:$4 sm:$0xff]  }
 0x48c   :  { %19971 = vmatprep.mubr.msk.bf16.mxu0 %vm25283_vm1, %v28709_v60 }
 0x493   :  { %19972 = vmatmul.mubr.msk.bf16.gmra.mrb[28].mxu0 %vm2608_vm2, %v23489_v25  ;;  %v23497_v25 = vld [vmem:[%s28615_s1 + $0x170] ss:$12 sps:$4 sm:$0xff]  }
 0x494   :  { %19975 = vmatprep.mubr.msk.bf16.mxu0 %vm25283_vm1, %v28709_v60 }
 0x49b   :  { %19976 = vmatmul.mubr.msk.bf16.gmra.mrb[32].mxu0 %vm2608_vm2, %v23490_v29  ;;  %v23498_v29 = vld [vmem:[%s28615_s1 + $0x188] ss:$12 sps:$4 sm:$0xff]  }
 0x49c   :  { %19979 = vmatprep.mubr.msk.bf16.mxu0 %vm25283_vm1, %v28709_v60 }
 0x4a3   :  { %19980 = vmatmul.mubr.msk.bf16.gmra.mrb[36].mxu0 %vm2608_vm2, %v23491_v39  ;;  %v23499_v39 = vld [vmem:[%s28615_s1 + $0x1a0] ss:$12 sps:$4 sm:$0xff]  }
 0x4a4   :  { %19983 = vmatprep.mubr.msk.bf16.mxu0 %vm25283_vm1, %v28709_v60 }
 0x4ab   :  { %19984 = vmatmul.mubr.msk.bf16.gmra.mrb[40].mxu0 %vm2608_vm2, %v23492_v3  ;;  %v23500_v3 = vld [vmem:[%s28615_s1 + $0x1b8] ss:$12 sps:$4 sm:$0xff]  }
 0x4ac   :  { %19987 = vmatprep.mubr.msk.bf16.mxu0 %vm25283_vm1, %v28709_v60 }
 0x4b3   :  { %19988 = vmatmul.mubr.msk.bf16.gmra.mrb[44].mxu0 %vm2608_vm2, %v23493_v21  ;;  %v23501_v21 = vld [vmem:[%s28615_s1 + $0x1d0] ss:$12 sps:$4 sm:$0xff]  }
 0x4b4   :  { %19991 = vmatprep.mubr.msk.bf16.mxu0 %vm25283_vm1, %v28709_v60 }
 0x4bb   :  { %19992 = vmatmul.mubr.msk.bf16.gmra.mrb[48].mxu0 %vm2608_vm2, %v23494_v0  ;;  %v23502_v0 = vld [vmem:[%s28615_s1 + $0x1e8] ss:$12 sps:$4 sm:$0xff]  }
 0x4bc   :  { %19995 = vmatprep.mubr.msk.bf16.mxu0 %vm25283_vm1, %v28709_v60 }
 0x4c3   :  { %19996 = vmatmul.mubr.msk.bf16.gmra.mrb[52].mxu0 %vm2608_vm2, %v23495_v47  ;;  %v23503_v47 = vld [vmem:[%s28615_s1 + $0x200] ss:$12 sps:$4 sm:$0xff]  }
 0x4c4   :  { %19999 = vmatprep.mubr.msk.bf16.mxu0 %vm25283_vm1, %v28709_v60 }
 0x4cb   :  { %20000 = vmatmul.mubr.msk.bf16.gmra.mrb[56].mxu0 %vm2608_vm2, %v23496_v6  ;;  %v23504_v6 = vld [vmem:[%s28615_s1 + $0x218] ss:$12 sps:$4 sm:$0xff]  }
 0x4cc   :  { %20003 = vmatprep.mubr.msk.bf16.mxu0 %vm25283_vm1, %v28709_v60 }
 0x4d3   :  { %20004 = vmatmul.mubr.msk.bf16.gmra.mrb[60].mxu0 %vm2608_vm2, %v23497_v25  ;;  %v23505_v25 = vld [vmem:[%s28615_s1 + $0x230] ss:$12 sps:$4 sm:$0xff]  }
 0x4d4   :  { %20007 = vmatprep.mubr.msk.bf16.mxu0 %vm25283_vm1, %v28709_v60 }
 0x4db   :  { %20008 = vmatmul.mubr.msk.bf16.gmra.mrb[64].mxu0 %vm2608_vm2, %v23498_v29  ;;  %v23506_v29 = vld [vmem:[%s28615_s1 + $0x248] ss:$12 sps:$4 sm:$0xff]  }
 0x4dc   :  { %20011 = vmatprep.mubr.msk.bf16.mxu0 %vm25283_vm1, %v28709_v60 }
 0x4e3   :  { %20012 = vmatmul.mubr.msk.bf16.gmra.mrb[68].mxu0 %vm2608_vm2, %v23499_v39  ;;  %v23507_v39 = vld [vmem:[%s28615_s1 + $0x260] ss:$12 sps:$4 sm:$0xff]  }
 0x4e4   :  { %20015 = vmatprep.mubr.msk.bf16.mxu0 %vm25283_vm1, %v28709_v60 }
 0x4eb   :  { %20016 = vmatmul.mubr.msk.bf16.gmra.mrb[72].mxu0 %vm2608_vm2, %v23500_v3  ;;  %v23508_v3 = vld [vmem:[%s28615_s1 + $0x278] ss:$12 sps:$4 sm:$0xff]  }
 0x4ec   :  { %20019 = vmatprep.mubr.msk.bf16.mxu0 %vm25283_vm1, %v28709_v60 }
 0x4f3   :  { %20020 = vmatmul.mubr.msk.bf16.gmra.mrb[76].mxu0 %vm2608_vm2, %v23501_v21 }
 0x4f4   :  { %20023 = vmatprep.mubr.msk.bf16.mxu0 %vm25283_vm1, %v28709_v60 }
 0x4fb   :  { %20024 = vmatmul.mubr.msk.bf16.gmra.mrb[80].mxu0 %vm2608_vm2, %v23502_v0 }
 0x4fc   :  { %20027 = vmatprep.mubr.msk.bf16.mxu0 %vm25283_vm1, %v28709_v60 }
 0x503   :  { %20028 = vmatmul.mubr.msk.bf16.gmra.mrb[84].mxu0 %vm2608_vm2, %v23503_v47  ;;  %v23509_v47 = vld [vmem:[%s28615_s1 + $0x290] ss:$12 sps:$4 sm:$0xff]  }
 0x504   :  { %20031 = vmatprep.mubr.msk.bf16.mxu0 %vm25283_vm1, %v28709_v60 }
 0x50b   :  { %20032 = vmatmul.mubr.msk.bf16.gmra.mrb[88].mxu0 %vm2608_vm2, %v23504_v6 }
 0x50c   :  { %20035 = vmatprep.mubr.msk.bf16.mxu0 %vm25283_vm1, %v28709_v60 }
 0x513   :  { %20036 = vmatmul.mubr.msk.bf16.gmra.mrb[92].mxu0 %vm2608_vm2, %v23505_v25 }
 0x514   :  { %20039 = vmatprep.mubr.msk.bf16.mxu0 %vm25283_vm1, %v28709_v60 }
 0x51b   :  { %20040 = vmatmul.mubr.msk.bf16.gmra.mrb[96].mxu0 %vm2608_vm2, %v23506_v29 }
 0x51c   :  { %20043 = vmatprep.mubr.msk.bf16.mxu0 %vm25283_vm1, %v28709_v60 }
 0x523   :  { %20044 = vmatmul.mubr.msk.bf16.gmra.mrb[100].mxu0 %vm2608_vm2, %v23507_v39 }
 0x524   :  { %20047 = vmatprep.mubr.msk.bf16.mxu0 %vm25283_vm1, %v28709_v60 }
 0x52b   :  { %20048 = vmatmul.mubr.msk.bf16.gmra.mrb[104].mxu0 %vm2608_vm2, %v23508_v3 }
 0x52c   :  { %20051 = vmatprep.mubr.msk.bf16.mxu0 %vm25283_vm1, %v28709_v60 }
 0x52e   :  { %v4098_v21 = vpop.f32.mrb[0].mxu0 }
 0x52f   :  { %v19945_v0 = vpop.f32.mrb[1].mxu0  ;;  %v5128_v25 = vmax.f32 %v4098_v21, 0.0 }
 0x530   :  { %v4101_v6 = vpop.f32.mrb[2].mxu0  ;;  %v23510_v0 = vld [vmem:[%s28615_s1 + $0x2a8] ss:$12 sps:$4 sm:$0xff]  }
 0x531   :  { %v5129_v29 = vmax.f32 %v4101_v6, 0.0  ;;  %v19946_v39 = vpop.f32.mrb[3].mxu0 }
 0x533   :  { %v5385_v17 = vpack.c.bf16 %v5129_v29, %v5128_v25  ;;  %20052 = vmatmul.mubr.msk.bf16.gmra.mrb[108].mxu0 %vm2608_vm2, %v23509_v47 }
 0x534   :  { %20055 = vmatprep.mubr.msk.bf16.mxu0 %vm25283_vm1, %v28709_v60 }
 0x535   :  { %12373 = vmatpush1.bf16.msra.mxu0 %v5385_v17 }
 0x536   :  { %v4106_v3 = vpop.f32.mrb[4].mxu0  ;;  %12374 = vmatprep.subr.bf16.mxu0 %v28710_v12 }
 0x537   :  { %v19949_v55 = vpop.f32.mrb[5].mxu0  ;;  %v5130_v35 = vmax.f32 %v4106_v3, 0.0 }
 0x538   :  { %v4109_v48 = vpop.f32.mrb[6].mxu0  ;;  %v23511_v55 = vld [vmem:[%s28615_s1 + $0x2c0] ss:$12 sps:$4 sm:$0xff]  }
 0x539   :  { %v5131_v21 = vmax.f32 %v4109_v48, 0.0  ;;  %v19950_v6 = vpop.f32.mrb[7].mxu0 }
 0x53b   :  { %v5386_v39 = vpack.c.bf16 %v5131_v21, %v5130_v35  ;;  %20056 = vmatmul.mubr.msk.bf16.gmra.mrb[112].mxu0 %vm2608_vm2, %v23510_v0  ;;  %v23512_v21 = vld [vmem:[%s28615_s1 + $0x2d8] ss:$12 sps:$4 sm:$0xff]  }
 0x53c   :  { %20059 = vmatprep.mubr.msk.bf16.mxu0 %vm25283_vm1, %v28709_v60 }
 0x53d   :  { %12375 = vmatpush1.bf16.msra.mxu0 %v5386_v39 }
 0x53e   :  { %v4114_v17 = vpop.f32.mrb[8].mxu0  ;;  %12376 = vmatprep.subr.bf16.mxu0 %v28710_v12 }
 0x53f   :  { %v19953_v47 = vpop.f32.mrb[9].mxu0  ;;  %v5132_v29 = vmax.f32 %v4114_v17, 0.0 }
 0x540   :  { %v4117_v25 = vpop.f32.mrb[10].mxu0 }
 0x541   :  { %v5133_v3 = vmax.f32 %v4117_v25, 0.0  ;;  %v19954_v48 = vpop.f32.mrb[11].mxu0 }
 0x543   :  { %v5387_v6 = vpack.c.bf16 %v5133_v3, %v5132_v29  ;;  %20060 = vmatmul.mubr.msk.bf16.gmra.mrb[116].mxu0 %vm2608_vm2, %v23511_v55  ;;  %v23513_v3 = vld [vmem:[%s28615_s1 + $0x2f0] ss:$12 sps:$4 sm:$0xff]  }
 0x544   :  { %20063 = vmatprep.mubr.msk.bf16.mxu0 %vm25283_vm1, %v28709_v60 }
 0x545   :  { %12377 = vmatpush1.bf16.msra.mxu0 %v5387_v6 }
 0x546   :  { %v4122_v35 = vpop.f32.mrb[12].mxu0  ;;  %12378 = vmatprep.subr.bf16.mxu0 %v28710_v12 }
 0x547   :  { %v19957_v0 = vpop.f32.mrb[13].mxu0  ;;  %v5134_v47 = vmax.f32 %v4122_v35, 0.0 }
 0x548   :  { %v4125_v39 = vpop.f32.mrb[14].mxu0 }
 0x549   :  { %v5135_v17 = vmax.f32 %v4125_v39, 0.0  ;;  %v19958_v25 = vpop.f32.mrb[15].mxu0 }
 0x54b   :  { %v5388_v48 = vpack.c.bf16 %v5135_v17, %v5134_v47  ;;  %20064 = vmatmul.mubr.msk.bf16.gmra.mrb[120].mxu0 %vm2608_vm2, %v23512_v21  ;;  %v23514_v17 = vld [vmem:[%s28615_s1 + $0x308] ss:$12 sps:$4 sm:$0xff]  }
 0x54c   :  { %20067 = vmatprep.mubr.msk.bf16.mxu0 %vm25283_vm1, %v28709_v60 }
 0x54d   :  { %12379 = vmatpush1.bf16.msra.mxu0 %v5388_v48 }
 0x54e   :  { %v4130_v55 = vpop.f32.mrb[16].mxu0  ;;  %12380 = vmatprep.subr.bf16.mxu0 %v28710_v12 }
 0x54f   :  { %v19961_v29 = vpop.f32.mrb[17].mxu0  ;;  %v5136_v0 = vmax.f32 %v4130_v55, 0.0 }
 0x550   :  { %v4133_v6 = vpop.f32.mrb[18].mxu0 }
 0x551   :  { %v5137_v35 = vmax.f32 %v4133_v6, 0.0  ;;  %v19962_v39 = vpop.f32.mrb[19].mxu0 }
 0x553   :  { %v5389_v25 = vpack.c.bf16 %v5137_v35, %v5136_v0  ;;  %20068 = vmatmul.mubr.msk.bf16.gmra.mrb[124].mxu0 %vm2608_vm2, %v23513_v3  ;;  %v23515_v35 = vld [vmem:[%s28615_s1 + $0x320] ss:$12 sps:$4 sm:$0xff]  }
 0x554   :  { %20071 = vmatprep.mubr.msk.bf16.mxu0 %vm25283_vm1, %v28709_v60 }
 0x555   :  { %12381 = vmatpush1.bf16.msra.mxu0 %v5389_v25 }
 0x556   :  { %v4138_v21 = vpop.f32.mrb[20].mxu0  ;;  %12382 = vmatprep.subr.bf16.mxu0 %v28710_v12 }
 0x557   :  { %v19965_v47 = vpop.f32.mrb[21].mxu0  ;;  %v5138_v29 = vmax.f32 %v4138_v21, 0.0 }
 0x558   :  { %v4141_v48 = vpop.f32.mrb[22].mxu0 }
 0x559   :  { %v5139_v55 = vmax.f32 %v4141_v48, 0.0  ;;  %v19966_v6 = vpop.f32.mrb[23].mxu0 }
 0x55b   :  { %v5390_v39 = vpack.c.bf16 %v5139_v55, %v5138_v29  ;;  %20072 = vmatmul.mubr.msk.bf16.gmra.mrb[128].mxu0 %vm2608_vm2, %v23514_v17  ;;  %v23516_v55 = vld [vmem:[%s28615_s1 + $0x338] ss:$12 sps:$4 sm:$0xff]  }
 0x55c   :  { %20075 = vmatprep.mubr.msk.bf16.mxu0 %vm25283_vm1, %v28709_v60 }
 0x55d   :  { %12383 = vmatpush1.bf16.msra.mxu0 %v5390_v39 }
 0x55e   :  { %v4146_v3 = vpop.f32.mrb[24].mxu0  ;;  %12384 = vmatprep.subr.bf16.mxu0 %v28710_v12 }
 0x55f   :  { %v19969_v0 = vpop.f32.mrb[25].mxu0  ;;  %v5140_v47 = vmax.f32 %v4146_v3, 0.0 }
 0x560   :  { %v4149_v25 = vpop.f32.mrb[26].mxu0 }
 0x561   :  { %v5141_v21 = vmax.f32 %v4149_v25, 0.0  ;;  %v19970_v48 = vpop.f32.mrb[27].mxu0 }
 0x563   :  { %v5391_v6 = vpack.c.bf16 %v5141_v21, %v5140_v47  ;;  %20076 = vmatmul.mubr.msk.bf16.gmra.mrb[132].mxu0 %vm2608_vm2, %v23515_v35  ;;  %v23517_v21 = vld [vmem:[%s28615_s1 + $0x350] ss:$12 sps:$4 sm:$0xff]  }
 0x564   :  { %20079 = vmatprep.mubr.msk.bf16.mxu0 %vm25283_vm1, %v28709_v60 }
 0x565   :  { %12385 = vmatpush1.bf16.msra.mxu0 %v5391_v6 }
 0x566   :  { %v4154_v17 = vpop.f32.mrb[28].mxu0  ;;  %12386 = vmatprep.subr.bf16.mxu0 %v28710_v12 }
 0x567   :  { %v19973_v29 = vpop.f32.mrb[29].mxu0  ;;  %v5142_v0 = vmax.f32 %v4154_v17, 0.0 }
 0x568   :  { %v4157_v39 = vpop.f32.mrb[30].mxu0 }
 0x569   :  { %v5143_v3 = vmax.f32 %v4157_v39, 0.0  ;;  %v19974_v25 = vpop.f32.mrb[31].mxu0 }
 0x56b   :  { %v5392_v48 = vpack.c.bf16 %v5143_v3, %v5142_v0  ;;  %20080 = vmatmul.mubr.msk.bf16.gmra.mrb[136].mxu0 %vm2608_vm2, %v23516_v55  ;;  %v23518_v3 = vld [vmem:[%s28615_s1 + $0x368] ss:$12 sps:$4 sm:$0xff]  }
 0x56c   :  { %20083 = vmatprep.mubr.msk.bf16.mxu0 %vm25283_vm1, %v28709_v60 }
 0x56d   :  { %12387 = vmatpush1.bf16.msra.mxu0 %v5392_v48 }
 0x56e   :  { %v4162_v35 = vpop.f32.mrb[32].mxu0  ;;  %12388 = vmatprep.subr.bf16.mxu0 %v28710_v12 }
 0x56f   :  { %v19977_v47 = vpop.f32.mrb[33].mxu0  ;;  %v5144_v29 = vmax.f32 %v4162_v35, 0.0 }
 0x570   :  { %v4165_v6 = vpop.f32.mrb[34].mxu0 }
 0x571   :  { %v5145_v17 = vmax.f32 %v4165_v6, 0.0  ;;  %v19978_v39 = vpop.f32.mrb[35].mxu0 }
 0x573   :  { %v5393_v25 = vpack.c.bf16 %v5145_v17, %v5144_v29  ;;  %20084 = vmatmul.mubr.msk.bf16.gmra.mrb[140].mxu0 %vm2608_vm2, %v23517_v21  ;;  %v23519_v17 = vld [vmem:[%s28615_s1 + $0x380] ss:$12 sps:$4 sm:$0xff]  }
 0x574   :  { %20087 = vmatprep.mubr.msk.bf16.mxu0 %vm25283_vm1, %v28709_v60 }
 0x575   :  { %12389 = vmatpush1.bf16.msra.mxu0 %v5393_v25 }
 0x576   :  { %v4170_v55 = vpop.f32.mrb[36].mxu0  ;;  %12390 = vmatprep.subr.bf16.mxu0 %v28710_v12 }
 0x577   :  { %v19981_v0 = vpop.f32.mrb[37].mxu0  ;;  %v5146_v47 = vmax.f32 %v4170_v55, 0.0 }
 0x578   :  { %v4173_v48 = vpop.f32.mrb[38].mxu0 }
 0x579   :  { %v5147_v35 = vmax.f32 %v4173_v48, 0.0  ;;  %v19982_v6 = vpop.f32.mrb[39].mxu0 }
 0x57b   :  { %v5394_v39 = vpack.c.bf16 %v5147_v35, %v5146_v47  ;;  %20088 = vmatmul.mubr.msk.bf16.gmra.mrb[144].mxu0 %vm2608_vm2, %v23518_v3  ;;  %v23520_v35 = vld [vmem:[%s28615_s1 + $0x398] ss:$12 sps:$4 sm:$0xff]  }
 0x57c   :  { %20091 = vmatprep.mubr.msk.bf16.mxu0 %vm25283_vm1, %v28709_v60 }
 0x57d   :  { %12391 = vmatpush1.bf16.msra.mxu0 %v5394_v39 }
 0x57e   :  { %v4178_v21 = vpop.f32.mrb[40].mxu0  ;;  %12392 = vmatprep.subr.bf16.mxu0 %v28710_v12 }
 0x57f   :  { %v19985_v29 = vpop.f32.mrb[41].mxu0  ;;  %v5148_v0 = vmax.f32 %v4178_v21, 0.0 }
 0x580   :  { %v4181_v25 = vpop.f32.mrb[42].mxu0 }
 0x581   :  { %v5149_v55 = vmax.f32 %v4181_v25, 0.0  ;;  %v19986_v48 = vpop.f32.mrb[43].mxu0 }
 0x583   :  { %v5395_v6 = vpack.c.bf16 %v5149_v55, %v5148_v0  ;;  %20092 = vmatmul.mubr.msk.bf16.gmra.mrb[0].mxu0 %vm2608_vm2, %v23519_v17  ;;  %v23521_v55 = vld [vmem:[%s28615_s1 + $0x3b0] ss:$12 sps:$4 sm:$0xff]  }
 0x584   :  { %20095 = vmatprep.mubr.msk.bf16.mxu0 %vm25283_vm1, %v28709_v60 }
 0x585   :  { %12393 = vmatpush1.bf16.msra.mxu0 %v5395_v6 }
 0x586   :  { %v4186_v3 = vpop.f32.mrb[44].mxu0  ;;  %12394 = vmatprep.subr.bf16.mxu0 %v28710_v12 }
 0x587   :  { %v19989_v47 = vpop.f32.mrb[45].mxu0  ;;  %v5150_v29 = vmax.f32 %v4186_v3, 0.0 }
 0x588   :  { %v4189_v39 = vpop.f32.mrb[46].mxu0 }
 0x589   :  { %v5151_v21 = vmax.f32 %v4189_v39, 0.0  ;;  %v19990_v25 = vpop.f32.mrb[47].mxu0 }
 0x58b   :  { %v5396_v48 = vpack.c.bf16 %v5151_v21, %v5150_v29  ;;  %20096 = vmatmul.mubr.msk.bf16.gmra.mrb[4].mxu0 %vm2608_vm2, %v23520_v35  ;;  %v23522_v21 = vld [vmem:[%s28615_s1 + $0x3c8] ss:$12 sps:$4 sm:$0xff]  }
 0x58c   :  { %20099 = vmatprep.mubr.msk.bf16.mxu0 %vm25283_vm1, %v28709_v60 }
 0x58d   :  { %12395 = vmatpush1.bf16.msra.mxu0 %v5396_v48 }
 0x58e   :  { %v4194_v17 = vpop.f32.mrb[48].mxu0  ;;  %12396 = vmatprep.subr.bf16.mxu0 %v28710_v12 }
 0x58f   :  { %v19993_v0 = vpop.f32.mrb[49].mxu0  ;;  %v5152_v47 = vmax.f32 %v4194_v17, 0.0 }
 0x590   :  { %v4197_v6 = vpop.f32.mrb[50].mxu0 }
 0x591   :  { %v5153_v3 = vmax.f32 %v4197_v6, 0.0  ;;  %v19994_v39 = vpop.f32.mrb[51].mxu0 }
 0x593   :  { %v5397_v25 = vpack.c.bf16 %v5153_v3, %v5152_v47  ;;  %20100 = vmatmul.mubr.msk.bf16.gmra.mrb[8].mxu0 %vm2608_vm2, %v23521_v55  ;;  %v23523_v3 = vld [vmem:[%s28615_s1 + $0x3e0] ss:$12 sps:$4 sm:$0xff]  }
 0x594   :  { %20103 = vmatprep.mubr.msk.bf16.mxu0 %vm25283_vm1, %v28709_v60 }
 0x595   :  { %12397 = vmatpush1.bf16.msra.mxu0 %v5397_v25 }
 0x596   :  { %v4202_v35 = vpop.f32.mrb[52].mxu0  ;;  %12398 = vmatprep.subr.bf16.mxu0 %v28710_v12 }
 0x597   :  { %v19997_v29 = vpop.f32.mrb[53].mxu0  ;;  %v5154_v0 = vmax.f32 %v4202_v35, 0.0 }
 0x598   :  { %v4205_v48 = vpop.f32.mrb[54].mxu0 }
 0x599   :  { %v5155_v17 = vmax.f32 %v4205_v48, 0.0  ;;  %v19998_v6 = vpop.f32.mrb[55].mxu0 }
 0x59b   :  { %v5398_v39 = vpack.c.bf16 %v5155_v17, %v5154_v0  ;;  %20104 = vmatmul.mubr.msk.bf16.gmra.mrb[12].mxu0 %vm2608_vm2, %v23522_v21  ;;  %v23524_v17 = vld [vmem:[%s28615_s1 + $0x3f8] ss:$12 sps:$4 sm:$0xff]  }
 0x59c   :  { %20107 = vmatprep.mubr.msk.bf16.mxu0 %vm25283_vm1, %v28709_v60 }
 0x59d   :  { %12399 = vmatpush1.bf16.msra.mxu0 %v5398_v39 }
 0x59e   :  { %v4210_v55 = vpop.f32.mrb[56].mxu0  ;;  %12400 = vmatprep.subr.bf16.mxu0 %v28710_v12 }
 0x59f   :  { %v20001_v47 = vpop.f32.mrb[57].mxu0  ;;  %v5156_v29 = vmax.f32 %v4210_v55, 0.0 }
 0x5a0   :  { %v4213_v25 = vpop.f32.mrb[58].mxu0 }
 0x5a1   :  { %v5157_v35 = vmax.f32 %v4213_v25, 0.0  ;;  %v20002_v48 = vpop.f32.mrb[59].mxu0 }
 0x5a3   :  { %v5399_v6 = vpack.c.bf16 %v5157_v35, %v5156_v29  ;;  %20108 = vmatmul.mubr.msk.bf16.gmra.mrb[16].mxu0 %vm2608_vm2, %v23523_v3  ;;  %v23525_v35 = vld [vmem:[%s28615_s1 + $0x410] ss:$12 sps:$4 sm:$0xff]  }
 0x5a4   :  { %20111 = vmatprep.mubr.msk.bf16.mxu0 %vm25283_vm1, %v28709_v60 }
 0x5a5   :  { %12401 = vmatpush1.bf16.msra.mxu0 %v5399_v6 }
 0x5a6   :  { %v4218_v21 = vpop.f32.mrb[60].mxu0  ;;  %12402 = vmatprep.subr.bf16.mxu0 %v28710_v12 }
 0x5a7   :  { %v20005_v0 = vpop.f32.mrb[61].mxu0  ;;  %v5158_v47 = vmax.f32 %v4218_v21, 0.0 }
 0x5a8   :  { %v4221_v39 = vpop.f32.mrb[62].mxu0 }
 0x5a9   :  { %v5159_v55 = vmax.f32 %v4221_v39, 0.0  ;;  %v20006_v25 = vpop.f32.mrb[63].mxu0 }
 0x5ab   :  { %v5400_v48 = vpack.c.bf16 %v5159_v55, %v5158_v47  ;;  %20112 = vmatmul.mubr.msk.bf16.gmra.mrb[20].mxu0 %vm2608_vm2, %v23524_v17  ;;  %v23526_v55 = vld [vmem:[%s28615_s1 + $0x428] ss:$12 sps:$4 sm:$0xff]  }
 0x5ac   :  { %20115 = vmatprep.mubr.msk.bf16.mxu0 %vm25283_vm1, %v28709_v60 }
 0x5ad   :  { %12403 = vmatpush1.bf16.msra.mxu0 %v5400_v48 }
 0x5ae   :  { %v4226_v3 = vpop.f32.mrb[64].mxu0  ;;  %12924 = vmatprep.subr.bf16.mxu0 %v28710_v12 }
 0x5af   :  { %v20009_v29 = vpop.f32.mrb[65].mxu0  ;;  %v5160_v0 = vmax.f32 %v4226_v3, 0.0 }
 0x5b0   :  { %v4229_v6 = vpop.f32.mrb[66].mxu0 }
 0x5b1   :  { %v5161_v21 = vmax.f32 %v4229_v6, 0.0  ;;  %v20010_v39 = vpop.f32.mrb[67].mxu0 }
 0x5b3   :  { %v26702_v25 = vpack.c.bf16 %v5161_v21, %v5160_v0  ;;  %20116 = vmatmul.mubr.msk.bf16.gmra.mrb[24].mxu0 %vm2608_vm2, %v23525_v35  ;;  %v23527_v0 = vld [vmem:[%s28615_s1 + $0x440] ss:$12 sps:$4 sm:$0xff]  }
 0x5b4   :  { %20119 = vmatprep.mubr.msk.bf16.mxu0 %vm25283_vm1, %v28709_v60 }
 0x5b5   :  { %28711 = vst [vmem:[#allocation87_spill] sm:$0xff] %v26702_v25 }
 0x5b6   :  { %v4234_v17 = vpop.f32.mrb[68].mxu0 }
 0x5b7   :  { %v20013_v47 = vpop.f32.mrb[69].mxu0  ;;  %v5162_v29 = vmax.f32 %v4234_v17, 0.0 }
 0x5b8   :  { %v4237_v48 = vpop.f32.mrb[70].mxu0 }
 0x5b9   :  { %v5163_v20 = vmax.f32 %v4237_v48, 0.0  ;;  %v20014_v10 = vpop.f32.mrb[71].mxu0 }
 0x5bb   :  { %v26710_v3 = vpack.c.bf16 %v5163_v20, %v5162_v29  ;;  %20120 = vmatmul.mubr.msk.bf16.gmra.mrb[28].mxu0 %vm2608_vm2, %v23526_v55  ;;  %v23528_v55 = vld [vmem:[%s28615_s1 + $0x458] ss:$12 sps:$4 sm:$0xff]  }
 0x5bc   :  { %20123 = vmatprep.mubr.msk.bf16.mxu0 %vm25283_vm1, %v28709_v60 }
 0x5bd   :  { %28712 = vst [vmem:[#allocation88_spill] sm:$0xff] %v26710_v3 }
 0x5be   :  { %v4242_v35 = vpop.f32.mrb[72].mxu0 }
 0x5bf   :  { %v20017_v6 = vpop.f32.mrb[73].mxu0  ;;  %v5164_v39 = vmax.f32 %v4242_v35, 0.0 }
 0x5c0   :  { %v4245_v21 = vpop.f32.mrb[74].mxu0 }
 0x5c1   :  { %v5165_v47 = vmax.f32 %v4245_v21, 0.0  ;;  %v20018_v25 = vpop.f32.mrb[75].mxu0  ;;  %v23529_v21 = vld [vmem:[%s28615_s1 + $0x470] ss:$12 sps:$4 sm:$0xff]  }
 0x5c3   :  { %v26718_v17 = vpack.c.bf16 %v5165_v47, %v5164_v39  ;;  %20124 = vmatmul.mubr.msk.bf16.gmra.mrb[32].mxu0 %vm2608_vm2, %v23527_v0 }
 0x5c4   :  { %20127 = vmatprep.mubr.msk.bf16.mxu0 %vm25283_vm1, %v28709_v60 }
 0x5c5   :  { %28713 = vst [vmem:[#allocation89_spill] sm:$0xff] %v26718_v17 }
 0x5c6   :  { %v4250_v10 = vpop.f32.mrb[76].mxu0 }
 0x5c7   :  { %v20021_v20 = vpop.f32.mrb[77].mxu0  ;;  %v5166_v29 = vmax.f32 %v4250_v10, 0.0 }
 0x5c8   :  { %v4253_v48 = vpop.f32.mrb[78].mxu0 }
 0x5c9   :  { %v5167_v6 = vmax.f32 %v4253_v48, 0.0  ;;  %v20022_v3 = vpop.f32.mrb[79].mxu0  ;;  %v23530_v48 = vld [vmem:[%s28615_s1 + $0x488] ss:$12 sps:$4 sm:$0xff]  }
 0x5cb   :  { %v26726_v35 = vpack.c.bf16 %v5167_v6, %v5166_v29  ;;  %20128 = vmatmul.mubr.msk.bf16.gmra.mrb[36].mxu0 %vm2608_vm2, %v23528_v55 }
 0x5cc   :  { %20131 = vmatprep.mubr.msk.bf16.mxu0 %vm25283_vm1, %v28709_v60 }
 0x5cd   :  { %28714 = vst [vmem:[#allocation90_spill] sm:$0xff] %v26726_v35 }
 0x5ce   :  { %v4258_v25 = vpop.f32.mrb[80].mxu0 }
 0x5cf   :  { %v20025_v0 = vpop.f32.mrb[81].mxu0  ;;  %v5168_v47 = vmax.f32 %v4258_v25, 0.0 }
 0x5d0   :  { %v4261_v39 = vpop.f32.mrb[82].mxu0 }
 0x5d1   :  { %v5169_v20 = vmax.f32 %v4261_v39, 0.0  ;;  %v20026_v17 = vpop.f32.mrb[83].mxu0  ;;  %v23531_v39 = vld [vmem:[%s28615_s1 + $0x4a0] ss:$12 sps:$4 sm:$0xff]  }
 0x5d3   :  { %v26734_v10 = vpack.c.bf16 %v5169_v20, %v5168_v47  ;;  %20132 = vmatmul.mubr.msk.bf16.gmra.mrb[40].mxu0 %vm2608_vm2, %v23529_v21 }
 0x5d4   :  { %20135 = vmatprep.mubr.msk.bf16.mxu0 %vm25283_vm1, %v28709_v60 }
 0x5d5   :  { %28715 = vst [vmem:[#allocation91_spill] sm:$0xff] %v26734_v10 }
 0x5d6   :  { %v4266_v3 = vpop.f32.mrb[84].mxu0 }
 0x5d7   :  { %v20029_v55 = vpop.f32.mrb[85].mxu0  ;;  %v5170_v6 = vmax.f32 %v4266_v3, 0.0 }
 0x5d8   :  { %v4269_v29 = vpop.f32.mrb[86].mxu0 }
 0x5d9   :  { %v5171_v0 = vmax.f32 %v4269_v29, 0.0  ;;  %v20030_v35 = vpop.f32.mrb[87].mxu0  ;;  %v23532_v29 = vld [vmem:[%s28615_s1 + $0x4b8] ss:$12 sps:$4 sm:$0xff]  }
 0x5db   :  { %v26742_v25 = vpack.c.bf16 %v5171_v0, %v5170_v6  ;;  %20136 = vmatmul.mubr.msk.bf16.gmra.mrb[44].mxu0 %vm2608_vm2, %v23530_v48 }
 0x5dc   :  { %20139 = vmatprep.mubr.msk.bf16.mxu0 %vm25283_vm1, %v28709_v60 }
 0x5dd   :  { %28716 = vst [vmem:[#allocation92_spill] sm:$0xff] %v26742_v25 }
 0x5de   :  { %v4274_v17 = vpop.f32.mrb[88].mxu0 }
 0x5df   :  { %v20033_v21 = vpop.f32.mrb[89].mxu0  ;;  %v5172_v20 = vmax.f32 %v4274_v17, 0.0 }
 0x5e0   :  { %v4277_v47 = vpop.f32.mrb[90].mxu0 }
 0x5e1   :  { %v5173_v55 = vmax.f32 %v4277_v47, 0.0  ;;  %v20034_v10 = vpop.f32.mrb[91].mxu0  ;;  %v23533_v47 = vld [vmem:[%s28615_s1 + $0x4d0] ss:$12 sps:$4 sm:$0xff]  }
 0x5e3   :  { %v26750_v3 = vpack.c.bf16 %v5173_v55, %v5172_v20  ;;  %20140 = vmatmul.mubr.msk.bf16.gmra.mrb[48].mxu0 %vm2608_vm2, %v23531_v39 }
 0x5e4   :  { %20143 = vmatprep.mubr.msk.bf16.mxu0 %vm25283_vm1, %v28709_v60 }
 0x5e5   :  { %28717 = vst [vmem:[#allocation93_spill] sm:$0xff] %v26750_v3 }
 0x5e6   :  { %v4282_v35 = vpop.f32.mrb[92].mxu0 }
 0x5e7   :  { %v20037_v48 = vpop.f32.mrb[93].mxu0  ;;  %v5174_v0 = vmax.f32 %v4282_v35, 0.0 }
 0x5e8   :  { %v4285_v6 = vpop.f32.mrb[94].mxu0 }
 0x5e9   :  { %v5175_v21 = vmax.f32 %v4285_v6, 0.0  ;;  %v20038_v25 = vpop.f32.mrb[95].mxu0  ;;  %v23534_v6 = vld [vmem:[%s28615_s1 + $0x4e8] ss:$12 sps:$4 sm:$0xff]  }
 0x5eb   :  { %v26758_v17 = vpack.c.bf16 %v5175_v21, %v5174_v0  ;;  %20144 = vmatmul.mubr.msk.bf16.gmra.mrb[52].mxu0 %vm2608_vm2, %v23532_v29 }
 0x5ec   :  { %20147 = vmatprep.mubr.msk.bf16.mxu0 %vm25283_vm1, %v28709_v60 }
 0x5ed   :  { %28718 = vst [vmem:[#allocation94_spill] sm:$0xff] %v26758_v17 }
 0x5ee   :  { %v4290_v10 = vpop.f32.mrb[96].mxu0 }
 0x5ef   :  { %v20041_v39 = vpop.f32.mrb[97].mxu0  ;;  %v5176_v55 = vmax.f32 %v4290_v10, 0.0 }
 0x5f0   :  { %v4293_v20 = vpop.f32.mrb[98].mxu0 }
 0x5f1   :  { %v5177_v48 = vmax.f32 %v4293_v20, 0.0  ;;  %v20042_v3 = vpop.f32.mrb[99].mxu0  ;;  %v23535_v20 = vld [vmem:[%s28615_s1 + $0x500] ss:$12 sps:$4 sm:$0xff]  }
 0x5f3   :  { %v26766_v35 = vpack.c.bf16 %v5177_v48, %v5176_v55  ;;  %20148 = vmatmul.mubr.msk.bf16.gmra.mrb[56].mxu0 %vm2608_vm2, %v23533_v47 }
 0x5f4   :  { %20151 = vmatprep.mubr.msk.bf16.mxu0 %vm25283_vm1, %v28709_v60 }
 0x5f5   :  { %28719 = vst [vmem:[#allocation95_spill] sm:$0xff] %v26766_v35 }
 0x5f6   :  { %v4298_v25 = vpop.f32.mrb[100].mxu0 }
 0x5f7   :  { %v20045_v29 = vpop.f32.mrb[101].mxu0  ;;  %v5178_v21 = vmax.f32 %v4298_v25, 0.0 }
 0x5f8   :  { %v4301_v0 = vpop.f32.mrb[102].mxu0 }
 0x5f9   :  { %v5179_v39 = vmax.f32 %v4301_v0, 0.0  ;;  %v20046_v17 = vpop.f32.mrb[103].mxu0  ;;  %v23536_v0 = vld [vmem:[%s28615_s1 + $0x518] ss:$12 sps:$4 sm:$0xff]  }
 0x5fb   :  { %v26774_v10 = vpack.c.bf16 %v5179_v39, %v5178_v21  ;;  %20152 = vmatmul.mubr.msk.bf16.gmra.mrb[60].mxu0 %vm2608_vm2, %v23534_v6 }
 0x5fc   :  { %20155 = vmatprep.mubr.msk.bf16.mxu0 %vm25283_vm1, %v28709_v60 }
 0x5fd   :  { %28720 = vst [vmem:[#allocation96_spill] sm:$0xff] %v26774_v10 }
 0x5fe   :  { %v4306_v3 = vpop.f32.mrb[104].mxu0 }
 0x5ff   :  { %v20049_v47 = vpop.f32.mrb[105].mxu0  ;;  %v5180_v48 = vmax.f32 %v4306_v3, 0.0 }
 0x600   :  { %v4309_v55 = vpop.f32.mrb[106].mxu0 }
 0x601   :  { %v5181_v29 = vmax.f32 %v4309_v55, 0.0  ;;  %v20050_v35 = vpop.f32.mrb[107].mxu0  ;;  %v23537_v55 = vld [vmem:[%s28615_s1 + $0x530] ss:$12 sps:$4 sm:$0xff]  }
 0x603   :  { %v26782_v25 = vpack.c.bf16 %v5181_v29, %v5180_v48  ;;  %20156 = vmatmul.mubr.msk.bf16.gmra.mrb[64].mxu0 %vm2608_vm2, %v23535_v20 }
 0x604   :  { %20159 = vmatprep.mubr.msk.bf16.mxu0 %vm25283_vm1, %v28709_v60 }
 0x605   :  { %28721 = vst [vmem:[#allocation97_spill] sm:$0xff] %v26782_v25 }
 0x606   :  { %v4314_v17 = vpop.f32.mrb[108].mxu0 }
 0x607   :  { %v20053_v6 = vpop.f32.mrb[109].mxu0  ;;  %v5182_v39 = vmax.f32 %v4314_v17, 0.0 }
 0x608   :  { %v4317_v21 = vpop.f32.mrb[110].mxu0 }
 0x609   :  { %v5183_v47 = vmax.f32 %v4317_v21, 0.0  ;;  %v20054_v10 = vpop.f32.mrb[111].mxu0  ;;  %v23538_v21 = vld [vmem:[%s28615_s1 + $0x548] ss:$12 sps:$4 sm:$0xff]  }
 0x60b   :  { %v26790_v3 = vpack.c.bf16 %v5183_v47, %v5182_v39  ;;  %20160 = vmatmul.mubr.msk.bf16.gmra.mrb[68].mxu0 %vm2608_vm2, %v23536_v0 }
 0x60c   :  { %20163 = vmatprep.mubr.msk.bf16.mxu0 %vm25283_vm1, %v28709_v60 }
 0x60d   :  { %28722 = vst [vmem:[#allocation98_spill] sm:$0xff] %v26790_v3 }
 0x60e   :  { %v4322_v35 = vpop.f32.mrb[112].mxu0 }
 0x60f   :  { %v20057_v20 = vpop.f32.mrb[113].mxu0  ;;  %v5184_v29 = vmax.f32 %v4322_v35, 0.0 }
 0x610   :  { %v4325_v48 = vpop.f32.mrb[114].mxu0 }
 0x611   :  { %v5185_v6 = vmax.f32 %v4325_v48, 0.0  ;;  %v20058_v25 = vpop.f32.mrb[115].mxu0  ;;  %v23539_v48 = vld [vmem:[%s28615_s1 + $0x560] ss:$12 sps:$4 sm:$0xff]  }
 0x613   :  { %v26798_v17 = vpack.c.bf16 %v5185_v6, %v5184_v29  ;;  %20164 = vmatmul.mubr.msk.bf16.gmra.mrb[72].mxu0 %vm2608_vm2, %v23537_v55 }
 0x614   :  { %20167 = vmatprep.mubr.msk.bf16.mxu0 %vm25283_vm1, %v28709_v60 }
 0x615   :  { %28723 = vst [vmem:[#allocation99_spill] sm:$0xff] %v26798_v17 }
 0x616   :  { %v4330_v10 = vpop.f32.mrb[116].mxu0 }
 0x617   :  { %v20061_v0 = vpop.f32.mrb[117].mxu0  ;;  %v5186_v47 = vmax.f32 %v4330_v10, 0.0 }
 0x618   :  { %v4333_v39 = vpop.f32.mrb[118].mxu0 }
 0x619   :  { %v5187_v20 = vmax.f32 %v4333_v39, 0.0  ;;  %v20062_v3 = vpop.f32.mrb[119].mxu0  ;;  %v23540_v39 = vld [vmem:[%s28615_s1 + $0x578] ss:$12 sps:$4 sm:$0xff]  }
 0x61b   :  { %v26806_v35 = vpack.c.bf16 %v5187_v20, %v5186_v47  ;;  %20168 = vmatmul.mubr.msk.bf16.gmra.mrb[76].mxu0 %vm2608_vm2, %v23538_v21 }
 0x61c   :  { %20171 = vmatprep.mubr.msk.bf16.mxu0 %vm25283_vm1, %v28709_v60 }
 0x61d   :  { %28724 = vst [vmem:[#allocation100_spill] sm:$0xff] %v26806_v35 }
 0x61e   :  { %v4338_v25 = vpop.f32.mrb[120].mxu0 }
 0x61f   :  { %v20065_v55 = vpop.f32.mrb[121].mxu0  ;;  %v5188_v6 = vmax.f32 %v4338_v25, 0.0 }
 0x620   :  { %v4341_v29 = vpop.f32.mrb[122].mxu0 }
 0x621   :  { %v5189_v0 = vmax.f32 %v4341_v29, 0.0  ;;  %v20066_v17 = vpop.f32.mrb[123].mxu0  ;;  %v23541_v29 = vld [vmem:[%s28615_s1 + $0x590] ss:$12 sps:$4 sm:$0xff]  }
 0x623   :  { %v26814_v10 = vpack.c.bf16 %v5189_v0, %v5188_v6  ;;  %20172 = vmatmul.mubr.msk.bf16.gmra.mrb[80].mxu0 %vm2608_vm2, %v23539_v48  ;;  %v23559_v6 = vld [vmem:[#allocation2 + $0xde4] ss:$68 sps:$4 sm:$0xff]  }
 0x624   :  { %20175 = vmatprep.mubr.msk.bf16.mxu0 %vm25283_vm1, %v28709_v60  ;;  %13716 = vmatprep.mubr.bf16.mxu1 %v23559_v6 }
 0x625   :  { %28725 = vst [vmem:[#allocation101_spill] sm:$0xff] %v26814_v10 }
 0x626   :  { %v4346_v3 = vpop.f32.mrb[124].mxu0 }
 0x627   :  { %v20069_v21 = vpop.f32.mrb[125].mxu0  ;;  %v5190_v20 = vmax.f32 %v4346_v3, 0.0 }
 0x628   :  { %v4349_v47 = vpop.f32.mrb[126].mxu0 }
 0x629   :  { %v5191_v55 = vmax.f32 %v4349_v47, 0.0  ;;  %v20070_v35 = vpop.f32.mrb[127].mxu0 }
 0x62b   :  { %v26822_v25 = vpack.c.bf16 %v5191_v55, %v5190_v20  ;;  %20176 = vmatmul.mubr.msk.bf16.gmra.mrb[84].mxu0 %vm2608_vm2, %v23540_v39  ;;  %v23542_v20 = vld [vmem:[%s28615_s1 + $0x5a8] ss:$12 sps:$4 sm:$0xff]  }
 0x62c   :  { %20179 = vmatprep.mubr.msk.bf16.mxu0 %vm25283_vm1, %v28709_v60 }
 0x62e   :  { %v4354_v17 = vpop.f32.mrb[128].mxu0 }
 0x62f   :  { %v20073_v48 = vpop.f32.mrb[129].mxu0  ;;  %v5192_v10 = vmax.f32 %v4354_v17, 0.0 }
 0x630   :  { %v4357_v0 = vpop.f32.mrb[130].mxu0 }
 0x631   :  { %v20074_v21 = vpop.f32.mrb[131].mxu0  ;;  %v5193_v3 = vmax.f32 %v4357_v0, 0.0 }
 0x632   :  { %v23543_v21 = vld [vmem:[%s28615_s1 + $0x5c0] ss:$12 sps:$4 sm:$0xff]  }
 0x633   :  { %20180 = vmatmul.mubr.msk.bf16.gmra.mrb[88].mxu0 %vm2608_vm2, %v23541_v29  ;;  %v26831_v35 = vpack.c.bf16 %v5193_v3, %v5192_v10 }
 0x634   :  { %20183 = vmatprep.mubr.msk.bf16.mxu0 %vm25283_vm1, %v28709_v60 }
 0x635   :  { %20743 = vmatpush1.bf16.msra.mxu1 %v26831_v35 }
 0x636   :  { %v4362_v39 = vpop.f32.mrb[132].mxu0  ;;  %20728 = vmatprep.subr.bf16.mxu1 %v28710_v12 }
 0x637   :  { %v20077_v47 = vpop.f32.mrb[133].mxu0  ;;  %v5194_v17 = vmax.f32 %v4362_v39, 0.0 }
 0x638   :  { %v4365_v55 = vpop.f32.mrb[134].mxu0 }
 0x639   :  { %v5195_v48 = vmax.f32 %v4365_v55, 0.0  ;;  %v20078_v6 = vpop.f32.mrb[135].mxu0 }
 0x63a   :  { %v23544_v6 = vld [vmem:[%s28615_s1 + $0x5d8] ss:$12 sps:$4 sm:$0xff]  }
 0x63b   :  { %20184 = vmatmul.mubr.msk.bf16.gmra.mrb[92].mxu0 %vm2608_vm2, %v23542_v20  ;;  %v26841_v10 = vpack.c.bf16 %v5195_v48, %v5194_v17 }
 0x63c   :  { %20187 = vmatprep.mubr.msk.bf16.mxu0 %vm25283_vm1, %v28709_v60 }
 0x63d   :  { %20744 = vmatpush1.bf16.msra.mxu1 %v26841_v10 }
 0x63e   :  { %v4370_v29 = vpop.f32.mrb[136].mxu0  ;;  %20729 = vmatprep.subr.bf16.mxu1 %v28710_v12 }
 0x63f   :  { %v20081_v0 = vpop.f32.mrb[137].mxu0  ;;  %v5196_v39 = vmax.f32 %v4370_v29, 0.0 }
 0x640   :  { %v4373_v3 = vpop.f32.mrb[138].mxu0 }
 0x641   :  { %v5197_v47 = vmax.f32 %v4373_v3, 0.0  ;;  %v20082_v55 = vpop.f32.mrb[139].mxu0 }
 0x643   :  { %20188 = vmatmul.mubr.msk.bf16.gmra.mrb[96].mxu0 %vm2608_vm2, %v23543_v21  ;;  %v26851_v20 = vpack.c.bf16 %v5197_v47, %v5196_v39 }
 0x644   :  { %20191 = vmatprep.mubr.msk.bf16.mxu0 %vm25283_vm1, %v28709_v60 }
 0x645   :  { %28726 = vst [vmem:[#allocation102_spill] sm:$0xff] %v26851_v20  ;;  %20745 = vmatpush1.bf16.msra.mxu1 %v26851_v20 }
 0x646   :  { %v4378_v17 = vpop.f32.mrb[140].mxu0  ;;  %20730 = vmatprep.subr.bf16.mxu1 %v28710_v12 }
 0x647   :  { %v20085_v48 = vpop.f32.mrb[141].mxu0  ;;  %v5198_v0 = vmax.f32 %v4378_v17, 0.0 }
 0x648   :  { %v4381_v29 = vpop.f32.mrb[142].mxu0  ;;  %v23545_v48 = vld [vmem:[%s28615_s1 + $0x5f0] ss:$12 sps:$4 sm:$0xff]  }
 0x649   :  { %v5199_v3 = vmax.f32 %v4381_v29, 0.0  ;;  %v20086_v55 = vpop.f32.mrb[143].mxu0 }
 0x64b   :  { %20192 = vmatmul.mubr.msk.bf16.gmra.mrb[100].mxu0 %vm2608_vm2, %v23544_v6  ;;  %v26861_v21 = vpack.c.bf16 %v5199_v3, %v5198_v0 }
 0x64c   :  { %20195 = vmatprep.mubr.msk.bf16.mxu0 %vm25283_vm1, %v28709_v60 }
 0x64d   :  { %28727 = vst [vmem:[#allocation103_spill] sm:$0xff] %v26861_v21  ;;  %20746 = vmatpush1.bf16.msra.mxu1 %v26861_v21 }
 0x64e   :  { %v4386_v39 = vpop.f32.mrb[144].mxu0  ;;  %20731 = vmatprep.subr.bf16.mxu1 %v28710_v12 }
 0x64f   :  { %v20089_v47 = vpop.f32.mrb[145].mxu0  ;;  %v5200_v29 = vmax.f32 %v4386_v39, 0.0  ;;  %v23546_v39 = vld [vmem:[%s28615_s1 + $0x608] ss:$12 sps:$4 sm:$0xff]  }
 0x650   :  { %v4389_v17 = vpop.f32.mrb[146].mxu0 }
 0x651   :  { %v5201_v55 = vmax.f32 %v4389_v17, 0.0  ;;  %v20090_v20 = vpop.f32.mrb[147].mxu0 }
 0x653   :  { %20196 = vmatmul.mubr.msk.bf16.gmra.mrb[104].mxu0 %vm2608_vm2, %v23545_v48  ;;  %v26871_v6 = vpack.c.bf16 %v5201_v55, %v5200_v29 }
 0x654   :  { %20199 = vmatprep.mubr.msk.bf16.mxu0 %vm25283_vm1, %v28709_v60 }
 0x655   :  { %28728 = vst [vmem:[#allocation104_spill] sm:$0xff] %v26871_v6  ;;  %20747 = vmatpush1.bf16.msra.mxu1 %v26871_v6 }
 0x656   :  { %v4394_v0 = vpop.f32.mrb[0].mxu0  ;;  %20732 = vmatprep.subr.bf16.mxu1 %v28710_v12 }
 0x657   :  { %v4395_v3 = vadd.f32 %v4394_v0, %v25782_v26  ;;  %v20093_v47 = vpop.f32.mrb[1].mxu0 }
 0x658   :  { %v4397_v20 = vpop.f32.mrb[2].mxu0 }
 0x659   :  { %v4398_v48 = vadd.f32 %v4397_v20, %v25784_v28  ;;  %v20094_v17 = vpop.f32.mrb[3].mxu0  ;;  %v5202_v29 = vmax.f32 %v4395_v3, 0.0  ;;  %v23547_v28 = vld [vmem:[%s28615_s1 + $0x620] ss:$12 sps:$4 sm:$0xff]  }
 0x65b   :  { %v5203_v55 = vmax.f32 %v4398_v48, 0.0  ;;  %20200 = vmatmul.mubr.msk.bf16.gmra.mrb[108].mxu0 %vm2608_vm2, %v23546_v39 }
 0x65c   :  { %20203 = vmatprep.mubr.msk.bf16.mxu0 %vm25283_vm1, %v28709_v60 }
 0x65d   :  { %v26885_v6 = vpack.c.bf16 %v5203_v55, %v5202_v29 }
 0x65e   :  { %v4402_v21 = vpop.f32.mrb[4].mxu0 }
 0x65f   :  { %v4403_v26 = vadd.f32 %v4402_v21, %v25792_v32  ;;  %v20097_v0 = vpop.f32.mrb[5].mxu0  ;;  %20748 = vmatpush1.bf16.msra.mxu1 %v26885_v6 }
 0x660   :  { %v4405_v47 = vpop.f32.mrb[6].mxu0  ;;  %20733 = vmatprep.subr.bf16.mxu1 %v28710_v12 }
 0x661   :  { %v4406_v3 = vadd.f32 %v4405_v47, %v25794_v34  ;;  %v20098_v39 = vpop.f32.mrb[7].mxu0  ;;  %v5204_v20 = vmax.f32 %v4403_v26, 0.0  ;;  %v23548_v34 = vld [vmem:[%s28615_s1 + $0x638] ss:$12 sps:$4 sm:$0xff]  }
 0x663   :  { %v5205_v48 = vmax.f32 %v4406_v3, 0.0  ;;  %20204 = vmatmul.mubr.msk.bf16.gmra.mrb[112].mxu0 %vm2608_vm2, %v23547_v28 }
 0x664   :  { %20207 = vmatprep.mubr.msk.bf16.mxu0 %vm25283_vm1, %v28709_v60 }
 0x665   :  { %v26897_v32 = vpack.c.bf16 %v5205_v48, %v5204_v20 }
 0x666   :  { %v4410_v21 = vpop.f32.mrb[8].mxu0 }
 0x667   :  { %v4411_v17 = vadd.f32 %v4410_v21, %v25802_v38  ;;  %v20101_v29 = vpop.f32.mrb[9].mxu0  ;;  %20749 = vmatpush1.bf16.msra.mxu1 %v26897_v32 }
 0x668   :  { %v4413_v55 = vpop.f32.mrb[10].mxu0  ;;  %20734 = vmatprep.subr.bf16.mxu1 %v28710_v12 }
 0x669   :  { %v4414_v26 = vadd.f32 %v4413_v55, %v25804_v40  ;;  %v20102_v0 = vpop.f32.mrb[11].mxu0  ;;  %v5206_v28 = vmax.f32 %v4411_v17, 0.0  ;;  %v23549_v40 = vld [vmem:[%s28615_s1 + $0x650] ss:$12 sps:$4 sm:$0xff]  }
 0x66b   :  { %v5207_v47 = vmax.f32 %v4414_v26, 0.0  ;;  %20208 = vmatmul.mubr.msk.bf16.gmra.mrb[116].mxu0 %vm2608_vm2, %v23548_v34 }
 0x66c   :  { %20211 = vmatprep.mubr.msk.bf16.mxu0 %vm25283_vm1, %v28709_v60 }
 0x66d   :  { %v26909_v38 = vpack.c.bf16 %v5207_v47, %v5206_v28 }
 0x66e   :  { %v4418_v3 = vpop.f32.mrb[12].mxu0 }
 0x66f   :  { %v4419_v39 = vadd.f32 %v4418_v3, %v25812_v44  ;;  %v20105_v20 = vpop.f32.mrb[13].mxu0  ;;  %20750 = vmatpush1.bf16.msra.mxu1 %v26909_v38 }
 0x670   :  { %v4421_v48 = vpop.f32.mrb[14].mxu0  ;;  %20735 = vmatprep.subr.bf16.mxu1 %v28710_v12 }
 0x671   :  { %v4422_v21 = vadd.f32 %v4421_v48, %v25814_v46  ;;  %v20106_v17 = vpop.f32.mrb[15].mxu0  ;;  %v5208_v29 = vmax.f32 %v4419_v39, 0.0  ;;  %v23550_v46 = vld [vmem:[%s28615_s1 + $0x668] ss:$12 sps:$4 sm:$0xff]  }
 0x673   :  { %v5209_v34 = vmax.f32 %v4422_v21, 0.0  ;;  %20212 = vmatmul.mubr.msk.bf16.gmra.mrb[120].mxu0 %vm2608_vm2, %v23549_v40 }
 0x674   :  { %20215 = vmatprep.mubr.msk.bf16.mxu0 %vm25283_vm1, %v28709_v60 }
 0x675   :  { %v26921_v44 = vpack.c.bf16 %v5209_v34, %v5208_v29 }
 0x676   :  { %v4426_v55 = vpop.f32.mrb[16].mxu0 }
 0x677   :  { %v4427_v26 = vadd.f32 %v4426_v55, %v25822_v50  ;;  %v20109_v0 = vpop.f32.mrb[17].mxu0  ;;  %20751 = vmatpush1.bf16.msra.mxu1 %v26921_v44 }
 0x678   :  { %v4429_v28 = vpop.f32.mrb[18].mxu0  ;;  %20736 = vmatprep.subr.bf16.mxu1 %v28710_v12 }
 0x679   :  { %v4430_v47 = vadd.f32 %v4429_v28, %v25824_v52  ;;  %v20110_v3 = vpop.f32.mrb[19].mxu0  ;;  %v5210_v39 = vmax.f32 %v4427_v26, 0.0  ;;  %v23551_v52 = vld [vmem:[%s28615_s1 + $0x680] ss:$12 sps:$4 sm:$0xff]  }
 0x67b   :  { %v5211_v20 = vmax.f32 %v4430_v47, 0.0  ;;  %20216 = vmatmul.mubr.msk.bf16.gmra.mrb[124].mxu0 %vm2608_vm2, %v23550_v46 }
 0x67c   :  { %20219 = vmatprep.mubr.msk.bf16.mxu0 %vm25283_vm1, %v28709_v60 }
 0x67d   :  { %v26933_v50 = vpack.c.bf16 %v5211_v20, %v5210_v39 }
 0x67e   :  { %v4434_v40 = vpop.f32.mrb[20].mxu0 }
 0x67f   :  { %v4435_v48 = vadd.f32 %v4434_v40, %v25832_v56  ;;  %v20113_v21 = vpop.f32.mrb[21].mxu0  ;;  %20752 = vmatpush1.bf16.msra.mxu1 %v26933_v50 }
 0x680   :  { %v4437_v17 = vpop.f32.mrb[22].mxu0  ;;  %20737 = vmatprep.subr.bf16.mxu1 %v28710_v12 }
 0x681   :  { %v4438_v29 = vadd.f32 %v4437_v17, %v25834_v58  ;;  %v20114_v34 = vpop.f32.mrb[23].mxu0  ;;  %v5212_v55 = vmax.f32 %v4435_v48, 0.0  ;;  %v23552_v58 = vld [vmem:[%s28615_s1 + $0x698] ss:$12 sps:$4 sm:$0xff]  }
 0x683   :  { %v5213_v26 = vmax.f32 %v4438_v29, 0.0  ;;  %20220 = vmatmul.mubr.msk.bf16.gmra.mrb[128].mxu0 %vm2608_vm2, %v23551_v52 }
 0x684   :  { %20223 = vmatprep.mubr.msk.bf16.mxu0 %vm25283_vm1, %v28709_v60 }
 0x685   :  { %v26945_v56 = vpack.c.bf16 %v5213_v26, %v5212_v55 }
 0x686   :  { %v4442_v0 = vpop.f32.mrb[24].mxu0 }
 0x687   :  { %v4443_v46 = vadd.f32 %v4442_v0, %v25842_v62  ;;  %v20117_v28 = vpop.f32.mrb[25].mxu0  ;;  %20753 = vmatpush1.bf16.msra.mxu1 %v26945_v56 }
 0x688   :  { %v4445_v47 = vpop.f32.mrb[26].mxu0  ;;  %20738 = vmatprep.subr.bf16.mxu1 %v28710_v12 }
 0x689   :  { %v4446_v3 = vadd.f32 %v4445_v47, %v25844_v1  ;;  %v20118_v39 = vpop.f32.mrb[27].mxu0  ;;  %v5214_v20 = vmax.f32 %v4443_v46, 0.0  ;;  %v23553_v1 = vld [vmem:[%s28615_s1 + $0x6b0] ss:$12 sps:$4 sm:$0xff]  }
 0x68b   :  { %v5215_v40 = vmax.f32 %v4446_v3, 0.0  ;;  %20224 = vmatmul.mubr.msk.bf16.gmra.mrb[132].mxu0 %vm2608_vm2, %v23552_v58 }
 0x68c   :  { %20227 = vmatprep.mubr.msk.bf16.mxu0 %vm25283_vm1, %v28709_v60 }
 0x68d   :  { %v26957_v62 = vpack.c.bf16 %v5215_v40, %v5214_v20 }
 0x68e   :  { %v4450_v48 = vpop.f32.mrb[28].mxu0 }
 0x68f   :  { %v4451_v21 = vadd.f32 %v4450_v48, %v25852_v5  ;;  %v20121_v52 = vpop.f32.mrb[29].mxu0  ;;  %20754 = vmatpush1.bf16.msra.mxu1 %v26957_v62 }
 0x690   :  { %v4453_v17 = vpop.f32.mrb[30].mxu0  ;;  %20739 = vmatprep.subr.bf16.mxu1 %v28710_v12 }
 0x691   :  { %v4454_v29 = vadd.f32 %v4453_v17, %v25854_v7  ;;  %v20122_v34 = vpop.f32.mrb[31].mxu0  ;;  %v5216_v55 = vmax.f32 %v4451_v21, 0.0  ;;  %v23554_v7 = vld [vmem:[%s28615_s1 + $0x6c8] ss:$12 sps:$4 sm:$0xff]  }
 0x693   :  { %v5217_v26 = vmax.f32 %v4454_v29, 0.0  ;;  %20228 = vmatmul.mubr.msk.bf16.gmra.mrb[136].mxu0 %vm2608_vm2, %v23553_v1 }
 0x694   :  { %20231 = vmatprep.mubr.msk.bf16.mxu0 %vm25283_vm1, %v28709_v60 }
 0x695   :  { %v26969_v5 = vpack.c.bf16 %v5217_v26, %v5216_v55 }
 0x696   :  { %v4458_v0 = vpop.f32.mrb[32].mxu0 }
 0x697   :  { %v4459_v46 = vadd.f32 %v4458_v0, %v25862_v11  ;;  %v20125_v28 = vpop.f32.mrb[33].mxu0  ;;  %20755 = vmatpush1.bf16.msra.mxu1 %v26969_v5 }
 0x698   :  { %v4461_v58 = vpop.f32.mrb[34].mxu0  ;;  %20740 = vmatprep.subr.bf16.mxu1 %v28710_v12 }
 0x699   :  { %v4462_v47 = vadd.f32 %v4461_v58, %v25864_v13  ;;  %v20126_v3 = vpop.f32.mrb[35].mxu0  ;;  %v5218_v39 = vmax.f32 %v4459_v46, 0.0  ;;  %v23555_v13 = vld [vmem:[%s28615_s1 + $0x6e0] ss:$12 sps:$4 sm:$0xff]  }
 0x69b   :  { %v5219_v20 = vmax.f32 %v4462_v47, 0.0  ;;  %20232 = vmatmul.mubr.msk.bf16.gmra.mrb[140].mxu0 %vm2608_vm2, %v23554_v7 }
 0x69c   :  { %20235 = vmatprep.mubr.msk.bf16.mxu0 %vm25283_vm1, %v28709_v60 }
 0x69d   :  { %v26981_v11 = vpack.c.bf16 %v5219_v20, %v5218_v39  ;;  %v23557_v39 = vld [vmem:[#allocation2 + $0xde0] ss:$68 sps:$4 sm:$0xff]  }
 0x69e   :  { %v4466_v40 = vpop.f32.mrb[36].mxu0 }
 0x69f   :  { %v4467_v48 = vadd.f32 %v4466_v40, %v25869_v16  ;;  %v20129_v21 = vpop.f32.mrb[37].mxu0  ;;  %20756 = vmatpush1.bf16.msra.mxu1 %v26981_v11 }
 0x6a0   :  { %v4469_v52 = vpop.f32.mrb[38].mxu0  ;;  %20741 = vmatprep.subr.bf16.mxu1 %v28710_v12 }
 0x6a1   :  { %v4470_v1 = vadd.f32 %v4469_v52, %v25874_v19  ;;  %v20130_v17 = vpop.f32.mrb[39].mxu0  ;;  %v5220_v29 = vmax.f32 %v4467_v48, 0.0  ;;  %v23556_v19 = vld [vmem:[%s28615_s1 + $0x6f8] ss:$12 sps:$4 sm:$0xff]   ;;  %v23561_v48 = vld [vmem:[#allocation2 + $0xe6c] ss:$68 sps:$4 sm:$0xff]  }
 0x6a3   :  { %v5221_v34 = vmax.f32 %v4470_v1, 0.0  ;;  %20236 = vmatmul.mubr.msk.bf16.gmra.mrb[144].mxu0 %vm2608_vm2, %v23555_v13 }
 0x6a4   :  { %20239 = vmatprep.mubr.msk.bf16.mxu0 %vm25283_vm1, %v28709_v60 }
 0x6a5   :  { %v26993_v16 = vpack.c.bf16 %v5221_v34, %v5220_v29  ;;  %v23563_v34 = vld [vmem:[#allocation2 + $0xe68] ss:$68 sps:$4 sm:$0xff]  }
 0x6a6   :  { %v4474_v55 = vpop.f32.mrb[40].mxu0 }
 0x6a7   :  { %v4475_v26 = vadd.f32 %v4474_v55, %v25879_v23  ;;  %v20133_v0 = vpop.f32.mrb[41].mxu0  ;;  %20757 = vmatpush1.bf16.msra.mxu1 %v26993_v16 }
 0x6a8   :  { %v4477_v46 = vpop.f32.mrb[42].mxu0  ;;  %20742 = vmatprep.subr.bf16.mxu1 %v28710_v12  ;;  %v23565_v0 = vld [vmem:[#allocation2 + $0xef4] ss:$68 sps:$4 sm:$0xff]  }
 0x6a9   :  { %v4478_v28 = vadd.f32 %v4477_v46, %v25884_v27  ;;  %v20134_v7 = vpop.f32.mrb[43].mxu0  ;;  %v5222_v58 = vmax.f32 %v4475_v26, 0.0  ;;  %v23560_v27 = vld [vmem:[%s28615_s1 + $0x710] ss:$12 sps:$4 sm:$0xff]  }
 0x6ab   :  { %v5223_v47 = vmax.f32 %v4478_v28, 0.0  ;;  %20240 = vmatmul.mubr.msk.bf16.gmra.mrb[0].mxu0 %vm2608_vm2, %v23556_v19 }
 0x6ac   :  { %20243 = vmatprep.mubr.msk.bf16.mxu0 %vm25283_vm1, %v28709_v60 }
 0x6ad   :  { %v27005_v23 = vpack.c.bf16 %v5223_v47, %v5222_v58 }
 0x6ae   :  { %v4482_v3 = vpop.f32.mrb[44].mxu0 }
 0x6af   :  { %v4483_v20 = vadd.f32 %v4482_v3, %v25889_v31  ;;  %v20137_v40 = vpop.f32.mrb[45].mxu0  ;;  %20758 = vmatpush1.bf16.msra.mxu1 %v27005_v23  ;;  %v23567_v3 = vld [vmem:[#allocation2 + $0xef0] ss:$68 sps:$4 sm:$0xff]  }
 0x6b0   :  { %v4485_v21 = vpop.f32.mrb[46].mxu0  ;;  %14028 = vmatprep.subr.bf16.mxu1 %v28710_v12  ;;  %v23569_v40 = vld [vmem:[#allocation2 + $0xf7c] ss:$68 sps:$4 sm:$0xff]  }
 0x6b1   :  { %v4486_v13 = vadd.f32 %v4485_v21, %v25894_v36  ;;  %v20138_v52 = vpop.f32.mrb[47].mxu0  ;;  %v5224_v1 = vmax.f32 %v4483_v20, 0.0  ;;  %v23564_v36 = vld [vmem:[%s28615_s1 + $0x728] ss:$12 sps:$4 sm:$0xff]  }
 0x6b2   :  { %13717 = vmatmul.mubr.bf16.vlgmr.msra.gmra.mrb[0].mxu1 %v23557_v39 }
 0x6b3   :  { %v5225_v17 = vmax.f32 %v4486_v13, 0.0  ;;  %20244 = vmatmul.mubr.msk.bf16.gmra.mrb[4].mxu0 %vm2608_vm2, %v23560_v27  ;;  %13724 = vmatprep.mubr.bf16.mxu1 %v23561_v48 }
 0x6b4   :  { %20247 = vmatprep.mubr.msk.bf16.mxu0 %vm25283_vm1, %v28709_v60 }
 0x6b5   :  { %v5433_v31 = vpack.c.bf16 %v5225_v17, %v5224_v1  ;;  %v23571_v17 = vld [vmem:[#allocation2 + $0xf78] ss:$68 sps:$4 sm:$0xff]  }
 0x6b6   :  { %v4490_v29 = vpop.f32.mrb[48].mxu0 }
 0x6b7   :  { %v4491_v55 = vadd.f32 %v4490_v29, %v25899_v41  ;;  %v20141_v26 = vpop.f32.mrb[49].mxu0  ;;  %14029 = vmatpush1.bf16.msra.mxu1 %v5433_v31 }
 0x6b8   :  { %v4493_v19 = vpop.f32.mrb[50].mxu0  ;;  %14030 = vmatprep.subr.bf16.mxu1 %v28710_v12 }
 0x6b9   :  { %v4494_v46 = vadd.f32 %v4493_v19, %v25904_v45  ;;  %v20142_v28 = vpop.f32.mrb[51].mxu0  ;;  %v5226_v7 = vmax.f32 %v4491_v55, 0.0  ;;  %v23568_v45 = vld [vmem:[%s28615_s1 + $0x740] ss:$12 sps:$4 sm:$0xff]  }
 0x6ba   :  { %13725 = vmatmul.mubr.bf16.gmra.mrb[4].mxu1 %v23563_v34  ;;  %v23573_v34 = vld [vmem:[#allocation2 + $0x1004] ss:$68 sps:$4 sm:$0xff]  }
 0x6bb   :  { %v5227_v58 = vmax.f32 %v4494_v46, 0.0  ;;  %20248 = vmatmul.mubr.msk.bf16.gmra.mrb[8].mxu0 %vm2608_vm2, %v23564_v36  ;;  %13732 = vmatprep.mubr.bf16.mxu1 %v23565_v0  ;;  %v23575_v28 = vld [vmem:[#allocation2 + $0x1000] ss:$68 sps:$4 sm:$0xff]  }
 0x6bc   :  { %20251 = vmatprep.mubr.msk.bf16.mxu0 %vm25283_vm1, %v28709_v60 }
 0x6bd   :  { %v5434_v41 = vpack.c.bf16 %v5227_v58, %v5226_v7 }
 0x6be   :  { %v4498_v47 = vpop.f32.mrb[52].mxu0 }
 0x6bf   :  { %v4499_v39 = vadd.f32 %v4498_v47, %v25909_v49  ;;  %v20145_v20 = vpop.f32.mrb[53].mxu0  ;;  %14031 = vmatpush1.bf16.msra.mxu1 %v5434_v41  ;;  %v23577_v41 = vld [vmem:[#allocation2 + $0x108c] ss:$68 sps:$4 sm:$0xff]  }
 0x6c0   :  { %v4501_v27 = vpop.f32.mrb[54].mxu0  ;;  %14032 = vmatprep.subr.bf16.mxu1 %v28710_v12 }
 0x6c1   :  { %v4502_v48 = vadd.f32 %v4501_v27, %v25914_v54  ;;  %v20146_v21 = vpop.f32.mrb[55].mxu0  ;;  %v5228_v13 = vmax.f32 %v4499_v39, 0.0  ;;  %v23572_v54 = vld [vmem:[%s28615_s1 + $0x758] ss:$12 sps:$4 sm:$0xff]  }
 0x6c2   :  { %13733 = vmatmul.mubr.bf16.gmra.mrb[8].mxu1 %v23567_v3  ;;  %v23579_v27 = vld [vmem:[#allocation2 + $0x1088] ss:$68 sps:$4 sm:$0xff]  }
 0x6c3   :  { %v5229_v52 = vmax.f32 %v4502_v48, 0.0  ;;  %20252 = vmatmul.mubr.msk.bf16.gmra.mrb[12].mxu0 %vm2608_vm2, %v23568_v45  ;;  %13740 = vmatprep.mubr.bf16.mxu1 %v23569_v40 }
 0x6c4   :  { %20255 = vmatprep.mubr.msk.bf16.mxu0 %vm25283_vm1, %v28709_v60 }
 0x6c5   :  { %v5435_v49 = vpack.c.bf16 %v5229_v52, %v5228_v13  ;;  %v23581_v13 = vld [vmem:[#allocation2 + $0x1114] ss:$68 sps:$4 sm:$0xff]  }
 0x6c6   :  { %v4506_v1 = vpop.f32.mrb[56].mxu0 }
 0x6c7   :  { %v4507_v31 = vadd.f32 %v4506_v1, %v25919_v59  ;;  %v20149_v29 = vpop.f32.mrb[57].mxu0  ;;  %14033 = vmatpush1.bf16.msra.mxu1 %v5435_v49 }
 0x6c8   :  { %v4509_v55 = vpop.f32.mrb[58].mxu0  ;;  %14034 = vmatprep.subr.bf16.mxu1 %v28710_v12 }
 0x6c9   :  { %v4510_v26 = vadd.f32 %v4509_v55, %v25924_v63  ;;  %v20150_v36 = vpop.f32.mrb[59].mxu0  ;;  %v5230_v0 = vmax.f32 %v4507_v31, 0.0  ;;  %v23576_v63 = vld [vmem:[%s28615_s1 + $0x770] ss:$12 sps:$4 sm:$0xff]  }
 0x6ca   :  { %13741 = vmatmul.mubr.bf16.gmra.mrb[12].mxu1 %v23571_v17 }
 0x6cb   :  { %v5231_v19 = vmax.f32 %v4510_v26, 0.0  ;;  %20256 = vmatmul.mubr.msk.bf16.gmra.mrb[16].mxu0 %vm2608_vm2, %v23572_v54  ;;  %13748 = vmatprep.mubr.bf16.mxu1 %v23573_v34  ;;  %v23583_v54 = vld [vmem:[#allocation2 + $0x1110] ss:$68 sps:$4 sm:$0xff]   ;;  %v23585_v26 = vld [vmem:[#allocation2 + $0x119c] ss:$68 sps:$4 sm:$0xff]  }
 0x6cc   :  { %20259 = vmatprep.mubr.msk.bf16.mxu0 %vm25283_vm1, %v28709_v60 }
 0x6cd   :  { %v5436_v59 = vpack.c.bf16 %v5231_v19, %v5230_v0 }
 0x6ce   :  { %v4514_v46 = vpop.f32.mrb[60].mxu0 }
 0x6cf   :  { %v4515_v7 = vadd.f32 %v4514_v46, %v25929_v4  ;;  %v20153_v58 = vpop.f32.mrb[61].mxu0  ;;  %14035 = vmatpush1.bf16.msra.mxu1 %v5436_v59 }
 0x6d0   :  { %v4517_v47 = vpop.f32.mrb[62].mxu0  ;;  %14036 = vmatprep.subr.bf16.mxu1 %v28710_v12 }
 0x6d1   :  { %v4518_v3 = vadd.f32 %v4517_v47, %v25934_v9  ;;  %v20154_v39 = vpop.f32.mrb[63].mxu0  ;;  %v5232_v20 = vmax.f32 %v4515_v7, 0.0  ;;  %v23580_v9 = vld [vmem:[%s28615_s1 + $0x788] ss:$12 sps:$4 sm:$0xff]  }
 0x6d2   :  { %13749 = vmatmul.mubr.bf16.gmra.mrb[16].mxu1 %v23575_v28  ;;  %v23587_v7 = vld [vmem:[#allocation2 + $0x1198] ss:$68 sps:$4 sm:$0xff]  }
 0x6d3   :  { %v5233_v45 = vmax.f32 %v4518_v3, 0.0  ;;  %20260 = vmatmul.mubr.msk.bf16.gmra.mrb[20].mxu0 %vm2608_vm2, %v23576_v63  ;;  %13756 = vmatprep.mubr.bf16.mxu1 %v23577_v41  ;;  %v23589_v41 = vld [vmem:[#allocation2 + $0x1224] ss:$68 sps:$4 sm:$0xff]  }
 0x6d4   :  { %20263 = vmatprep.mubr.msk.bf16.mxu0 %vm25283_vm1, %v28709_v60 }
 0x6d5   :  { %v5437_v4 = vpack.c.bf16 %v5233_v45, %v5232_v20 }
 0x6d6   :  { %v4522_v40 = vpop.f32.mrb[64].mxu0 }
 0x6d7   :  { %v4523_v48 = vadd.f32 %v4522_v40, %v25939_v14  ;;  %v20157_v21 = vpop.f32.mrb[65].mxu0  ;;  %14037 = vmatpush1.bf16.msra.mxu1 %v5437_v4  ;;  %v23591_v40 = vld [vmem:[#allocation2 + $0x1220] ss:$68 sps:$4 sm:$0xff]  }
 0x6d8   :  { %v4525_v52 = vpop.f32.mrb[66].mxu0  ;;  %14038 = vmatprep.subr.bf16.mxu1 %v28710_v12  ;;  %v23593_v21 = vld [vmem:[#allocation2 + $0x12ac] ss:$68 sps:$4 sm:$0xff]  }
 0x6d9   :  { %v4526_v49 = vadd.f32 %v4525_v52, %v25944_v18  ;;  %v20158_v1 = vpop.f32.mrb[67].mxu0  ;;  %v5234_v17 = vmax.f32 %v4523_v48, 0.0  ;;  %v23584_v18 = vld [vmem:[%s28615_s1 + $0x7a0] ss:$12 sps:$4 sm:$0xff]  }
 0x6da   :  { %13757 = vmatmul.mubr.bf16.gmra.mrb[20].mxu1 %v23579_v27 }
 0x6db   :  { %v5235_v31 = vmax.f32 %v4526_v49, 0.0  ;;  %20264 = vmatmul.mubr.msk.bf16.gmra.mrb[24].mxu0 %vm2608_vm2, %v23580_v9  ;;  %13764 = vmatprep.mubr.bf16.mxu1 %v23581_v13 }
 0x6dc   :  { %20267 = vmatprep.mubr.msk.bf16.mxu0 %vm25283_vm1, %v28709_v60 }
 0x6dd   :  { %v5438_v14 = vpack.c.bf16 %v5235_v31, %v5234_v17  ;;  %v23595_v31 = vld [vmem:[#allocation2 + $0x12a8] ss:$68 sps:$4 sm:$0xff]  }
 0x6de   :  { %v4530_v29 = vpop.f32.mrb[68].mxu0 }
 0x6df   :  { %v4531_v34 = vadd.f32 %v4530_v29, %v25949_v24  ;;  %v20161_v55 = vpop.f32.mrb[69].mxu0  ;;  %14039 = vmatpush1.bf16.msra.mxu1 %v5438_v14 }
 0x6e0   :  { %v4533_v36 = vpop.f32.mrb[70].mxu0  ;;  %14040 = vmatprep.subr.bf16.mxu1 %v28710_v12 }
 0x6e1   :  { %v4534_v0 = vadd.f32 %v4533_v36, %v25954_v30  ;;  %v20162_v19 = vpop.f32.mrb[71].mxu0  ;;  %v5236_v59 = vmax.f32 %v4531_v34, 0.0  ;;  %v23588_v30 = vld [vmem:[%s28615_s1 + $0x7b8] ss:$12 sps:$4 sm:$0xff]  }
 0x6e2   :  { %13765 = vmatmul.mubr.bf16.gmra.mrb[24].mxu1 %v23583_v54  ;;  %v23597_v54 = vld [vmem:[#allocation2 + $0x1334] ss:$68 sps:$4 sm:$0xff]  }
 0x6e3   :  { %v5237_v46 = vmax.f32 %v4534_v0, 0.0  ;;  %20268 = vmatmul.mubr.msk.bf16.gmra.mrb[28].mxu0 %vm2608_vm2, %v23584_v18  ;;  %13772 = vmatprep.mubr.bf16.mxu1 %v23585_v26  ;;  %v23599_v19 = vld [vmem:[#allocation2 + $0x1330] ss:$68 sps:$4 sm:$0xff]  }
 0x6e4   :  { %20271 = vmatprep.mubr.msk.bf16.mxu0 %vm25283_vm1, %v28709_v60 }
 0x6e5   :  { %v5439_v24 = vpack.c.bf16 %v5237_v46, %v5236_v59 }
 0x6e6   :  { %v4538_v28 = vpop.f32.mrb[72].mxu0 }
 0x6e7   :  { %v4539_v58 = vadd.f32 %v4538_v28, %v25959_v37  ;;  %v20165_v63 = vpop.f32.mrb[73].mxu0  ;;  %14041 = vmatpush1.bf16.msra.mxu1 %v5439_v24  ;;  %v23601_v24 = vld [vmem:[#allocation2 + $0x13bc] ss:$68 sps:$4 sm:$0xff]  }
 0x6e8   :  { %v4541_v47 = vpop.f32.mrb[74].mxu0  ;;  %14042 = vmatprep.subr.bf16.mxu1 %v28710_v12 }
 0x6e9   :  { %v4542_v3 = vadd.f32 %v4541_v47, %v25964_v43  ;;  %v20166_v39 = vpop.f32.mrb[75].mxu0  ;;  %v5238_v20 = vmax.f32 %v4539_v58, 0.0  ;;  %v23592_v43 = vld [vmem:[%s28615_s1 + $0x7d0] ss:$12 sps:$4 sm:$0xff]   ;;  %v23603_v47 = vld [vmem:[#allocation2 + $0x13b8] ss:$68 sps:$4 sm:$0xff]  }
 0x6ea   :  { %13773 = vmatmul.mubr.bf16.gmra.mrb[28].mxu1 %v23587_v7 }
 0x6eb   :  { %v5239_v45 = vmax.f32 %v4542_v3, 0.0  ;;  %20272 = vmatmul.mubr.msk.bf16.gmra.mrb[32].mxu0 %vm2608_vm2, %v23588_v30  ;;  %13780 = vmatprep.mubr.bf16.mxu1 %v23589_v41 }
 0x6ec   :  { %20275 = vmatprep.mubr.msk.bf16.mxu0 %vm25283_vm1, %v28709_v60 }
 0x6ed   :  { %v5440_v37 = vpack.c.bf16 %v5239_v45, %v5238_v20  ;;  %v23605_v20 = vld [vmem:[#allocation2 + $0x1444] ss:$68 sps:$4 sm:$0xff]  }
 0x6ee   :  { %v4546_v4 = vpop.f32.mrb[76].mxu0 }
 0x6ef   :  { %v4547_v27 = vadd.f32 %v4546_v4, %v25969_v51  ;;  %v20169_v48 = vpop.f32.mrb[77].mxu0  ;;  %14043 = vmatpush1.bf16.msra.mxu1 %v5440_v37 }
 0x6f0   :  { %v4549_v9 = vpop.f32.mrb[78].mxu0  ;;  %14044 = vmatprep.subr.bf16.mxu1 %v28710_v12 }
 0x6f1   :  { %v4550_v13 = vadd.f32 %v4549_v9, %v25974_v57  ;;  %v20170_v52 = vpop.f32.mrb[79].mxu0  ;;  %v5240_v49 = vmax.f32 %v4547_v27, 0.0  ;;  %v23596_v57 = vld [vmem:[%s28615_s1 + $0x7e8] ss:$12 sps:$4 sm:$0xff]  }
 0x6f2   :  { %13781 = vmatmul.mubr.bf16.gmra.mrb[32].mxu1 %v23591_v40 }
 0x6f3   :  { %v5241_v1 = vmax.f32 %v4550_v13, 0.0  ;;  %20276 = vmatmul.mubr.msk.bf16.gmra.mrb[36].mxu0 %vm2608_vm2, %v23592_v43  ;;  %13788 = vmatprep.mubr.bf16.mxu1 %v23593_v21  ;;  %v23607_v43 = vld [vmem:[#allocation2 + $0x1440] ss:$68 sps:$4 sm:$0xff]   ;;  %v23609_v13 = vld [vmem:[#allocation2 + $0x14cc] ss:$68 sps:$4 sm:$0xff]  }
 0x6f4   :  { %20279 = vmatprep.mubr.msk.bf16.mxu0 %vm25283_vm1, %v28709_v60 }
 0x6f5   :  { %v5441_v51 = vpack.c.bf16 %v5241_v1, %v5240_v49 }
 0x6f6   :  { %v4554_v17 = vpop.f32.mrb[80].mxu0 }
 0x6f7   :  { %v4555_v14 = vadd.f32 %v4554_v17, %v25979_v2  ;;  %v20173_v29 = vpop.f32.mrb[81].mxu0  ;;  %14045 = vmatpush1.bf16.msra.mxu1 %v5441_v51 }
 0x6f8   :  { %v4557_v34 = vpop.f32.mrb[82].mxu0  ;;  %14046 = vmatprep.subr.bf16.mxu1 %v28710_v12  ;;  %v28729_v29 = vld [vmem:[#allocation5_spill] sm:$0xff] }
 0x6f9   :  { %v4558_v55 = vadd.f32 %v4557_v34, %v25984_v8  ;;  %v20174_v18 = vpop.f32.mrb[83].mxu0  ;;  %v5242_v26 = vmax.f32 %v4555_v14, 0.0  ;;  %v23600_v8 = vld [vmem:[%s28615_s1 + $0x800] ss:$12 sps:$4 sm:$0xff]   ;;  %v23611_v14 = vld [vmem:[#allocation2 + $0x14c8] ss:$68 sps:$4 sm:$0xff]  }
 0x6fa   :  { %13789 = vmatmul.mubr.bf16.gmra.mrb[36].mxu1 %v23595_v31  ;;  %v23613_v34 = vld [vmem:[#allocation2 + $0x1554] ss:$68 sps:$4 sm:$0xff]   ;;  %v28730_v18 = vld [vmem:[#allocation6_spill] sm:$0xff] }
 0x6fb   :  { %v5243_v36 = vmax.f32 %v4558_v55, 0.0  ;;  %20280 = vmatmul.mubr.msk.bf16.gmra.mrb[40].mxu0 %vm2608_vm2, %v23596_v57  ;;  %13796 = vmatprep.mubr.bf16.mxu1 %v23597_v54 }
 0x6fc   :  { %20283 = vmatprep.mubr.msk.bf16.mxu0 %vm25283_vm1, %v28709_v60 }
 0x6fd   :  { %v5442_v2 = vpack.c.bf16 %v5243_v36, %v5242_v26 }
 0x6fe   :  { %v4562_v0 = vpop.f32.mrb[84].mxu0 }
 0x6ff   :  { %v4563_v59 = vadd.f32 %v4562_v0, %v25989_v15  ;;  %v20177_v46 = vpop.f32.mrb[85].mxu0  ;;  %14047 = vmatpush1.bf16.msra.mxu1 %v5442_v2 }
 0x700   :  { %v4565_v28 = vpop.f32.mrb[86].mxu0  ;;  %14048 = vmatprep.subr.bf16.mxu1 %v28710_v12  ;;  %v23615_v46 = vld [vmem:[#allocation2 + $0x1550] ss:$68 sps:$4 sm:$0xff]  }
 0x701   :  { %v4566_v7 = vadd.f32 %v4565_v28, %v25994_v22  ;;  %v20178_v58 = vpop.f32.mrb[87].mxu0  ;;  %v5244_v63 = vmax.f32 %v4563_v59, 0.0  ;;  %v23604_v22 = vld [vmem:[%s28615_s1 + $0x818] ss:$12 sps:$4 sm:$0xff]  }
 0x702   :  { %13797 = vmatmul.mubr.bf16.gmra.mrb[40].mxu1 %v23599_v19  ;;  %v23617_v58 = vld [vmem:[#allocation2 + $0x15dc] ss:$68 sps:$4 sm:$0xff]  }
 0x703   :  { %v5245_v30 = vmax.f32 %v4566_v7, 0.0  ;;  %20284 = vmatmul.mubr.msk.bf16.gmra.mrb[44].mxu0 %vm2608_vm2, %v23600_v8  ;;  %13804 = vmatprep.mubr.bf16.mxu1 %v23601_v24  ;;  %v28731_v8 = vld [vmem:[#allocation7_spill] sm:$0xff]  ;;  %v23616_v7 = vld [vmem:[%s28615_s1 + $0x860] ss:$12 sps:$4 sm:$0xff]  }
 0x704   :  { %20287 = vmatprep.mubr.msk.bf16.mxu0 %vm25283_vm1, %v28709_v60 }
 0x705   :  { %v5443_v15 = vpack.c.bf16 %v5245_v30, %v5244_v63  ;;  %v28732_v30 = vld [vmem:[#allocation8_spill] sm:$0xff] }
 0x706   :  { %v4570_v41 = vpop.f32.mrb[88].mxu0 }
 0x707   :  { %v4571_v3 = vadd.f32 %v4570_v41, %v25999_v33  ;;  %v20181_v39 = vpop.f32.mrb[89].mxu0  ;;  %14049 = vmatpush1.bf16.msra.mxu1 %v5443_v15 }
 0x708   :  { %v4573_v45 = vpop.f32.mrb[90].mxu0  ;;  %14050 = vmatprep.subr.bf16.mxu1 %v28710_v12 }
 0x709   :  { %v4574_v37 = vadd.f32 %v4573_v45, %v26004_v42  ;;  %v20182_v4 = vpop.f32.mrb[91].mxu0  ;;  %v5246_v40 = vmax.f32 %v4571_v3, 0.0  ;;  %v23608_v42 = vld [vmem:[%s28615_s1 + $0x830] ss:$12 sps:$4 sm:$0xff]   ;;  %v28733_v45 = vld [vmem:[#allocation9_spill] sm:$0xff] }
 0x70a   :  { %13805 = vmatmul.mubr.bf16.gmra.mrb[44].mxu1 %v23603_v47 }
 0x70b   :  { %v5247_v27 = vmax.f32 %v4574_v37, 0.0  ;;  %20288 = vmatmul.mubr.msk.bf16.gmra.mrb[48].mxu0 %vm2608_vm2, %v23604_v22  ;;  %13812 = vmatprep.mubr.bf16.mxu1 %v23605_v20  ;;  %v23619_v20 = vld [vmem:[#allocation2 + $0x15d8] ss:$68 sps:$4 sm:$0xff]  }
 0x70c   :  { %20291 = vmatprep.mubr.msk.bf16.mxu0 %vm25283_vm1, %v28709_v60 }
 0x70d   :  { %v5444_v33 = vpack.c.bf16 %v5247_v27, %v5246_v40  ;;  %v23620_v40 = vld [vmem:[%s28615_s1 + $0x878] ss:$12 sps:$4 sm:$0xff]  }
 0x70e   :  { %v4578_v48 = vpop.f32.mrb[92].mxu0  ;;  %v23621_v27 = vld [vmem:[#allocation2 + $0x1664] ss:$68 sps:$4 sm:$0xff]  }
 0x70f   :  { %v4579_v21 = vadd.f32 %v4578_v48, %v26009_v53  ;;  %v20185_v9 = vpop.f32.mrb[93].mxu0  ;;  %14051 = vmatpush1.bf16.msra.mxu1 %v5444_v33  ;;  %v28734_v48 = vld [vmem:[#allocation10_spill] sm:$0xff] }
 0x710   :  { %v4581_v52 = vpop.f32.mrb[94].mxu0  ;;  %14052 = vmatprep.subr.bf16.mxu1 %v28710_v12 }
 0x711   :  { %v4582_v49 = vadd.f32 %v4581_v52, %v26014_v61  ;;  %v20186_v1 = vpop.f32.mrb[95].mxu0  ;;  %v5248_v51 = vmax.f32 %v4579_v21, 0.0  ;;  %v23612_v61 = vld [vmem:[%s28615_s1 + $0x848] ss:$12 sps:$4 sm:$0xff]  }
 0x712   :  { %13813 = vmatmul.mubr.bf16.gmra.mrb[48].mxu1 %v23607_v43  ;;  %v28735_v1 = vld [vmem:[#allocation11_spill] sm:$0xff] }
 0x713   :  { %v5249_v17 = vmax.f32 %v4582_v49, 0.0  ;;  %20292 = vmatmul.mubr.msk.bf16.gmra.mrb[52].mxu0 %vm2608_vm2, %v23608_v42  ;;  %13820 = vmatprep.mubr.bf16.mxu1 %v23609_v13  ;;  %v23623_v49 = vld [vmem:[#allocation2 + $0x1660] ss:$68 sps:$4 sm:$0xff]  }
 0x714   :  { %20295 = vmatprep.mubr.msk.bf16.mxu0 %vm25283_vm1, %v28709_v60 }
 0x715   :  { %v5445_v53 = vpack.c.bf16 %v5249_v17, %v5248_v51 }
 0x716   :  { %v4586_v31 = vpop.f32.mrb[96].mxu0 }
 0x717   :  { %v4587_v57 = vadd.f32 %v4586_v31, %v28729_v29  ;;  %v20189_v54 = vpop.f32.mrb[97].mxu0  ;;  %14053 = vmatpush1.bf16.msra.mxu1 %v5445_v53  ;;  %v23624_v53 = vld [vmem:[%s28615_s1 + $0x890] ss:$12 sps:$4 sm:$0xff]  }
 0x718   :  { %v4589_v55 = vpop.f32.mrb[98].mxu0  ;;  %14054 = vmatprep.subr.bf16.mxu1 %v28710_v12  ;;  %v23625_v31 = vld [vmem:[#allocation2 + $0x16ec] ss:$68 sps:$4 sm:$0xff]   ;;  %v28736_v29 = vld [vmem:[#allocation12_spill] sm:$0xff] }
 0x719   :  { %v4590_v26 = vadd.f32 %v4589_v55, %v28730_v18  ;;  %v20190_v36 = vpop.f32.mrb[99].mxu0  ;;  %v5250_v2 = vmax.f32 %v4587_v57, 0.0 }
 0x71a   :  { %13821 = vmatmul.mubr.bf16.gmra.mrb[52].mxu1 %v23611_v14  ;;  %v28737_v36 = vld [vmem:[#allocation13_spill] sm:$0xff] }
 0x71b   :  { %v5251_v0 = vmax.f32 %v4590_v26, 0.0  ;;  %20296 = vmatmul.mubr.msk.bf16.gmra.mrb[56].mxu0 %vm2608_vm2, %v23612_v61  ;;  %13828 = vmatprep.mubr.bf16.mxu1 %v23613_v34  ;;  %v23627_v26 = vld [vmem:[#allocation2 + $0x16e8] ss:$68 sps:$4 sm:$0xff]  }
 0x71c   :  { %20299 = vmatprep.mubr.msk.bf16.mxu0 %vm25283_vm1, %v28709_v60 }
 0x71d   :  { %v5446_v19 = vpack.c.bf16 %v5251_v0, %v5250_v2 }
 0x71e   :  { %v4594_v59 = vpop.f32.mrb[100].mxu0 }
 0x71f   :  { %v4595_v24 = vadd.f32 %v4594_v59, %v28731_v8  ;;  %v20193_v28 = vpop.f32.mrb[101].mxu0  ;;  %14055 = vmatpush1.bf16.msra.mxu1 %v5446_v19  ;;  %v23628_v19 = vld [vmem:[%s28615_s1 + $0x8a8] ss:$12 sps:$4 sm:$0xff]   ;;  %v28738_v8 = vld [vmem:[#allocation14_spill] sm:$0xff] }
 0x720   :  { %v4597_v63 = vpop.f32.mrb[102].mxu0  ;;  %14056 = vmatprep.subr.bf16.mxu1 %v28710_v12  ;;  %v23629_v59 = vld [vmem:[#allocation2 + $0x1774] ss:$68 sps:$4 sm:$0xff]  }
 0x721   :  { %v4598_v15 = vadd.f32 %v4597_v63, %v28732_v30  ;;  %v20194_v41 = vpop.f32.mrb[103].mxu0  ;;  %v5252_v47 = vmax.f32 %v4595_v24, 0.0 }
 0x722   :  { %13829 = vmatmul.mubr.bf16.gmra.mrb[56].mxu1 %v23615_v46  ;;  %v28739_v41 = vld [vmem:[#allocation15_spill] sm:$0xff] }
 0x723   :  { %v5253_v3 = vmax.f32 %v4598_v15, 0.0  ;;  %20300 = vmatmul.mubr.msk.bf16.gmra.mrb[60].mxu0 %vm2608_vm2, %v23616_v7  ;;  %13836 = vmatprep.mubr.bf16.mxu1 %v23617_v58  ;;  %v23631_v15 = vld [vmem:[#allocation2 + $0x1770] ss:$68 sps:$4 sm:$0xff]  }
 0x724   :  { %20303 = vmatprep.mubr.msk.bf16.mxu0 %vm25283_vm1, %v28709_v60 }
 0x725   :  { %v5447_v39 = vpack.c.bf16 %v5253_v3, %v5252_v47 }
 0x726   :  { %v4602_v22 = vpop.f32.mrb[104].mxu0 }
 0x727   :  { %v4603_v37 = vadd.f32 %v4602_v22, %v28733_v45  ;;  %v20197_v4 = vpop.f32.mrb[105].mxu0  ;;  %14057 = vmatpush1.bf16.msra.mxu1 %v5447_v39  ;;  %v23632_v39 = vld [vmem:[%s28615_s1 + $0x8c0] ss:$12 sps:$4 sm:$0xff]  }
 0x728   :  { %v4605_v33 = vpop.f32.mrb[106].mxu0  ;;  %14058 = vmatprep.subr.bf16.mxu1 %v28710_v12  ;;  %v23633_v22 = vld [vmem:[#allocation2 + $0x17fc] ss:$68 sps:$4 sm:$0xff]  }
 0x729   :  { %v4606_v43 = vadd.f32 %v4605_v33, %v28734_v48  ;;  %v20198_v21 = vpop.f32.mrb[107].mxu0  ;;  %v5254_v9 = vmax.f32 %v4603_v37, 0.0  ;;  %v28740_v45 = vld [vmem:[#allocation16_spill] sm:$0xff] }
 0x72a   :  { %13837 = vmatmul.mubr.bf16.gmra.mrb[60].mxu1 %v23619_v20  ;;  %v28741_v21 = vld [vmem:[#allocation17_spill] sm:$0xff] }
 0x72b   :  { %v5255_v42 = vmax.f32 %v4606_v43, 0.0  ;;  %20304 = vmatmul.mubr.msk.bf16.gmra.mrb[64].mxu0 %vm2608_vm2, %v23620_v40  ;;  %13844 = vmatprep.mubr.bf16.mxu1 %v23621_v27  ;;  %v23635_v43 = vld [vmem:[#allocation2 + $0x17f8] ss:$68 sps:$4 sm:$0xff]  }
 0x72c   :  { %20307 = vmatprep.mubr.msk.bf16.mxu0 %vm25283_vm1, %v28709_v60 }
 0x72d   :  { %v5448_v13 = vpack.c.bf16 %v5255_v42, %v5254_v9 }
 0x72e   :  { %v4610_v52 = vpop.f32.mrb[108].mxu0 }
 0x72f   :  { %v4611_v51 = vadd.f32 %v4610_v52, %v28735_v1  ;;  %v20201_v17 = vpop.f32.mrb[109].mxu0  ;;  %14059 = vmatpush1.bf16.msra.mxu1 %v5448_v13  ;;  %v23636_v13 = vld [vmem:[%s28615_s1 + $0x8d8] ss:$12 sps:$4 sm:$0xff]   ;;  %v28742_v1 = vld [vmem:[#allocation18_spill] sm:$0xff] }
 0x730   :  { %v4613_v14 = vpop.f32.mrb[110].mxu0  ;;  %14580 = vmatprep.subr.bf16.mxu1 %v28710_v12  ;;  %v23637_v52 = vld [vmem:[#allocation2 + $0x1884] ss:$68 sps:$4 sm:$0xff]  }
 0x731   :  { %v4614_v57 = vadd.f32 %v4613_v14, %v28736_v29  ;;  %v20202_v54 = vpop.f32.mrb[111].mxu0  ;;  %v5256_v61 = vmax.f32 %v4611_v51, 0.0 }
 0x732   :  { %13845 = vmatmul.mubr.bf16.gmra.mrb[64].mxu1 %v23623_v49  ;;  %v28743_v54 = vld [vmem:[#allocation19_spill] sm:$0xff] }
 0x733   :  { %v5257_v34 = vmax.f32 %v4614_v57, 0.0  ;;  %20308 = vmatmul.mubr.msk.bf16.gmra.mrb[68].mxu0 %vm2608_vm2, %v23624_v53  ;;  %13852 = vmatprep.mubr.bf16.mxu1 %v23625_v31  ;;  %v23639_v57 = vld [vmem:[#allocation2 + $0x1880] ss:$68 sps:$4 sm:$0xff]  }
 0x734   :  { %20311 = vmatprep.mubr.msk.bf16.mxu0 %vm25283_vm1, %v28709_v60 }
 0x735   :  { %v27161_v55 = vpack.c.bf16 %v5257_v34, %v5256_v61 }
 0x736   :  { %v4618_v18 = vpop.f32.mrb[112].mxu0 }
 0x737   :  { %v4619_v2 = vadd.f32 %v4618_v18, %v28737_v36  ;;  %v20205_v0 = vpop.f32.mrb[113].mxu0  ;;  %v23640_v18 = vld [vmem:[%s28615_s1 + $0x8f0] ss:$12 sps:$4 sm:$0xff]  }
 0x738   :  { %v4621_v46 = vpop.f32.mrb[114].mxu0 }
 0x739   :  { %v4622_v24 = vadd.f32 %v4621_v46, %v28738_v8  ;;  %v20206_v28 = vpop.f32.mrb[115].mxu0  ;;  %v5258_v7 = vmax.f32 %v4619_v2, 0.0  ;;  %v28744_v2 = vld [vmem:[#allocation20_spill] sm:$0xff] }
 0x73a   :  { %13853 = vmatmul.mubr.bf16.gmra.mrb[68].mxu1 %v23627_v26  ;;  %v23641_v26 = vld [vmem:[#allocation2 + $0x190c] ss:$68 sps:$4 sm:$0xff]  }
 0x73b   :  { %v5259_v58 = vmax.f32 %v4622_v24, 0.0  ;;  %20312 = vmatmul.mubr.msk.bf16.gmra.mrb[72].mxu0 %vm2608_vm2, %v23628_v19  ;;  %13860 = vmatprep.mubr.bf16.mxu1 %v23629_v59  ;;  %v23643_v28 = vld [vmem:[#allocation2 + $0x1908] ss:$68 sps:$4 sm:$0xff]  }
 0x73c   :  { %20315 = vmatprep.mubr.msk.bf16.mxu0 %vm25283_vm1, %v28709_v60 }
 0x73d   :  { %v27171_v63 = vpack.c.bf16 %v5259_v58, %v5258_v7  ;;  %v28745_v7 = vld [vmem:[#allocation21_spill] sm:$0xff] }
 0x73e   :  { %v4626_v30 = vpop.f32.mrb[116].mxu0 }
 0x73f   :  { %v4627_v47 = vadd.f32 %v4626_v30, %v28739_v41  ;;  %v20209_v3 = vpop.f32.mrb[117].mxu0  ;;  %v23645_v41 = vld [vmem:[#allocation2 + $0x1994] ss:$68 sps:$4 sm:$0xff]  }
 0x740   :  { %v4629_v20 = vpop.f32.mrb[118].mxu0  ;;  %v28746_v3 = vld [vmem:[#allocation22_spill] sm:$0xff] }
 0x741   :  { %v4630_v37 = vadd.f32 %v4629_v20, %v28740_v45  ;;  %v20210_v4 = vpop.f32.mrb[119].mxu0  ;;  %v5260_v40 = vmax.f32 %v4627_v47, 0.0 }
 0x742   :  { %13861 = vmatmul.mubr.bf16.gmra.mrb[72].mxu1 %v23631_v15  ;;  %v23644_v15 = vld [vmem:[%s28615_s1 + $0x908] ss:$12 sps:$4 sm:$0xff]  }
 0x743   :  { %v5261_v27 = vmax.f32 %v4630_v37, 0.0  ;;  %20316 = vmatmul.mubr.msk.bf16.gmra.mrb[76].mxu0 %vm2608_vm2, %v23632_v39  ;;  %13868 = vmatprep.mubr.bf16.mxu1 %v23633_v22 }
 0x744   :  { %20319 = vmatprep.mubr.msk.bf16.mxu0 %vm25283_vm1, %v28709_v60 }
 0x745   :  { %v27181_v33 = vpack.c.bf16 %v5261_v27, %v5260_v40  ;;  %v23647_v40 = vld [vmem:[#allocation2 + $0x1990] ss:$68 sps:$4 sm:$0xff]  }
 0x746   :  { %v4634_v48 = vpop.f32.mrb[120].mxu0  ;;  %v28747_v27 = vld [vmem:[#allocation23_spill] sm:$0xff] }
 0x747   :  { %v4635_v9 = vadd.f32 %v4634_v48, %v28741_v21  ;;  %v20213_v42 = vpop.f32.mrb[121].mxu0  ;;  %v23648_v21 = vld [vmem:[%s28615_s1 + $0x920] ss:$12 sps:$4 sm:$0xff]  }
 0x748   :  { %v4637_v49 = vpop.f32.mrb[122].mxu0 }
 0x749   :  { %v4638_v51 = vadd.f32 %v4637_v49, %v28742_v1  ;;  %v20214_v17 = vpop.f32.mrb[123].mxu0  ;;  %v5262_v53 = vmax.f32 %v4635_v9, 0.0  ;;  %v23649_v9 = vld [vmem:[#allocation2 + $0x1a1c] ss:$68 sps:$4 sm:$0xff]  }
 0x74a   :  { %13869 = vmatmul.mubr.bf16.gmra.mrb[76].mxu1 %v23635_v43 }
 0x74b   :  { %v5263_v31 = vmax.f32 %v4638_v51, 0.0  ;;  %20320 = vmatmul.mubr.msk.bf16.gmra.mrb[80].mxu0 %vm2608_vm2, %v23636_v13  ;;  %13876 = vmatprep.mubr.bf16.mxu1 %v23637_v52  ;;  %v28748_v13 = vld [vmem:[#allocation24_spill] sm:$0xff] }
 0x74c   :  { %20323 = vmatprep.mubr.msk.bf16.mxu0 %vm25283_vm1, %v28709_v60 }
 0x74d   :  { %v27191_v14 = vpack.c.bf16 %v5263_v31, %v5262_v53  ;;  %v23651_v31 = vld [vmem:[#allocation2 + $0x1a18] ss:$68 sps:$4 sm:$0xff]  }
 0x74e   :  { %v4642_v29 = vpop.f32.mrb[124].mxu0 }
 0x74f   :  { %v4643_v61 = vadd.f32 %v4642_v29, %v28743_v54  ;;  %v20217_v34 = vpop.f32.mrb[125].mxu0  ;;  %v28749_v29 = vld [vmem:[#allocation25_spill] sm:$0xff] }
 0x750   :  { %v4645_v36 = vpop.f32.mrb[126].mxu0  ;;  %v23653_v34 = vld [vmem:[#allocation2 + $0x1aa4] ss:$68 sps:$4 sm:$0xff]  }
 0x751   :  { %v4646_v0 = vadd.f32 %v4645_v36, %v28744_v2  ;;  %v20218_v19 = vpop.f32.mrb[127].mxu0  ;;  %v5264_v59 = vmax.f32 %v4643_v61, 0.0  ;;  %v23652_v61 = vld [vmem:[%s28615_s1 + $0x938] ss:$12 sps:$4 sm:$0xff]  }
 0x752   :  { %13877 = vmatmul.mubr.bf16.gmra.mrb[80].mxu1 %v23639_v57 }
 0x753   :  { %v5265_v46 = vmax.f32 %v4646_v0, 0.0  ;;  %20324 = vmatmul.mubr.msk.bf16.gmra.mrb[84].mxu0 %vm2608_vm2, %v23640_v18  ;;  %13884 = vmatprep.mubr.bf16.mxu1 %v23641_v26  ;;  %v28750_v26 = vld [vmem:[#allocation26_spill] sm:$0xff] }
 0x754   :  { %20327 = vmatprep.mubr.msk.bf16.mxu0 %vm25283_vm1, %v28709_v60 }
 0x755   :  { %v27201_v8 = vpack.c.bf16 %v5265_v46, %v5264_v59 }
 0x756   :  { %v4650_v24 = vpop.f32.mrb[128].mxu0 }
 0x757   :  { %v4651_v58 = vadd.f32 %v4650_v24, %v28745_v7  ;;  %v20221_v30 = vpop.f32.mrb[129].mxu0  ;;  %v23655_v24 = vld [vmem:[#allocation2 + $0x1aa0] ss:$68 sps:$4 sm:$0xff]  }
 0x758   :  { %v4653_v47 = vpop.f32.mrb[130].mxu0  ;;  %v23656_v30 = vld [vmem:[%s28615_s1 + $0x950] ss:$12 sps:$4 sm:$0xff]  }
 0x759   :  { %v4654_v39 = vadd.f32 %v4653_v47, %v28746_v3  ;;  %v20222_v22 = vpop.f32.mrb[131].mxu0  ;;  %v5266_v20 = vmax.f32 %v4651_v58, 0.0  ;;  %v28752_v47 = vld [vmem:[#allocation28_spill] sm:$0xff] }
 0x75a   :  { %13885 = vmatmul.mubr.bf16.gmra.mrb[84].mxu1 %v23643_v28  ;;  %v28751_v28 = vld [vmem:[#allocation27_spill] sm:$0xff] }
 0x75b   :  { %v5267_v45 = vmax.f32 %v4654_v39, 0.0  ;;  %20328 = vmatmul.mubr.msk.bf16.gmra.mrb[88].mxu0 %vm2608_vm2, %v23644_v15  ;;  %13892 = vmatprep.mubr.bf16.mxu1 %v23645_v41  ;;  %v23657_v15 = vld [vmem:[#allocation2 + $0x1b2c] ss:$68 sps:$4 sm:$0xff]  }
 0x75c   :  { %20331 = vmatprep.mubr.msk.bf16.mxu0 %vm25283_vm1, %v28709_v60 }
 0x75d   :  { %v27211_v37 = vpack.c.bf16 %v5267_v45, %v5266_v20 }
 0x75e   :  { %v4658_v4 = vpop.f32.mrb[132].mxu0 }
 0x75f   :  { %v4659_v48 = vadd.f32 %v4658_v4, %v28747_v27  ;;  %v20225_v43 = vpop.f32.mrb[133].mxu0  ;;  %v28753_v27 = vld [vmem:[#allocation29_spill] sm:$0xff] }
 0x760   :  { %v4661_v42 = vpop.f32.mrb[134].mxu0 }
 0x761   :  { %v4662_v52 = vadd.f32 %v4661_v42, %v28748_v13  ;;  %v20226_v49 = vpop.f32.mrb[135].mxu0  ;;  %v5268_v1 = vmax.f32 %v4659_v48, 0.0  ;;  %v28754_v13 = vld [vmem:[#allocation30_spill] sm:$0xff] }
 0x762   :  { %13893 = vmatmul.mubr.bf16.gmra.mrb[88].mxu1 %v23647_v40  ;;  %v23659_v40 = vld [vmem:[#allocation2 + $0x1b28] ss:$68 sps:$4 sm:$0xff]  }
 0x763   :  { %v5269_v51 = vmax.f32 %v4662_v52, 0.0  ;;  %20332 = vmatmul.mubr.msk.bf16.gmra.mrb[92].mxu0 %vm2608_vm2, %v23648_v21  ;;  %13900 = vmatprep.mubr.bf16.mxu1 %v23649_v9  ;;  %v23660_v21 = vld [vmem:[%s28615_s1 + $0x968] ss:$12 sps:$4 sm:$0xff]  }
 0x764   :  { %20335 = vmatprep.mubr.msk.bf16.mxu0 %vm25283_vm1, %v28709_v60  ;;  %v23661_v9 = vld [vmem:[#allocation2 + $0x1bb4] ss:$68 sps:$4 sm:$0xff]  }
 0x765   :  { %v27221_v17 = vpack.c.bf16 %v5269_v51, %v5268_v1 }
 0x766   :  { %v4666_v53 = vpop.f32.mrb[136].mxu0 }
 0x767   :  { %v4667_v57 = vadd.f32 %v4666_v53, %v28749_v29  ;;  %v20229_v54 = vpop.f32.mrb[137].mxu0  ;;  %v23663_v29 = vld [vmem:[#allocation2 + $0x1bb0] ss:$68 sps:$4 sm:$0xff]  }
 0x768   :  { %v4669_v18 = vpop.f32.mrb[138].mxu0 }
 0x769   :  { %v4670_v36 = vadd.f32 %v4669_v18, %v28750_v26  ;;  %v20230_v2 = vpop.f32.mrb[139].mxu0  ;;  %v5270_v0 = vmax.f32 %v4667_v57, 0.0  ;;  %v28755_v57 = vld [vmem:[#allocation31_spill] sm:$0xff]  ;;  %v23665_v18 = vld [vmem:[#allocation2 + $0x1c3c] ss:$68 sps:$4 sm:$0xff]  }
 0x76a   :  { %13901 = vmatmul.mubr.bf16.gmra.mrb[92].mxu1 %v23651_v31 }
 0x76b   :  { %v5271_v19 = vmax.f32 %v4670_v36, 0.0  ;;  %20336 = vmatmul.mubr.msk.bf16.gmra.mrb[96].mxu0 %vm2608_vm2, %v23652_v61  ;;  %13908 = vmatprep.mubr.bf16.mxu1 %v23653_v34  ;;  %v23664_v34 = vld [vmem:[%s28615_s1 + $0x980] ss:$12 sps:$4 sm:$0xff]  }
 0x76c   :  { %20339 = vmatprep.mubr.msk.bf16.mxu0 %vm25283_vm1, %v28709_v60  ;;  %v28756_v36 = vld [vmem:[#allocation32_spill] sm:$0xff] }
 0x76d   :  { %v27231_v59 = vpack.c.bf16 %v5271_v19, %v5270_v0 }
 0x76e   :  { %v4674_v46 = vpop.f32.mrb[140].mxu0 }
 0x76f   :  { %v4675_v7 = vadd.f32 %v4674_v46, %v28751_v28  ;;  %v20233_v58 = vpop.f32.mrb[141].mxu0 }
 0x770   :  { %v4677_v41 = vpop.f32.mrb[142].mxu0  ;;  %v28757_v58 = vld [vmem:[#allocation33_spill] sm:$0xff] }
 0x771   :  { %v4678_v3 = vadd.f32 %v4677_v41, %v28752_v47  ;;  %v20234_v39 = vpop.f32.mrb[143].mxu0  ;;  %v5272_v22 = vmax.f32 %v4675_v7, 0.0  ;;  %v23667_v7 = vld [vmem:[#allocation2 + $0x1c38] ss:$68 sps:$4 sm:$0xff]   ;;  %v23668_v41 = vld [vmem:[%s28615_s1 + $0x998] ss:$12 sps:$4 sm:$0xff]  }
 0x772   :  { %13909 = vmatmul.mubr.bf16.gmra.mrb[96].mxu1 %v23655_v24  ;;  %v23669_v47 = vld [vmem:[#allocation2 + $0x1cc4] ss:$68 sps:$4 sm:$0xff]   ;;  %v28758_v39 = vld [vmem:[#allocation34_spill] sm:$0xff] }
 0x773   :  { %v5273_v20 = vmax.f32 %v4678_v3, 0.0  ;;  %20340 = vmatmul.mubr.msk.bf16.gmra.mrb[100].mxu0 %vm2608_vm2, %v23656_v30  ;;  %13916 = vmatprep.mubr.bf16.mxu1 %v23657_v15 }
 0x774   :  { %20343 = vmatprep.mubr.msk.bf16.mxu0 %vm25283_vm1, %v28709_v60 }
 0x775   :  { %v27241_v45 = vpack.c.bf16 %v5273_v20, %v5272_v22 }
 0x776   :  { %v4682_v4 = vpop.f32.mrb[144].mxu0 }
 0x777   :  { %v4683_v48 = vadd.f32 %v4682_v4, %v28753_v27  ;;  %v20237_v43 = vpop.f32.mrb[145].mxu0 }
 0x778   :  { %v4685_v42 = vpop.f32.mrb[146].mxu0  ;;  %v23671_v43 = vld [vmem:[#allocation2 + $0x1cc0] ss:$68 sps:$4 sm:$0xff]  }
 0x779   :  { %v4686_v52 = vadd.f32 %v4685_v42, %v28754_v13  ;;  %v20238_v49 = vpop.f32.mrb[147].mxu0  ;;  %v5274_v1 = vmax.f32 %v4683_v48, 0.0  ;;  %v23672_v13 = vld [vmem:[%s28615_s1 + $0x9b0] ss:$12 sps:$4 sm:$0xff]  }
 0x77a   :  { %13917 = vmatmul.mubr.bf16.gmra.mrb[100].mxu1 %v23659_v40 }
 0x77b   :  { %v5275_v51 = vmax.f32 %v4686_v52, 0.0  ;;  %20344 = vmatmul.mubr.msk.bf16.gmra.mrb[104].mxu0 %vm2608_vm2, %v23660_v21  ;;  %13924 = vmatprep.mubr.bf16.mxu1 %v23661_v9  ;;  %v28759_v21 = vld [vmem:[#allocation35_spill] sm:$0xff]  ;;  %v23673_v52 = vld [vmem:[#allocation2 + $0x1d4c] ss:$68 sps:$4 sm:$0xff]  }
 0x77c   :  { %20347 = vmatprep.mubr.msk.bf16.mxu0 %vm25283_vm1, %v28709_v60 }
 0x77d   :  { %v27251_v53 = vpack.c.bf16 %v5275_v51, %v5274_v1  ;;  %v28760_v1 = vld [vmem:[#allocation36_spill] sm:$0xff] }
 0x77e   :  { %v4690_v31 = vpop.f32.mrb[0].mxu0 }
 0x77f   :  { %v4691_v54 = vadd.f32 %v4690_v31, %v28755_v57  ;;  %v20241_v61 = vpop.f32.mrb[1].mxu0 }
 0x780   :  { %v4693_v26 = vpop.f32.mrb[2].mxu0 }
 0x781   :  { %v4694_v2 = vadd.f32 %v4693_v26, %v28756_v36  ;;  %v20242_v0 = vpop.f32.mrb[3].mxu0  ;;  %v5276_v19 = vmax.f32 %v4691_v54, 0.0 }
 0x782   :  { %13925 = vmatmul.mubr.bf16.gmra.mrb[104].mxu1 %v23663_v29  ;;  %v23677_v0 = vld [vmem:[#allocation2 + $0x1dd4] ss:$68 sps:$4 sm:$0xff]  }
 0x783   :  { %v5277_v46 = vmax.f32 %v4694_v2, 0.0  ;;  %20348 = vmatmul.mubr.msk.bf16.gmra.mrb[108].mxu0 %vm2608_vm2, %v23664_v34  ;;  %13932 = vmatprep.mubr.bf16.mxu1 %v23665_v18  ;;  %v23675_v34 = vld [vmem:[#allocation2 + $0x1d48] ss:$68 sps:$4 sm:$0xff]   ;;  %v23676_v2 = vld [vmem:[%s28615_s1 + $0x9c8] ss:$12 sps:$4 sm:$0xff]  }
 0x784   :  { %20351 = vmatprep.mubr.msk.bf16.mxu0 %vm25283_vm1, %v28709_v60  ;;  %v28761_v18 = vld [vmem:[#allocation37_spill] sm:$0xff] }
 0x785   :  { %v27261_v24 = vpack.c.bf16 %v5277_v46, %v5276_v19  ;;  %v28762_v46 = vld [vmem:[#allocation38_spill] sm:$0xff] }
 0x786   :  { %v4698_v28 = vpop.f32.mrb[4].mxu0 }
 0x787   :  { %v4699_v30 = vadd.f32 %v4698_v28, %v28757_v58  ;;  %v20245_v15 = vpop.f32.mrb[5].mxu0 }
 0x788   :  { %v4701_v3 = vpop.f32.mrb[6].mxu0 }
 0x789   :  { %v4702_v22 = vadd.f32 %v4701_v3, %v28758_v39  ;;  %v20246_v20 = vpop.f32.mrb[7].mxu0  ;;  %v5278_v4 = vmax.f32 %v4699_v30, 0.0  ;;  %v28763_v3 = vld [vmem:[#allocation39_spill] sm:$0xff] }
 0x78a   :  { %13933 = vmatmul.mubr.bf16.gmra.mrb[108].mxu1 %v23667_v7  ;;  %v23680_v20 = vld [vmem:[%s28615_s1 + $0x9e0] ss:$12 sps:$4 sm:$0xff]  }
 0x78b   :  { %v5279_v40 = vmax.f32 %v4702_v22, 0.0  ;;  %20352 = vmatmul.mubr.msk.bf16.gmra.mrb[192].mxu0 %vm2608_vm2, %v23668_v41  ;;  %13940 = vmatprep.mubr.bf16.mxu1 %v23669_v47  ;;  %v23679_v47 = vld [vmem:[#allocation2 + $0x1dd0] ss:$68 sps:$4 sm:$0xff]  }
 0x78c   :  { %20355 = vmatprep.mubr.msk.bf16.mxu0 %vm25283_vm1, %v28709_v60 }
 0x78d   :  { %v27271_v27 = vpack.c.bf16 %v5279_v40, %v5278_v4  ;;  %v23681_v4 = vld [vmem:[#allocation2 + $0x1e5c] ss:$68 sps:$4 sm:$0xff]  }
 0x78e   :  { %v4706_v48 = vpop.f32.mrb[8].mxu0 }
 0x78f   :  { %v4707_v9 = vadd.f32 %v4706_v48, %v28759_v21  ;;  %v20249_v42 = vpop.f32.mrb[9].mxu0  ;;  %v28764_v48 = vld [vmem:[#allocation40_spill] sm:$0xff] }
 0x790   :  { %v4709_v49 = vpop.f32.mrb[10].mxu0 }
 0x791   :  { %v4710_v51 = vadd.f32 %v4709_v49, %v28760_v1  ;;  %v20250_v31 = vpop.f32.mrb[11].mxu0  ;;  %v5280_v29 = vmax.f32 %v4707_v9, 0.0  ;;  %v23683_v49 = vld [vmem:[#allocation2 + $0x1e58] ss:$68 sps:$4 sm:$0xff]   ;;  %v28765_v1 = vld [vmem:[#allocation41_spill] sm:$0xff] }
 0x792   :  { %13941 = vmatmul.mubr.bf16.gmra.mrb[112].mxu1 %v23671_v43 }
 0x793   :  { %v5281_v57 = vmax.f32 %v4710_v51, 0.0  ;;  %20356 = vmatmul.mubr.msk.bf16.gmra.mrb[196].mxu0 %vm2608_vm2, %v23672_v13  ;;  %13948 = vmatprep.mubr.bf16.mxu1 %v23673_v52 }
 0x794   :  { %20359 = vmatprep.mubr.msk.bf16.mxu0 %vm25283_vm1, %v28709_v60 }
 0x795   :  { %v27281_v54 = vpack.c.bf16 %v5281_v57, %v5280_v29  ;;  %v23684_v29 = vld [vmem:[%s28615_s1 + $0x9f8] ss:$12 sps:$4 sm:$0xff]  }
 0x796   :  { %v4714_v61 = vpop.f32.mrb[12].mxu0  ;;  %v23685_v57 = vld [vmem:[#allocation2 + $0x1ee4] ss:$68 sps:$4 sm:$0xff]  }
 0x797   :  { %v4715_v26 = vadd.f32 %v4714_v61, %v28761_v18  ;;  %v20253_v36 = vpop.f32.mrb[13].mxu0 }
 0x798   :  { %v4717_v19 = vpop.f32.mrb[14].mxu0 }
 0x799   :  { %v4718_v28 = vadd.f32 %v4717_v19, %v28762_v46  ;;  %v20254_v7 = vpop.f32.mrb[15].mxu0  ;;  %v5282_v58 = vmax.f32 %v4715_v26, 0.0  ;;  %v23687_v46 = vld [vmem:[#allocation2 + $0x1ee0] ss:$68 sps:$4 sm:$0xff]  }
 0x79a   :  { %13949 = vmatmul.mubr.bf16.gmra.mrb[116].mxu1 %v23675_v34  ;;  %v28766_v34 = vld [vmem:[#allocation42_spill] sm:$0xff] }
 0x79b   :  { %v5283_v30 = vmax.f32 %v4718_v28, 0.0  ;;  %20360 = vmatmul.mubr.msk.bf16.gmra.mrb[200].mxu0 %vm2608_vm2, %v23676_v2  ;;  %13956 = vmatprep.mubr.bf16.mxu1 %v23677_v0  ;;  %v28767_v28 = vld [vmem:[#allocation43_spill] sm:$0xff] }
 0x79c   :  { %20363 = vmatprep.mubr.msk.bf16.mxu0 %vm25283_vm1, %v28709_v60 }
 0x79d   :  { %v27291_v15 = vpack.c.bf16 %v5283_v30, %v5282_v58  ;;  %v23688_v30 = vld [vmem:[%s28615_s1 + $0xa10] ss:$12 sps:$4 sm:$0xff]  }
 0x79e   :  { %v4722_v41 = vpop.f32.mrb[16].mxu0 }
 0x79f   :  { %v4723_v39 = vadd.f32 %v4722_v41, %v28763_v3  ;;  %v20257_v22 = vpop.f32.mrb[17].mxu0  ;;  %v23689_v41 = vld [vmem:[#allocation2 + $0x1f6c] ss:$68 sps:$4 sm:$0xff]   ;;  %v28768_v3 = vld [vmem:[#allocation44_spill] sm:$0xff] }
 0x7a0   :  { %v4725_v40 = vpop.f32.mrb[18].mxu0 }
 0x7a1   :  { %v4726_v43 = vadd.f32 %v4725_v40, %v28764_v48  ;;  %v20258_v21 = vpop.f32.mrb[19].mxu0  ;;  %v5284_v9 = vmax.f32 %v4723_v39, 0.0 }
 0x7a2   :  { %13957 = vmatmul.mubr.bf16.gmra.mrb[120].mxu1 %v23679_v47  ;;  %v28769_v21 = vld [vmem:[#allocation45_spill] sm:$0xff] }
 0x7a3   :  { %v5285_v42 = vmax.f32 %v4726_v43, 0.0  ;;  %20364 = vmatmul.mubr.msk.bf16.gmra.mrb[204].mxu0 %vm2608_vm2, %v23680_v20  ;;  %13964 = vmatprep.mubr.bf16.mxu1 %v23681_v4  ;;  %v23691_v43 = vld [vmem:[#allocation2 + $0x1f68] ss:$68 sps:$4 sm:$0xff]  }
 0x7a4   :  { %20367 = vmatprep.mubr.msk.bf16.mxu0 %vm25283_vm1, %v28709_v60 }
 0x7a5   :  { %v27301_v13 = vpack.c.bf16 %v5285_v42, %v5284_v9 }
 0x7a6   :  { %v4730_v52 = vpop.f32.mrb[20].mxu0 }
 0x7a7   :  { %v4731_v51 = vadd.f32 %v4730_v52, %v28765_v1  ;;  %v20261_v31 = vpop.f32.mrb[21].mxu0  ;;  %v23692_v52 = vld [vmem:[%s28615_s1 + $0xa28] ss:$12 sps:$4 sm:$0xff]  }
 0x7a8   :  { %v4733_v61 = vpop.f32.mrb[22].mxu0 }
 0x7a9   :  { %v4734_v18 = vadd.f32 %v4733_v61, %v28766_v34  ;;  %v20262_v26 = vpop.f32.mrb[23].mxu0  ;;  %v5286_v36 = vmax.f32 %v4731_v51, 0.0  ;;  %v28770_v51 = vld [vmem:[#allocation46_spill] sm:$0xff] }
 0x7aa   :  { %13965 = vmatmul.mubr.bf16.gmra.mrb[124].mxu1 %v23683_v49  ;;  %v23693_v49 = vld [vmem:[#allocation2 + $0x1ff4] ss:$68 sps:$4 sm:$0xff]  }
 0x7ab   :  { %v5287_v2 = vmax.f32 %v4734_v18, 0.0  ;;  %20368 = vmatmul.mubr.msk.bf16.gmra.mrb[208].mxu0 %vm2608_vm2, %v23684_v29  ;;  %13972 = vmatprep.mubr.bf16.mxu1 %v23685_v57  ;;  %v23695_v26 = vld [vmem:[#allocation2 + $0x1ff0] ss:$68 sps:$4 sm:$0xff]  }
 0x7ac   :  { %20371 = vmatprep.mubr.msk.bf16.mxu0 %vm25283_vm1, %v28709_v60 }
 0x7ad   :  { %v27311_v0 = vpack.c.bf16 %v5287_v2, %v5286_v36  ;;  %v28771_v36 = vld [vmem:[#allocation47_spill] sm:$0xff] }
 0x7ae   :  { %v4738_v19 = vpop.f32.mrb[24].mxu0 }
 0x7af   :  { %v4739_v7 = vadd.f32 %v4738_v19, %v28767_v28  ;;  %v20265_v58 = vpop.f32.mrb[25].mxu0  ;;  %v23697_v28 = vld [vmem:[#allocation2 + $0x207c] ss:$68 sps:$4 sm:$0xff]  }
 0x7b0   :  { %v4741_v47 = vpop.f32.mrb[26].mxu0  ;;  %v28772_v58 = vld [vmem:[#allocation48_spill] sm:$0xff] }
 0x7b1   :  { %v4742_v39 = vadd.f32 %v4741_v47, %v28768_v3  ;;  %v20266_v22 = vpop.f32.mrb[27].mxu0  ;;  %v5288_v20 = vmax.f32 %v4739_v7, 0.0 }
 0x7b2   :  { %13973 = vmatmul.mubr.bf16.gmra.mrb[128].mxu1 %v23687_v46  ;;  %v23696_v46 = vld [vmem:[%s28615_s1 + $0xa40] ss:$12 sps:$4 sm:$0xff]  }
 0x7b3   :  { %v5289_v4 = vmax.f32 %v4742_v39, 0.0  ;;  %20372 = vmatmul.mubr.msk.bf16.gmra.mrb[212].mxu0 %vm2608_vm2, %v23688_v30  ;;  %13980 = vmatprep.mubr.bf16.mxu1 %v23689_v41 }
 0x7b4   :  { %20375 = vmatprep.mubr.msk.bf16.mxu0 %vm25283_vm1, %v28709_v60 }
 0x7b5   :  { %v27321_v40 = vpack.c.bf16 %v5289_v4, %v5288_v20  ;;  %v23699_v20 = vld [vmem:[#allocation2 + $0x2078] ss:$68 sps:$4 sm:$0xff]   ;;  %v28773_v4 = vld [vmem:[#allocation49_spill] sm:$0xff] }
 0x7b6   :  { %v4746_v48 = vpop.f32.mrb[28].mxu0 }
 0x7b7   :  { %v4747_v9 = vadd.f32 %v4746_v48, %v28769_v21  ;;  %v20269_v42 = vpop.f32.mrb[29].mxu0  ;;  %v23700_v21 = vld [vmem:[%s28615_s1 + $0xa58] ss:$12 sps:$4 sm:$0xff]  }
 0x7b8   :  { %v4749_v1 = vpop.f32.mrb[30].mxu0 }
 0x7b9   :  { %v4750_v31 = vadd.f32 %v4749_v1, %v28770_v51  ;;  %v20270_v29 = vpop.f32.mrb[31].mxu0  ;;  %v5290_v57 = vmax.f32 %v4747_v9, 0.0  ;;  %v23701_v9 = vld [vmem:[#allocation2 + $0x2104] ss:$68 sps:$4 sm:$0xff]  }
 0x7ba   :  { %13981 = vmatmul.mubr.bf16.gmra.mrb[132].mxu1 %v23691_v43 }
 0x7bb   :  { %v5291_v61 = vmax.f32 %v4750_v31, 0.0  ;;  %20376 = vmatmul.mubr.msk.bf16.gmra.mrb[216].mxu0 %vm2608_vm2, %v23692_v52  ;;  %13988 = vmatprep.mubr.bf16.mxu1 %v23693_v49  ;;  %v28774_v52 = vld [vmem:[#allocation50_spill] sm:$0xff] }
 0x7bc   :  { %20379 = vmatprep.mubr.msk.bf16.mxu0 %vm25283_vm1, %v28709_v60 }
 0x7bd   :  { %v27331_v34 = vpack.c.bf16 %v5291_v61, %v5290_v57  ;;  %v23703_v61 = vld [vmem:[#allocation2 + $0x2100] ss:$68 sps:$4 sm:$0xff]  }
 0x7be   :  { %v4754_v18 = vpop.f32.mrb[32].mxu0 }
 0x7bf   :  { %v4755_v2 = vadd.f32 %v4754_v18, %v28771_v36  ;;  %v20273_v19 = vpop.f32.mrb[33].mxu0  ;;  %v28775_v18 = vld [vmem:[#allocation51_spill] sm:$0xff] }
 0x7c0   :  { %v4757_v7 = vpop.f32.mrb[34].mxu0  ;;  %v23705_v19 = vld [vmem:[#allocation2 + $0x218c] ss:$68 sps:$4 sm:$0xff]  }
 0x7c1   :  { %v4758_v30 = vadd.f32 %v4757_v7, %v28772_v58  ;;  %v20274_v41 = vpop.f32.mrb[35].mxu0  ;;  %v5292_v47 = vmax.f32 %v4755_v2, 0.0  ;;  %v23704_v2 = vld [vmem:[%s28615_s1 + $0xa70] ss:$12 sps:$4 sm:$0xff]  }
 0x7c2   :  { %13989 = vmatmul.mubr.bf16.gmra.mrb[136].mxu1 %v23695_v26 }
 0x7c3   :  { %v5293_v3 = vmax.f32 %v4758_v30, 0.0  ;;  %20380 = vmatmul.mubr.msk.bf16.gmra.mrb[220].mxu0 %vm2608_vm2, %v23696_v46  ;;  %13996 = vmatprep.mubr.bf16.mxu1 %v23697_v28  ;;  %v28776_v28 = vld [vmem:[#allocation52_spill] sm:$0xff] }
 0x7c4   :  { %20383 = vmatprep.mubr.msk.bf16.mxu0 %vm25283_vm1, %v28709_v60 }
 0x7c5   :  { %v27341_v39 = vpack.c.bf16 %v5293_v3, %v5292_v47  ;;  %v6668_v47 = vld [vmem:[#allocation2 + $0x2210] sm:$0xff] }
 0x7c6   :  { %v4762_v22 = vpop.f32.mrb[36].mxu0 }
 0x7c7   :  { %v4763_v48 = vadd.f32 %v4762_v22, %v28773_v4  ;;  %v20277_v43 = vpop.f32.mrb[37].mxu0  ;;  %v28777_v4 = vld [vmem:[#allocation53_spill] sm:$0xff] }
 0x7c8   :  { %v4765_v42 = vpop.f32.mrb[38].mxu0 }
 0x7c9   :  { %v4766_v49 = vadd.f32 %v4765_v42, %v28774_v52  ;;  %v20278_v1 = vpop.f32.mrb[39].mxu0  ;;  %v5294_v51 = vmax.f32 %v4763_v48, 0.0  ;;  %v28778_v52 = vld [vmem:[#allocation54_spill] sm:$0xff] }
 0x7ca   :  { %13997 = vmatmul.mubr.bf16.gmra.mrb[140].mxu1 %v23699_v20  ;;  %v23707_v20 = vld [vmem:[#allocation2 + $0x2188] ss:$68 sps:$4 sm:$0xff]  }
 0x7cb   :  { %v5295_v31 = vmax.f32 %v4766_v49, 0.0  ;;  %20384 = vmatmul.mubr.msk.bf16.gmra.mrb[224].mxu0 %vm2608_vm2, %v23700_v21  ;;  %14004 = vmatprep.mubr.bf16.mxu1 %v23701_v9  ;;  %v23708_v21 = vld [vmem:[%s28615_s1 + $0xa88] ss:$12 sps:$4 sm:$0xff]   ;;  %v19533_v9 = vcombine.high %v6668_v47, %v6668_v47 }
 0x7cc   :  { %20387 = vmatprep.mubr.msk.bf16.mxu0 %vm25283_vm1, %v28709_v60 }
 0x7cd   :  { %v27351_v29 = vpack.c.bf16 %v5295_v31, %v5294_v51 }
 0x7ce   :  { %v4770_v57 = vpop.f32.mrb[40].mxu0 }
 0x7cf   :  { %v4771_v26 = vadd.f32 %v4770_v57, %v28775_v18  ;;  %v20281_v36 = vpop.f32.mrb[41].mxu0  ;;  %v19532_v18 = vcombine.low %v6668_v47, %v6668_v47 }
 0x7d0   :  { %v4773_v46 = vpop.f32.mrb[42].mxu0 }
 0x7d1   :  { %v4774_v7 = vadd.f32 %v4773_v46, %v28776_v28  ;;  %v20282_v58 = vpop.f32.mrb[43].mxu0  ;;  %v5296_v30 = vmax.f32 %v4771_v26, 0.0  ;;  %v28779_v26 = vld [vmem:[#allocation55_spill] sm:$0xff]  ;;  %v23714_v46 = vld [vmem:[#allocation2 + $0x1c] ss:$68 sps:$4 sm:$0xff]  }
 0x7d2   :  { %14005 = vmatmul.mubr.bf16.gmra.mrb[144].mxu1 %v23703_v61 }
 0x7d3   :  { %v5297_v41 = vmax.f32 %v4774_v7, 0.0  ;;  %20388 = vmatmul.mubr.msk.bf16.gmra.mrb[228].mxu0 %vm2608_vm2, %v23704_v2  ;;  %14012 = vmatprep.mubr.bf16.mxu1 %v23705_v19  ;;  %v23711_v19 = vld [vmem:[%s28615_s1 + $0xaa0] ss:$12 sps:$4 sm:$0xff]  }
 0x7d4   :  { %20391 = vmatprep.mubr.msk.bf16.mxu0 %vm25283_vm1, %v28709_v60  ;;  %v28780_v7 = vld [vmem:[#allocation56_spill] sm:$0xff] }
 0x7d5   :  { %v27361_v3 = vpack.c.bf16 %v5297_v41, %v5296_v30 }
 0x7d6   :  { %v4778_v22 = vpop.f32.mrb[44].mxu0 }
 0x7d7   :  { %v4779_v48 = vadd.f32 %v4778_v22, %v28777_v4  ;;  %v20285_v43 = vpop.f32.mrb[45].mxu0  ;;  %v23712_v4 = vld [vmem:[#allocation2 + $0x18] ss:$68 sps:$4 sm:$0xff]  }
 0x7d8   :  { %v4781_v42 = vpop.f32.mrb[46].mxu0 }
 0x7d9   :  { %v4782_v49 = vadd.f32 %v4781_v42, %v28778_v52  ;;  %v20286_v1 = vpop.f32.mrb[47].mxu0  ;;  %v5298_v51 = vmax.f32 %v4779_v48, 0.0  ;;  %v28781_v48 = vld [vmem:[#allocation57_spill] sm:$0xff] }
 0x7da   :  { %14013 = vmatmul.mubr.bf16.gmra.mrb[148].mxu1 %v23707_v20  ;;  %v23716_v52 = vld [vmem:[#allocation2 + $0xa4] ss:$68 sps:$4 sm:$0xff]  }
 0x7db   :  { %v5299_v31 = vmax.f32 %v4782_v49, 0.0  ;;  %20392 = vmatmul.mubr.msk.bf16.gmra.mrb[232].mxu0 %vm2608_vm2, %v23708_v21  ;;  %14020 = vmatprep.mubr.bf16.mxu1 %v19533_v9  ;;  %v23715_v9 = vld [vmem:[%s28615_s1 + $0xab8] ss:$12 sps:$4 sm:$0xff]   ;;  %v28782_v49 = vld [vmem:[#allocation58_spill] sm:$0xff] }
 0x7dc   :  { %20395 = vmatprep.mubr.msk.bf16.mxu0 %vm25283_vm1, %v28709_v60 }
 0x7dd   :  { %v27371_v57 = vpack.c.bf16 %v5299_v31, %v5298_v51 }
 0x7de   :  { %v4786_v61 = vpop.f32.mrb[48].mxu0 }
 0x7df   :  { %v4787_v36 = vadd.f32 %v4786_v61, %v28779_v26  ;;  %v20289_v2 = vpop.f32.mrb[49].mxu0 }
 0x7e0   :  { %v4789_v28 = vpop.f32.mrb[50].mxu0  ;;  %v28783_v2 = vld [vmem:[#allocation59_spill] sm:$0xff] }
 0x7e1   :  { %v4790_v58 = vadd.f32 %v4789_v28, %v28780_v7  ;;  %v20290_v30 = vpop.f32.mrb[51].mxu0  ;;  %v5300_v41 = vmax.f32 %v4787_v36, 0.0  ;;  %v23718_v36 = vld [vmem:[#allocation2 + $0xa0] ss:$68 sps:$4 sm:$0xff]   ;;  %v23720_v7 = vld [vmem:[#allocation2 + $0x12c] ss:$68 sps:$4 sm:$0xff]  }
 0x7e2   :  { %14021 = vmatmul.mubr.bf16.gmra.mrb[152].mxu1 %v19532_v18 }
 0x7e3   :  { %v5301_v22 = vmax.f32 %v4790_v58, 0.0  ;;  %20396 = vmatmul.mubr.msk.bf16.gmra.mrb[236].mxu0 %vm2608_vm2, %v23711_v19  ;;  %14060 = vmatprep.mubr.bf16.mxu1 %v23714_v46  ;;  %v28784_v58 = vld [vmem:[#allocation60_spill] sm:$0xff] }
 0x7e4   :  { %20399 = vmatprep.mubr.msk.bf16.mxu0 %vm25283_vm1, %v28709_v60 }
 0x7e5   :  { %v27381_v47 = vpack.c.bf16 %v5301_v22, %v5300_v41 }
 0x7e6   :  { %v4794_v20 = vpop.f32.mrb[52].mxu0 }
 0x7e7   :  { %v4795_v43 = vadd.f32 %v4794_v20, %v28781_v48  ;;  %v20293_v21 = vpop.f32.mrb[53].mxu0  ;;  %v23722_v48 = vld [vmem:[#allocation2 + $0x128] ss:$68 sps:$4 sm:$0xff]  }
 0x7e8   :  { %v4797_v42 = vpop.f32.mrb[54].mxu0 }
 0x7e9   :  { %v4798_v1 = vadd.f32 %v4797_v42, %v28782_v49  ;;  %v20294_v51 = vpop.f32.mrb[55].mxu0  ;;  %v5302_v31 = vmax.f32 %v4795_v43, 0.0  ;;  %v28785_v43 = vld [vmem:[#allocation61_spill] sm:$0xff]  ;;  %v28786_v49 = vld [vmem:[#allocation62_spill] sm:$0xff] }
 0x7ea   :  { %14061 = vmatmul.mubr.bf16.vlgmr.msra.gmra.mrb[156].mxu1 %v23712_v4 }
 0x7eb   :  { %v5303_v61 = vmax.f32 %v4798_v1, 0.0  ;;  %14581 = vmatpush1.bf16.msra.mxu1 %v27161_v55  ;;  %20400 = vmatmul.mubr.msk.bf16.gmra.mrb[240].mxu0 %vm2608_vm2, %v23715_v9  ;;  %v23719_v55 = vld [vmem:[%s28615_s1 + $0xad0] ss:$12 sps:$4 sm:$0xff]  }
 0x7ec   :  { %14582 = vmatprep.subr.bf16.mxu1 %v28710_v12  ;;  %14068 = vmatprep.mubr.bf16.mxu1 %v23716_v52  ;;  %v23724_v52 = vld [vmem:[#allocation2 + $0x1b4] ss:$68 sps:$4 sm:$0xff]  }
 0x7ed   :  { %20403 = vmatprep.mubr.msk.bf16.mxu0 %vm25283_vm1, %v28709_v60  ;;  %v27393_v18 = vpack.c.bf16 %v5303_v61, %v5302_v31 }
 0x7ee   :  { %v4802_v26 = vpop.f32.mrb[56].mxu0 }
 0x7ef   :  { %v4803_v19 = vadd.f32 %v4802_v26, %v28783_v2  ;;  %14583 = vmatpush1.bf16.msra.mxu1 %v27171_v63  ;;  %v20297_v46 = vpop.f32.mrb[57].mxu0  ;;  %v28787_v2 = vld [vmem:[#allocation63_spill] sm:$0xff] }
 0x7f0   :  { %v4805_v28 = vpop.f32.mrb[58].mxu0  ;;  %14584 = vmatprep.subr.bf16.mxu1 %v28710_v12 }
 0x7f1   :  { %v4806_v30 = vadd.f32 %v4805_v28, %v28784_v58  ;;  %v20298_v41 = vpop.f32.mrb[59].mxu0  ;;  %v5304_v22 = vmax.f32 %v4803_v19, 0.0  ;;  %v23728_v28 = vld [vmem:[#allocation2 + $0x23c] ss:$68 sps:$4 sm:$0xff]  }
 0x7f2   :  { %14069 = vmatmul.mubr.bf16.gmra.mrb[160].mxu1 %v23718_v36  ;;  %v23726_v36 = vld [vmem:[#allocation2 + $0x1b0] ss:$68 sps:$4 sm:$0xff]  }
 0x7f3   :  { %v5305_v20 = vmax.f32 %v4806_v30, 0.0  ;;  %14585 = vmatpush1.bf16.msra.mxu1 %v27181_v33  ;;  %20404 = vmatmul.mubr.msk.bf16.gmra.mrb[244].mxu0 %vm2608_vm2, %v23719_v55  ;;  %v23723_v33 = vld [vmem:[%s28615_s1 + $0xae8] ss:$12 sps:$4 sm:$0xff]  }
 0x7f4   :  { %14586 = vmatprep.subr.bf16.mxu1 %v28710_v12  ;;  %14076 = vmatprep.mubr.bf16.mxu1 %v23720_v7  ;;  %v28788_v7 = vld [vmem:[#allocation64_spill] sm:$0xff] }
 0x7f5   :  { %20407 = vmatprep.mubr.msk.bf16.mxu0 %vm25283_vm1, %v28709_v60  ;;  %v27407_v63 = vpack.c.bf16 %v5305_v20, %v5304_v22 }
 0x7f6   :  { %v4810_v4 = vpop.f32.mrb[60].mxu0 }
 0x7f7   :  { %v4811_v21 = vadd.f32 %v4810_v4, %v28785_v43  ;;  %14587 = vmatpush1.bf16.msra.mxu1 %v27191_v14  ;;  %v20301_v9 = vpop.f32.mrb[61].mxu0  ;;  %v23730_v4 = vld [vmem:[#allocation2 + $0x238] ss:$68 sps:$4 sm:$0xff]  }
 0x7f8   :  { %v4813_v42 = vpop.f32.mrb[62].mxu0  ;;  %14588 = vmatprep.subr.bf16.mxu1 %v28710_v12 }
 0x7f9   :  { %v4814_v1 = vadd.f32 %v4813_v42, %v28786_v49  ;;  %v20302_v51 = vpop.f32.mrb[63].mxu0  ;;  %v5306_v31 = vmax.f32 %v4811_v21, 0.0  ;;  %v28790_v42 = vld [vmem:[#allocation66_spill] sm:$0xff] }
 0x7fa   :  { %14077 = vmatmul.mubr.bf16.gmra.mrb[164].mxu1 %v23722_v48  ;;  %v28789_v48 = vld [vmem:[#allocation65_spill] sm:$0xff] }
 0x7fb   :  { %v5307_v61 = vmax.f32 %v4814_v1, 0.0  ;;  %14589 = vmatpush1.bf16.msra.mxu1 %v27201_v8  ;;  %20408 = vmatmul.mubr.msk.bf16.gmra.mrb[248].mxu0 %vm2608_vm2, %v23723_v33  ;;  %v23727_v8 = vld [vmem:[%s28615_s1 + $0xb00] ss:$12 sps:$4 sm:$0xff]   ;;  %v23732_v33 = vld [vmem:[#allocation2 + $0x2c4] ss:$68 sps:$4 sm:$0xff]  }
 0x7fc   :  { %14590 = vmatprep.subr.bf16.mxu1 %v28710_v12  ;;  %14084 = vmatprep.mubr.bf16.mxu1 %v23724_v52 }
 0x7fd   :  { %20411 = vmatprep.mubr.msk.bf16.mxu0 %vm25283_vm1, %v28709_v60  ;;  %v27421_v14 = vpack.c.bf16 %v5307_v61, %v5306_v31  ;;  %v23734_v61 = vld [vmem:[#allocation2 + $0x2c0] ss:$68 sps:$4 sm:$0xff]  }
 0x7fe   :  { %v4818_v26 = vpop.f32.mrb[64].mxu0 }
 0x7ff   :  { %v4819_v19 = vadd.f32 %v4818_v26, %v28787_v2  ;;  %14591 = vmatpush1.bf16.msra.mxu1 %v27211_v37  ;;  %v20305_v46 = vpop.f32.mrb[65].mxu0  ;;  %v28791_v26 = vld [vmem:[#allocation67_spill] sm:$0xff] }
 0x800   :  { %v4821_v55 = vpop.f32.mrb[66].mxu0  ;;  %14592 = vmatprep.subr.bf16.mxu1 %v28710_v12  ;;  %v23736_v46 = vld [vmem:[#allocation2 + $0x34c] ss:$68 sps:$4 sm:$0xff]  }
 0x801   :  { %v4822_v58 = vadd.f32 %v4821_v55, %v28788_v7  ;;  %v20306_v30 = vpop.f32.mrb[67].mxu0  ;;  %v5308_v41 = vmax.f32 %v4819_v19, 0.0 }
 0x802   :  { %14085 = vmatmul.mubr.bf16.gmra.mrb[168].mxu1 %v23726_v36 }
 0x803   :  { %v5309_v22 = vmax.f32 %v4822_v58, 0.0  ;;  %14593 = vmatpush1.bf16.msra.mxu1 %v27221_v17  ;;  %20412 = vmatmul.mubr.msk.bf16.gmra.mrb[252].mxu0 %vm2608_vm2, %v23727_v8  ;;  %v23731_v17 = vld [vmem:[%s28615_s1 + $0xb18] ss:$12 sps:$4 sm:$0xff]   ;;  %v28792_v8 = vld [vmem:[#allocation68_spill] sm:$0xff] }
 0x804   :  { %14594 = vmatprep.subr.bf16.mxu1 %v28710_v12  ;;  %14092 = vmatprep.mubr.bf16.mxu1 %v23728_v28 }
 0x805   :  { %20415 = vmatprep.mubr.msk.bf16.mxu0 %vm25283_vm1, %v28709_v60  ;;  %v27435_v37 = vpack.c.bf16 %v5309_v22, %v5308_v41  ;;  %v23738_v41 = vld [vmem:[#allocation2 + $0x348] ss:$68 sps:$4 sm:$0xff]  }
 0x806   :  { %v4826_v20 = vpop.f32.mrb[68].mxu0  ;;  %v28793_v22 = vld [vmem:[#allocation69_spill] sm:$0xff] }
 0x807   :  { %v4827_v43 = vadd.f32 %v4826_v20, %v28789_v48  ;;  %14595 = vmatpush1.bf16.msra.mxu1 %v27231_v59  ;;  %v20309_v21 = vpop.f32.mrb[69].mxu0 }
 0x808   :  { %v4829_v9 = vpop.f32.mrb[70].mxu0  ;;  %14596 = vmatprep.subr.bf16.mxu1 %v28710_v12  ;;  %v28794_v21 = vld [vmem:[#allocation70_spill] sm:$0xff] }
 0x809   :  { %v4830_v52 = vadd.f32 %v4829_v9, %v28790_v42  ;;  %v20310_v49 = vpop.f32.mrb[71].mxu0  ;;  %v5310_v1 = vmax.f32 %v4827_v43, 0.0  ;;  %v23740_v43 = vld [vmem:[#allocation2 + $0x3d4] ss:$68 sps:$4 sm:$0xff]  }
 0x80a   :  { %14093 = vmatmul.mubr.bf16.gmra.mrb[172].mxu1 %v23730_v4  ;;  %v23742_v49 = vld [vmem:[#allocation2 + $0x3d0] ss:$68 sps:$4 sm:$0xff]  }
 0x80b   :  { %v5311_v51 = vmax.f32 %v4830_v52, 0.0  ;;  %14597 = vmatpush1.bf16.msra.mxu1 %v27241_v45  ;;  %20416 = vmatmul.mubr.msk.bf16.gmra.mrb[148].mxu0 %vm2608_vm2, %v23731_v17  ;;  %v23735_v45 = vld [vmem:[%s28615_s1 + $0xb30] ss:$12 sps:$4 sm:$0xff]  }
 0x80c   :  { %14598 = vmatprep.subr.bf16.mxu1 %v28710_v12  ;;  %14100 = vmatprep.mubr.bf16.mxu1 %v23732_v33 }
 0x80d   :  { %20419 = vmatprep.mubr.msk.bf16.mxu0 %vm25283_vm1, %v28709_v60  ;;  %v27449_v59 = vpack.c.bf16 %v5311_v51, %v5310_v1  ;;  %v28795_v1 = vld [vmem:[#allocation71_spill] sm:$0xff] }
 0x80e   :  { %v4834_v31 = vpop.f32.mrb[72].mxu0 }
 0x80f   :  { %v4835_v36 = vadd.f32 %v4834_v31, %v28791_v26  ;;  %14599 = vmatpush1.bf16.msra.mxu1 %v27251_v53  ;;  %v20313_v2 = vpop.f32.mrb[73].mxu0  ;;  %v23744_v26 = vld [vmem:[#allocation2 + $0x45c] ss:$68 sps:$4 sm:$0xff]  }
 0x810   :  { %v4837_v19 = vpop.f32.mrb[74].mxu0  ;;  %14600 = vmatprep.subr.bf16.mxu1 %v28710_v12 }
 0x811   :  { %v4838_v55 = vadd.f32 %v4837_v19, %v28792_v8  ;;  %v20314_v28 = vpop.f32.mrb[75].mxu0  ;;  %v5312_v7 = vmax.f32 %v4835_v36, 0.0  ;;  %v28796_v36 = vld [vmem:[#allocation72_spill] sm:$0xff] }
 0x812   :  { %14101 = vmatmul.mubr.bf16.gmra.mrb[176].mxu1 %v23734_v61  ;;  %v28797_v28 = vld [vmem:[#allocation73_spill] sm:$0xff] }
 0x813   :  { %v5313_v58 = vmax.f32 %v4838_v55, 0.0  ;;  %14601 = vmatpush1.bf16.msra.mxu1 %v27261_v24  ;;  %20420 = vmatmul.mubr.msk.bf16.gmra.mrb[152].mxu0 %vm2608_vm2, %v23735_v45  ;;  %v23739_v24 = vld [vmem:[%s28615_s1 + $0xb48] ss:$12 sps:$4 sm:$0xff]  }
 0x814   :  { %14602 = vmatprep.subr.bf16.mxu1 %v28710_v12  ;;  %14108 = vmatprep.mubr.bf16.mxu1 %v23736_v46  ;;  %v23746_v55 = vld [vmem:[#allocation2 + $0x458] ss:$68 sps:$4 sm:$0xff]  }
 0x815   :  { %20423 = vmatprep.mubr.msk.bf16.mxu0 %vm25283_vm1, %v28709_v60  ;;  %v27463_v53 = vpack.c.bf16 %v5313_v58, %v5312_v7 }
 0x816   :  { %v4842_v30 = vpop.f32.mrb[76].mxu0 }
 0x817   :  { %v4843_v20 = vadd.f32 %v4842_v30, %v28793_v22  ;;  %14603 = vmatpush1.bf16.msra.mxu1 %v27271_v27  ;;  %v20317_v4 = vpop.f32.mrb[77].mxu0  ;;  %v23748_v30 = vld [vmem:[#allocation2 + $0x4e4] ss:$68 sps:$4 sm:$0xff]   ;;  %v28798_v22 = vld [vmem:[#allocation74_spill] sm:$0xff] }
 0x818   :  { %v4845_v48 = vpop.f32.mrb[78].mxu0  ;;  %14604 = vmatprep.subr.bf16.mxu1 %v28710_v12 }
 0x819   :  { %v4846_v17 = vadd.f32 %v4845_v48, %v28794_v21  ;;  %v20318_v9 = vpop.f32.mrb[79].mxu0  ;;  %v5314_v33 = vmax.f32 %v4843_v20, 0.0  ;;  %v23750_v21 = vld [vmem:[#allocation2 + $0x4e0] ss:$68 sps:$4 sm:$0xff]  }
 0x81a   :  { %14109 = vmatmul.mubr.bf16.gmra.mrb[180].mxu1 %v23738_v41 }
 0x81b   :  { %v5315_v42 = vmax.f32 %v4846_v17, 0.0  ;;  %14605 = vmatpush1.bf16.msra.mxu1 %v27281_v54  ;;  %20424 = vmatmul.mubr.msk.bf16.gmra.mrb[156].mxu0 %vm2608_vm2, %v23739_v24  ;;  %v23743_v54 = vld [vmem:[%s28615_s1 + $0xb60] ss:$12 sps:$4 sm:$0xff]   ;;  %v28799_v17 = vld [vmem:[#allocation75_spill] sm:$0xff] }
 0x81c   :  { %14606 = vmatprep.subr.bf16.mxu1 %v28710_v12  ;;  %14116 = vmatprep.mubr.bf16.mxu1 %v23740_v43 }
 0x81d   :  { %20427 = vmatprep.mubr.msk.bf16.mxu0 %vm25283_vm1, %v28709_v60  ;;  %v27477_v27 = vpack.c.bf16 %v5315_v42, %v5314_v33  ;;  %v23751_v42 = vld [vmem:[%s28615_s1 + $0xb90] ss:$12 sps:$4 sm:$0xff]  }
 0x81e   :  { %v4850_v52 = vpop.f32.mrb[80].mxu0 }
 0x81f   :  { %v4851_v51 = vadd.f32 %v4850_v52, %v28795_v1  ;;  %14607 = vmatpush1.bf16.msra.mxu1 %v27291_v15  ;;  %v20321_v31 = vpop.f32.mrb[81].mxu0  ;;  %v23752_v52 = vld [vmem:[#allocation2 + $0x56c] ss:$68 sps:$4 sm:$0xff]   ;;  %v28800_v1 = vld [vmem:[#allocation76_spill] sm:$0xff] }
 0x820   :  { %v4853_v61 = vpop.f32.mrb[82].mxu0  ;;  %14608 = vmatprep.subr.bf16.mxu1 %v28710_v12 }
 0x821   :  { %v4854_v2 = vadd.f32 %v4853_v61, %v28796_v36  ;;  %v20322_v45 = vpop.f32.mrb[83].mxu0  ;;  %v5316_v19 = vmax.f32 %v4851_v51, 0.0 }
 0x822   :  { %14117 = vmatmul.mubr.bf16.gmra.mrb[184].mxu1 %v23742_v49  ;;  %v28801_v45 = vld [vmem:[#allocation77_spill] sm:$0xff] }
 0x823   :  { %v5317_v46 = vmax.f32 %v4854_v2, 0.0  ;;  %14609 = vmatpush1.bf16.msra.mxu1 %v27301_v13  ;;  %20428 = vmatmul.mubr.msk.bf16.gmra.mrb[160].mxu0 %vm2608_vm2, %v23743_v54  ;;  %v23747_v13 = vld [vmem:[%s28615_s1 + $0xb78] ss:$12 sps:$4 sm:$0xff]  }
 0x824   :  { %14610 = vmatprep.subr.bf16.mxu1 %v28710_v12  ;;  %14124 = vmatprep.mubr.bf16.mxu1 %v23744_v26  ;;  %v23754_v2 = vld [vmem:[#allocation2 + $0x568] ss:$68 sps:$4 sm:$0xff]  }
 0x825   :  { %20431 = vmatprep.mubr.msk.bf16.mxu0 %vm25283_vm1, %v28709_v60  ;;  %v27491_v15 = vpack.c.bf16 %v5317_v46, %v5316_v19 }
 0x826   :  { %v4858_v8 = vpop.f32.mrb[84].mxu0 }
 0x827   :  { %v4859_v7 = vadd.f32 %v4858_v8, %v28797_v28  ;;  %14611 = vmatpush1.bf16.msra.mxu1 %v27311_v0  ;;  %v20325_v58 = vpop.f32.mrb[85].mxu0  ;;  %v23755_v8 = vld [vmem:[%s28615_s1 + $0xba8] ss:$12 sps:$4 sm:$0xff]  }
 0x828   :  { %v4861_v41 = vpop.f32.mrb[86].mxu0  ;;  %15132 = vmatprep.subr.bf16.mxu1 %v28710_v12 }
 0x829   :  { %v4862_v20 = vadd.f32 %v4861_v41, %v28798_v22  ;;  %v20326_v4 = vpop.f32.mrb[87].mxu0  ;;  %v5318_v24 = vmax.f32 %v4859_v7, 0.0  ;;  %v28802_v7 = vld [vmem:[#allocation78_spill] sm:$0xff] }
 0x82a   :  { %14125 = vmatmul.mubr.bf16.gmra.mrb[188].mxu1 %v23746_v55  ;;  %v23756_v55 = vld [vmem:[#allocation2 + $0x5f4] ss:$68 sps:$4 sm:$0xff]  }
 0x82b   :  { %v5319_v48 = vmax.f32 %v4862_v20, 0.0  ;;  %20432 = vmatmul.mubr.msk.bf16.gmra.mrb[164].mxu0 %vm2608_vm2, %v23747_v13  ;;  %14132 = vmatprep.mubr.bf16.mxu1 %v23748_v30  ;;  %v23758_v4 = vld [vmem:[#allocation2 + $0x5f0] ss:$68 sps:$4 sm:$0xff]  }
 0x82c   :  { %20435 = vmatprep.mubr.msk.bf16.mxu0 %vm25283_vm1, %v28709_v60 }
 0x82d   :  { %v27503_v0 = vpack.c.bf16 %v5319_v48, %v5318_v24  ;;  %v28803_v24 = vld [vmem:[#allocation79_spill] sm:$0xff] }
 0x82e   :  { %v4866_v43 = vpop.f32.mrb[88].mxu0 }
 0x82f   :  { %v4867_v9 = vadd.f32 %v4866_v43, %v28799_v17  ;;  %v20329_v33 = vpop.f32.mrb[89].mxu0  ;;  %v23760_v17 = vld [vmem:[#allocation2 + $0x67c] ss:$68 sps:$4 sm:$0xff]  }
 0x830   :  { %v4869_v49 = vpop.f32.mrb[90].mxu0  ;;  %v28804_v33 = vld [vmem:[#allocation80_spill] sm:$0xff] }
 0x831   :  { %v4870_v51 = vadd.f32 %v4869_v49, %v28800_v1  ;;  %v20330_v31 = vpop.f32.mrb[91].mxu0  ;;  %v5320_v54 = vmax.f32 %v4867_v9, 0.0 }
 0x832   :  { %14133 = vmatmul.mubr.bf16.gmra.mrb[192].mxu1 %v23750_v21  ;;  %v23759_v21 = vld [vmem:[%s28615_s1 + $0xbc0] ss:$12 sps:$4 sm:$0xff]  }
 0x833   :  { %v5321_v61 = vmax.f32 %v4870_v51, 0.0  ;;  %20436 = vmatmul.mubr.msk.bf16.gmra.mrb[168].mxu0 %vm2608_vm2, %v23751_v42  ;;  %14140 = vmatprep.mubr.bf16.mxu1 %v23752_v52 }
 0x834   :  { %20439 = vmatprep.mubr.msk.bf16.mxu0 %vm25283_vm1, %v28709_v60 }
 0x835   :  { %v27513_v26 = vpack.c.bf16 %v5321_v61, %v5320_v54  ;;  %v23762_v54 = vld [vmem:[#allocation2 + $0x678] ss:$68 sps:$4 sm:$0xff]   ;;  %v28805_v61 = vld [vmem:[#allocation81_spill] sm:$0xff] }
 0x836   :  { %v4874_v36 = vpop.f32.mrb[92].mxu0 }
 0x837   :  { %v4875_v19 = vadd.f32 %v4874_v36, %v28801_v45  ;;  %v20333_v46 = vpop.f32.mrb[93].mxu0  ;;  %v23763_v45 = vld [vmem:[%s28615_s1 + $0xbd8] ss:$12 sps:$4 sm:$0xff]  }
 0x838   :  { %v4877_v28 = vpop.f32.mrb[94].mxu0 }
 0x839   :  { %v4878_v58 = vadd.f32 %v4877_v28, %v28802_v7  ;;  %v20334_v13 = vpop.f32.mrb[95].mxu0  ;;  %v5322_v30 = vmax.f32 %v4875_v19, 0.0  ;;  %v23764_v19 = vld [vmem:[#allocation2 + $0x704] ss:$68 sps:$4 sm:$0xff]  }
 0x83a   :  { %14141 = vmatmul.mubr.bf16.gmra.mrb[196].mxu1 %v23754_v2 }
 0x83b   :  { %v5323_v41 = vmax.f32 %v4878_v58, 0.0  ;;  %20440 = vmatmul.mubr.msk.bf16.gmra.mrb[172].mxu0 %vm2608_vm2, %v23755_v8  ;;  %14148 = vmatprep.mubr.bf16.mxu1 %v23756_v55  ;;  %v28806_v8 = vld [vmem:[#allocation82_spill] sm:$0xff] }
 0x83c   :  { %20443 = vmatprep.mubr.msk.bf16.mxu0 %vm25283_vm1, %v28709_v60 }
 0x83d   :  { %v27523_v22 = vpack.c.bf16 %v5323_v41, %v5322_v30  ;;  %v23766_v41 = vld [vmem:[#allocation2 + $0x700] ss:$68 sps:$4 sm:$0xff]  }
 0x83e   :  { %v4882_v20 = vpop.f32.mrb[96].mxu0 }
 0x83f   :  { %v4883_v48 = vadd.f32 %v4882_v20, %v28803_v24  ;;  %v20337_v43 = vpop.f32.mrb[97].mxu0  ;;  %v28807_v20 = vld [vmem:[#allocation83_spill] sm:$0xff] }
 0x840   :  { %v4885_v9 = vpop.f32.mrb[98].mxu0  ;;  %v23768_v43 = vld [vmem:[#allocation2 + $0x78c] ss:$68 sps:$4 sm:$0xff]  }
 0x841   :  { %v4886_v42 = vadd.f32 %v4885_v9, %v28804_v33  ;;  %v20338_v52 = vpop.f32.mrb[99].mxu0  ;;  %v5324_v49 = vmax.f32 %v4883_v48, 0.0  ;;  %v23767_v48 = vld [vmem:[%s28615_s1 + $0xbf0] ss:$12 sps:$4 sm:$0xff]  }
 0x842   :  { %14149 = vmatmul.mubr.bf16.gmra.mrb[200].mxu1 %v23758_v4 }
 0x843   :  { %v5325_v1 = vmax.f32 %v4886_v42, 0.0  ;;  %20444 = vmatmul.mubr.msk.bf16.gmra.mrb[176].mxu0 %vm2608_vm2, %v23759_v21  ;;  %14156 = vmatprep.mubr.bf16.mxu1 %v23760_v17  ;;  %v28808_v17 = vld [vmem:[#allocation84_spill] sm:$0xff] }
 0x844   :  { %20447 = vmatprep.mubr.msk.bf16.mxu0 %vm25283_vm1, %v28709_v60 }
 0x845   :  { %v27533_v51 = vpack.c.bf16 %v5325_v1, %v5324_v49 }
 0x846   :  { %v4890_v31 = vpop.f32.mrb[100].mxu0 }
 0x847   :  { %v4891_v36 = vadd.f32 %v4890_v31, %v28805_v61  ;;  %v20341_v2 = vpop.f32.mrb[101].mxu0  ;;  %v23770_v31 = vld [vmem:[#allocation2 + $0x788] ss:$68 sps:$4 sm:$0xff]  }
 0x848   :  { %v4893_v46 = vpop.f32.mrb[102].mxu0  ;;  %v23771_v2 = vld [vmem:[%s28615_s1 + $0xc08] ss:$0 sps:$4 sm:$0xff]  }
 0x849   :  { %v4894_v55 = vadd.f32 %v4893_v46, %v28806_v8  ;;  %v20342_v28 = vpop.f32.mrb[103].mxu0  ;;  %v5326_v7 = vmax.f32 %v4891_v36, 0.0  ;;  %v23776_v46 = vld [vmem:[#allocation2 + $0x4] ss:$68 sps:$4 sm:$0xff]   ;;  %v28810_v8 = vld [vmem:[#allocation86_spill] sm:$0xff] }
 0x84a   :  { %14157 = vmatmul.mubr.bf16.gmra.mrb[204].mxu1 %v23762_v54  ;;  %v28809_v54 = vld [vmem:[#allocation85_spill] sm:$0xff] }
 0x84b   :  { %v5327_v58 = vmax.f32 %v4894_v55, 0.0  ;;  %20448 = vmatmul.mubr.msk.bf16.gmra.mrb[180].mxu0 %vm2608_vm2, %v23763_v45  ;;  %14164 = vmatprep.mubr.bf16.mxu1 %v23764_v19  ;;  %v23772_v45 = vld [vmem:[#allocation2 + $0x814] ss:$68 sps:$4 sm:$0xff]  }
 0x84c   :  { %20451 = vmatprep.mubr.msk.bf16.mxu0 %vm25283_vm1, %v28709_v60 }
 0x84d   :  { %v27543_v13 = vpack.c.bf16 %v5327_v58, %v5326_v7 }
 0x84e   :  { %v4898_v30 = vpop.f32.mrb[104].mxu0 }
 0x84f   :  { %v4899_v4 = vadd.f32 %v4898_v30, %v28807_v20  ;;  %v20345_v24 = vpop.f32.mrb[105].mxu0  ;;  %v23777_v20 = vld [vmem:[#allocation2 + $0x810] ss:$68 sps:$4 sm:$0xff]  }
 0x850   :  { %v4901_v21 = vpop.f32.mrb[106].mxu0  ;;  %v23774_v24 = vld [vmem:[#allocation2] ss:$68 sps:$4 sm:$0xff]  }
 0x851   :  { %v4902_v9 = vadd.f32 %v4901_v21, %v28808_v17  ;;  %v20346_v33 = vpop.f32.mrb[107].mxu0  ;;  %v5328_v42 = vmax.f32 %v4899_v4, 0.0  ;;  %v23782_v21 = vld [vmem:[#allocation2 + $0x8c] ss:$68 sps:$4 sm:$0xff]  }
 0x852   :  { %14165 = vmatmul.mubr.bf16.gmra.mrb[208].mxu1 %v23766_v41 }
 0x853   :  { %v5329_v52 = vmax.f32 %v4902_v9, 0.0  ;;  %20452 = vmatmul.mubr.msk.bf16.gmra.mrb[184].mxu0 %vm2608_vm2, %v23767_v48  ;;  %14172 = vmatprep.mubr.bf16.mxu1 %v23768_v43  ;;  %v23778_v48 = vld [vmem:[#allocation2 + $0x89c] ss:$68 sps:$4 sm:$0xff]  }
 0x854   :  { %20455 = vmatprep.mubr.msk.bf16.mxu0 %vm25283_vm1, %v28709_v60 }
 0x855   :  { %v27553_v49 = vpack.c.bf16 %v5329_v52, %v5328_v42  ;;  %v28811_v52 = vld [vmem:[#allocation87_spill] sm:$0xff] }
 0x856   :  { %v4906_v1 = vpop.f32.mrb[108].mxu0 }
 0x857   :  { %v4907_v61 = vadd.f32 %v4906_v1, %v28809_v54  ;;  %v20349_v36 = vpop.f32.mrb[109].mxu0 }
 0x858   :  { %v4909_v19 = vpop.f32.mrb[110].mxu0  ;;  %v23784_v36 = vld [vmem:[#allocation2 + $0x924] ss:$68 sps:$4 sm:$0xff]  }
 0x859   :  { %v4910_v55 = vadd.f32 %v4909_v19, %v28810_v8  ;;  %v20350_v28 = vpop.f32.mrb[111].mxu0  ;;  %v5330_v7 = vmax.f32 %v4907_v61, 0.0  ;;  %v23780_v61 = vld [vmem:[#allocation2 + $0x88] ss:$68 sps:$4 sm:$0xff]   ;;  %v23788_v19 = vld [vmem:[#allocation2 + $0x114] ss:$68 sps:$4 sm:$0xff]  }
 0x85a   :  { %14173 = vmatmul.mubr.bf16.gmra.mrb[212].mxu1 %v23770_v31  ;;  %v23783_v31 = vld [vmem:[#allocation2 + $0x898] ss:$68 sps:$4 sm:$0xff]  }
 0x85b   :  { %v5331_v58 = vmax.f32 %v4910_v55, 0.0  ;;  %20456 = vmatmul.mubr.msk.bf16.gmra.mrb[188].mxu0 %vm2608_vm2, %v23771_v2  ;;  %14180 = vmatprep.mubr.bf16.mxu1 %v23772_v45  ;;  %v28812_v2 = vld [vmem:[#allocation88_spill] sm:$0xff] }
 0x85c   :  { %12404 = vmatprep.mubr.bf16.mxu0 %v23776_v46 }
 0x85d   :  { %v27561_v30 = vpack.c.bf16 %v5331_v58, %v5330_v7  ;;  %v28813_v7 = vld [vmem:[#allocation89_spill] sm:$0xff] }
 0x85e   :  { %v4914_v41 = vpop.f32.mrb[192].mxu0 }
 0x85f   :  { %v20353_v4 = vpop.f32.mrb[193].mxu0  ;;  %v5332_v17 = vmax.f32 %v4914_v41, 0.0  ;;  %v23789_v41 = vld [vmem:[#allocation2 + $0x920] ss:$68 sps:$4 sm:$0xff]  }
 0x860   :  { %v4917_v43 = vpop.f32.mrb[194].mxu0  ;;  %v23786_v4 = vld [vmem:[#allocation2 + $0x110] ss:$68 sps:$4 sm:$0xff]  }
 0x861   :  { %v5333_v9 = vmax.f32 %v4917_v43, 0.0  ;;  %v20354_v33 = vpop.f32.mrb[195].mxu0 }
 0x862   :  { %14181 = vmatmul.mubr.bf16.gmra.mrb[216].mxu1 %v23777_v20 }
 0x863   :  { %v27563_v42 = vpack.c.bf16 %v5333_v9, %v5332_v17  ;;  %12405 = vmatmul.mubr.bf16.vlgmr.msra.gmra.mrb[112].mxu0 %v23774_v24  ;;  %14188 = vmatprep.mubr.bf16.mxu1 %v23778_v48  ;;  %v23790_v24 = vld [vmem:[#allocation2 + $0x9ac] ss:$68 sps:$4 sm:$0xff]  }
 0x864   :  { %12925 = vmatpush1.bf16.msra.mxu0 %v28811_v52  ;;  %12412 = vmatprep.mubr.bf16.mxu0 %v23782_v21  ;;  %v28814_v48 = vld [vmem:[#allocation90_spill] sm:$0xff]  ;;  %v23794_v21 = vld [vmem:[#allocation2 + $0x19c] ss:$68 sps:$4 sm:$0xff]  }
 0x865   :  { %12926 = vmatprep.subr.bf16.mxu0 %v28710_v12 }
 0x866   :  { %v4922_v1 = vpop.f32.mrb[196].mxu0 }
 0x867   :  { %v20357_v54 = vpop.f32.mrb[197].mxu0  ;;  %v5334_v46 = vmax.f32 %v4922_v1, 0.0  ;;  %v28815_v1 = vld [vmem:[#allocation91_spill] sm:$0xff] }
 0x868   :  { %12927 = vmatpush1.bf16.msra.mxu0 %v28812_v2  ;;  %v4925_v45 = vpop.f32.mrb[198].mxu0  ;;  %v23795_v54 = vld [vmem:[#allocation2 + $0x9a8] ss:$68 sps:$4 sm:$0xff]   ;;  %v23796_v2 = vld [vmem:[#allocation2 + $0xa34] ss:$68 sps:$4 sm:$0xff]  }
 0x869   :  { %v5335_v8 = vmax.f32 %v4925_v45, 0.0  ;;  %v20358_v55 = vpop.f32.mrb[199].mxu0  ;;  %12928 = vmatprep.subr.bf16.mxu0 %v28710_v12  ;;  %v28816_v45 = vld [vmem:[#allocation92_spill] sm:$0xff] }
 0x86a   :  { %14189 = vmatmul.mubr.bf16.gmra.mrb[220].mxu1 %v23783_v31 }
 0x86b   :  { %12413 = vmatmul.mubr.bf16.gmra.mrb[116].mxu0 %v23780_v61  ;;  %14196 = vmatprep.mubr.bf16.mxu1 %v23784_v36  ;;  %v27569_v28 = vpack.c.bf16 %v5335_v8, %v5334_v46  ;;  %v23792_v36 = vld [vmem:[#allocation2 + $0x198] ss:$68 sps:$4 sm:$0xff]   ;;  %v23800_v46 = vld [vmem:[#allocation2 + $0x224] ss:$68 sps:$4 sm:$0xff]  }
 0x86c   :  { %12929 = vmatpush1.bf16.msra.mxu0 %v28813_v7  ;;  %12420 = vmatprep.mubr.bf16.mxu0 %v23788_v19 }
 0x86d   :  { %12930 = vmatprep.subr.bf16.mxu0 %v28710_v12 }
 0x86e   :  { %v4930_v58 = vpop.f32.mrb[200].mxu0 }
 0x86f   :  { %v20361_v20 = vpop.f32.mrb[201].mxu0  ;;  %v5336_v17 = vmax.f32 %v4930_v58, 0.0 }
 0x870   :  { %12931 = vmatpush1.bf16.msra.mxu0 %v28814_v48  ;;  %v4933_v43 = vpop.f32.mrb[202].mxu0  ;;  %v23798_v48 = vld [vmem:[#allocation2 + $0x220] ss:$68 sps:$4 sm:$0xff]  }
 0x871   :  { %v5337_v9 = vmax.f32 %v4933_v43, 0.0  ;;  %v20362_v33 = vpop.f32.mrb[203].mxu0  ;;  %12932 = vmatprep.subr.bf16.mxu0 %v28710_v12  ;;  %v23802_v43 = vld [vmem:[#allocation2 + $0xabc] ss:$68 sps:$4 sm:$0xff]  }
 0x872   :  { %14197 = vmatmul.mubr.bf16.gmra.mrb[224].mxu1 %v23789_v41  ;;  %v28817_v41 = vld [vmem:[#allocation93_spill] sm:$0xff] }
 0x873   :  { %12421 = vmatmul.mubr.bf16.gmra.mrb[120].mxu0 %v23786_v4  ;;  %14204 = vmatprep.mubr.bf16.mxu1 %v23790_v24  ;;  %v27575_v52 = vpack.c.bf16 %v5337_v9, %v5336_v17  ;;  %v23801_v4 = vld [vmem:[#allocation2 + $0xa30] ss:$68 sps:$4 sm:$0xff]  }
 0x874   :  { %12933 = vmatpush1.bf16.msra.mxu0 %v28815_v1  ;;  %12428 = vmatprep.mubr.bf16.mxu0 %v23794_v21  ;;  %v28818_v21 = vld [vmem:[#allocation94_spill] sm:$0xff] }
 0x875   :  { %12934 = vmatprep.subr.bf16.mxu0 %v28710_v12  ;;  %v23806_v9 = vld [vmem:[#allocation2 + $0x2ac] ss:$68 sps:$4 sm:$0xff]  }
 0x876   :  { %v4938_v31 = vpop.f32.mrb[204].mxu0 }
 0x877   :  { %v20365_v61 = vpop.f32.mrb[205].mxu0  ;;  %v5338_v8 = vmax.f32 %v4938_v31, 0.0 }
 0x878   :  { %12935 = vmatpush1.bf16.msra.mxu0 %v28816_v45  ;;  %v4941_v19 = vpop.f32.mrb[206].mxu0  ;;  %v28819_v61 = vld [vmem:[#allocation95_spill] sm:$0xff] }
 0x879   :  { %v5339_v55 = vmax.f32 %v4941_v19, 0.0  ;;  %v20366_v7 = vpop.f32.mrb[207].mxu0  ;;  %12936 = vmatprep.subr.bf16.mxu0 %v28710_v12  ;;  %v23804_v19 = vld [vmem:[#allocation2 + $0x2a8] ss:$68 sps:$4 sm:$0xff]  }
 0x87a   :  { %14205 = vmatmul.mubr.bf16.gmra.mrb[228].mxu1 %v23795_v54  ;;  %v23812_v7 = vld [vmem:[#allocation2 + $0x334] ss:$68 sps:$4 sm:$0xff]  }
 0x87b   :  { %12429 = vmatmul.mubr.bf16.gmra.mrb[124].mxu0 %v23792_v36  ;;  %14212 = vmatprep.mubr.bf16.mxu1 %v23796_v2  ;;  %v27581_v58 = vpack.c.bf16 %v5339_v55, %v5338_v8  ;;  %v23807_v2 = vld [vmem:[#allocation2 + $0xab8] ss:$68 sps:$4 sm:$0xff]  }
 0x87c   :  { %12937 = vmatpush1.bf16.msra.mxu0 %v28817_v41  ;;  %12436 = vmatprep.mubr.bf16.mxu0 %v23800_v46  ;;  %v23808_v46 = vld [vmem:[#allocation2 + $0xb44] ss:$68 sps:$4 sm:$0xff]   ;;  %v28820_v8 = vld [vmem:[#allocation96_spill] sm:$0xff] }
 0x87d   :  { %12938 = vmatprep.subr.bf16.mxu0 %v28710_v12 }
 0x87e   :  { %v4946_v20 = vpop.f32.mrb[208].mxu0 }
 0x87f   :  { %v20369_v24 = vpop.f32.mrb[209].mxu0  ;;  %v5340_v33 = vmax.f32 %v4946_v20, 0.0 }
 0x880   :  { %12939 = vmatpush1.bf16.msra.mxu0 %v28818_v21  ;;  %v4949_v17 = vpop.f32.mrb[210].mxu0  ;;  %v23813_v21 = vld [vmem:[#allocation2 + $0xb40] ss:$68 sps:$4 sm:$0xff]  }
 0x881   :  { %v5341_v1 = vmax.f32 %v4949_v17, 0.0  ;;  %v20370_v31 = vpop.f32.mrb[211].mxu0  ;;  %12940 = vmatprep.subr.bf16.mxu0 %v28710_v12 }
 0x882   :  { %14213 = vmatmul.mubr.bf16.gmra.mrb[232].mxu1 %v23801_v4 }
 0x883   :  { %12437 = vmatmul.mubr.bf16.gmra.mrb[128].mxu0 %v23798_v48  ;;  %14220 = vmatprep.mubr.bf16.mxu1 %v23802_v43  ;;  %v27587_v54 = vpack.c.bf16 %v5341_v1, %v5340_v33  ;;  %v28821_v48 = vld [vmem:[#allocation97_spill] sm:$0xff]  ;;  %v23814_v33 = vld [vmem:[#allocation2 + $0xbcc] ss:$68 sps:$4 sm:$0xff]  }
 0x884   :  { %12941 = vmatpush1.bf16.msra.mxu0 %v28819_v61  ;;  %12444 = vmatprep.mubr.bf16.mxu0 %v23806_v9  ;;  %v23810_v9 = vld [vmem:[#allocation2 + $0x330] ss:$68 sps:$4 sm:$0xff]   ;;  %v23818_v61 = vld [vmem:[#allocation2 + $0x3bc] ss:$68 sps:$4 sm:$0xff]  }
 0x885   :  { %12942 = vmatprep.subr.bf16.mxu0 %v28710_v12  ;;  %v28822_v1 = vld [vmem:[#allocation98_spill] sm:$0xff] }
 0x886   :  { %v4954_v36 = vpop.f32.mrb[212].mxu0 }
 0x887   :  { %v20373_v45 = vpop.f32.mrb[213].mxu0  ;;  %v5342_v41 = vmax.f32 %v4954_v36, 0.0 }
 0x888   :  { %12943 = vmatpush1.bf16.msra.mxu0 %v28820_v8  ;;  %v4957_v55 = vpop.f32.mrb[214].mxu0 }
 0x889   :  { %v5343_v20 = vmax.f32 %v4957_v55, 0.0  ;;  %v20374_v4 = vpop.f32.mrb[215].mxu0  ;;  %12944 = vmatprep.subr.bf16.mxu0 %v28710_v12  ;;  %v23819_v55 = vld [vmem:[#allocation2 + $0xbc8] ss:$68 sps:$4 sm:$0xff]  }
 0x88a   :  { %14221 = vmatmul.mubr.bf16.gmra.mrb[236].mxu1 %v23807_v2  ;;  %v28824_v4 = vld [vmem:[#allocation100_spill] sm:$0xff] }
 0x88b   :  { %12445 = vmatmul.mubr.bf16.gmra.mrb[132].mxu0 %v23804_v19  ;;  %14228 = vmatprep.mubr.bf16.mxu1 %v23808_v46  ;;  %v27593_v24 = vpack.c.bf16 %v5343_v20, %v5342_v41  ;;  %v28823_v46 = vld [vmem:[#allocation99_spill] sm:$0xff] }
 0x88c   :  { %12945 = vmatpush1.bf16.msra.mxu0 %v28821_v48  ;;  %12452 = vmatprep.mubr.bf16.mxu0 %v23812_v7  ;;  %v23816_v41 = vld [vmem:[#allocation2 + $0x3b8] ss:$68 sps:$4 sm:$0xff]  }
 0x88d   :  { %12946 = vmatprep.subr.bf16.mxu0 %v28710_v12  ;;  %v23820_v20 = vld [vmem:[#allocation2 + $0xc54] ss:$68 sps:$4 sm:$0xff]  }
 0x88e   :  { %v4962_v43 = vpop.f32.mrb[216].mxu0 }
 0x88f   :  { %v20377_v17 = vpop.f32.mrb[217].mxu0  ;;  %v5344_v36 = vmax.f32 %v4962_v43, 0.0  ;;  %v23824_v43 = vld [vmem:[#allocation2 + $0x444] ss:$68 sps:$4 sm:$0xff]  }
 0x890   :  { %12947 = vmatpush1.bf16.msra.mxu0 %v28822_v1  ;;  %v4965_v31 = vpop.f32.mrb[218].mxu0  ;;  %v28825_v1 = vld [vmem:[#allocation101_spill] sm:$0xff] }
 0x891   :  { %v5345_v2 = vmax.f32 %v4965_v31, 0.0  ;;  %v20378_v45 = vpop.f32.mrb[219].mxu0  ;;  %12948 = vmatprep.subr.bf16.mxu0 %v28710_v12 }
 0x892   :  { %14229 = vmatmul.mubr.bf16.gmra.mrb[240].mxu1 %v23813_v21  ;;  %v23826_v45 = vld [vmem:[#allocation2 + $0xcdc] ss:$68 sps:$4 sm:$0xff]  }
 0x893   :  { %12453 = vmatmul.mubr.bf16.gmra.mrb[136].mxu0 %v23810_v9  ;;  %14236 = vmatprep.mubr.bf16.mxu1 %v23814_v33  ;;  %v27599_v19 = vpack.c.bf16 %v5345_v2, %v5344_v36  ;;  %v23822_v2 = vld [vmem:[#allocation2 + $0x440] ss:$68 sps:$4 sm:$0xff]  }
 0x894   :  { %12949 = vmatpush1.bf16.msra.mxu0 %v28823_v46  ;;  %12460 = vmatprep.mubr.bf16.mxu0 %v23818_v61  ;;  %v23825_v61 = vld [vmem:[#allocation2 + $0xc50] ss:$68 sps:$4 sm:$0xff]  }
 0x895   :  { %12950 = vmatprep.subr.bf16.mxu0 %v28710_v12 }
 0x896   :  { %v4970_v8 = vpop.f32.mrb[220].mxu0 }
 0x897   :  { %v20381_v7 = vpop.f32.mrb[221].mxu0  ;;  %v5346_v17 = vmax.f32 %v4970_v8, 0.0  ;;  %v23830_v8 = vld [vmem:[#allocation2 + $0x4cc] ss:$68 sps:$4 sm:$0xff]  }
 0x898   :  { %12951 = vmatpush1.bf16.msra.mxu0 %v28824_v4  ;;  %v4973_v48 = vpop.f32.mrb[222].mxu0 }
 0x899   :  { %v5347_v21 = vmax.f32 %v4973_v48, 0.0  ;;  %v20382_v9 = vpop.f32.mrb[223].mxu0  ;;  %12952 = vmatprep.subr.bf16.mxu0 %v28710_v12  ;;  %v23831_v48 = vld [vmem:[#allocation2 + $0xcd8] ss:$68 sps:$4 sm:$0xff]  }
 0x89a   :  { %14237 = vmatmul.mubr.bf16.gmra.mrb[244].mxu1 %v23819_v55 }
 0x89b   :  { %12461 = vmatmul.mubr.bf16.gmra.mrb[140].mxu0 %v23816_v41  ;;  %14244 = vmatprep.mubr.bf16.mxu1 %v23820_v20  ;;  %v27605_v33 = vpack.c.bf16 %v5347_v21, %v5346_v17  ;;  %v23828_v17 = vld [vmem:[#allocation2 + $0x4c8] ss:$68 sps:$4 sm:$0xff]  }
 0x89c   :  { %12953 = vmatpush1.bf16.msra.mxu0 %v28825_v1  ;;  %12468 = vmatprep.mubr.bf16.mxu0 %v23824_v43  ;;  %v23834_v21 = vld [vmem:[#allocation2 + $0xd64] ss:$68 sps:$4 sm:$0xff]  }
 0x89d   :  { %12954 = vmatprep.subr.bf16.mxu0 %v28710_v12 }
 0x89e   :  { %v4978_v31 = vpop.f32.mrb[224].mxu0 }
 0x89f   :  { %v20385_v36 = vpop.f32.mrb[225].mxu0  ;;  %v5348_v7 = vmax.f32 %v4978_v31, 0.0 }
 0x8a0   :  { %12955 = vmatpush1.bf16.msra.mxu0 %v26822_v25  ;;  %v4981_v46 = vpop.f32.mrb[226].mxu0  ;;  %v23837_v25 = vld [vmem:[#allocation2 + $0x554] ss:$68 sps:$4 sm:$0xff]  }
 0x8a1   :  { %v5349_v55 = vmax.f32 %v4981_v46, 0.0  ;;  %v20386_v41 = vpop.f32.mrb[227].mxu0  ;;  %13476 = vmatprep.subr.bf16.mxu0 %v28710_v12 }
 0x8a2   :  { %14245 = vmatmul.mubr.bf16.gmra.mrb[248].mxu1 %v23825_v61  ;;  %v23835_v41 = vld [vmem:[#allocation2 + $0x550] ss:$68 sps:$4 sm:$0xff]  }
 0x8a3   :  { %12469 = vmatmul.mubr.bf16.gmra.mrb[144].mxu0 %v23822_v2  ;;  %14252 = vmatprep.mubr.bf16.mxu1 %v23826_v45  ;;  %v27611_v20 = vpack.c.bf16 %v5349_v55, %v5348_v7 }
 0x8a4   :  { %12476 = vmatprep.mubr.bf16.mxu0 %v23830_v8  ;;  %v23832_v8 = vld [vmem:[#allocation2 + $0xd60] ss:$68 sps:$4 sm:$0xff]  }
 0x8a5   :  { %28826 = vst [vmem:[#allocation5_spill] sm:$0xff] %v27611_v20 }
 0x8a6   :  { %v4986_v4 = vpop.f32.mrb[228].mxu0 }
 0x8a7   :  { %v20389_v43 = vpop.f32.mrb[229].mxu0  ;;  %v5350_v1 = vmax.f32 %v4986_v4, 0.0 }
 0x8a8   :  { %v4989_v9 = vpop.f32.mrb[230].mxu0  ;;  %v23838_v43 = vld [vmem:[#allocation2 + $0xdec] ss:$68 sps:$4 sm:$0xff]  }
 0x8a9   :  { %v5351_v36 = vmax.f32 %v4989_v9, 0.0  ;;  %v20390_v31 = vpop.f32.mrb[231].mxu0  ;;  %v23842_v9 = vld [vmem:[#allocation2 + $0x5dc] ss:$68 sps:$4 sm:$0xff]  }
 0x8aa   :  { %14253 = vmatmul.mubr.bf16.gmra.mrb[252].mxu1 %v23831_v48 }
 0x8ab   :  { %12477 = vmatmul.mubr.bf16.gmra.mrb[0].mxu0 %v23828_v17  ;;  %14260 = vmatprep.mubr.bf16.mxu1 %v23834_v21  ;;  %v27613_v46 = vpack.c.bf16 %v5351_v36, %v5350_v1  ;;  %v23843_v1 = vld [vmem:[#allocation2 + $0xde8] ss:$68 sps:$4 sm:$0xff]  }
 0x8ac   :  { %12484 = vmatprep.mubr.bf16.mxu0 %v23837_v25 }
 0x8ad   :  { %28827 = vst [vmem:[#allocation6_spill] sm:$0xff] %v27613_v46  ;;  %v27615_v61 = vpop.f32.mrb[148].mxu1 }
 0x8ae   :  { %28828 = vst [vmem:[#allocation7_spill] sm:$0xff] %v27615_v61  ;;  %v4994_v2 = vpop.f32.mrb[232].mxu0  ;;  %v14016_v45 = vpop.f32.mrb[149].mxu1  ;;  %v23848_v61 = vld [vmem:[#allocation2 + $0x664] ss:$68 sps:$4 sm:$0xff]  }
 0x8af   :  { %v20393_v7 = vpop.f32.mrb[233].mxu0  ;;  %v27617_v55 = vpop.f32.mrb[150].mxu1  ;;  %v5352_v31 = vmax.f32 %v4994_v2, 0.0  ;;  %v23840_v45 = vld [vmem:[#allocation2 + $0x5d8] ss:$68 sps:$4 sm:$0xff]  }
 0x8b0   :  { %28829 = vst [vmem:[#allocation8_spill] sm:$0xff] %v27617_v55  ;;  %v4997_v60 = vpop.f32.mrb[234].mxu0  ;;  %v14019_v4 = vpop.f32.mrb[151].mxu1  ;;  %v23844_v7 = vld [vmem:[#allocation2 + $0xe74] ss:$68 sps:$4 sm:$0xff]  }
 0x8b1   :  { %v5353_v48 = vmax.f32 %v4997_v60, 0.0  ;;  %v20394_v17 = vpop.f32.mrb[235].mxu0 }
 0x8b2   :  { %14261 = vmatmul.mubr.bf16.gmra.mrb[148].mxu1 %v23832_v8  ;;  %v23849_v8 = vld [vmem:[#allocation2 + $0xe70] ss:$68 sps:$4 sm:$0xff]  }
 0x8b3   :  { %12485 = vmatmul.mubr.bf16.gmra.mrb[4].mxu0 %v23835_v41  ;;  %14268 = vmatprep.mubr.bf16.mxu1 %v23838_v43  ;;  %v27619_v21 = vpack.c.bf16 %v5353_v48, %v5352_v31  ;;  %v23846_v43 = vld [vmem:[#allocation2 + $0x660] ss:$68 sps:$4 sm:$0xff]   ;;  %v23854_v48 = vld [vmem:[#allocation2 + $0x6ec] ss:$68 sps:$4 sm:$0xff]  }
 0x8b4   :  { %12492 = vmatprep.mubr.bf16.mxu0 %v23842_v9  ;;  %v23850_v9 = vld [vmem:[#allocation2 + $0xefc] ss:$68 sps:$4 sm:$0xff]  }
 0x8b5   :  { %28830 = vst [vmem:[#allocation9_spill] sm:$0xff] %v27619_v21 }
 0x8b6   :  { %v5002_v25 = vpop.f32.mrb[236].mxu0 }
 0x8b7   :  { %v20397_v36 = vpop.f32.mrb[237].mxu0  ;;  %v5354_v46 = vmax.f32 %v5002_v25, 0.0 }
 0x8b8   :  { %v5005_v55 = vpop.f32.mrb[238].mxu0 }
 0x8b9   :  { %v5355_v20 = vmax.f32 %v5005_v55, 0.0  ;;  %v20398_v4 = vpop.f32.mrb[239].mxu0 }
 0x8ba   :  { %14269 = vmatmul.mubr.bf16.gmra.mrb[0].mxu1 %v23843_v1  ;;  %v23856_v1 = vld [vmem:[#allocation2 + $0xf84] ss:$68 sps:$4 sm:$0xff]  }
 0x8bb   :  { %12493 = vmatmul.mubr.bf16.gmra.mrb[8].mxu0 %v23840_v45  ;;  %14276 = vmatprep.mubr.bf16.mxu1 %v23844_v7  ;;  %v27621_v60 = vpack.c.bf16 %v5355_v20, %v5354_v46  ;;  %v23855_v20 = vld [vmem:[#allocation2 + $0xef8] ss:$68 sps:$4 sm:$0xff]  }
 0x8bc   :  { %12500 = vmatprep.mubr.bf16.mxu0 %v23848_v61  ;;  %v23852_v61 = vld [vmem:[#allocation2 + $0x6e8] ss:$68 sps:$4 sm:$0xff]   ;;  %v23860_v7 = vld [vmem:[#allocation2 + $0x774] ss:$68 sps:$4 sm:$0xff]  }
 0x8bd   :  { %28831 = vst [vmem:[#allocation10_spill] sm:$0xff] %v27621_v60 }
 0x8be   :  { %v5010_v2 = vpop.f32.mrb[240].mxu0 }
 0x8bf   :  { %v20401_v41 = vpop.f32.mrb[241].mxu0  ;;  %v5356_v17 = vmax.f32 %v5010_v2, 0.0 }
 0x8c0   :  { %v5013_v31 = vpop.f32.mrb[242].mxu0 }
 0x8c1   :  { %v5357_v36 = vmax.f32 %v5013_v31, 0.0  ;;  %v20402_v21 = vpop.f32.mrb[243].mxu0  ;;  %v23862_v31 = vld [vmem:[#allocation2 + $0x100c] ss:$68 sps:$4 sm:$0xff]  }
 0x8c2   :  { %14277 = vmatmul.mubr.bf16.gmra.mrb[4].mxu1 %v23849_v8  ;;  %v23861_v8 = vld [vmem:[#allocation2 + $0xf80] ss:$68 sps:$4 sm:$0xff]  }
 0x8c3   :  { %12501 = vmatmul.mubr.bf16.gmra.mrb[12].mxu0 %v23846_v43  ;;  %14284 = vmatprep.mubr.bf16.mxu1 %v23850_v9  ;;  %v27623_v55 = vpack.c.bf16 %v5357_v36, %v5356_v17  ;;  %v23858_v9 = vld [vmem:[#allocation2 + $0x770] ss:$68 sps:$4 sm:$0xff]   ;;  %v23866_v17 = vld [vmem:[#allocation2 + $0x7fc] ss:$68 sps:$4 sm:$0xff]  }
 0x8c4   :  { %12508 = vmatprep.mubr.bf16.mxu0 %v23854_v48 }
 0x8c5   :  { %28832 = vst [vmem:[#allocation11_spill] sm:$0xff] %v27623_v55 }
 0x8c6   :  { %v5018_v25 = vpop.f32.mrb[244].mxu0 }
 0x8c7   :  { %v20405_v46 = vpop.f32.mrb[245].mxu0  ;;  %v5358_v4 = vmax.f32 %v5018_v25, 0.0 }
 0x8c8   :  { %v5021_v45 = vpop.f32.mrb[246].mxu0 }
 0x8c9   :  { %v5359_v41 = vmax.f32 %v5021_v45, 0.0  ;;  %v20406_v60 = vpop.f32.mrb[247].mxu0  ;;  %v23868_v45 = vld [vmem:[#allocation2 + $0x1094] ss:$68 sps:$4 sm:$0xff]  }
 0x8ca   :  { %14285 = vmatmul.mubr.bf16.gmra.mrb[8].mxu1 %v23855_v20  ;;  %v23867_v20 = vld [vmem:[#allocation2 + $0x1008] ss:$68 sps:$4 sm:$0xff]  }
 0x8cb   :  { %12509 = vmatmul.mubr.bf16.gmra.mrb[16].mxu0 %v23852_v61  ;;  %14292 = vmatprep.mubr.bf16.mxu1 %v23856_v1  ;;  %v27625_v21 = vpack.c.bf16 %v5359_v41, %v5358_v4  ;;  %v23864_v1 = vld [vmem:[#allocation2 + $0x7f8] ss:$68 sps:$4 sm:$0xff]   ;;  %v23872_v4 = vld [vmem:[#allocation2 + $0x884] ss:$68 sps:$4 sm:$0xff]  }
 0x8cc   :  { %12516 = vmatprep.mubr.bf16.mxu0 %v23860_v7 }
 0x8cd   :  { %28833 = vst [vmem:[#allocation12_spill] sm:$0xff] %v27625_v21 }
 0x8ce   :  { %v5026_v2 = vpop.f32.mrb[248].mxu0 }
 0x8cf   :  { %v20409_v43 = vpop.f32.mrb[249].mxu0  ;;  %v5360_v36 = vmax.f32 %v5026_v2, 0.0 }
 0x8d0   :  { %v5029_v48 = vpop.f32.mrb[250].mxu0 }
 0x8d1   :  { %v5361_v46 = vmax.f32 %v5029_v48, 0.0  ;;  %v20410_v55 = vpop.f32.mrb[251].mxu0  ;;  %v23874_v48 = vld [vmem:[#allocation2 + $0x111c] ss:$68 sps:$4 sm:$0xff]  }
 0x8d2   :  { %14293 = vmatmul.mubr.bf16.gmra.mrb[12].mxu1 %v23861_v8  ;;  %v23873_v8 = vld [vmem:[#allocation2 + $0x1090] ss:$68 sps:$4 sm:$0xff]  }
 0x8d3   :  { %12517 = vmatmul.mubr.bf16.gmra.mrb[20].mxu0 %v23858_v9  ;;  %14300 = vmatprep.mubr.bf16.mxu1 %v23862_v31  ;;  %v27627_v60 = vpack.c.bf16 %v5361_v46, %v5360_v36  ;;  %v23870_v31 = vld [vmem:[#allocation2 + $0x880] ss:$68 sps:$4 sm:$0xff]   ;;  %v23878_v36 = vld [vmem:[#allocation2 + $0x90c] ss:$68 sps:$4 sm:$0xff]  }
 0x8d4   :  { %12524 = vmatprep.mubr.bf16.mxu0 %v23866_v17 }
 0x8d5   :  { %28834 = vst [vmem:[#allocation13_spill] sm:$0xff] %v27627_v60 }
 0x8d6   :  { %v5034_v25 = vpop.f32.mrb[252].mxu0 }
 0x8d7   :  { %v20413_v61 = vpop.f32.mrb[253].mxu0  ;;  %v5362_v41 = vmax.f32 %v5034_v25, 0.0 }
 0x8d8   :  { %v5037_v7 = vpop.f32.mrb[254].mxu0 }
 0x8d9   :  { %v5363_v43 = vmax.f32 %v5037_v7, 0.0  ;;  %v20414_v21 = vpop.f32.mrb[255].mxu0  ;;  %v23880_v7 = vld [vmem:[#allocation2 + $0x11a4] ss:$68 sps:$4 sm:$0xff]  }
 0x8da   :  { %14301 = vmatmul.mubr.bf16.gmra.mrb[16].mxu1 %v23867_v20  ;;  %v23879_v20 = vld [vmem:[#allocation2 + $0x1118] ss:$68 sps:$4 sm:$0xff]  }
 0x8db   :  { %12525 = vmatmul.mubr.bf16.gmra.mrb[24].mxu0 %v23864_v1  ;;  %14308 = vmatprep.mubr.bf16.mxu1 %v23868_v45  ;;  %v27629_v55 = vpack.c.bf16 %v5363_v43, %v5362_v41  ;;  %v23876_v45 = vld [vmem:[#allocation2 + $0x908] ss:$68 sps:$4 sm:$0xff]   ;;  %v23884_v41 = vld [vmem:[#allocation2 + $0x994] ss:$68 sps:$4 sm:$0xff]  }
 0x8dc   :  { %12532 = vmatprep.mubr.bf16.mxu0 %v23872_v4 }
 0x8dd   :  { %28835 = vst [vmem:[#allocation14_spill] sm:$0xff] %v27629_v55 }
 0x8de   :  { %v5042_v2 = vpop.f32.mrb[148].mxu0 }
 0x8df   :  { %v20417_v9 = vpop.f32.mrb[149].mxu0  ;;  %v5364_v46 = vmax.f32 %v5042_v2, 0.0 }
 0x8e0   :  { %v5045_v17 = vpop.f32.mrb[150].mxu0 }
 0x8e1   :  { %v5365_v61 = vmax.f32 %v5045_v17, 0.0  ;;  %v20418_v60 = vpop.f32.mrb[151].mxu0  ;;  %v23886_v17 = vld [vmem:[#allocation2 + $0x122c] ss:$68 sps:$4 sm:$0xff]  }
 0x8e2   :  { %14309 = vmatmul.mubr.bf16.gmra.mrb[20].mxu1 %v23873_v8  ;;  %v23885_v8 = vld [vmem:[#allocation2 + $0x11a0] ss:$68 sps:$4 sm:$0xff]  }
 0x8e3   :  { %12533 = vmatmul.mubr.bf16.gmra.mrb[28].mxu0 %v23870_v31  ;;  %14316 = vmatprep.mubr.bf16.mxu1 %v23874_v48  ;;  %v27631_v21 = vpack.c.bf16 %v5365_v61, %v5364_v46  ;;  %v23882_v48 = vld [vmem:[#allocation2 + $0x990] ss:$68 sps:$4 sm:$0xff]   ;;  %v23890_v46 = vld [vmem:[#allocation2 + $0xa1c] ss:$68 sps:$4 sm:$0xff]  }
 0x8e4   :  { %12540 = vmatprep.mubr.bf16.mxu0 %v23878_v36 }
 0x8e5   :  { %28836 = vst [vmem:[#allocation15_spill] sm:$0xff] %v27631_v21 }
 0x8e6   :  { %v5050_v25 = vpop.f32.mrb[152].mxu0 }
 0x8e7   :  { %v20421_v1 = vpop.f32.mrb[153].mxu0  ;;  %v5366_v43 = vmax.f32 %v5050_v25, 0.0 }
 0x8e8   :  { %v5053_v4 = vpop.f32.mrb[154].mxu0 }
 0x8e9   :  { %v5367_v9 = vmax.f32 %v5053_v4, 0.0  ;;  %v20422_v55 = vpop.f32.mrb[155].mxu0  ;;  %v23892_v4 = vld [vmem:[#allocation2 + $0x12b4] ss:$68 sps:$4 sm:$0xff]  }
 0x8ea   :  { %14317 = vmatmul.mubr.bf16.gmra.mrb[24].mxu1 %v23879_v20  ;;  %v23891_v20 = vld [vmem:[#allocation2 + $0x1228] ss:$68 sps:$4 sm:$0xff]  }
 0x8eb   :  { %12541 = vmatmul.mubr.bf16.gmra.mrb[32].mxu0 %v23876_v45  ;;  %14324 = vmatprep.mubr.bf16.mxu1 %v23880_v7  ;;  %v27633_v60 = vpack.c.bf16 %v5367_v9, %v5366_v43  ;;  %v23888_v7 = vld [vmem:[#allocation2 + $0xa18] ss:$68 sps:$4 sm:$0xff]   ;;  %v23896_v43 = vld [vmem:[#allocation2 + $0xaa4] ss:$68 sps:$4 sm:$0xff]  }
 0x8ec   :  { %12548 = vmatprep.mubr.bf16.mxu0 %v23884_v41 }
 0x8ed   :  { %28837 = vst [vmem:[#allocation16_spill] sm:$0xff] %v27633_v60 }
 0x8ee   :  { %v5058_v2 = vpop.f32.mrb[156].mxu0 }
 0x8ef   :  { %v20425_v31 = vpop.f32.mrb[157].mxu0  ;;  %v5368_v61 = vmax.f32 %v5058_v2, 0.0 }
 0x8f0   :  { %v5061_v36 = vpop.f32.mrb[158].mxu0 }
 0x8f1   :  { %v5369_v1 = vmax.f32 %v5061_v36, 0.0  ;;  %v20426_v21 = vpop.f32.mrb[159].mxu0  ;;  %v23898_v36 = vld [vmem:[#allocation2 + $0x133c] ss:$68 sps:$4 sm:$0xff]  }
 0x8f2   :  { %14325 = vmatmul.mubr.bf16.gmra.mrb[28].mxu1 %v23885_v8  ;;  %v23897_v8 = vld [vmem:[#allocation2 + $0x12b0] ss:$68 sps:$4 sm:$0xff]  }
 0x8f3   :  { %12549 = vmatmul.mubr.bf16.gmra.mrb[36].mxu0 %v23882_v48  ;;  %14332 = vmatprep.mubr.bf16.mxu1 %v23886_v17  ;;  %v27635_v55 = vpack.c.bf16 %v5369_v1, %v5368_v61  ;;  %v23894_v17 = vld [vmem:[#allocation2 + $0xaa0] ss:$68 sps:$4 sm:$0xff]   ;;  %v23902_v61 = vld [vmem:[#allocation2 + $0xb2c] ss:$68 sps:$4 sm:$0xff]  }
 0x8f4   :  { %12556 = vmatprep.mubr.bf16.mxu0 %v23890_v46 }
 0x8f5   :  { %28838 = vst [vmem:[#allocation17_spill] sm:$0xff] %v27635_v55 }
 0x8f6   :  { %v5066_v25 = vpop.f32.mrb[160].mxu0 }
 0x8f7   :  { %v20429_v45 = vpop.f32.mrb[161].mxu0  ;;  %v5370_v9 = vmax.f32 %v5066_v25, 0.0 }
 0x8f8   :  { %v5069_v41 = vpop.f32.mrb[162].mxu0 }
 0x8f9   :  { %v5371_v31 = vmax.f32 %v5069_v41, 0.0  ;;  %v20430_v60 = vpop.f32.mrb[163].mxu0  ;;  %v23904_v41 = vld [vmem:[#allocation2 + $0x13c4] ss:$68 sps:$4 sm:$0xff]  }
 0x8fa   :  { %14333 = vmatmul.mubr.bf16.gmra.mrb[32].mxu1 %v23891_v20  ;;  %v23903_v20 = vld [vmem:[#allocation2 + $0x1338] ss:$68 sps:$4 sm:$0xff]  }
 0x8fb   :  { %12557 = vmatmul.mubr.bf16.gmra.mrb[40].mxu0 %v23888_v7  ;;  %14340 = vmatprep.mubr.bf16.mxu1 %v23892_v4  ;;  %v27637_v21 = vpack.c.bf16 %v5371_v31, %v5370_v9  ;;  %v23900_v4 = vld [vmem:[#allocation2 + $0xb28] ss:$68 sps:$4 sm:$0xff]   ;;  %v23908_v9 = vld [vmem:[#allocation2 + $0xbb4] ss:$68 sps:$4 sm:$0xff]  }
 0x8fc   :  { %12564 = vmatprep.mubr.bf16.mxu0 %v23896_v43 }
 0x8fd   :  { %28839 = vst [vmem:[#allocation18_spill] sm:$0xff] %v27637_v21 }
 0x8fe   :  { %v5074_v2 = vpop.f32.mrb[164].mxu0 }
 0x8ff   :  { %v20433_v48 = vpop.f32.mrb[165].mxu0  ;;  %v5372_v1 = vmax.f32 %v5074_v2, 0.0 }
 0x900   :  { %v5077_v46 = vpop.f32.mrb[166].mxu0 }
 0x901   :  { %v5373_v45 = vmax.f32 %v5077_v46, 0.0  ;;  %v20434_v55 = vpop.f32.mrb[167].mxu0  ;;  %v23910_v46 = vld [vmem:[#allocation2 + $0x144c] ss:$68 sps:$4 sm:$0xff]  }
 0x902   :  { %14341 = vmatmul.mubr.bf16.gmra.mrb[36].mxu1 %v23897_v8  ;;  %v23909_v8 = vld [vmem:[#allocation2 + $0x13c0] ss:$68 sps:$4 sm:$0xff]  }
 0x903   :  { %12565 = vmatmul.mubr.bf16.gmra.mrb[44].mxu0 %v23894_v17  ;;  %14348 = vmatprep.mubr.bf16.mxu1 %v23898_v36  ;;  %v27639_v60 = vpack.c.bf16 %v5373_v45, %v5372_v1  ;;  %v23906_v36 = vld [vmem:[#allocation2 + $0xbb0] ss:$68 sps:$4 sm:$0xff]   ;;  %v23914_v1 = vld [vmem:[#allocation2 + $0xc3c] ss:$68 sps:$4 sm:$0xff]  }
 0x904   :  { %12572 = vmatprep.mubr.bf16.mxu0 %v23902_v61 }
 0x905   :  { %28840 = vst [vmem:[#allocation19_spill] sm:$0xff] %v27639_v60 }
 0x906   :  { %v5082_v25 = vpop.f32.mrb[168].mxu0 }
 0x907   :  { %v20437_v7 = vpop.f32.mrb[169].mxu0  ;;  %v5374_v31 = vmax.f32 %v5082_v25, 0.0 }
 0x908   :  { %v5085_v43 = vpop.f32.mrb[170].mxu0 }
 0x909   :  { %v5375_v48 = vmax.f32 %v5085_v43, 0.0  ;;  %v20438_v21 = vpop.f32.mrb[171].mxu0  ;;  %v23916_v43 = vld [vmem:[#allocation2 + $0x14d4] ss:$68 sps:$4 sm:$0xff]  }
 0x90a   :  { %14349 = vmatmul.mubr.bf16.gmra.mrb[40].mxu1 %v23903_v20  ;;  %v23915_v20 = vld [vmem:[#allocation2 + $0x1448] ss:$68 sps:$4 sm:$0xff]  }
 0x90b   :  { %12573 = vmatmul.mubr.bf16.gmra.mrb[48].mxu0 %v23900_v4  ;;  %14356 = vmatprep.mubr.bf16.mxu1 %v23904_v41  ;;  %v27641_v55 = vpack.c.bf16 %v5375_v48, %v5374_v31  ;;  %v23912_v41 = vld [vmem:[#allocation2 + $0xc38] ss:$68 sps:$4 sm:$0xff]   ;;  %v23920_v31 = vld [vmem:[#allocation2 + $0xcc4] ss:$68 sps:$4 sm:$0xff]  }
 0x90c   :  { %12580 = vmatprep.mubr.bf16.mxu0 %v23908_v9 }
 0x90d   :  { %28841 = vst [vmem:[#allocation20_spill] sm:$0xff] %v27641_v55 }
 0x90e   :  { %v5090_v2 = vpop.f32.mrb[172].mxu0 }
 0x90f   :  { %v20441_v17 = vpop.f32.mrb[173].mxu0  ;;  %v5376_v45 = vmax.f32 %v5090_v2, 0.0 }
 0x910   :  { %v5093_v61 = vpop.f32.mrb[174].mxu0 }
 0x911   :  { %v5377_v7 = vmax.f32 %v5093_v61, 0.0  ;;  %v20442_v60 = vpop.f32.mrb[175].mxu0  ;;  %v23922_v61 = vld [vmem:[#allocation2 + $0x155c] ss:$68 sps:$4 sm:$0xff]  }
 0x912   :  { %14357 = vmatmul.mubr.bf16.gmra.mrb[44].mxu1 %v23909_v8  ;;  %v23921_v8 = vld [vmem:[#allocation2 + $0x14d0] ss:$68 sps:$4 sm:$0xff]  }
 0x913   :  { %12581 = vmatmul.mubr.bf16.gmra.mrb[52].mxu0 %v23906_v36  ;;  %14364 = vmatprep.mubr.bf16.mxu1 %v23910_v46  ;;  %v27643_v21 = vpack.c.bf16 %v5377_v7, %v5376_v45  ;;  %v23918_v46 = vld [vmem:[#allocation2 + $0xcc0] ss:$68 sps:$4 sm:$0xff]   ;;  %v23926_v45 = vld [vmem:[#allocation2 + $0xd4c] ss:$68 sps:$4 sm:$0xff]  }
 0x914   :  { %12588 = vmatprep.mubr.bf16.mxu0 %v23914_v1 }
 0x915   :  { %28842 = vst [vmem:[#allocation21_spill] sm:$0xff] %v27643_v21 }
 0x916   :  { %v5098_v25 = vpop.f32.mrb[176].mxu0 }
 0x917   :  { %v20445_v4 = vpop.f32.mrb[177].mxu0  ;;  %v5378_v48 = vmax.f32 %v5098_v25, 0.0 }
 0x918   :  { %v5101_v9 = vpop.f32.mrb[178].mxu0 }
 0x919   :  { %v5379_v17 = vmax.f32 %v5101_v9, 0.0  ;;  %v20446_v55 = vpop.f32.mrb[179].mxu0  ;;  %v23928_v9 = vld [vmem:[#allocation2 + $0x15e4] ss:$68 sps:$4 sm:$0xff]  }
 0x91a   :  { %14365 = vmatmul.mubr.bf16.gmra.mrb[48].mxu1 %v23915_v20  ;;  %v23927_v20 = vld [vmem:[#allocation2 + $0x1558] ss:$68 sps:$4 sm:$0xff]  }
 0x91b   :  { %12589 = vmatmul.mubr.bf16.gmra.mrb[56].mxu0 %v23912_v41  ;;  %14372 = vmatprep.mubr.bf16.mxu1 %v23916_v43  ;;  %v27645_v60 = vpack.c.bf16 %v5379_v17, %v5378_v48  ;;  %v23924_v43 = vld [vmem:[#allocation2 + $0xd48] ss:$68 sps:$4 sm:$0xff]   ;;  %v23932_v48 = vld [vmem:[#allocation2 + $0xdd4] ss:$68 sps:$4 sm:$0xff]  }
 0x91c   :  { %12596 = vmatprep.mubr.bf16.mxu0 %v23920_v31 }
 0x91d   :  { %28843 = vst [vmem:[#allocation22_spill] sm:$0xff] %v27645_v60 }
 0x91e   :  { %v5106_v2 = vpop.f32.mrb[180].mxu0 }
 0x91f   :  { %v20449_v36 = vpop.f32.mrb[181].mxu0  ;;  %v5380_v7 = vmax.f32 %v5106_v2, 0.0 }
 0x920   :  { %v5109_v1 = vpop.f32.mrb[182].mxu0 }
 0x921   :  { %v5381_v4 = vmax.f32 %v5109_v1, 0.0  ;;  %v20450_v21 = vpop.f32.mrb[183].mxu0  ;;  %v23934_v1 = vld [vmem:[#allocation2 + $0x166c] ss:$68 sps:$4 sm:$0xff]  }
 0x922   :  { %14373 = vmatmul.mubr.bf16.gmra.mrb[52].mxu1 %v23921_v8  ;;  %v23933_v8 = vld [vmem:[#allocation2 + $0x15e0] ss:$68 sps:$4 sm:$0xff]  }
 0x923   :  { %12597 = vmatmul.mubr.bf16.gmra.mrb[60].mxu0 %v23918_v46  ;;  %14380 = vmatprep.mubr.bf16.mxu1 %v23922_v61  ;;  %v27647_v55 = vpack.c.bf16 %v5381_v4, %v5380_v7  ;;  %v23930_v61 = vld [vmem:[#allocation2 + $0xdd0] ss:$68 sps:$4 sm:$0xff]   ;;  %v23938_v7 = vld [vmem:[#allocation2 + $0xe5c] ss:$68 sps:$4 sm:$0xff]  }
 0x924   :  { %12604 = vmatprep.mubr.bf16.mxu0 %v23926_v45 }
 0x926   :  { %v5114_v25 = vpop.f32.mrb[184].mxu0 }
 0x927   :  { %v20453_v41 = vpop.f32.mrb[185].mxu0  ;;  %v5382_v17 = vmax.f32 %v5114_v25, 0.0  ;;  %v23936_v25 = vld [vmem:[#allocation2 + $0xe58] ss:$68 sps:$4 sm:$0xff]  }
 0x928   :  { %v5117_v31 = vpop.f32.mrb[186].mxu0  ;;  %v23944_v41 = vld [vmem:[#allocation2 + $0xee4] ss:$68 sps:$4 sm:$0xff]  }
 0x929   :  { %v5383_v36 = vmax.f32 %v5117_v31, 0.0  ;;  %v20454_v60 = vpop.f32.mrb[187].mxu0  ;;  %v23946_v31 = vld [vmem:[#allocation2 + $0x177c] ss:$68 sps:$4 sm:$0xff]  }
 0x92a   :  { %14381 = vmatmul.mubr.bf16.gmra.mrb[56].mxu1 %v23927_v20  ;;  %v23939_v60 = vld [vmem:[#allocation2 + $0x1668] ss:$68 sps:$4 sm:$0xff]   ;;  %v23940_v20 = vld [vmem:[#allocation2 + $0x16f4] ss:$68 sps:$4 sm:$0xff]  }
 0x92b   :  { %12605 = vmatmul.mubr.bf16.gmra.mrb[64].mxu0 %v23924_v43  ;;  %14388 = vmatprep.mubr.bf16.mxu1 %v23928_v9  ;;  %v27649_v21 = vpack.c.bf16 %v5383_v36, %v5382_v17  ;;  %v23945_v43 = vld [vmem:[#allocation2 + $0x16f0] ss:$68 sps:$4 sm:$0xff]   ;;  %v23942_v9 = vld [vmem:[#allocation2 + $0xee0] ss:$68 sps:$4 sm:$0xff]   ;;  %v23951_v17 = vld [vmem:[#allocation2 + $0x1778] ss:$68 sps:$4 sm:$0xff]  }
 0x92c   :  { %12612 = vmatprep.mubr.bf16.mxu0 %v23932_v48  ;;  %v23950_v48 = vld [vmem:[#allocation2 + $0xf6c] ss:$68 sps:$4 sm:$0xff]  }
 0x92d   :  { %v23948_v36 = vld [vmem:[#allocation2 + $0xf68] ss:$68 sps:$4 sm:$0xff]  }
 0x92e   :  { %v27651_v2 = vpop.f32.mrb[188].mxu0 }
 0x92f   :  { %v20457_v46 = vpop.f32.mrb[189].mxu0 }
 0x930   :  { %v5125_v45 = vpop.f32.mrb[190].mxu0  ;;  %v23956_v46 = vld [vmem:[#allocation2 + $0xff4] ss:$68 sps:$4 sm:$0xff]  }
 0x931   :  { %v20458_v4 = vpop.f32.mrb[191].mxu0  ;;  %v23958_v45 = vld [vmem:[#allocation2 + $0x188c] ss:$68 sps:$4 sm:$0xff]  }
 0x932   :  { %14389 = vmatmul.mubr.bf16.gmra.mrb[60].mxu1 %v23933_v8  ;;  %v23952_v8 = vld [vmem:[#allocation2 + $0x1804] ss:$68 sps:$4 sm:$0xff]  }
 0x933   :  { %12613 = vmatmul.mubr.bf16.gmra.mrb[68].mxu0 %v23930_v61  ;;  %14396 = vmatprep.mubr.bf16.mxu1 %v23934_v1  ;;  %v23957_v61 = vld [vmem:[#allocation2 + $0x1800] ss:$68 sps:$4 sm:$0xff]   ;;  %v23954_v1 = vld [vmem:[#allocation2 + $0xff0] ss:$68 sps:$4 sm:$0xff]   ;;  %v23963_v4 = vld [vmem:[#allocation2 + $0x1888] ss:$68 sps:$4 sm:$0xff]  }
 0x934   :  { %12620 = vmatprep.mubr.bf16.mxu0 %v23938_v7  ;;  %v23962_v7 = vld [vmem:[#allocation2 + $0x107c] ss:$68 sps:$4 sm:$0xff]  }
 0x93a   :  { %14397 = vmatmul.mubr.bf16.gmra.mrb[64].mxu1 %v23939_v60  ;;  %v23960_v60 = vld [vmem:[#allocation2 + $0x1078] ss:$68 sps:$4 sm:$0xff]  }
 0x93b   :  { %12621 = vmatmul.mubr.bf16.gmra.mrb[72].mxu0 %v23936_v25  ;;  %14404 = vmatprep.mubr.bf16.mxu1 %v23940_v20  ;;  %v23964_v25 = vld [vmem:[#allocation2 + $0x1914] ss:$68 sps:$4 sm:$0xff]   ;;  %v23968_v20 = vld [vmem:[#allocation2 + $0x1104] ss:$68 sps:$4 sm:$0xff]  }
 0x93c   :  { %12628 = vmatprep.mubr.bf16.mxu0 %v23944_v41  ;;  %v23969_v41 = vld [vmem:[#allocation2 + $0x1910] ss:$68 sps:$4 sm:$0xff]  }
 0x942   :  { %14405 = vmatmul.mubr.bf16.gmra.mrb[68].mxu1 %v23945_v43  ;;  %v23966_v43 = vld [vmem:[#allocation2 + $0x1100] ss:$68 sps:$4 sm:$0xff]  }
 0x943   :  { %12629 = vmatmul.mubr.bf16.gmra.mrb[76].mxu0 %v23942_v9  ;;  %14412 = vmatprep.mubr.bf16.mxu1 %v23946_v31  ;;  %v23970_v9 = vld [vmem:[#allocation2 + $0x199c] ss:$68 sps:$4 sm:$0xff]   ;;  %v23974_v31 = vld [vmem:[#allocation2 + $0x118c] ss:$68 sps:$4 sm:$0xff]  }
 0x944   :  { %12636 = vmatprep.mubr.bf16.mxu0 %v23950_v48  ;;  %v23975_v48 = vld [vmem:[#allocation2 + $0x1998] ss:$68 sps:$4 sm:$0xff]  }
 0x94a   :  { %14413 = vmatmul.mubr.bf16.gmra.mrb[72].mxu1 %v23951_v17  ;;  %v23972_v17 = vld [vmem:[#allocation2 + $0x1188] ss:$68 sps:$4 sm:$0xff]  }
 0x94b   :  { %12637 = vmatmul.mubr.bf16.gmra.mrb[80].mxu0 %v23948_v36  ;;  %14420 = vmatprep.mubr.bf16.mxu1 %v23952_v8  ;;  %v23976_v36 = vld [vmem:[#allocation2 + $0x1a24] ss:$68 sps:$4 sm:$0xff]   ;;  %v23980_v8 = vld [vmem:[#allocation2 + $0x1214] ss:$68 sps:$4 sm:$0xff]  }
 0x94c   :  { %12644 = vmatprep.mubr.bf16.mxu0 %v23956_v46  ;;  %v23981_v46 = vld [vmem:[#allocation2 + $0x1a20] ss:$68 sps:$4 sm:$0xff]  }
 0x952   :  { %14421 = vmatmul.mubr.bf16.gmra.mrb[76].mxu1 %v23957_v61  ;;  %v23978_v61 = vld [vmem:[#allocation2 + $0x1210] ss:$68 sps:$4 sm:$0xff]  }
 0x953   :  { %12645 = vmatmul.mubr.bf16.gmra.mrb[84].mxu0 %v23954_v1  ;;  %14428 = vmatprep.mubr.bf16.mxu1 %v23958_v45  ;;  %v23982_v1 = vld [vmem:[#allocation2 + $0x1aac] ss:$68 sps:$4 sm:$0xff]   ;;  %v23986_v45 = vld [vmem:[#allocation2 + $0x129c] ss:$68 sps:$4 sm:$0xff]  }
 0x954   :  { %12652 = vmatprep.mubr.bf16.mxu0 %v23962_v7  ;;  %v23987_v7 = vld [vmem:[#allocation2 + $0x1aa8] ss:$68 sps:$4 sm:$0xff]  }
 0x95a   :  { %14429 = vmatmul.mubr.bf16.gmra.mrb[80].mxu1 %v23963_v4  ;;  %v23984_v4 = vld [vmem:[#allocation2 + $0x1298] ss:$68 sps:$4 sm:$0xff]  }
 0x95b   :  { %12653 = vmatmul.mubr.bf16.gmra.mrb[88].mxu0 %v23960_v60  ;;  %14436 = vmatprep.mubr.bf16.mxu1 %v23964_v25  ;;  %v23988_v60 = vld [vmem:[#allocation2 + $0x1b34] ss:$68 sps:$4 sm:$0xff]   ;;  %v23992_v25 = vld [vmem:[#allocation2 + $0x1324] ss:$68 sps:$4 sm:$0xff]  }
 0x95c   :  { %12660 = vmatprep.mubr.bf16.mxu0 %v23968_v20  ;;  %v23993_v20 = vld [vmem:[#allocation2 + $0x1b30] ss:$68 sps:$4 sm:$0xff]  }
 0x962   :  { %14437 = vmatmul.mubr.bf16.gmra.mrb[84].mxu1 %v23969_v41  ;;  %v23990_v41 = vld [vmem:[#allocation2 + $0x1320] ss:$68 sps:$4 sm:$0xff]  }
 0x963   :  { %12661 = vmatmul.mubr.bf16.gmra.mrb[92].mxu0 %v23966_v43  ;;  %14444 = vmatprep.mubr.bf16.mxu1 %v23970_v9  ;;  %v23994_v43 = vld [vmem:[#allocation2 + $0x1bbc] ss:$68 sps:$4 sm:$0xff]   ;;  %v23998_v9 = vld [vmem:[#allocation2 + $0x13ac] ss:$68 sps:$4 sm:$0xff]  }
 0x964   :  { %12668 = vmatprep.mubr.bf16.mxu0 %v23974_v31  ;;  %v23999_v31 = vld [vmem:[#allocation2 + $0x1bb8] ss:$68 sps:$4 sm:$0xff]  }
 0x96a   :  { %14445 = vmatmul.mubr.bf16.gmra.mrb[88].mxu1 %v23975_v48  ;;  %v23996_v48 = vld [vmem:[#allocation2 + $0x13a8] ss:$68 sps:$4 sm:$0xff]  }
 0x96b   :  { %12669 = vmatmul.mubr.bf16.gmra.mrb[96].mxu0 %v23972_v17  ;;  %14452 = vmatprep.mubr.bf16.mxu1 %v23976_v36  ;;  %v24000_v17 = vld [vmem:[#allocation2 + $0x1c44] ss:$68 sps:$4 sm:$0xff]   ;;  %v24004_v36 = vld [vmem:[#allocation2 + $0x1434] ss:$68 sps:$4 sm:$0xff]  }
 0x96c   :  { %12676 = vmatprep.mubr.bf16.mxu0 %v23980_v8  ;;  %v24005_v8 = vld [vmem:[#allocation2 + $0x1c40] ss:$68 sps:$4 sm:$0xff]  }
 0x972   :  { %14453 = vmatmul.mubr.bf16.gmra.mrb[92].mxu1 %v23981_v46  ;;  %v24002_v46 = vld [vmem:[#allocation2 + $0x1430] ss:$68 sps:$4 sm:$0xff]  }
 0x973   :  { %12677 = vmatmul.mubr.bf16.gmra.mrb[100].mxu0 %v23978_v61  ;;  %14460 = vmatprep.mubr.bf16.mxu1 %v23982_v1  ;;  %v24006_v61 = vld [vmem:[#allocation2 + $0x1ccc] ss:$68 sps:$4 sm:$0xff]   ;;  %v24010_v1 = vld [vmem:[#allocation2 + $0x14bc] ss:$68 sps:$4 sm:$0xff]  }
 0x974   :  { %12684 = vmatprep.mubr.bf16.mxu0 %v23986_v45  ;;  %v24011_v45 = vld [vmem:[#allocation2 + $0x1cc8] ss:$68 sps:$4 sm:$0xff]  }
 0x97a   :  { %14461 = vmatmul.mubr.bf16.gmra.mrb[96].mxu1 %v23987_v7  ;;  %v24008_v7 = vld [vmem:[#allocation2 + $0x14b8] ss:$68 sps:$4 sm:$0xff]  }
 0x97b   :  { %12685 = vmatmul.mubr.bf16.gmra.mrb[104].mxu0 %v23984_v4  ;;  %14468 = vmatprep.mubr.bf16.mxu1 %v23988_v60  ;;  %v24012_v4 = vld [vmem:[#allocation2 + $0x1d54] ss:$68 sps:$4 sm:$0xff]   ;;  %v24016_v60 = vld [vmem:[#allocation2 + $0x1544] ss:$68 sps:$4 sm:$0xff]  }
 0x97c   :  { %12692 = vmatprep.mubr.bf16.mxu0 %v23992_v25  ;;  %v24017_v25 = vld [vmem:[#allocation2 + $0x1d50] ss:$68 sps:$4 sm:$0xff]  }
 0x982   :  { %14469 = vmatmul.mubr.bf16.gmra.mrb[100].mxu1 %v23993_v20  ;;  %v24014_v20 = vld [vmem:[#allocation2 + $0x1540] ss:$68 sps:$4 sm:$0xff]  }
 0x983   :  { %12693 = vmatmul.mubr.bf16.gmra.mrb[108].mxu0 %v23990_v41  ;;  %14476 = vmatprep.mubr.bf16.mxu1 %v23994_v43  ;;  %v24018_v41 = vld [vmem:[#allocation2 + $0x1ddc] ss:$68 sps:$4 sm:$0xff]   ;;  %v24022_v43 = vld [vmem:[#allocation2 + $0x15cc] ss:$68 sps:$4 sm:$0xff]  }
 0x984   :  { %12700 = vmatprep.mubr.bf16.mxu0 %v23998_v9  ;;  %v24023_v9 = vld [vmem:[#allocation2 + $0x1dd8] ss:$68 sps:$4 sm:$0xff]  }
 0x98a   :  { %14477 = vmatmul.mubr.bf16.gmra.mrb[104].mxu1 %v23999_v31  ;;  %v24020_v31 = vld [vmem:[#allocation2 + $0x15c8] ss:$68 sps:$4 sm:$0xff]  }
 0x98b   :  { %12701 = vmatmul.mubr.bf16.gmra.mrb[192].mxu0 %v23996_v48  ;;  %14484 = vmatprep.mubr.bf16.mxu1 %v24000_v17  ;;  %v24024_v48 = vld [vmem:[#allocation2 + $0x1e64] ss:$68 sps:$4 sm:$0xff]   ;;  %v24028_v17 = vld [vmem:[#allocation2 + $0x1654] ss:$68 sps:$4 sm:$0xff]  }
 0x98c   :  { %12708 = vmatprep.mubr.bf16.mxu0 %v24004_v36  ;;  %v24029_v36 = vld [vmem:[#allocation2 + $0x1e60] ss:$68 sps:$4 sm:$0xff]  }
 0x992   :  { %14485 = vmatmul.mubr.bf16.gmra.mrb[108].mxu1 %v24005_v8  ;;  %v24026_v8 = vld [vmem:[#allocation2 + $0x1650] ss:$68 sps:$4 sm:$0xff]  }
 0x993   :  { %12709 = vmatmul.mubr.bf16.gmra.mrb[196].mxu0 %v24002_v46  ;;  %14492 = vmatprep.mubr.bf16.mxu1 %v24006_v61  ;;  %v24030_v46 = vld [vmem:[#allocation2 + $0x1eec] ss:$68 sps:$4 sm:$0xff]   ;;  %v24034_v61 = vld [vmem:[#allocation2 + $0x16dc] ss:$68 sps:$4 sm:$0xff]  }
 0x994   :  { %12716 = vmatprep.mubr.bf16.mxu0 %v24010_v1  ;;  %v24035_v1 = vld [vmem:[#allocation2 + $0x1ee8] ss:$68 sps:$4 sm:$0xff]  }
 0x99a   :  { %14493 = vmatmul.mubr.bf16.gmra.mrb[112].mxu1 %v24011_v45  ;;  %v24032_v45 = vld [vmem:[#allocation2 + $0x16d8] ss:$68 sps:$4 sm:$0xff]  }
 0x99b   :  { %12717 = vmatmul.mubr.bf16.gmra.mrb[200].mxu0 %v24008_v7  ;;  %14500 = vmatprep.mubr.bf16.mxu1 %v24012_v4  ;;  %v24036_v7 = vld [vmem:[#allocation2 + $0x1f74] ss:$68 sps:$4 sm:$0xff]   ;;  %v24040_v4 = vld [vmem:[#allocation2 + $0x1764] ss:$68 sps:$4 sm:$0xff]  }
 0x99c   :  { %12724 = vmatprep.mubr.bf16.mxu0 %v24016_v60  ;;  %v24041_v60 = vld [vmem:[#allocation2 + $0x1f70] ss:$68 sps:$4 sm:$0xff]  }
 0x9a2   :  { %14501 = vmatmul.mubr.bf16.gmra.mrb[116].mxu1 %v24017_v25  ;;  %v24038_v25 = vld [vmem:[#allocation2 + $0x1760] ss:$68 sps:$4 sm:$0xff]  }
 0x9a3   :  { %12725 = vmatmul.mubr.bf16.gmra.mrb[204].mxu0 %v24014_v20  ;;  %14508 = vmatprep.mubr.bf16.mxu1 %v24018_v41  ;;  %v24042_v20 = vld [vmem:[#allocation2 + $0x1ffc] ss:$68 sps:$4 sm:$0xff]   ;;  %v24046_v41 = vld [vmem:[#allocation2 + $0x17ec] ss:$68 sps:$4 sm:$0xff]  }
 0x9a4   :  { %12732 = vmatprep.mubr.bf16.mxu0 %v24022_v43  ;;  %v24047_v43 = vld [vmem:[#allocation2 + $0x1ff8] ss:$68 sps:$4 sm:$0xff]  }
 0x9aa   :  { %14509 = vmatmul.mubr.bf16.gmra.mrb[120].mxu1 %v24023_v9  ;;  %v24044_v9 = vld [vmem:[#allocation2 + $0x17e8] ss:$68 sps:$4 sm:$0xff]  }
 0x9ab   :  { %12733 = vmatmul.mubr.bf16.gmra.mrb[208].mxu0 %v24020_v31  ;;  %14516 = vmatprep.mubr.bf16.mxu1 %v24024_v48  ;;  %v24048_v31 = vld [vmem:[#allocation2 + $0x2084] ss:$68 sps:$4 sm:$0xff]   ;;  %v24052_v48 = vld [vmem:[#allocation2 + $0x1874] ss:$68 sps:$4 sm:$0xff]  }
 0x9ac   :  { %12740 = vmatprep.mubr.bf16.mxu0 %v24028_v17  ;;  %v24053_v17 = vld [vmem:[#allocation2 + $0x2080] ss:$68 sps:$4 sm:$0xff]  }
 0x9b2   :  { %14517 = vmatmul.mubr.bf16.gmra.mrb[124].mxu1 %v24029_v36  ;;  %v24050_v36 = vld [vmem:[#allocation2 + $0x1870] ss:$68 sps:$4 sm:$0xff]  }
 0x9b3   :  { %12741 = vmatmul.mubr.bf16.gmra.mrb[212].mxu0 %v24026_v8  ;;  %14524 = vmatprep.mubr.bf16.mxu1 %v24030_v46  ;;  %v24054_v8 = vld [vmem:[#allocation2 + $0x210c] ss:$68 sps:$4 sm:$0xff]   ;;  %v24058_v46 = vld [vmem:[#allocation2 + $0x18fc] ss:$68 sps:$4 sm:$0xff]  }
 0x9b4   :  { %12748 = vmatprep.mubr.bf16.mxu0 %v24034_v61  ;;  %v24059_v61 = vld [vmem:[#allocation2 + $0x2108] ss:$68 sps:$4 sm:$0xff]  }
 0x9ba   :  { %14525 = vmatmul.mubr.bf16.gmra.mrb[128].mxu1 %v24035_v1  ;;  %v24056_v1 = vld [vmem:[#allocation2 + $0x18f8] ss:$68 sps:$4 sm:$0xff]  }
 0x9bb   :  { %12749 = vmatmul.mubr.bf16.gmra.mrb[216].mxu0 %v24032_v45  ;;  %14532 = vmatprep.mubr.bf16.mxu1 %v24036_v7  ;;  %v24062_v45 = vld [vmem:[#allocation2 + $0x2194] ss:$68 sps:$4 sm:$0xff]   ;;  %v24065_v7 = vld [vmem:[#allocation2 + $0x1984] ss:$68 sps:$4 sm:$0xff]  }
 0x9bc   :  { %12756 = vmatprep.mubr.bf16.mxu0 %v24040_v4  ;;  %v6669_v4 = vld [vmem:[#allocation2 + $0x2218] sm:$0xff] }
 0x9c2   :  { %14533 = vmatmul.mubr.bf16.gmra.mrb[132].mxu1 %v24041_v60 }
 0x9c3   :  { %12757 = vmatmul.mubr.bf16.gmra.mrb[220].mxu0 %v24038_v25  ;;  %14540 = vmatprep.mubr.bf16.mxu1 %v24042_v20  ;;  %v24060_v20 = vld [vmem:[#allocation2 + $0x2190] ss:$68 sps:$4 sm:$0xff]  }
 0x9c4   :  { %12764 = vmatprep.mubr.bf16.mxu0 %v24046_v41 }
 0x9ca   :  { %14541 = vmatmul.mubr.bf16.gmra.mrb[136].mxu1 %v24047_v43  ;;  %v24063_v43 = vld [vmem:[#allocation2 + $0x1980] ss:$68 sps:$4 sm:$0xff]  }
 0x9cb   :  { %12765 = vmatmul.mubr.bf16.gmra.mrb[224].mxu0 %v24044_v9  ;;  %14548 = vmatprep.mubr.bf16.mxu1 %v24048_v31  ;;  %v19535_v9 = vcombine.high %v6669_v4, %v6669_v4 }
 0x9cc   :  { %12772 = vmatprep.mubr.bf16.mxu0 %v24052_v48  ;;  %v24069_v48 = vld [vmem:[#allocation2 + $0x1a0c] ss:$68 sps:$4 sm:$0xff]  }
 0x9d2   :  { %14549 = vmatmul.mubr.bf16.gmra.mrb[140].mxu1 %v24053_v17  ;;  %v19534_v17 = vcombine.low %v6669_v4, %v6669_v4  ;;  %v24082_v4 = vld [vmem:[#allocation2 + $0xa8] ss:$68 sps:$4 sm:$0xff]  }
 0x9d3   :  { %12773 = vmatmul.mubr.bf16.gmra.mrb[228].mxu0 %v24050_v36  ;;  %14556 = vmatprep.mubr.bf16.mxu1 %v24054_v8  ;;  %v24067_v36 = vld [vmem:[#allocation2 + $0x1a08] ss:$68 sps:$4 sm:$0xff]  }
 0x9d4   :  { %12780 = vmatprep.mubr.bf16.mxu0 %v24058_v46  ;;  %v24073_v8 = vld [vmem:[#allocation2 + $0x24] ss:$68 sps:$4 sm:$0xff]   ;;  %v24076_v46 = vld [vmem:[#allocation2 + $0x1a94] ss:$68 sps:$4 sm:$0xff]  }
 0x9da   :  { %14557 = vmatmul.mubr.bf16.gmra.mrb[144].mxu1 %v24059_v61  ;;  %v24071_v61 = vld [vmem:[#allocation2 + $0x20] ss:$68 sps:$4 sm:$0xff]  }
 0x9db   :  { %12781 = vmatmul.mubr.bf16.gmra.mrb[232].mxu0 %v24056_v1  ;;  %14564 = vmatprep.mubr.bf16.mxu1 %v24062_v45  ;;  %v24074_v1 = vld [vmem:[#allocation2 + $0x1a90] ss:$68 sps:$4 sm:$0xff]  }
 0x9dc   :  { %12788 = vmatprep.mubr.bf16.mxu0 %v24065_v7  ;;  %v24077_v45 = vld [vmem:[#allocation2 + $0xac] ss:$68 sps:$4 sm:$0xff]   ;;  %v24081_v7 = vld [vmem:[#allocation2 + $0x1b1c] ss:$68 sps:$4 sm:$0xff]  }
 0x9dd   :  { %v27653_v60 = vpop.f32.mrb[40].mxu1 }
 0x9de   :  { %v14352_v25 = vpop.f32.mrb[41].mxu1 }
 0x9df   :  { %v27655_v41 = vpop.f32.mrb[42].mxu1  ;;  %v24079_v25 = vld [vmem:[#allocation2 + $0x1b18] ss:$68 sps:$4 sm:$0xff]  }
 0x9e0   :  { %v14355_v31 = vpop.f32.mrb[43].mxu1 }
 0x9e1   :  { %v24093_v31 = vld [vmem:[#allocation2 + $0x1c2c] ss:$68 sps:$4 sm:$0xff]  }
 0x9e2   :  { %14565 = vmatmul.mubr.bf16.gmra.mrb[40].mxu1 %v24060_v20  ;;  %v24083_v20 = vld [vmem:[#allocation2 + $0x134] ss:$68 sps:$4 sm:$0xff]  }
 0x9e3   :  { %12789 = vmatmul.mubr.bf16.gmra.mrb[236].mxu0 %v24063_v43  ;;  %14572 = vmatprep.mubr.bf16.mxu1 %v19535_v9  ;;  %v24087_v43 = vld [vmem:[#allocation2 + $0x1ba4] ss:$68 sps:$4 sm:$0xff]  }
 0x9e4   :  { %12796 = vmatprep.mubr.bf16.mxu0 %v24069_v48  ;;  %v24085_v9 = vld [vmem:[#allocation2 + $0x1ba0] ss:$68 sps:$4 sm:$0xff]   ;;  %v24091_v48 = vld [vmem:[#allocation2 + $0x1c28] ss:$68 sps:$4 sm:$0xff]  }
 0x9ea   :  { %14573 = vmatmul.mubr.bf16.gmra.mrb[152].mxu1 %v19534_v17  ;;  %v24099_v17 = vld [vmem:[#allocation2 + $0x1cb4] ss:$68 sps:$4 sm:$0xff]  }
 0x9eb   :  { %12797 = vmatmul.mubr.bf16.gmra.mrb[240].mxu0 %v24067_v36  ;;  %14612 = vmatprep.mubr.bf16.mxu1 %v24073_v8  ;;  %v24097_v36 = vld [vmem:[#allocation2 + $0x1cb0] ss:$68 sps:$4 sm:$0xff]   ;;  %v24105_v8 = vld [vmem:[#allocation2 + $0x1d3c] ss:$68 sps:$4 sm:$0xff]  }
 0x9ec   :  { %12804 = vmatprep.mubr.bf16.mxu0 %v24076_v46  ;;  %v24103_v46 = vld [vmem:[#allocation2 + $0x1d38] ss:$68 sps:$4 sm:$0xff]  }
 0x9f2   :  { %14613 = vmatmul.mubr.bf16.vlgmr.msra.gmra.mrb[156].mxu1 %v24071_v61  ;;  %v24111_v61 = vld [vmem:[#allocation2 + $0x1dc4] ss:$68 sps:$4 sm:$0xff]  }
 0x9f3   :  { %15133 = vmatpush1.bf16.msra.mxu1 %v27321_v40  ;;  %12805 = vmatmul.mubr.bf16.gmra.mrb[244].mxu0 %v24074_v1  ;;  %v24088_v40 = vld [vmem:[#allocation2 + $0x130] ss:$68 sps:$4 sm:$0xff]   ;;  %v24109_v1 = vld [vmem:[#allocation2 + $0x1dc0] ss:$68 sps:$4 sm:$0xff]  }
 0x9f4   :  { %15134 = vmatprep.subr.bf16.mxu1 %v28710_v12  ;;  %14620 = vmatprep.mubr.bf16.mxu1 %v24077_v45  ;;  %v24117_v45 = vld [vmem:[#allocation2 + $0x1e4c] ss:$68 sps:$4 sm:$0xff]  }
 0x9f5   :  { %12812 = vmatprep.mubr.bf16.mxu0 %v24081_v7  ;;  %v24115_v7 = vld [vmem:[#allocation2 + $0x1e48] ss:$68 sps:$4 sm:$0xff]  }
 0x9f7   :  { %15135 = vmatpush1.bf16.msra.mxu1 %v27331_v34  ;;  %v24089_v34 = vld [vmem:[#allocation2 + $0x1bc] ss:$68 sps:$4 sm:$0xff]  }
 0x9f8   :  { %15136 = vmatprep.subr.bf16.mxu1 %v28710_v12 }
 0x9fa   :  { %14621 = vmatmul.mubr.bf16.gmra.mrb[160].mxu1 %v24082_v4  ;;  %v24123_v4 = vld [vmem:[#allocation2 + $0x1ed4] ss:$68 sps:$4 sm:$0xff]  }
 0x9fb   :  { %15137 = vmatpush1.bf16.msra.mxu1 %v27341_v39  ;;  %12813 = vmatmul.mubr.bf16.gmra.mrb[248].mxu0 %v24079_v25  ;;  %v24094_v39 = vld [vmem:[#allocation2 + $0x1b8] ss:$68 sps:$4 sm:$0xff]   ;;  %v24121_v25 = vld [vmem:[#allocation2 + $0x1ed0] ss:$68 sps:$4 sm:$0xff]  }
 0x9fc   :  { %15138 = vmatprep.subr.bf16.mxu1 %v28710_v12  ;;  %14628 = vmatprep.mubr.bf16.mxu1 %v24083_v20  ;;  %v24125_v20 = vld [vmem:[#allocation2 + $0x4ec] ss:$68 sps:$4 sm:$0xff]  }
 0x9fd   :  { %12820 = vmatprep.mubr.bf16.mxu0 %v24087_v43  ;;  %v24129_v43 = vld [vmem:[#allocation2 + $0x1f5c] ss:$68 sps:$4 sm:$0xff]  }
 0x9ff   :  { %15139 = vmatpush1.bf16.msra.mxu1 %v27351_v29  ;;  %v24095_v29 = vld [vmem:[#allocation2 + $0x244] ss:$68 sps:$4 sm:$0xff]  }
 0xa00   :  { %15140 = vmatprep.subr.bf16.mxu1 %v28710_v12 }
 0xa02   :  { %14629 = vmatmul.mubr.bf16.gmra.mrb[164].mxu1 %v24088_v40  ;;  %v24127_v40 = vld [vmem:[#allocation2 + $0x1f58] ss:$68 sps:$4 sm:$0xff]  }
 0xa03   :  { %15141 = vmatpush1.bf16.msra.mxu1 %v27361_v3  ;;  %12821 = vmatmul.mubr.bf16.gmra.mrb[252].mxu0 %v24085_v9  ;;  %v24100_v3 = vld [vmem:[#allocation2 + $0x240] ss:$68 sps:$4 sm:$0xff]  }
 0xa04   :  { %15142 = vmatprep.subr.bf16.mxu1 %v28710_v12  ;;  %14636 = vmatprep.mubr.bf16.mxu1 %v24089_v34  ;;  %v24135_v9 = vld [vmem:[#allocation2 + $0x1fe4] ss:$68 sps:$4 sm:$0xff]   ;;  %v24136_v34 = vld [vmem:[#allocation2 + $0x570] ss:$68 sps:$4 sm:$0xff]  }
 0xa05   :  { %12828 = vmatprep.mubr.bf16.mxu0 %v24093_v31  ;;  %v24133_v31 = vld [vmem:[#allocation2 + $0x1fe0] ss:$68 sps:$4 sm:$0xff]  }
 0xa07   :  { %15143 = vmatpush1.bf16.msra.mxu1 %v27371_v57  ;;  %v24101_v57 = vld [vmem:[#allocation2 + $0x2cc] ss:$68 sps:$4 sm:$0xff]  }
 0xa08   :  { %15144 = vmatprep.subr.bf16.mxu1 %v28710_v12 }
 0xa0a   :  { %14637 = vmatmul.mubr.bf16.gmra.mrb[168].mxu1 %v24094_v39  ;;  %v24141_v39 = vld [vmem:[#allocation2 + $0x206c] ss:$68 sps:$4 sm:$0xff]  }
 0xa0b   :  { %15145 = vmatpush1.bf16.msra.mxu1 %v27381_v47  ;;  %12829 = vmatmul.mubr.bf16.gmra.mrb[148].mxu0 %v24091_v48  ;;  %v24106_v47 = vld [vmem:[#allocation2 + $0x2c8] ss:$68 sps:$4 sm:$0xff]   ;;  %v24142_v48 = vld [vmem:[#allocation2 + $0x5f8] ss:$68 sps:$4 sm:$0xff]  }
 0xa0c   :  { %15146 = vmatprep.subr.bf16.mxu1 %v28710_v12  ;;  %14644 = vmatprep.mubr.bf16.mxu1 %v24095_v29  ;;  %v24139_v29 = vld [vmem:[#allocation2 + $0x2068] ss:$68 sps:$4 sm:$0xff]  }
 0xa0d   :  { %12836 = vmatprep.mubr.bf16.mxu0 %v24099_v17  ;;  %v24143_v17 = vld [vmem:[#allocation2 + $0x684] ss:$68 sps:$4 sm:$0xff]  }
 0xa0f   :  { %15147 = vmatpush1.bf16.msra.mxu1 %v27393_v18  ;;  %v24107_v18 = vld [vmem:[#allocation2 + $0x354] ss:$68 sps:$4 sm:$0xff]  }
 0xa10   :  { %15148 = vmatprep.subr.bf16.mxu1 %v28710_v12 }
 0xa12   :  { %14645 = vmatmul.mubr.bf16.gmra.mrb[172].mxu1 %v24100_v3  ;;  %v24147_v3 = vld [vmem:[#allocation2 + $0x20f4] ss:$68 sps:$4 sm:$0xff]  }
 0xa13   :  { %15149 = vmatpush1.bf16.msra.mxu1 %v27407_v63  ;;  %12837 = vmatmul.mubr.bf16.gmra.mrb[152].mxu0 %v24097_v36  ;;  %v24112_v63 = vld [vmem:[#allocation2 + $0x350] ss:$68 sps:$4 sm:$0xff]   ;;  %v24148_v36 = vld [vmem:[#allocation2 + $0x680] ss:$68 sps:$4 sm:$0xff]  }
 0xa14   :  { %15150 = vmatprep.subr.bf16.mxu1 %v28710_v12  ;;  %14652 = vmatprep.mubr.bf16.mxu1 %v24101_v57  ;;  %v24145_v57 = vld [vmem:[#allocation2 + $0x20f0] ss:$68 sps:$4 sm:$0xff]  }
 0xa15   :  { %12844 = vmatprep.mubr.bf16.mxu0 %v24105_v8  ;;  %v24149_v8 = vld [vmem:[#allocation2 + $0x70c] ss:$68 sps:$4 sm:$0xff]  }
 0xa17   :  { %15151 = vmatpush1.bf16.msra.mxu1 %v27421_v14  ;;  %v24113_v14 = vld [vmem:[#allocation2 + $0x3dc] ss:$68 sps:$4 sm:$0xff]  }
 0xa18   :  { %15152 = vmatprep.subr.bf16.mxu1 %v28710_v12 }
 0xa1a   :  { %14653 = vmatmul.mubr.bf16.gmra.mrb[176].mxu1 %v24106_v47  ;;  %v24153_v47 = vld [vmem:[#allocation2 + $0x217c] ss:$68 sps:$4 sm:$0xff]  }
 0xa1b   :  { %15153 = vmatpush1.bf16.msra.mxu1 %v27435_v37  ;;  %12845 = vmatmul.mubr.bf16.gmra.mrb[156].mxu0 %v24103_v46  ;;  %v24118_v37 = vld [vmem:[#allocation2 + $0x3d8] ss:$68 sps:$4 sm:$0xff]   ;;  %v6666_v46 = vld [vmem:[#allocation2 + $0x2200] sm:$0xff] }
 0xa1c   :  { %15154 = vmatprep.subr.bf16.mxu1 %v28710_v12  ;;  %14660 = vmatprep.mubr.bf16.mxu1 %v24107_v18  ;;  %v24154_v18 = vld [vmem:[#allocation2 + $0x708] ss:$68 sps:$4 sm:$0xff]  }
 0xa1d   :  { %12852 = vmatprep.mubr.bf16.mxu0 %v24111_v61  ;;  %v24151_v61 = vld [vmem:[#allocation2 + $0x2178] ss:$68 sps:$4 sm:$0xff]  }
 0xa1f   :  { %15155 = vmatpush1.bf16.msra.mxu1 %v27449_v59  ;;  %v24119_v59 = vld [vmem:[#allocation2 + $0x464] ss:$68 sps:$4 sm:$0xff]  }
 0xa20   :  { %15156 = vmatprep.subr.bf16.mxu1 %v28710_v12 }
 0xa22   :  { %14661 = vmatmul.mubr.bf16.gmra.mrb[180].mxu1 %v24112_v63  ;;  %v24155_v63 = vld [vmem:[#allocation2 + $0x794] ss:$68 sps:$4 sm:$0xff]  }
 0xa23   :  { %15157 = vmatpush1.bf16.msra.mxu1 %v27463_v53  ;;  %12853 = vmatmul.mubr.bf16.gmra.mrb[160].mxu0 %v24109_v1  ;;  %v24124_v53 = vld [vmem:[#allocation2 + $0x460] ss:$68 sps:$4 sm:$0xff]   ;;  %v19529_v1 = vcombine.high %v6666_v46, %v6666_v46 }
 0xa24   :  { %15158 = vmatprep.subr.bf16.mxu1 %v28710_v12  ;;  %14668 = vmatprep.mubr.bf16.mxu1 %v24113_v14 }
 0xa25   :  { %12860 = vmatprep.mubr.bf16.mxu0 %v24117_v45  ;;  %v24159_v45 = vld [vmem:[#allocation2 + $0x790] ss:$68 sps:$4 sm:$0xff]  }
 0xa27   :  { %15159 = vmatpush1.bf16.msra.mxu1 %v27477_v27  ;;  %v24130_v27 = vld [vmem:[#allocation2 + $0x4e8] ss:$68 sps:$4 sm:$0xff]  }
 0xa28   :  { %15160 = vmatprep.subr.bf16.mxu1 %v28710_v12 }
 0xa2a   :  { %14669 = vmatmul.mubr.bf16.gmra.mrb[184].mxu1 %v24118_v37 }
 0xa2b   :  { %15161 = vmatpush1.bf16.msra.mxu1 %v27491_v15  ;;  %12861 = vmatmul.mubr.bf16.gmra.mrb[164].mxu0 %v24115_v7  ;;  %v24131_v15 = vld [vmem:[#allocation2 + $0x574] ss:$68 sps:$4 sm:$0xff]   ;;  %v19528_v7 = vcombine.low %v6666_v46, %v6666_v46  ;;  %v24186_v46 = vld [vmem:[#allocation2 + $0x228] ss:$68 sps:$4 sm:$0xff]  }
 0xa2c   :  { %15162 = vmatprep.subr.bf16.mxu1 %v28710_v12  ;;  %14676 = vmatprep.mubr.bf16.mxu1 %v24119_v59  ;;  %v24160_v59 = vld [vmem:[#allocation2 + $0x81c] ss:$68 sps:$4 sm:$0xff]  }
 0xa2d   :  { %12868 = vmatprep.mubr.bf16.mxu0 %v24123_v4 }
 0xa2f   :  { %15163 = vmatpush1.bf16.msra.mxu1 %v27503_v0  ;;  %v24137_v0 = vld [vmem:[#allocation2 + $0x5fc] ss:$68 sps:$4 sm:$0xff]  }
 0xa30   :  { %15684 = vmatprep.subr.bf16.mxu1 %v28710_v12 }
 0xa32   :  { %14677 = vmatmul.mubr.bf16.gmra.mrb[188].mxu1 %v24124_v53  ;;  %v24164_v53 = vld [vmem:[#allocation2 + $0xc] ss:$68 sps:$4 sm:$0xff]  }
 0xa33   :  { %12869 = vmatmul.mubr.bf16.gmra.mrb[168].mxu0 %v24121_v25  ;;  %14684 = vmatprep.mubr.bf16.mxu1 %v24125_v20  ;;  %v24165_v20 = vld [vmem:[#allocation2 + $0x818] ss:$68 sps:$4 sm:$0xff]  }
 0xa34   :  { %12876 = vmatprep.mubr.bf16.mxu0 %v24129_v43  ;;  %v24162_v43 = vld [vmem:[#allocation2 + $0x8] ss:$68 sps:$4 sm:$0xff]  }
 0xa3a   :  { %14685 = vmatmul.mubr.bf16.gmra.mrb[192].mxu1 %v24130_v27  ;;  %v24166_v27 = vld [vmem:[#allocation2 + $0x8a4] ss:$68 sps:$4 sm:$0xff]  }
 0xa3b   :  { %12877 = vmatmul.mubr.bf16.gmra.mrb[172].mxu0 %v24127_v40  ;;  %14692 = vmatprep.mubr.bf16.mxu1 %v24131_v15  ;;  %v24170_v40 = vld [vmem:[#allocation2 + $0x94] ss:$68 sps:$4 sm:$0xff]   ;;  %v24171_v15 = vld [vmem:[#allocation2 + $0x8a0] ss:$68 sps:$4 sm:$0xff]  }
 0xa3c   :  { %12884 = vmatprep.mubr.bf16.mxu0 %v24135_v9  ;;  %v24168_v9 = vld [vmem:[#allocation2 + $0x90] ss:$68 sps:$4 sm:$0xff]  }
 0xa42   :  { %14693 = vmatmul.mubr.bf16.gmra.mrb[196].mxu1 %v24136_v34  ;;  %v24172_v34 = vld [vmem:[#allocation2 + $0x92c] ss:$68 sps:$4 sm:$0xff]  }
 0xa43   :  { %12885 = vmatmul.mubr.bf16.gmra.mrb[176].mxu0 %v24133_v31  ;;  %14700 = vmatprep.mubr.bf16.mxu1 %v24137_v0  ;;  %v24176_v31 = vld [vmem:[#allocation2 + $0x11c] ss:$68 sps:$4 sm:$0xff]   ;;  %v28844_v0 = vld [vmem:[#allocation102_spill] sm:$0xff] }
 0xa44   :  { %12892 = vmatprep.mubr.bf16.mxu0 %v24141_v39  ;;  %v24174_v39 = vld [vmem:[#allocation2 + $0x118] ss:$68 sps:$4 sm:$0xff]  }
 0xa4a   :  { %14701 = vmatmul.mubr.bf16.gmra.mrb[200].mxu1 %v24142_v48  ;;  %v24178_v48 = vld [vmem:[#allocation2 + $0x9b4] ss:$68 sps:$4 sm:$0xff]  }
 0xa4b   :  { %12893 = vmatmul.mubr.bf16.gmra.mrb[180].mxu0 %v24139_v29  ;;  %14708 = vmatprep.mubr.bf16.mxu1 %v24143_v17  ;;  %v28845_v29 = vld [vmem:[#allocation103_spill] sm:$0xff]  ;;  %v24182_v17 = vld [vmem:[#allocation2 + $0x1a4] ss:$68 sps:$4 sm:$0xff]  }
 0xa4c   :  { %12900 = vmatprep.mubr.bf16.mxu0 %v24147_v3  ;;  %v24183_v3 = vld [vmem:[#allocation2 + $0x9b0] ss:$68 sps:$4 sm:$0xff]  }
 0xa52   :  { %14709 = vmatmul.mubr.bf16.gmra.mrb[204].mxu1 %v24148_v36  ;;  %v24180_v36 = vld [vmem:[#allocation2 + $0x1a0] ss:$68 sps:$4 sm:$0xff]  }
 0xa53   :  { %12901 = vmatmul.mubr.bf16.gmra.mrb[184].mxu0 %v24145_v57  ;;  %14716 = vmatprep.mubr.bf16.mxu1 %v24149_v8  ;;  %v24184_v57 = vld [vmem:[#allocation2 + $0xa3c] ss:$68 sps:$4 sm:$0xff]   ;;  %v24188_v8 = vld [vmem:[#allocation2 + $0x22c] ss:$68 sps:$4 sm:$0xff]  }
 0xa54   :  { %12908 = vmatprep.mubr.bf16.mxu0 %v24153_v47  ;;  %v24189_v47 = vld [vmem:[#allocation2 + $0xa38] ss:$68 sps:$4 sm:$0xff]  }
 0xa5a   :  { %14717 = vmatmul.mubr.bf16.gmra.mrb[208].mxu1 %v24154_v18  ;;  %v24190_v18 = vld [vmem:[#allocation2 + $0xac4] ss:$68 sps:$4 sm:$0xff]  }
 0xa5b   :  { %12909 = vmatmul.mubr.bf16.gmra.mrb[188].mxu0 %v24151_v61  ;;  %14724 = vmatprep.mubr.bf16.mxu1 %v24155_v63  ;;  %v24194_v61 = vld [vmem:[#allocation2 + $0x2b4] ss:$68 sps:$4 sm:$0xff]   ;;  %v24196_v63 = vld [vmem:[#allocation2 + $0xb4c] ss:$68 sps:$4 sm:$0xff]  }
 0xa5c   :  { %12916 = vmatprep.mubr.bf16.mxu0 %v19529_v1  ;;  %v24200_v1 = vld [vmem:[#allocation2 + $0x33c] ss:$68 sps:$4 sm:$0xff]  }
 0xa5e   :  { %v27689_v14 = vpop.f32.mrb[192].mxu0 }
 0xa5f   :  { %v12704_v37 = vpop.f32.mrb[193].mxu0 }
 0xa60   :  { %v27691_v4 = vpop.f32.mrb[194].mxu0  ;;  %v24206_v37 = vld [vmem:[#allocation2 + $0x3c4] ss:$68 sps:$4 sm:$0xff]  }
 0xa61   :  { %v12707_v25 = vpop.f32.mrb[195].mxu0 }
 0xa62   :  { %14725 = vmatmul.mubr.bf16.gmra.mrb[212].mxu1 %v24159_v45  ;;  %v24202_v45 = vld [vmem:[#allocation2 + $0xbd4] ss:$68 sps:$4 sm:$0xff]  }
 0xa63   :  { %12917 = vmatmul.mubr.bf16.gmra.mrb[192].mxu0 %v19528_v7  ;;  %14732 = vmatprep.mubr.bf16.mxu1 %v24160_v59  ;;  %v24208_v7 = vld [vmem:[#allocation2 + $0xc5c] ss:$68 sps:$4 sm:$0xff]   ;;  %v24212_v59 = vld [vmem:[#allocation2 + $0x44c] ss:$68 sps:$4 sm:$0xff]   ;;  %v24218_v25 = vld [vmem:[#allocation2 + $0x4d4] ss:$68 sps:$4 sm:$0xff]  }
 0xa64   :  { %12956 = vmatprep.mubr.bf16.mxu0 %v24164_v53  ;;  %v24214_v53 = vld [vmem:[#allocation2 + $0xce4] ss:$68 sps:$4 sm:$0xff]  }
 0xa6a   :  { %14733 = vmatmul.mubr.bf16.gmra.mrb[216].mxu1 %v24165_v20  ;;  %v24216_v20 = vld [vmem:[#allocation2 + $0x4d0] ss:$68 sps:$4 sm:$0xff]  }
 0xa6b   :  { %12957 = vmatmul.mubr.bf16.vlgmr.msra.gmra.mrb[112].mxu0 %v24162_v43  ;;  %14740 = vmatprep.mubr.bf16.mxu1 %v24166_v27  ;;  %v24222_v43 = vld [vmem:[#allocation2 + $0xd6c] ss:$68 sps:$4 sm:$0xff]   ;;  %v24225_v27 = vld [vmem:[#allocation2 + $0x55c] ss:$68 sps:$4 sm:$0xff]  }
 0xa6c   :  { %13477 = vmatpush1.bf16.msra.mxu0 %v26831_v35  ;;  %12964 = vmatprep.mubr.bf16.mxu0 %v24170_v40  ;;  %v24177_v35 = vld [vmem:[#allocation2 + $0x928] ss:$68 sps:$4 sm:$0xff]   ;;  %v24223_v40 = vld [vmem:[#allocation2 + $0x558] ss:$68 sps:$4 sm:$0xff]  }
 0xa6d   :  { %13478 = vmatprep.subr.bf16.mxu0 %v28710_v12 }
 0xa70   :  { %13479 = vmatpush1.bf16.msra.mxu0 %v26841_v10  ;;  %v28846_v10 = vld [vmem:[#allocation104_spill] sm:$0xff] }
 0xa71   :  { %13480 = vmatprep.subr.bf16.mxu0 %v28710_v12 }
 0xa72   :  { %14741 = vmatmul.mubr.bf16.gmra.mrb[220].mxu1 %v24171_v15  ;;  %v24226_v15 = vld [vmem:[#allocation2 + $0xdf4] ss:$68 sps:$4 sm:$0xff]  }
 0xa73   :  { %12965 = vmatmul.mubr.bf16.gmra.mrb[116].mxu0 %v24168_v9  ;;  %14748 = vmatprep.mubr.bf16.mxu1 %v24172_v34  ;;  %v24230_v9 = vld [vmem:[#allocation2 + $0x5e4] ss:$68 sps:$4 sm:$0xff]  }
 0xa74   :  { %13481 = vmatpush1.bf16.msra.mxu0 %v28844_v0  ;;  %12972 = vmatprep.mubr.bf16.mxu0 %v24176_v31  ;;  %v24228_v34 = vld [vmem:[#allocation2 + $0x5e0] ss:$68 sps:$4 sm:$0xff]   ;;  %v24236_v0 = vld [vmem:[#allocation2 + $0x66c] ss:$68 sps:$4 sm:$0xff]  }
 0xa75   :  { %13482 = vmatprep.subr.bf16.mxu0 %v28710_v12  ;;  %v24232_v31 = vld [vmem:[#allocation2 + $0xe7c] ss:$68 sps:$4 sm:$0xff]  }
 0xa78   :  { %13483 = vmatpush1.bf16.msra.mxu0 %v28845_v29  ;;  %v24242_v29 = vld [vmem:[#allocation2 + $0x6f4] ss:$68 sps:$4 sm:$0xff]  }
 0xa79   :  { %13484 = vmatprep.subr.bf16.mxu0 %v28710_v12 }
 0xa7a   :  { %14749 = vmatmul.mubr.bf16.gmra.mrb[224].mxu1 %v24177_v35  ;;  %v24237_v35 = vld [vmem:[#allocation2 + $0xe78] ss:$68 sps:$4 sm:$0xff]  }
 0xa7b   :  { %12973 = vmatmul.mubr.bf16.gmra.mrb[120].mxu0 %v24174_v39  ;;  %14756 = vmatprep.mubr.bf16.mxu1 %v24178_v48  ;;  %v24234_v39 = vld [vmem:[#allocation2 + $0x668] ss:$68 sps:$4 sm:$0xff]  }
 0xa7c   :  { %13485 = vmatpush1.bf16.msra.mxu0 %v28846_v10  ;;  %12980 = vmatprep.mubr.bf16.mxu0 %v24182_v17  ;;  %v24238_v48 = vld [vmem:[#allocation2 + $0xf04] ss:$68 sps:$4 sm:$0xff]   ;;  %v24240_v10 = vld [vmem:[#allocation2 + $0x6f0] ss:$68 sps:$4 sm:$0xff]  }
 0xa7d   :  { %13486 = vmatprep.subr.bf16.mxu0 %v28710_v12  ;;  %v24243_v17 = vld [vmem:[#allocation2 + $0xf00] ss:$68 sps:$4 sm:$0xff]  }
 0xa80   :  { %13487 = vmatpush1.bf16.msra.mxu0 %v26885_v6  ;;  %v24195_v6 = vld [vmem:[#allocation2 + $0xac0] ss:$68 sps:$4 sm:$0xff]  }
 0xa81   :  { %13488 = vmatprep.subr.bf16.mxu0 %v28710_v12 }
 0xa82   :  { %14757 = vmatmul.mubr.bf16.gmra.mrb[228].mxu1 %v24183_v3  ;;  %v24244_v3 = vld [vmem:[#allocation2 + $0xf8c] ss:$68 sps:$4 sm:$0xff]  }
 0xa83   :  { %12981 = vmatmul.mubr.bf16.gmra.mrb[124].mxu0 %v24180_v36  ;;  %14764 = vmatprep.mubr.bf16.mxu1 %v24184_v57  ;;  %v24248_v36 = vld [vmem:[#allocation2 + $0x77c] ss:$68 sps:$4 sm:$0xff]   ;;  %v24249_v57 = vld [vmem:[#allocation2 + $0xf88] ss:$68 sps:$4 sm:$0xff]  }
 0xa84   :  { %13489 = vmatpush1.bf16.msra.mxu0 %v26897_v32  ;;  %12988 = vmatprep.mubr.bf16.mxu0 %v24188_v8  ;;  %v24192_v32 = vld [vmem:[#allocation2 + $0x2b0] ss:$68 sps:$4 sm:$0xff]   ;;  %v24246_v8 = vld [vmem:[#allocation2 + $0x778] ss:$68 sps:$4 sm:$0xff]  }
 0xa85   :  { %13490 = vmatprep.subr.bf16.mxu0 %v28710_v12 }
 0xa88   :  { %13491 = vmatpush1.bf16.msra.mxu0 %v26909_v38  ;;  %v24201_v38 = vld [vmem:[#allocation2 + $0xb48] ss:$68 sps:$4 sm:$0xff]  }
 0xa89   :  { %13492 = vmatprep.subr.bf16.mxu0 %v28710_v12 }
 0xa8a   :  { %14765 = vmatmul.mubr.bf16.gmra.mrb[232].mxu1 %v24189_v47  ;;  %v24250_v47 = vld [vmem:[#allocation2 + $0x1014] ss:$68 sps:$4 sm:$0xff]  }
 0xa8b   :  { %12989 = vmatmul.mubr.bf16.gmra.mrb[128].mxu0 %v24186_v46  ;;  %14772 = vmatprep.mubr.bf16.mxu1 %v24190_v18  ;;  %v24254_v46 = vld [vmem:[#allocation2 + $0x804] ss:$68 sps:$4 sm:$0xff]   ;;  %v24255_v18 = vld [vmem:[#allocation2 + $0x1010] ss:$68 sps:$4 sm:$0xff]  }
 0xa8c   :  { %13493 = vmatpush1.bf16.msra.mxu0 %v26921_v44  ;;  %12996 = vmatprep.mubr.bf16.mxu0 %v24194_v61  ;;  %v24198_v44 = vld [vmem:[#allocation2 + $0x338] ss:$68 sps:$4 sm:$0xff]   ;;  %v24252_v61 = vld [vmem:[#allocation2 + $0x800] ss:$68 sps:$4 sm:$0xff]  }
 0xa8d   :  { %13494 = vmatprep.subr.bf16.mxu0 %v28710_v12 }
 0xa90   :  { %13495 = vmatpush1.bf16.msra.mxu0 %v26933_v50  ;;  %v24207_v50 = vld [vmem:[#allocation2 + $0xbd0] ss:$68 sps:$4 sm:$0xff]  }
 0xa91   :  { %13496 = vmatprep.subr.bf16.mxu0 %v28710_v12 }
 0xa92   :  { %14773 = vmatmul.mubr.bf16.gmra.mrb[236].mxu1 %v24195_v6  ;;  %v24256_v6 = vld [vmem:[#allocation2 + $0x109c] ss:$68 sps:$4 sm:$0xff]  }
 0xa93   :  { %12997 = vmatmul.mubr.bf16.gmra.mrb[132].mxu0 %v24192_v32  ;;  %14780 = vmatprep.mubr.bf16.mxu1 %v24196_v63  ;;  %v24260_v32 = vld [vmem:[#allocation2 + $0x88c] ss:$68 sps:$4 sm:$0xff]   ;;  %v24261_v63 = vld [vmem:[#allocation2 + $0x1098] ss:$68 sps:$4 sm:$0xff]  }
 0xa94   :  { %13497 = vmatpush1.bf16.msra.mxu0 %v26945_v56  ;;  %13004 = vmatprep.mubr.bf16.mxu0 %v24200_v1  ;;  %v24204_v56 = vld [vmem:[#allocation2 + $0x3c0] ss:$68 sps:$4 sm:$0xff]   ;;  %v24258_v1 = vld [vmem:[#allocation2 + $0x888] ss:$68 sps:$4 sm:$0xff]  }
 0xa95   :  { %13498 = vmatprep.subr.bf16.mxu0 %v28710_v12 }
 0xa98   :  { %13499 = vmatpush1.bf16.msra.mxu0 %v26957_v62  ;;  %v24213_v62 = vld [vmem:[#allocation2 + $0xc58] ss:$68 sps:$4 sm:$0xff]  }
 0xa99   :  { %13500 = vmatprep.subr.bf16.mxu0 %v28710_v12 }
 0xa9a   :  { %14781 = vmatmul.mubr.bf16.gmra.mrb[240].mxu1 %v24201_v38  ;;  %v24262_v38 = vld [vmem:[#allocation2 + $0x1124] ss:$68 sps:$4 sm:$0xff]  }
 0xa9b   :  { %13005 = vmatmul.mubr.bf16.gmra.mrb[136].mxu0 %v24198_v44  ;;  %14788 = vmatprep.mubr.bf16.mxu1 %v24202_v45  ;;  %v24266_v44 = vld [vmem:[#allocation2 + $0x914] ss:$68 sps:$4 sm:$0xff]   ;;  %v24267_v45 = vld [vmem:[#allocation2 + $0x1120] ss:$68 sps:$4 sm:$0xff]  }
 0xa9c   :  { %13501 = vmatpush1.bf16.msra.mxu0 %v26969_v5  ;;  %13012 = vmatprep.mubr.bf16.mxu0 %v24206_v37  ;;  %v24210_v5 = vld [vmem:[#allocation2 + $0x448] ss:$68 sps:$4 sm:$0xff]   ;;  %v24264_v37 = vld [vmem:[#allocation2 + $0x910] ss:$68 sps:$4 sm:$0xff]  }
 0xa9d   :  { %13502 = vmatprep.subr.bf16.mxu0 %v28710_v12 }
 0xaa0   :  { %13503 = vmatpush1.bf16.msra.mxu0 %v26981_v11  ;;  %v24219_v11 = vld [vmem:[#allocation2 + $0xce0] ss:$68 sps:$4 sm:$0xff]  }
 0xaa1   :  { %13504 = vmatprep.subr.bf16.mxu0 %v28710_v12 }
 0xaa2   :  { %14789 = vmatmul.mubr.bf16.gmra.mrb[244].mxu1 %v24207_v50  ;;  %v24268_v50 = vld [vmem:[#allocation2 + $0x11ac] ss:$68 sps:$4 sm:$0xff]  }
 0xaa3   :  { %13013 = vmatmul.mubr.bf16.gmra.mrb[140].mxu0 %v24204_v56  ;;  %14796 = vmatprep.mubr.bf16.mxu1 %v24208_v7  ;;  %v24272_v56 = vld [vmem:[#allocation2 + $0x99c] ss:$68 sps:$4 sm:$0xff]   ;;  %v24273_v7 = vld [vmem:[#allocation2 + $0x11a8] ss:$68 sps:$4 sm:$0xff]  }
 0xaa4   :  { %13505 = vmatpush1.bf16.msra.mxu0 %v26993_v16  ;;  %13020 = vmatprep.mubr.bf16.mxu0 %v24212_v59  ;;  %v24220_v16 = vld [vmem:[#allocation2 + $0xd68] ss:$68 sps:$4 sm:$0xff]   ;;  %v24270_v59 = vld [vmem:[#allocation2 + $0x998] ss:$68 sps:$4 sm:$0xff]  }
 0xaa5   :  { %13506 = vmatprep.subr.bf16.mxu0 %v28710_v12 }
 0xaa8   :  { %13507 = vmatpush1.bf16.msra.mxu0 %v27005_v23  ;;  %v24231_v23 = vld [vmem:[#allocation2 + $0xdf0] ss:$68 sps:$4 sm:$0xff]  }
 0xaaa   :  { %14797 = vmatmul.mubr.bf16.gmra.mrb[248].mxu1 %v24213_v62  ;;  %v24274_v62 = vld [vmem:[#allocation2 + $0x1234] ss:$68 sps:$4 sm:$0xff]  }
 0xaab   :  { %13021 = vmatmul.mubr.bf16.gmra.mrb[144].mxu0 %v24210_v5  ;;  %14804 = vmatprep.mubr.bf16.mxu1 %v24214_v53  ;;  %v24278_v5 = vld [vmem:[#allocation2 + $0xa24] ss:$68 sps:$4 sm:$0xff]   ;;  %v24279_v53 = vld [vmem:[#allocation2 + $0x1230] ss:$68 sps:$4 sm:$0xff]  }
 0xaac   :  { %13028 = vmatprep.mubr.bf16.mxu0 %v24218_v25  ;;  %v24276_v25 = vld [vmem:[#allocation2 + $0xa20] ss:$68 sps:$4 sm:$0xff]  }
 0xab2   :  { %14805 = vmatmul.mubr.bf16.gmra.mrb[252].mxu1 %v24219_v11  ;;  %v24280_v11 = vld [vmem:[#allocation2 + $0x12bc] ss:$68 sps:$4 sm:$0xff]  }
 0xab3   :  { %13029 = vmatmul.mubr.bf16.gmra.mrb[0].mxu0 %v24216_v20  ;;  %14812 = vmatprep.mubr.bf16.mxu1 %v24222_v43  ;;  %v24284_v20 = vld [vmem:[#allocation2 + $0xaac] ss:$68 sps:$4 sm:$0xff]   ;;  %v24285_v43 = vld [vmem:[#allocation2 + $0x12b8] ss:$68 sps:$4 sm:$0xff]  }
 0xab4   :  { %13036 = vmatprep.mubr.bf16.mxu0 %v24225_v27  ;;  %v24282_v27 = vld [vmem:[#allocation2 + $0xaa8] ss:$68 sps:$4 sm:$0xff]  }
 0xaba   :  { %14813 = vmatmul.mubr.bf16.gmra.mrb[148].mxu1 %v24220_v16  ;;  %v24288_v16 = vld [vmem:[#allocation2 + $0x1344] ss:$68 sps:$4 sm:$0xff]  }
 0xabb   :  { %13037 = vmatmul.mubr.bf16.gmra.mrb[4].mxu0 %v24223_v40  ;;  %14820 = vmatprep.mubr.bf16.mxu1 %v24226_v15  ;;  %v24291_v40 = vld [vmem:[#allocation2 + $0xb34] ss:$68 sps:$4 sm:$0xff]  }
 0xabc   :  { %13044 = vmatprep.mubr.bf16.mxu0 %v24230_v9 }
 0xac2   :  { %14821 = vmatmul.mubr.bf16.gmra.mrb[0].mxu1 %v24231_v23  ;;  %v24286_v23 = vld [vmem:[#allocation2 + $0x1340] ss:$68 sps:$4 sm:$0xff]  }
 0xac3   :  { %13045 = vmatmul.mubr.bf16.gmra.mrb[8].mxu0 %v24228_v34  ;;  %14828 = vmatprep.mubr.bf16.mxu1 %v24232_v31  ;;  %v24289_v31 = vld [vmem:[#allocation2 + $0xb30] ss:$68 sps:$4 sm:$0xff]  }
 0xac4   :  { %13052 = vmatprep.mubr.bf16.mxu0 %v24236_v0  ;;  %v24292_v0 = vld [vmem:[#allocation2 + $0x13cc] ss:$68 sps:$4 sm:$0xff]  }
 0xaca   :  { %14829 = vmatmul.mubr.bf16.gmra.mrb[4].mxu1 %v24237_v35 }
 0xacb   :  { %13053 = vmatmul.mubr.bf16.gmra.mrb[12].mxu0 %v24234_v39  ;;  %14836 = vmatprep.mubr.bf16.mxu1 %v24238_v48  ;;  %v24296_v39 = vld [vmem:[#allocation2 + $0xbbc] ss:$68 sps:$4 sm:$0xff]   ;;  %v24297_v48 = vld [vmem:[#allocation2 + $0x13c8] ss:$68 sps:$4 sm:$0xff]  }
 0xacc   :  { %13060 = vmatprep.mubr.bf16.mxu0 %v24242_v29  ;;  %v24294_v29 = vld [vmem:[#allocation2 + $0xbb8] ss:$68 sps:$4 sm:$0xff]  }
 0xad2   :  { %14837 = vmatmul.mubr.bf16.gmra.mrb[8].mxu1 %v24243_v17  ;;  %v24298_v17 = vld [vmem:[#allocation2 + $0x1454] ss:$68 sps:$4 sm:$0xff]  }
 0xad3   :  { %13061 = vmatmul.mubr.bf16.gmra.mrb[16].mxu0 %v24240_v10  ;;  %14844 = vmatprep.mubr.bf16.mxu1 %v24244_v3  ;;  %v24302_v10 = vld [vmem:[#allocation2 + $0xc44] ss:$68 sps:$4 sm:$0xff]   ;;  %v24303_v3 = vld [vmem:[#allocation2 + $0x1450] ss:$68 sps:$4 sm:$0xff]  }
 0xad4   :  { %13068 = vmatprep.mubr.bf16.mxu0 %v24248_v36  ;;  %v24300_v36 = vld [vmem:[#allocation2 + $0xc40] ss:$68 sps:$4 sm:$0xff]  }
 0xada   :  { %14845 = vmatmul.mubr.bf16.gmra.mrb[12].mxu1 %v24249_v57  ;;  %v24304_v57 = vld [vmem:[#allocation2 + $0x14dc] ss:$68 sps:$4 sm:$0xff]  }
 0xadb   :  { %13069 = vmatmul.mubr.bf16.gmra.mrb[20].mxu0 %v24246_v8  ;;  %14852 = vmatprep.mubr.bf16.mxu1 %v24250_v47  ;;  %v24308_v8 = vld [vmem:[#allocation2 + $0xccc] ss:$68 sps:$4 sm:$0xff]   ;;  %v24309_v47 = vld [vmem:[#allocation2 + $0x14d8] ss:$68 sps:$4 sm:$0xff]  }
 0xadc   :  { %13076 = vmatprep.mubr.bf16.mxu0 %v24254_v46  ;;  %v24306_v46 = vld [vmem:[#allocation2 + $0xcc8] ss:$68 sps:$4 sm:$0xff]  }
 0xae2   :  { %14853 = vmatmul.mubr.bf16.gmra.mrb[16].mxu1 %v24255_v18  ;;  %v24310_v18 = vld [vmem:[#allocation2 + $0x1564] ss:$68 sps:$4 sm:$0xff]  }
 0xae3   :  { %13077 = vmatmul.mubr.bf16.gmra.mrb[24].mxu0 %v24252_v61  ;;  %14860 = vmatprep.mubr.bf16.mxu1 %v24256_v6  ;;  %v24314_v61 = vld [vmem:[#allocation2 + $0xd54] ss:$68 sps:$4 sm:$0xff]   ;;  %v24315_v6 = vld [vmem:[#allocation2 + $0x1560] ss:$68 sps:$4 sm:$0xff]  }
 0xae4   :  { %13084 = vmatprep.mubr.bf16.mxu0 %v24260_v32  ;;  %v24312_v32 = vld [vmem:[#allocation2 + $0xd50] ss:$68 sps:$4 sm:$0xff]  }
 0xaea   :  { %14861 = vmatmul.mubr.bf16.gmra.mrb[20].mxu1 %v24261_v63  ;;  %v24316_v63 = vld [vmem:[#allocation2 + $0x15ec] ss:$68 sps:$4 sm:$0xff]  }
 0xaeb   :  { %13085 = vmatmul.mubr.bf16.gmra.mrb[28].mxu0 %v24258_v1  ;;  %14868 = vmatprep.mubr.bf16.mxu1 %v24262_v38  ;;  %v24320_v1 = vld [vmem:[#allocation2 + $0xddc] ss:$68 sps:$4 sm:$0xff]   ;;  %v24321_v38 = vld [vmem:[#allocation2 + $0x15e8] ss:$68 sps:$4 sm:$0xff]  }
 0xaec   :  { %13092 = vmatprep.mubr.bf16.mxu0 %v24266_v44  ;;  %v24318_v44 = vld [vmem:[#allocation2 + $0xdd8] ss:$68 sps:$4 sm:$0xff]  }
 0xaf2   :  { %14869 = vmatmul.mubr.bf16.gmra.mrb[24].mxu1 %v24267_v45  ;;  %v24322_v45 = vld [vmem:[#allocation2 + $0x1674] ss:$68 sps:$4 sm:$0xff]  }
 0xaf3   :  { %13093 = vmatmul.mubr.bf16.gmra.mrb[32].mxu0 %v24264_v37  ;;  %14876 = vmatprep.mubr.bf16.mxu1 %v24268_v50  ;;  %v24326_v37 = vld [vmem:[#allocation2 + $0xe64] ss:$68 sps:$4 sm:$0xff]   ;;  %v24327_v50 = vld [vmem:[#allocation2 + $0x1670] ss:$68 sps:$4 sm:$0xff]  }
 0xaf4   :  { %13100 = vmatprep.mubr.bf16.mxu0 %v24272_v56  ;;  %v24324_v56 = vld [vmem:[#allocation2 + $0xe60] ss:$68 sps:$4 sm:$0xff]  }
 0xafa   :  { %14877 = vmatmul.mubr.bf16.gmra.mrb[28].mxu1 %v24273_v7  ;;  %v24328_v7 = vld [vmem:[#allocation2 + $0x16fc] ss:$68 sps:$4 sm:$0xff]  }
 0xafb   :  { %13101 = vmatmul.mubr.bf16.gmra.mrb[36].mxu0 %v24270_v59  ;;  %14884 = vmatprep.mubr.bf16.mxu1 %v24274_v62  ;;  %v24332_v59 = vld [vmem:[#allocation2 + $0xeec] ss:$68 sps:$4 sm:$0xff]   ;;  %v24333_v62 = vld [vmem:[#allocation2 + $0x16f8] ss:$68 sps:$4 sm:$0xff]  }
 0xafc   :  { %13108 = vmatprep.mubr.bf16.mxu0 %v24278_v5  ;;  %v24330_v5 = vld [vmem:[#allocation2 + $0xee8] ss:$68 sps:$4 sm:$0xff]  }
 0xb02   :  { %14885 = vmatmul.mubr.bf16.gmra.mrb[32].mxu1 %v24279_v53  ;;  %v24334_v53 = vld [vmem:[#allocation2 + $0x1784] ss:$68 sps:$4 sm:$0xff]  }
 0xb03   :  { %13109 = vmatmul.mubr.bf16.gmra.mrb[40].mxu0 %v24276_v25  ;;  %14892 = vmatprep.mubr.bf16.mxu1 %v24280_v11  ;;  %v24338_v25 = vld [vmem:[#allocation2 + $0xf74] ss:$68 sps:$4 sm:$0xff]   ;;  %v24339_v11 = vld [vmem:[#allocation2 + $0x1780] ss:$68 sps:$4 sm:$0xff]  }
 0xb04   :  { %13116 = vmatprep.mubr.bf16.mxu0 %v24284_v20  ;;  %v24336_v20 = vld [vmem:[#allocation2 + $0xf70] ss:$68 sps:$4 sm:$0xff]  }
 0xb0a   :  { %14893 = vmatmul.mubr.bf16.gmra.mrb[36].mxu1 %v24285_v43  ;;  %v24340_v43 = vld [vmem:[#allocation2 + $0x180c] ss:$68 sps:$4 sm:$0xff]  }
 0xb0b   :  { %13117 = vmatmul.mubr.bf16.gmra.mrb[44].mxu0 %v24282_v27  ;;  %14900 = vmatprep.mubr.bf16.mxu1 %v24288_v16  ;;  %v24344_v27 = vld [vmem:[#allocation2 + $0xffc] ss:$68 sps:$4 sm:$0xff]   ;;  %v24345_v16 = vld [vmem:[#allocation2 + $0x1808] ss:$68 sps:$4 sm:$0xff]  }
 0xb0c   :  { %13124 = vmatprep.mubr.bf16.mxu0 %v24291_v40  ;;  %v24342_v40 = vld [vmem:[#allocation2 + $0xff8] ss:$68 sps:$4 sm:$0xff]  }
 0xb0d   :  { %v27724_v15 = vpop.f32.mrb[192].mxu1 }
 0xb0e   :  { %v14688_v9 = vpop.f32.mrb[193].mxu1 }
 0xb0f   :  { %v27726_v34 = vpop.f32.mrb[194].mxu1  ;;  %v24346_v9 = vld [vmem:[#allocation2 + $0x1894] ss:$68 sps:$4 sm:$0xff]  }
 0xb10   :  { %v14691_v35 = vpop.f32.mrb[195].mxu1 }
 0xb11   :  { %v24352_v35 = vld [vmem:[#allocation2 + $0x191c] ss:$68 sps:$4 sm:$0xff]  }
 0xb12   :  { %14901 = vmatmul.mubr.bf16.gmra.mrb[192].mxu1 %v24286_v23  ;;  %v24350_v23 = vld [vmem:[#allocation2 + $0x1084] ss:$68 sps:$4 sm:$0xff]  }
 0xb13   :  { %13125 = vmatmul.mubr.bf16.gmra.mrb[48].mxu0 %v24289_v31  ;;  %14908 = vmatprep.mubr.bf16.mxu1 %v24292_v0  ;;  %v24351_v31 = vld [vmem:[#allocation2 + $0x1890] ss:$68 sps:$4 sm:$0xff]   ;;  %v24348_v0 = vld [vmem:[#allocation2 + $0x1080] ss:$68 sps:$4 sm:$0xff]  }
 0xb14   :  { %13132 = vmatprep.mubr.bf16.mxu0 %v24296_v39  ;;  %v24356_v39 = vld [vmem:[#allocation2 + $0x110c] ss:$68 sps:$4 sm:$0xff]  }
 0xb1a   :  { %14909 = vmatmul.mubr.bf16.gmra.mrb[44].mxu1 %v24297_v48  ;;  %v24357_v48 = vld [vmem:[#allocation2 + $0x1918] ss:$68 sps:$4 sm:$0xff]  }
 0xb1b   :  { %13133 = vmatmul.mubr.bf16.gmra.mrb[52].mxu0 %v24294_v29  ;;  %14916 = vmatprep.mubr.bf16.mxu1 %v24298_v17  ;;  %v24354_v29 = vld [vmem:[#allocation2 + $0x1108] ss:$68 sps:$4 sm:$0xff]  }
 0xb1c   :  { %13140 = vmatprep.mubr.bf16.mxu0 %v24302_v10  ;;  %v24358_v17 = vld [vmem:[#allocation2 + $0x19a4] ss:$68 sps:$4 sm:$0xff]   ;;  %v24362_v10 = vld [vmem:[#allocation2 + $0x1194] ss:$68 sps:$4 sm:$0xff]  }
 0xb22   :  { %14917 = vmatmul.mubr.bf16.gmra.mrb[48].mxu1 %v24303_v3  ;;  %v24363_v3 = vld [vmem:[#allocation2 + $0x19a0] ss:$68 sps:$4 sm:$0xff]  }
 0xb23   :  { %13141 = vmatmul.mubr.bf16.gmra.mrb[56].mxu0 %v24300_v36  ;;  %14924 = vmatprep.mubr.bf16.mxu1 %v24304_v57  ;;  %v24360_v36 = vld [vmem:[#allocation2 + $0x1190] ss:$68 sps:$4 sm:$0xff]  }
 0xb24   :  { %13148 = vmatprep.mubr.bf16.mxu0 %v24308_v8  ;;  %v24364_v57 = vld [vmem:[#allocation2 + $0x1a2c] ss:$68 sps:$4 sm:$0xff]   ;;  %v24368_v8 = vld [vmem:[#allocation2 + $0x121c] ss:$68 sps:$4 sm:$0xff]  }
 0xb2a   :  { %14925 = vmatmul.mubr.bf16.gmra.mrb[52].mxu1 %v24309_v47  ;;  %v24369_v47 = vld [vmem:[#allocation2 + $0x1a28] ss:$68 sps:$4 sm:$0xff]  }
 0xb2b   :  { %13149 = vmatmul.mubr.bf16.gmra.mrb[60].mxu0 %v24306_v46  ;;  %14932 = vmatprep.mubr.bf16.mxu1 %v24310_v18  ;;  %v24366_v46 = vld [vmem:[#allocation2 + $0x1218] ss:$68 sps:$4 sm:$0xff]  }
 0xb2c   :  { %13156 = vmatprep.mubr.bf16.mxu0 %v24314_v61  ;;  %v24370_v18 = vld [vmem:[#allocation2 + $0x1ab4] ss:$68 sps:$4 sm:$0xff]   ;;  %v24374_v61 = vld [vmem:[#allocation2 + $0x12a4] ss:$68 sps:$4 sm:$0xff]  }
 0xb32   :  { %14933 = vmatmul.mubr.bf16.gmra.mrb[56].mxu1 %v24315_v6  ;;  %v24375_v6 = vld [vmem:[#allocation2 + $0x1ab0] ss:$68 sps:$4 sm:$0xff]  }
 0xb33   :  { %13157 = vmatmul.mubr.bf16.gmra.mrb[64].mxu0 %v24312_v32  ;;  %14940 = vmatprep.mubr.bf16.mxu1 %v24316_v63  ;;  %v24372_v32 = vld [vmem:[#allocation2 + $0x12a0] ss:$68 sps:$4 sm:$0xff]  }
 0xb34   :  { %13164 = vmatprep.mubr.bf16.mxu0 %v24320_v1  ;;  %v24376_v63 = vld [vmem:[#allocation2 + $0x1b3c] ss:$68 sps:$4 sm:$0xff]   ;;  %v24380_v1 = vld [vmem:[#allocation2 + $0x132c] ss:$68 sps:$4 sm:$0xff]  }
 0xb3a   :  { %14941 = vmatmul.mubr.bf16.gmra.mrb[60].mxu1 %v24321_v38  ;;  %v24381_v38 = vld [vmem:[#allocation2 + $0x1b38] ss:$68 sps:$4 sm:$0xff]  }
 0xb3b   :  { %13165 = vmatmul.mubr.bf16.gmra.mrb[68].mxu0 %v24318_v44  ;;  %14948 = vmatprep.mubr.bf16.mxu1 %v24322_v45  ;;  %v24378_v44 = vld [vmem:[#allocation2 + $0x1328] ss:$68 sps:$4 sm:$0xff]  }
 0xb3c   :  { %13172 = vmatprep.mubr.bf16.mxu0 %v24326_v37  ;;  %v24382_v45 = vld [vmem:[#allocation2 + $0x1bc4] ss:$68 sps:$4 sm:$0xff]   ;;  %v24386_v37 = vld [vmem:[#allocation2 + $0x13b4] ss:$68 sps:$4 sm:$0xff]  }
 0xb42   :  { %14949 = vmatmul.mubr.bf16.gmra.mrb[64].mxu1 %v24327_v50 }
 0xb43   :  { %13173 = vmatmul.mubr.bf16.gmra.mrb[72].mxu0 %v24324_v56  ;;  %14956 = vmatprep.mubr.bf16.mxu1 %v24328_v7  ;;  %v24387_v56 = vld [vmem:[#allocation2 + $0x1bc0] ss:$68 sps:$4 sm:$0xff]  }
 0xb44   :  { %13180 = vmatprep.mubr.bf16.mxu0 %v24332_v59  ;;  %v24384_v59 = vld [vmem:[#allocation2 + $0x13b0] ss:$68 sps:$4 sm:$0xff]  }
 0xb4a   :  { %14957 = vmatmul.mubr.bf16.gmra.mrb[68].mxu1 %v24333_v62  ;;  %v24388_v62 = vld [vmem:[#allocation2 + $0x1c4c] ss:$68 sps:$4 sm:$0xff]  }
 0xb4b   :  { %13181 = vmatmul.mubr.bf16.gmra.mrb[76].mxu0 %v24330_v5  ;;  %14964 = vmatprep.mubr.bf16.mxu1 %v24334_v53  ;;  %v24392_v53 = vld [vmem:[#allocation2 + $0x143c] ss:$68 sps:$4 sm:$0xff]  }
 0xb4c   :  { %13188 = vmatprep.mubr.bf16.mxu0 %v24338_v25 }
 0xb52   :  { %14965 = vmatmul.mubr.bf16.gmra.mrb[72].mxu1 %v24339_v11  ;;  %v24393_v11 = vld [vmem:[#allocation2 + $0x1c48] ss:$68 sps:$4 sm:$0xff]  }
 0xb53   :  { %13189 = vmatmul.mubr.bf16.gmra.mrb[80].mxu0 %v24336_v20  ;;  %14972 = vmatprep.mubr.bf16.mxu1 %v24340_v43  ;;  %v24390_v20 = vld [vmem:[#allocation2 + $0x1438] ss:$68 sps:$4 sm:$0xff]  }
 0xb54   :  { %13196 = vmatprep.mubr.bf16.mxu0 %v24344_v27  ;;  %v24394_v43 = vld [vmem:[#allocation2 + $0x1cd4] ss:$68 sps:$4 sm:$0xff]   ;;  %v24398_v27 = vld [vmem:[#allocation2 + $0x14c4] ss:$68 sps:$4 sm:$0xff]  }
 0xb5a   :  { %14973 = vmatmul.mubr.bf16.gmra.mrb[76].mxu1 %v24345_v16  ;;  %v24399_v16 = vld [vmem:[#allocation2 + $0x1cd0] ss:$68 sps:$4 sm:$0xff]  }
 0xb5b   :  { %13197 = vmatmul.mubr.bf16.gmra.mrb[84].mxu0 %v24342_v40  ;;  %14980 = vmatprep.mubr.bf16.mxu1 %v24346_v9  ;;  %v24396_v40 = vld [vmem:[#allocation2 + $0x14c0] ss:$68 sps:$4 sm:$0xff]  }
 0xb5c   :  { %13204 = vmatprep.mubr.bf16.mxu0 %v24350_v23  ;;  %v24400_v9 = vld [vmem:[#allocation2 + $0x1d5c] ss:$68 sps:$4 sm:$0xff]   ;;  %v24404_v23 = vld [vmem:[#allocation2 + $0x154c] ss:$68 sps:$4 sm:$0xff]  }
 0xb62   :  { %14981 = vmatmul.mubr.bf16.gmra.mrb[80].mxu1 %v24351_v31  ;;  %v24405_v31 = vld [vmem:[#allocation2 + $0x1d58] ss:$68 sps:$4 sm:$0xff]  }
 0xb63   :  { %13205 = vmatmul.mubr.bf16.gmra.mrb[88].mxu0 %v24348_v0  ;;  %14988 = vmatprep.mubr.bf16.mxu1 %v24352_v35  ;;  %v24402_v0 = vld [vmem:[#allocation2 + $0x1548] ss:$68 sps:$4 sm:$0xff]  }
 0xb64   :  { %13212 = vmatprep.mubr.bf16.mxu0 %v24356_v39  ;;  %v24406_v35 = vld [vmem:[#allocation2 + $0x1de4] ss:$68 sps:$4 sm:$0xff]   ;;  %v24410_v39 = vld [vmem:[#allocation2 + $0x15d4] ss:$68 sps:$4 sm:$0xff]  }
 0xb6a   :  { %14989 = vmatmul.mubr.bf16.gmra.mrb[84].mxu1 %v24357_v48  ;;  %v24411_v48 = vld [vmem:[#allocation2 + $0x1de0] ss:$68 sps:$4 sm:$0xff]  }
 0xb6b   :  { %13213 = vmatmul.mubr.bf16.gmra.mrb[92].mxu0 %v24354_v29  ;;  %14996 = vmatprep.mubr.bf16.mxu1 %v24358_v17  ;;  %v24408_v29 = vld [vmem:[#allocation2 + $0x15d0] ss:$68 sps:$4 sm:$0xff]  }
 0xb6c   :  { %13220 = vmatprep.mubr.bf16.mxu0 %v24362_v10  ;;  %v24412_v17 = vld [vmem:[#allocation2 + $0x1e6c] ss:$68 sps:$4 sm:$0xff]   ;;  %v24416_v10 = vld [vmem:[#allocation2 + $0x165c] ss:$68 sps:$4 sm:$0xff]  }
 0xb72   :  { %14997 = vmatmul.mubr.bf16.gmra.mrb[88].mxu1 %v24363_v3  ;;  %v24417_v3 = vld [vmem:[#allocation2 + $0x1e68] ss:$68 sps:$4 sm:$0xff]  }
 0xb73   :  { %13221 = vmatmul.mubr.bf16.gmra.mrb[96].mxu0 %v24360_v36  ;;  %15004 = vmatprep.mubr.bf16.mxu1 %v24364_v57  ;;  %v24414_v36 = vld [vmem:[#allocation2 + $0x1658] ss:$68 sps:$4 sm:$0xff]  }
 0xb74   :  { %13228 = vmatprep.mubr.bf16.mxu0 %v24368_v8  ;;  %v24418_v57 = vld [vmem:[#allocation2 + $0x1ef4] ss:$68 sps:$4 sm:$0xff]   ;;  %v24422_v8 = vld [vmem:[#allocation2 + $0x16e4] ss:$68 sps:$4 sm:$0xff]  }
 0xb7a   :  { %15005 = vmatmul.mubr.bf16.gmra.mrb[92].mxu1 %v24369_v47  ;;  %v24423_v47 = vld [vmem:[#allocation2 + $0x1ef0] ss:$68 sps:$4 sm:$0xff]  }
 0xb7b   :  { %13229 = vmatmul.mubr.bf16.gmra.mrb[100].mxu0 %v24366_v46  ;;  %15012 = vmatprep.mubr.bf16.mxu1 %v24370_v18  ;;  %v24420_v46 = vld [vmem:[#allocation2 + $0x16e0] ss:$68 sps:$4 sm:$0xff]  }
 0xb7c   :  { %13236 = vmatprep.mubr.bf16.mxu0 %v24374_v61  ;;  %v24424_v18 = vld [vmem:[#allocation2 + $0x1f7c] ss:$68 sps:$4 sm:$0xff]   ;;  %v24428_v61 = vld [vmem:[#allocation2 + $0x176c] ss:$68 sps:$4 sm:$0xff]  }
 0xb82   :  { %15013 = vmatmul.mubr.bf16.gmra.mrb[96].mxu1 %v24375_v6  ;;  %v24429_v6 = vld [vmem:[#allocation2 + $0x1f78] ss:$68 sps:$4 sm:$0xff]  }
 0xb83   :  { %13237 = vmatmul.mubr.bf16.gmra.mrb[104].mxu0 %v24372_v32  ;;  %15020 = vmatprep.mubr.bf16.mxu1 %v24376_v63  ;;  %v24426_v32 = vld [vmem:[#allocation2 + $0x1768] ss:$68 sps:$4 sm:$0xff]  }
 0xb84   :  { %13244 = vmatprep.mubr.bf16.mxu0 %v24380_v1  ;;  %v24430_v63 = vld [vmem:[#allocation2 + $0x2004] ss:$68 sps:$4 sm:$0xff]   ;;  %v24434_v1 = vld [vmem:[#allocation2 + $0x17f4] ss:$68 sps:$4 sm:$0xff]  }
 0xb8a   :  { %15021 = vmatmul.mubr.bf16.gmra.mrb[100].mxu1 %v24381_v38  ;;  %v24435_v38 = vld [vmem:[#allocation2 + $0x2000] ss:$68 sps:$4 sm:$0xff]  }
 0xb8b   :  { %13245 = vmatmul.mubr.bf16.gmra.mrb[108].mxu0 %v24378_v44  ;;  %15028 = vmatprep.mubr.bf16.mxu1 %v24382_v45  ;;  %v24432_v44 = vld [vmem:[#allocation2 + $0x17f0] ss:$68 sps:$4 sm:$0xff]  }
 0xb8c   :  { %13252 = vmatprep.mubr.bf16.mxu0 %v24386_v37  ;;  %v24436_v45 = vld [vmem:[#allocation2 + $0x208c] ss:$68 sps:$4 sm:$0xff]   ;;  %v24440_v37 = vld [vmem:[#allocation2 + $0x187c] ss:$68 sps:$4 sm:$0xff]  }
 0xb8e   :  { %v27728_v50 = vpop.f32.mrb[4].mxu0 }
 0xb8f   :  { %v13040_v7 = vpop.f32.mrb[5].mxu0 }
 0xb90   :  { %v27730_v5 = vpop.f32.mrb[6].mxu0  ;;  %v24438_v7 = vld [vmem:[#allocation2 + $0x1878] ss:$68 sps:$4 sm:$0xff]  }
 0xb91   :  { %v13043_v25 = vpop.f32.mrb[7].mxu0 }
 0xb92   :  { %15029 = vmatmul.mubr.bf16.gmra.mrb[104].mxu1 %v24387_v56  ;;  %v24441_v56 = vld [vmem:[#allocation2 + $0x2088] ss:$68 sps:$4 sm:$0xff]   ;;  %v24444_v25 = vld [vmem:[#allocation2 + $0x1900] ss:$68 sps:$4 sm:$0xff]  }
 0xb93   :  { %13253 = vmatmul.mubr.bf16.gmra.mrb[4].mxu0 %v24384_v59  ;;  %15036 = vmatprep.mubr.bf16.mxu1 %v24388_v62  ;;  %v24442_v59 = vld [vmem:[#allocation2 + $0x2114] ss:$68 sps:$4 sm:$0xff]   ;;  %v24446_v62 = vld [vmem:[#allocation2 + $0x1904] ss:$68 sps:$4 sm:$0xff]  }
 0xb94   :  { %13260 = vmatprep.mubr.bf16.mxu0 %v24392_v53  ;;  %v24447_v53 = vld [vmem:[#allocation2 + $0x2110] ss:$68 sps:$4 sm:$0xff]  }
 0xb9a   :  { %15037 = vmatmul.mubr.bf16.gmra.mrb[108].mxu1 %v24393_v11  ;;  %v24450_v11 = vld [vmem:[#allocation2 + $0x219c] ss:$68 sps:$4 sm:$0xff]  }
 0xb9b   :  { %13261 = vmatmul.mubr.bf16.gmra.mrb[196].mxu0 %v24390_v20  ;;  %15044 = vmatprep.mubr.bf16.mxu1 %v24394_v43  ;;  %v24453_v20 = vld [vmem:[#allocation2 + $0x198c] ss:$68 sps:$4 sm:$0xff]   ;;  %v6670_v43 = vld [vmem:[#allocation2 + $0x2220] sm:$0xff] }
 0xb9c   :  { %13268 = vmatprep.mubr.bf16.mxu0 %v24398_v27  ;;  %v24448_v27 = vld [vmem:[#allocation2 + $0x2198] ss:$68 sps:$4 sm:$0xff]  }
 0xba2   :  { %15045 = vmatmul.mubr.bf16.gmra.mrb[112].mxu1 %v24399_v16  ;;  %v24451_v16 = vld [vmem:[#allocation2 + $0x1988] ss:$68 sps:$4 sm:$0xff]  }
 0xba3   :  { %13269 = vmatmul.mubr.bf16.gmra.mrb[200].mxu0 %v24396_v40  ;;  %15052 = vmatprep.mubr.bf16.mxu1 %v24400_v9  ;;  %v19537_v40 = vcombine.high %v6670_v43, %v6670_v43  ;;  %v24457_v9 = vld [vmem:[#allocation2 + $0x1a14] ss:$68 sps:$4 sm:$0xff]  }
 0xba4   :  { %13276 = vmatprep.mubr.bf16.mxu0 %v24404_v23  ;;  %v19536_v23 = vcombine.low %v6670_v43, %v6670_v43 }
 0xbaa   :  { %15053 = vmatmul.mubr.bf16.gmra.mrb[116].mxu1 %v24405_v31  ;;  %v24455_v31 = vld [vmem:[#allocation2 + $0x1a10] ss:$68 sps:$4 sm:$0xff]  }
 0xbab   :  { %13277 = vmatmul.mubr.bf16.gmra.mrb[204].mxu0 %v24402_v0  ;;  %15060 = vmatprep.mubr.bf16.mxu1 %v24406_v35  ;;  %v24461_v0 = vld [vmem:[#allocation2 + $0x2c] ss:$68 sps:$4 sm:$0xff]   ;;  %v24464_v35 = vld [vmem:[#allocation2 + $0x1a9c] ss:$68 sps:$4 sm:$0xff]  }
 0xbac   :  { %13284 = vmatprep.mubr.bf16.mxu0 %v24410_v39  ;;  %v24459_v39 = vld [vmem:[#allocation2 + $0x28] ss:$68 sps:$4 sm:$0xff]  }
 0xbb2   :  { %15061 = vmatmul.mubr.bf16.gmra.mrb[120].mxu1 %v24411_v48  ;;  %v24462_v48 = vld [vmem:[#allocation2 + $0x1a98] ss:$68 sps:$4 sm:$0xff]  }
 0xbb3   :  { %13285 = vmatmul.mubr.bf16.gmra.mrb[208].mxu0 %v24408_v29  ;;  %15068 = vmatprep.mubr.bf16.mxu1 %v24412_v17  ;;  %v24465_v29 = vld [vmem:[#allocation2 + $0xb4] ss:$68 sps:$4 sm:$0xff]   ;;  %v24469_v17 = vld [vmem:[#allocation2 + $0x1b24] ss:$68 sps:$4 sm:$0xff]  }
 0xbb4   :  { %13292 = vmatprep.mubr.bf16.mxu0 %v24416_v10  ;;  %v24470_v10 = vld [vmem:[#allocation2 + $0xb0] ss:$68 sps:$4 sm:$0xff]  }
 0xbba   :  { %15069 = vmatmul.mubr.bf16.gmra.mrb[124].mxu1 %v24417_v3  ;;  %v24467_v3 = vld [vmem:[#allocation2 + $0x1b20] ss:$68 sps:$4 sm:$0xff]  }
 0xbbb   :  { %13293 = vmatmul.mubr.bf16.gmra.mrb[212].mxu0 %v24414_v36  ;;  %15076 = vmatprep.mubr.bf16.mxu1 %v24418_v57  ;;  %v24471_v36 = vld [vmem:[#allocation2 + $0x13c] ss:$68 sps:$4 sm:$0xff]   ;;  %v24475_v57 = vld [vmem:[#allocation2 + $0x1bac] ss:$68 sps:$4 sm:$0xff]  }
 0xbbc   :  { %13300 = vmatprep.mubr.bf16.mxu0 %v24422_v8  ;;  %v24473_v8 = vld [vmem:[#allocation2 + $0x1ba8] ss:$68 sps:$4 sm:$0xff]  }
 0xbc2   :  { %15077 = vmatmul.mubr.bf16.gmra.mrb[128].mxu1 %v24423_v47  ;;  %v24481_v47 = vld [vmem:[#allocation2 + $0x1c34] ss:$68 sps:$4 sm:$0xff]  }
 0xbc3   :  { %13301 = vmatmul.mubr.bf16.gmra.mrb[216].mxu0 %v24420_v46  ;;  %15084 = vmatprep.mubr.bf16.mxu1 %v24424_v18  ;;  %v24479_v18 = vld [vmem:[#allocation2 + $0x1c30] ss:$68 sps:$4 sm:$0xff]  }
 0xbc4   :  { %13308 = vmatprep.mubr.bf16.mxu0 %v24428_v61  ;;  %v24483_v61 = vld [vmem:[#allocation2 + $0x24c] ss:$68 sps:$4 sm:$0xff]  }
 0xbca   :  { %15085 = vmatmul.mubr.bf16.gmra.mrb[132].mxu1 %v24429_v6 }
 0xbcb   :  { %13309 = vmatmul.mubr.bf16.gmra.mrb[220].mxu0 %v24426_v32  ;;  %15092 = vmatprep.mubr.bf16.mxu1 %v24430_v63  ;;  %v24487_v32 = vld [vmem:[#allocation2 + $0x1cbc] ss:$68 sps:$4 sm:$0xff]  }
 0xbcc   :  { %13316 = vmatprep.mubr.bf16.mxu0 %v24434_v1 }
 0xbd2   :  { %15093 = vmatmul.mubr.bf16.gmra.mrb[136].mxu1 %v24435_v38 }
 0xbd3   :  { %13317 = vmatmul.mubr.bf16.gmra.mrb[224].mxu0 %v24432_v44  ;;  %15100 = vmatprep.mubr.bf16.mxu1 %v24436_v45  ;;  %v24489_v44 = vld [vmem:[#allocation2 + $0x2d4] ss:$68 sps:$4 sm:$0xff]  }
 0xbd4   :  { %13324 = vmatprep.mubr.bf16.mxu0 %v24440_v37  ;;  %v24493_v37 = vld [vmem:[#allocation2 + $0x1d44] ss:$68 sps:$4 sm:$0xff]  }
 0xbda   :  { %15101 = vmatmul.mubr.bf16.gmra.mrb[140].mxu1 %v24441_v56 }
 0xbdb   :  { %13325 = vmatmul.mubr.bf16.gmra.mrb[228].mxu0 %v24438_v7  ;;  %15108 = vmatprep.mubr.bf16.mxu1 %v24442_v59 }
 0xbdc   :  { %13332 = vmatprep.mubr.bf16.mxu0 %v24446_v62  ;;  %v24495_v62 = vld [vmem:[#allocation2 + $0x35c] ss:$68 sps:$4 sm:$0xff]  }
 0xbe2   :  { %15109 = vmatmul.mubr.bf16.gmra.mrb[144].mxu1 %v24447_v53 }
 0xbe3   :  { %13333 = vmatmul.mubr.bf16.gmra.mrb[232].mxu0 %v24444_v25  ;;  %15116 = vmatprep.mubr.bf16.mxu1 %v24450_v11  ;;  %v24499_v25 = vld [vmem:[#allocation2 + $0x1dcc] ss:$68 sps:$4 sm:$0xff]  }
 0xbe4   :  { %13340 = vmatprep.mubr.bf16.mxu0 %v24453_v20 }
 0xbea   :  { %15117 = vmatmul.mubr.bf16.gmra.mrb[40].mxu1 %v24448_v27  ;;  %v24501_v27 = vld [vmem:[#allocation2 + $0x3e4] ss:$68 sps:$4 sm:$0xff]  }
 0xbeb   :  { %13341 = vmatmul.mubr.bf16.gmra.mrb[236].mxu0 %v24451_v16  ;;  %15124 = vmatprep.mubr.bf16.mxu1 %v19537_v40  ;;  %v24505_v40 = vld [vmem:[#allocation2 + $0x1e54] ss:$68 sps:$4 sm:$0xff]  }
 0xbec   :  { %13348 = vmatprep.mubr.bf16.mxu0 %v24457_v9 }
 0xbf2   :  { %15125 = vmatmul.mubr.bf16.gmra.mrb[152].mxu1 %v19536_v23 }
 0xbf3   :  { %13349 = vmatmul.mubr.bf16.gmra.mrb[240].mxu0 %v24455_v31  ;;  %15164 = vmatprep.mubr.bf16.mxu1 %v24461_v0  ;;  %v24507_v0 = vld [vmem:[#allocation2 + $0x46c] ss:$68 sps:$4 sm:$0xff]  }
 0xbf4   :  { %13356 = vmatprep.mubr.bf16.mxu0 %v24464_v35 }
 0xbfa   :  { %15165 = vmatmul.mubr.bf16.vlgmr.msra.gmra.mrb[156].mxu1 %v24459_v39  ;;  %v24511_v39 = vld [vmem:[#allocation2 + $0x1edc] ss:$68 sps:$4 sm:$0xff]  }
 0xbfb   :  { %15685 = vmatpush1.bf16.msra.mxu1 %v27513_v26  ;;  %13357 = vmatmul.mubr.bf16.gmra.mrb[244].mxu0 %v24462_v48  ;;  %v24476_v26 = vld [vmem:[#allocation2 + $0x138] ss:$68 sps:$4 sm:$0xff]  }
 0xbfc   :  { %15686 = vmatprep.subr.bf16.mxu1 %v28710_v12  ;;  %15172 = vmatprep.mubr.bf16.mxu1 %v24465_v29  ;;  %v24512_v29 = vld [vmem:[#allocation2 + $0x468] ss:$68 sps:$4 sm:$0xff]  }
 0xbfd   :  { %13364 = vmatprep.mubr.bf16.mxu0 %v24469_v17 }
 0xbff   :  { %15687 = vmatpush1.bf16.msra.mxu1 %v27523_v22  ;;  %v24477_v22 = vld [vmem:[#allocation2 + $0x1c4] ss:$68 sps:$4 sm:$0xff]  }
 0xc00   :  { %15688 = vmatprep.subr.bf16.mxu1 %v28710_v12 }
 0xc02   :  { %15173 = vmatmul.mubr.bf16.gmra.mrb[160].mxu1 %v24470_v10  ;;  %v24509_v10 = vld [vmem:[#allocation2 + $0x1ed8] ss:$68 sps:$4 sm:$0xff]  }
 0xc03   :  { %15689 = vmatpush1.bf16.msra.mxu1 %v27533_v51  ;;  %13365 = vmatmul.mubr.bf16.gmra.mrb[248].mxu0 %v24467_v3  ;;  %v24482_v51 = vld [vmem:[#allocation2 + $0x1c0] ss:$68 sps:$4 sm:$0xff]   ;;  %v24515_v3 = vld [vmem:[#allocation2 + $0x4f4] ss:$68 sps:$4 sm:$0xff]  }
 0xc04   :  { %15690 = vmatprep.subr.bf16.mxu1 %v28710_v12  ;;  %15180 = vmatprep.mubr.bf16.mxu1 %v24471_v36 }
 0xc05   :  { %13372 = vmatprep.mubr.bf16.mxu0 %v24475_v57  ;;  %v24518_v57 = vld [vmem:[#allocation2 + $0x1f64] ss:$68 sps:$4 sm:$0xff]  }
 0xc07   :  { %15691 = vmatpush1.bf16.msra.mxu1 %v27543_v13 }
 0xc08   :  { %15692 = vmatprep.subr.bf16.mxu1 %v28710_v12 }
 0xc0a   :  { %15181 = vmatmul.mubr.bf16.gmra.mrb[164].mxu1 %v24476_v26 }
 0xc0b   :  { %15693 = vmatpush1.bf16.msra.mxu1 %v27553_v49  ;;  %13373 = vmatmul.mubr.bf16.gmra.mrb[252].mxu0 %v24473_v8  ;;  %v24488_v49 = vld [vmem:[#allocation2 + $0x248] ss:$68 sps:$4 sm:$0xff]  }
 0xc0c   :  { %15694 = vmatprep.subr.bf16.mxu1 %v28710_v12  ;;  %15188 = vmatprep.mubr.bf16.mxu1 %v24477_v22 }
 0xc0d   :  { %13380 = vmatprep.mubr.bf16.mxu0 %v24481_v47 }
 0xc0e   :  { %v27742_v46 = vpop.f32.mrb[68].mxu0 }
 0xc0f   :  { %28847 = vst [vmem:[#allocation23_spill] sm:$0xff] %v27742_v46  ;;  %15695 = vmatpush1.bf16.msra.mxu1 %v27561_v30  ;;  %v13168_v13 = vpop.f32.mrb[69].mxu0  ;;  %v24485_v30 = vld [vmem:[#allocation2 + $0x1cb8] ss:$68 sps:$4 sm:$0xff]   ;;  %v24757_v46 = vld [vmem:[#allocation2 + $0x21a4] ss:$68 sps:$4 sm:$0xff]  }
 0xc10   :  { %15696 = vmatprep.subr.bf16.mxu1 %v28710_v12  ;;  %v27746_v6 = vpop.f32.mrb[70].mxu0 }
 0xc11   :  { %28848 = vst [vmem:[#allocation24_spill] sm:$0xff] %v27746_v6  ;;  %v13171_v63 = vpop.f32.mrb[71].mxu0 }
 0xc12   :  { %15189 = vmatmul.mubr.bf16.gmra.mrb[168].mxu1 %v24482_v51  ;;  %v24513_v51 = vld [vmem:[#allocation2 + $0x4f0] ss:$68 sps:$4 sm:$0xff]  }
 0xc13   :  { %15697 = vmatpush1.bf16.msra.mxu1 %v27563_v42  ;;  %13381 = vmatmul.mubr.bf16.gmra.mrb[148].mxu0 %v24479_v18  ;;  %v24494_v42 = vld [vmem:[#allocation2 + $0x2d0] ss:$68 sps:$4 sm:$0xff]  }
 0xc14   :  { %15698 = vmatprep.subr.bf16.mxu1 %v28710_v12  ;;  %15196 = vmatprep.mubr.bf16.mxu1 %v24483_v61  ;;  %v24516_v61 = vld [vmem:[#allocation2 + $0x1f60] ss:$68 sps:$4 sm:$0xff]  }
 0xc15   :  { %13388 = vmatprep.mubr.bf16.mxu0 %v24487_v32  ;;  %v24519_v32 = vld [vmem:[#allocation2 + $0x57c] ss:$68 sps:$4 sm:$0xff]  }
 0xc16   :  { %v27750_v1 = vpop.f32.mrb[72].mxu0 }
 0xc17   :  { %28849 = vst [vmem:[#allocation25_spill] sm:$0xff] %v27750_v1  ;;  %15699 = vmatpush1.bf16.msra.mxu1 %v27569_v28  ;;  %v13176_v38 = vpop.f32.mrb[73].mxu0  ;;  %v24491_v28 = vld [vmem:[#allocation2 + $0x1d40] ss:$68 sps:$4 sm:$0xff]  }
 0xc18   :  { %15700 = vmatprep.subr.bf16.mxu1 %v28710_v12  ;;  %v27754_v45 = vpop.f32.mrb[74].mxu0 }
 0xc19   :  { %28850 = vst [vmem:[#allocation26_spill] sm:$0xff] %v27754_v45  ;;  %v13179_v56 = vpop.f32.mrb[75].mxu0 }
 0xc1a   :  { %15197 = vmatmul.mubr.bf16.gmra.mrb[172].mxu1 %v24488_v49 }
 0xc1b   :  { %15701 = vmatpush1.bf16.msra.mxu1 %v27575_v52  ;;  %13389 = vmatmul.mubr.bf16.gmra.mrb[152].mxu0 %v24485_v30  ;;  %v24500_v52 = vld [vmem:[#allocation2 + $0x358] ss:$68 sps:$4 sm:$0xff]   ;;  %v24523_v30 = vld [vmem:[#allocation2 + $0x1fec] ss:$68 sps:$4 sm:$0xff]  }
 0xc1c   :  { %15702 = vmatprep.subr.bf16.mxu1 %v28710_v12  ;;  %15204 = vmatprep.mubr.bf16.mxu1 %v24489_v44 }
 0xc1d   :  { %13396 = vmatprep.mubr.bf16.mxu0 %v24493_v37  ;;  %v24524_v37 = vld [vmem:[#allocation2 + $0x578] ss:$68 sps:$4 sm:$0xff]  }
 0xc1e   :  { %v27758_v7 = vpop.f32.mrb[76].mxu0 }
 0xc1f   :  { %28851 = vst [vmem:[#allocation27_spill] sm:$0xff] %v27758_v7  ;;  %15703 = vmatpush1.bf16.msra.mxu1 %v27581_v58  ;;  %v13184_v59 = vpop.f32.mrb[77].mxu0  ;;  %v24497_v58 = vld [vmem:[#allocation2 + $0x1dc8] ss:$68 sps:$4 sm:$0xff]  }
 0xc20   :  { %15704 = vmatprep.subr.bf16.mxu1 %v28710_v12  ;;  %v27762_v53 = vpop.f32.mrb[78].mxu0 }
 0xc21   :  { %28852 = vst [vmem:[#allocation28_spill] sm:$0xff] %v27762_v53  ;;  %v13187_v11 = vpop.f32.mrb[79].mxu0 }
 0xc22   :  { %15205 = vmatmul.mubr.bf16.gmra.mrb[176].mxu1 %v24494_v42  ;;  %v24521_v42 = vld [vmem:[#allocation2 + $0x1fe8] ss:$68 sps:$4 sm:$0xff]  }
 0xc23   :  { %15705 = vmatpush1.bf16.msra.mxu1 %v27587_v54  ;;  %13397 = vmatmul.mubr.bf16.gmra.mrb[156].mxu0 %v24491_v28  ;;  %v24506_v54 = vld [vmem:[#allocation2 + $0x3e0] ss:$68 sps:$4 sm:$0xff]  }
 0xc24   :  { %15706 = vmatprep.subr.bf16.mxu1 %v28710_v12  ;;  %15212 = vmatprep.mubr.bf16.mxu1 %v24495_v62  ;;  %v24525_v28 = vld [vmem:[#allocation2 + $0x604] ss:$68 sps:$4 sm:$0xff]   ;;  %v24529_v62 = vld [vmem:[#allocation2 + $0x2074] ss:$68 sps:$4 sm:$0xff]  }
 0xc25   :  { %13404 = vmatprep.mubr.bf16.mxu0 %v24499_v25 }
 0xc26   :  { %v27766_v20 = vpop.f32.mrb[80].mxu0 }
 0xc27   :  { %28853 = vst [vmem:[#allocation29_spill] sm:$0xff] %v27766_v20  ;;  %15707 = vmatpush1.bf16.msra.mxu1 %v27593_v24  ;;  %v13192_v43 = vpop.f32.mrb[81].mxu0  ;;  %v24503_v24 = vld [vmem:[#allocation2 + $0x1e50] ss:$68 sps:$4 sm:$0xff]  }
 0xc28   :  { %15708 = vmatprep.subr.bf16.mxu1 %v28710_v12  ;;  %v27770_v16 = vpop.f32.mrb[82].mxu0  ;;  %v24527_v43 = vld [vmem:[#allocation2 + $0x2070] ss:$68 sps:$4 sm:$0xff]  }
 0xc29   :  { %28854 = vst [vmem:[#allocation30_spill] sm:$0xff] %v27770_v16  ;;  %v13195_v9 = vpop.f32.mrb[83].mxu0  ;;  %v24746_v16 = vld [vmem:[#allocation2 + $0x200c] ss:$68 sps:$4 sm:$0xff]  }
 0xc2a   :  { %15213 = vmatmul.mubr.bf16.gmra.mrb[180].mxu1 %v24500_v52  ;;  %v24530_v52 = vld [vmem:[#allocation2 + $0x600] ss:$68 sps:$4 sm:$0xff]  }
 0xc2b   :  { %15709 = vmatpush1.bf16.msra.mxu1 %v27599_v19  ;;  %13405 = vmatmul.mubr.bf16.gmra.mrb[160].mxu0 %v24497_v58  ;;  %v28857_v19 = vld [vmem:[#allocation5_spill] sm:$0xff] }
 0xc2c   :  { %15710 = vmatprep.subr.bf16.mxu1 %v28710_v12  ;;  %15220 = vmatprep.mubr.bf16.mxu1 %v24501_v27 }
 0xc2d   :  { %13412 = vmatprep.mubr.bf16.mxu0 %v24505_v40  ;;  %v24531_v40 = vld [vmem:[#allocation2 + $0x68c] ss:$68 sps:$4 sm:$0xff]  }
 0xc2e   :  { %v27774_v23 = vpop.f32.mrb[84].mxu0 }
 0xc2f   :  { %28855 = vst [vmem:[#allocation31_spill] sm:$0xff] %v27774_v23  ;;  %15711 = vmatpush1.bf16.msra.mxu1 %v27605_v33  ;;  %v13200_v31 = vpop.f32.mrb[85].mxu0  ;;  %v28858_v33 = vld [vmem:[#allocation6_spill] sm:$0xff] }
 0xc30   :  { %15712 = vmatprep.subr.bf16.mxu1 %v28710_v12  ;;  %v27778_v35 = vpop.f32.mrb[86].mxu0 }
 0xc31   :  { %28856 = vst [vmem:[#allocation32_spill] sm:$0xff] %v27778_v35  ;;  %v13203_v48 = vpop.f32.mrb[87].mxu0  ;;  %v24743_v35 = vld [vmem:[#allocation2 + $0x1f84] ss:$68 sps:$4 sm:$0xff]  }
 0xc32   :  { %15221 = vmatmul.mubr.bf16.gmra.mrb[184].mxu1 %v24506_v54  ;;  %v24535_v54 = vld [vmem:[#allocation2 + $0x20fc] ss:$68 sps:$4 sm:$0xff]  }
 0xc33   :  { %15713 = vmatpush1.bf16.msra.mxu1 %v28857_v19  ;;  %13413 = vmatmul.mubr.bf16.gmra.mrb[164].mxu0 %v24503_v24  ;;  %v24537_v19 = vld [vmem:[#allocation2 + $0x714] ss:$68 sps:$4 sm:$0xff]  }
 0xc34   :  { %15714 = vmatprep.subr.bf16.mxu1 %v28710_v12  ;;  %15228 = vmatprep.mubr.bf16.mxu1 %v24507_v0  ;;  %v24536_v0 = vld [vmem:[#allocation2 + $0x688] ss:$68 sps:$4 sm:$0xff]  }
 0xc35   :  { %13420 = vmatprep.mubr.bf16.mxu0 %v24511_v39  ;;  %v24533_v39 = vld [vmem:[#allocation2 + $0x20f8] ss:$68 sps:$4 sm:$0xff]  }
 0xc36   :  { %v27782_v17 = vpop.f32.mrb[88].mxu0 }
 0xc37   :  { %15715 = vmatpush1.bf16.msra.mxu1 %v28858_v33  ;;  %v13208_v36 = vpop.f32.mrb[89].mxu0  ;;  %v24541_v33 = vld [vmem:[#allocation2 + $0x2184] ss:$68 sps:$4 sm:$0xff]  }
 0xc38   :  { %v27785_v26 = vpop.f32.mrb[90].mxu0  ;;  %16236 = vmatprep.subr.bf16.mxu1 %v28710_v12 }
 0xc39   :  { %v13211_v8 = vpop.f32.mrb[91].mxu0 }
 0xc3a   :  { %15229 = vmatmul.mubr.bf16.gmra.mrb[188].mxu1 %v24512_v29 }
 0xc3b   :  { %13421 = vmatmul.mubr.bf16.gmra.mrb[168].mxu0 %v24509_v10  ;;  %15236 = vmatprep.mubr.bf16.mxu1 %v24515_v3  ;;  %v6667_v3 = vld [vmem:[#allocation2 + $0x2208] sm:$0xff] }
 0xc3c   :  { %13428 = vmatprep.mubr.bf16.mxu0 %v24518_v57  ;;  %v24542_v57 = vld [vmem:[#allocation2 + $0x710] ss:$68 sps:$4 sm:$0xff]  }
 0xc3d   :  { %v27788_v22 = vpop.f32.mrb[84].mxu1 }
 0xc3e   :  { %v14992_v47 = vpop.f32.mrb[85].mxu1  ;;  %v27790_v18 = vpop.f32.mrb[92].mxu0 }
 0xc3f   :  { %28859 = vst [vmem:[#allocation33_spill] sm:$0xff] %v27790_v18  ;;  %v27792_v13 = vpop.f32.mrb[86].mxu1  ;;  %v13216_v63 = vpop.f32.mrb[93].mxu0 }
 0xc40   :  { %v14995_v49 = vpop.f32.mrb[87].mxu1  ;;  %v27794_v38 = vpop.f32.mrb[94].mxu0  ;;  %v19531_v63 = vcombine.high %v6667_v3, %v6667_v3 }
 0xc41   :  { %28860 = vst [vmem:[#allocation34_spill] sm:$0xff] %v27794_v38  ;;  %v13219_v44 = vpop.f32.mrb[95].mxu0  ;;  %v24740_v38 = vld [vmem:[#allocation2 + $0x1efc] ss:$68 sps:$4 sm:$0xff]  }
 0xc42   :  { %15237 = vmatmul.mubr.bf16.gmra.mrb[84].mxu1 %v24513_v51  ;;  %v24539_v51 = vld [vmem:[#allocation2 + $0x2180] ss:$68 sps:$4 sm:$0xff]   ;;  %v24547_v44 = vld [vmem:[#allocation2 + $0x798] ss:$68 sps:$4 sm:$0xff]  }
 0xc43   :  { %13429 = vmatmul.mubr.bf16.gmra.mrb[172].mxu0 %v24516_v61  ;;  %15244 = vmatprep.mubr.bf16.mxu1 %v24519_v32  ;;  %v24543_v61 = vld [vmem:[#allocation2 + $0x79c] ss:$68 sps:$4 sm:$0xff]  }
 0xc44   :  { %13436 = vmatprep.mubr.bf16.mxu0 %v24523_v30 }
 0xc46   :  { %v27796_v56 = vpop.f32.mrb[96].mxu0 }
 0xc47   :  { %28861 = vst [vmem:[#allocation35_spill] sm:$0xff] %v27796_v56  ;;  %v13224_v59 = vpop.f32.mrb[97].mxu0 }
 0xc48   :  { %v27798_v25 = vpop.f32.mrb[98].mxu0 }
 0xc49   :  { %28862 = vst [vmem:[#allocation36_spill] sm:$0xff] %v27798_v25  ;;  %v13227_v11 = vpop.f32.mrb[99].mxu0  ;;  %v24737_v25 = vld [vmem:[#allocation2 + $0x1e74] ss:$68 sps:$4 sm:$0xff]  }
 0xc4a   :  { %15245 = vmatmul.mubr.bf16.gmra.mrb[196].mxu1 %v24524_v37 }
 0xc4b   :  { %13437 = vmatmul.mubr.bf16.gmra.mrb[176].mxu0 %v24521_v42  ;;  %15252 = vmatprep.mubr.bf16.mxu1 %v24525_v28  ;;  %v19530_v42 = vcombine.low %v6667_v3, %v6667_v3  ;;  %v24548_v28 = vld [vmem:[#allocation2 + $0x824] ss:$68 sps:$4 sm:$0xff]  }
 0xc4c   :  { %13444 = vmatprep.mubr.bf16.mxu0 %v24529_v62  ;;  %v24552_v62 = vld [vmem:[#allocation2 + $0x14] ss:$68 sps:$4 sm:$0xff]   ;;  %v24564_v3 = vld [vmem:[#allocation2 + $0x124] ss:$68 sps:$4 sm:$0xff]  }
 0xc4e   :  { %v27800_v58 = vpop.f32.mrb[100].mxu0 }
 0xc4f   :  { %28863 = vst [vmem:[#allocation37_spill] sm:$0xff] %v27800_v58  ;;  %v13232_v27 = vpop.f32.mrb[101].mxu0 }
 0xc50   :  { %v27802_v9 = vpop.f32.mrb[102].mxu0 }
 0xc51   :  { %28864 = vst [vmem:[#allocation38_spill] sm:$0xff] %v27802_v9  ;;  %v13235_v24 = vpop.f32.mrb[103].mxu0 }
 0xc52   :  { %15253 = vmatmul.mubr.bf16.gmra.mrb[200].mxu1 %v24530_v52 }
 0xc53   :  { %13445 = vmatmul.mubr.bf16.gmra.mrb[180].mxu0 %v24527_v43  ;;  %15260 = vmatprep.mubr.bf16.mxu1 %v24531_v40  ;;  %v24553_v43 = vld [vmem:[#allocation2 + $0x820] ss:$68 sps:$4 sm:$0xff]   ;;  %v24550_v40 = vld [vmem:[#allocation2 + $0x10] ss:$68 sps:$4 sm:$0xff]  }
 0xc54   :  { %13452 = vmatprep.mubr.bf16.mxu0 %v24535_v54  ;;  %v24554_v54 = vld [vmem:[#allocation2 + $0x8ac] ss:$68 sps:$4 sm:$0xff]  }
 0xc56   :  { %v27804_v31 = vpop.f32.mrb[104].mxu0 }
 0xc57   :  { %28865 = vst [vmem:[#allocation39_spill] sm:$0xff] %v27804_v31  ;;  %v13240_v48 = vpop.f32.mrb[105].mxu0  ;;  %v24725_v31 = vld [vmem:[#allocation2 + $0x1c54] ss:$68 sps:$4 sm:$0xff]  }
 0xc58   :  { %v27806_v29 = vpop.f32.mrb[106].mxu0 }
 0xc59   :  { %28866 = vst [vmem:[#allocation40_spill] sm:$0xff] %v27806_v29  ;;  %v13243_v10 = vpop.f32.mrb[107].mxu0 }
 0xc5a   :  { %15261 = vmatmul.mubr.bf16.gmra.mrb[204].mxu1 %v24536_v0  ;;  %v24558_v0 = vld [vmem:[#allocation2 + $0x9c] ss:$68 sps:$4 sm:$0xff]  }
 0xc5b   :  { %13453 = vmatmul.mubr.bf16.gmra.mrb[184].mxu0 %v24533_v39  ;;  %15268 = vmatprep.mubr.bf16.mxu1 %v24537_v19  ;;  %v24556_v19 = vld [vmem:[#allocation2 + $0x98] ss:$68 sps:$4 sm:$0xff]  }
 0xc5c   :  { %13460 = vmatprep.mubr.bf16.mxu0 %v24541_v33  ;;  %v24560_v33 = vld [vmem:[#allocation2 + $0x934] ss:$68 sps:$4 sm:$0xff]  }
 0xc5e   :  { %v13246_v36 = vpop.f32.mrb[108].mxu0 }
 0xc5f   :  { %v27809_v8 = vadd.f32 %v27653_v60, %v13246_v36  ;;  %v13248_v47 = vpop.f32.mrb[109].mxu0 }
 0xc60   :  { %v13249_v32 = vpop.f32.mrb[110].mxu0  ;;  %v24565_v47 = vld [vmem:[#allocation2 + $0x930] ss:$68 sps:$4 sm:$0xff]  }
 0xc61   :  { %28867 = vst [vmem:[#allocation41_spill] sm:$0xff] %v27809_v8  ;;  %v27812_v49 = vadd.f32 %v27655_v41, %v13249_v32  ;;  %v13251_v30 = vpop.f32.mrb[111].mxu0  ;;  %v24566_v32 = vld [vmem:[#allocation2 + $0x9bc] ss:$68 sps:$4 sm:$0xff]   ;;  %v24722_v8 = vld [vmem:[#allocation2 + $0x1bcc] ss:$68 sps:$4 sm:$0xff]  }
 0xc62   :  { %15269 = vmatmul.mubr.bf16.gmra.mrb[208].mxu1 %v24542_v57  ;;  %v24570_v30 = vld [vmem:[#allocation2 + $0x1ac] ss:$68 sps:$4 sm:$0xff]  }
 0xc63   :  { %28868 = vst [vmem:[#allocation42_spill] sm:$0xff] %v27812_v49  ;;  %13461 = vmatmul.mubr.bf16.gmra.mrb[188].mxu0 %v24539_v51  ;;  %15276 = vmatprep.mubr.bf16.mxu1 %v24543_v61  ;;  %v24562_v61 = vld [vmem:[#allocation2 + $0x120] ss:$68 sps:$4 sm:$0xff]  }
 0xc64   :  { %13468 = vmatprep.mubr.bf16.mxu0 %v19531_v63 }
 0xc66   :  { %v13254_v37 = vpop.f32.mrb[4].mxu0 }
 0xc67   :  { %v27815_v60 = vadd.f32 %v13254_v37, %v27689_v14  ;;  %v13256_v59 = vpop.f32.mrb[5].mxu0 }
 0xc68   :  { %v13257_v11 = vpop.f32.mrb[6].mxu0  ;;  %v24568_v59 = vld [vmem:[#allocation2 + $0x1a8] ss:$68 sps:$4 sm:$0xff]  }
 0xc69   :  { %28869 = vst [vmem:[#allocation43_spill] sm:$0xff] %v27815_v60  ;;  %v27818_v52 = vadd.f32 %v13257_v11, %v27691_v4  ;;  %v13259_v41 = vpop.f32.mrb[7].mxu0  ;;  %v24559_v4 = vld [vmem:[#allocation2 + $0x8a8] ss:$68 sps:$4 sm:$0xff]  }
 0xc6a   :  { %15277 = vmatmul.mubr.bf16.gmra.mrb[212].mxu1 %v24547_v44  ;;  %v24576_v41 = vld [vmem:[#allocation2 + $0x234] ss:$68 sps:$4 sm:$0xff]  }
 0xc6b   :  { %28870 = vst [vmem:[#allocation44_spill] sm:$0xff] %v27818_v52  ;;  %13469 = vmatmul.mubr.bf16.gmra.mrb[192].mxu0 %v19530_v42  ;;  %15284 = vmatprep.mubr.bf16.mxu1 %v24548_v28  ;;  %v24571_v42 = vld [vmem:[#allocation2 + $0x9b8] ss:$68 sps:$4 sm:$0xff]  }
 0xc6c   :  { %13508 = vmatprep.mubr.bf16.mxu0 %v24552_v62  ;;  %v24572_v62 = vld [vmem:[#allocation2 + $0xa44] ss:$68 sps:$4 sm:$0xff]  }
 0xc6e   :  { %v27820_v27 = vpop.f32.mrb[196].mxu0 }
 0xc6f   :  { %28871 = vst [vmem:[#allocation45_spill] sm:$0xff] %v27820_v27  ;;  %v13264_v24 = vpop.f32.mrb[197].mxu0 }
 0xc70   :  { %v27822_v14 = vpop.f32.mrb[198].mxu0 }
 0xc71   :  { %28872 = vst [vmem:[#allocation46_spill] sm:$0xff] %v27822_v14  ;;  %v13267_v39 = vpop.f32.mrb[199].mxu0 }
 0xc72   :  { %15285 = vmatmul.mubr.bf16.gmra.mrb[216].mxu1 %v24553_v43  ;;  %v24578_v39 = vld [vmem:[#allocation2 + $0xacc] ss:$68 sps:$4 sm:$0xff]  }
 0xc73   :  { %13509 = vmatmul.mubr.bf16.vlgmr.msra.gmra.mrb[112].mxu0 %v24550_v40  ;;  %15292 = vmatprep.mubr.bf16.mxu1 %v24554_v54  ;;  %v24577_v54 = vld [vmem:[#allocation2 + $0xa40] ss:$68 sps:$4 sm:$0xff]  }
 0xc74   :  { %13516 = vmatprep.mubr.bf16.mxu0 %v24558_v0  ;;  %v24574_v0 = vld [vmem:[#allocation2 + $0x230] ss:$68 sps:$4 sm:$0xff]  }
 0xc76   :  { %v27824_v48 = vpop.f32.mrb[200].mxu0 }
 0xc77   :  { %28873 = vst [vmem:[#allocation47_spill] sm:$0xff] %v27824_v48  ;;  %v13272_v10 = vpop.f32.mrb[201].mxu0  ;;  %v24715_v48 = vld [vmem:[#allocation2 + $0x1a30] ss:$68 sps:$4 sm:$0xff]  }
 0xc78   :  { %v27826_v36 = vpop.f32.mrb[202].mxu0 }
 0xc79   :  { %28874 = vst [vmem:[#allocation48_spill] sm:$0xff] %v27826_v36  ;;  %v13275_v57 = vpop.f32.mrb[203].mxu0 }
 0xc7a   :  { %15293 = vmatmul.mubr.bf16.gmra.mrb[220].mxu1 %v24559_v4 }
 0xc7b   :  { %13517 = vmatmul.mubr.bf16.gmra.mrb[116].mxu0 %v24556_v19  ;;  %15300 = vmatprep.mubr.bf16.mxu1 %v24560_v33  ;;  %v24582_v19 = vld [vmem:[#allocation2 + $0x2bc] ss:$68 sps:$4 sm:$0xff]  }
 0xc7c   :  { %13524 = vmatprep.mubr.bf16.mxu0 %v24564_v3  ;;  %v24583_v3 = vld [vmem:[#allocation2 + $0xac8] ss:$68 sps:$4 sm:$0xff]  }
 0xc7e   :  { %v27828_v51 = vpop.f32.mrb[204].mxu0 }
 0xc7f   :  { %28875 = vst [vmem:[#allocation49_spill] sm:$0xff] %v27828_v51  ;;  %v13280_v63 = vpop.f32.mrb[205].mxu0 }
 0xc80   :  { %v27830_v44 = vpop.f32.mrb[206].mxu0  ;;  %v24588_v63 = vld [vmem:[#allocation2 + $0x344] ss:$68 sps:$4 sm:$0xff]  }
 0xc81   :  { %28876 = vst [vmem:[#allocation50_spill] sm:$0xff] %v27830_v44  ;;  %v13283_v37 = vpop.f32.mrb[207].mxu0 }
 0xc82   :  { %15301 = vmatmul.mubr.bf16.gmra.mrb[224].mxu1 %v24565_v47  ;;  %v24580_v47 = vld [vmem:[#allocation2 + $0x2b8] ss:$68 sps:$4 sm:$0xff]  }
 0xc83   :  { %13525 = vmatmul.mubr.bf16.gmra.mrb[120].mxu0 %v24562_v61  ;;  %15308 = vmatprep.mubr.bf16.mxu1 %v24566_v32  ;;  %v24584_v61 = vld [vmem:[#allocation2 + $0xb54] ss:$68 sps:$4 sm:$0xff]  }
 0xc84   :  { %13532 = vmatprep.mubr.bf16.mxu0 %v24570_v30 }
 0xc86   :  { %v27832_v28 = vpop.f32.mrb[208].mxu0 }
 0xc87   :  { %28877 = vst [vmem:[#allocation51_spill] sm:$0xff] %v27832_v28  ;;  %v13288_v11 = vpop.f32.mrb[209].mxu0 }
 0xc88   :  { %v27834_v43 = vpop.f32.mrb[210].mxu0  ;;  %v24590_v11 = vld [vmem:[#allocation2 + $0xbdc] ss:$68 sps:$4 sm:$0xff]  }
 0xc89   :  { %28878 = vst [vmem:[#allocation52_spill] sm:$0xff] %v27834_v43  ;;  %v13291_v40 = vpop.f32.mrb[211].mxu0  ;;  %v24707_v43 = vld [vmem:[#allocation2 + $0x1920] ss:$68 sps:$4 sm:$0xff]  }
 0xc8a   :  { %15309 = vmatmul.mubr.bf16.gmra.mrb[228].mxu1 %v24571_v42  ;;  %v24589_v42 = vld [vmem:[#allocation2 + $0xb50] ss:$68 sps:$4 sm:$0xff]  }
 0xc8b   :  { %13533 = vmatmul.mubr.bf16.gmra.mrb[124].mxu0 %v24568_v59  ;;  %15316 = vmatprep.mubr.bf16.mxu1 %v24572_v62  ;;  %v24586_v62 = vld [vmem:[#allocation2 + $0x340] ss:$68 sps:$4 sm:$0xff]   ;;  %v24594_v40 = vld [vmem:[#allocation2 + $0x3cc] ss:$68 sps:$4 sm:$0xff]  }
 0xc8c   :  { %13540 = vmatprep.mubr.bf16.mxu0 %v24576_v41 }
 0xc8e   :  { %v27836_v24 = vpop.f32.mrb[212].mxu0 }
 0xc8f   :  { %v13296_v4 = vpop.f32.mrb[213].mxu0 }
 0xc90   :  { %v27838_v33 = vpop.f32.mrb[214].mxu0 }
 0xc91   :  { %v13299_v10 = vpop.f32.mrb[215].mxu0 }
 0xc92   :  { %15317 = vmatmul.mubr.bf16.gmra.mrb[232].mxu1 %v24577_v54 }
 0xc93   :  { %13541 = vmatmul.mubr.bf16.gmra.mrb[128].mxu0 %v24574_v0  ;;  %15324 = vmatprep.mubr.bf16.mxu1 %v24578_v39  ;;  %v24595_v39 = vld [vmem:[#allocation2 + $0xbd8] ss:$68 sps:$4 sm:$0xff]  }
 0xc94   :  { %13548 = vmatprep.mubr.bf16.mxu0 %v24582_v19  ;;  %v24592_v19 = vld [vmem:[#allocation2 + $0x3c8] ss:$68 sps:$4 sm:$0xff]  }
 0xc96   :  { %v27840_v57 = vpop.f32.mrb[216].mxu0 }
 0xc97   :  { %28879 = vst [vmem:[#allocation53_spill] sm:$0xff] %v27840_v57  ;;  %v13304_v32 = vpop.f32.mrb[217].mxu0 }
 0xc98   :  { %v27842_v30 = vpop.f32.mrb[218].mxu0 }
 0xc99   :  { %28880 = vst [vmem:[#allocation54_spill] sm:$0xff] %v27842_v30  ;;  %v13307_v37 = vpop.f32.mrb[219].mxu0  ;;  %v24709_v30 = vld [vmem:[#allocation2 + $0x1924] ss:$68 sps:$4 sm:$0xff]  }
 0xc9a   :  { %15325 = vmatmul.mubr.bf16.gmra.mrb[236].mxu1 %v24583_v3  ;;  %v24596_v3 = vld [vmem:[#allocation2 + $0xc64] ss:$68 sps:$4 sm:$0xff]  }
 0xc9b   :  { %13549 = vmatmul.mubr.bf16.gmra.mrb[132].mxu0 %v24580_v47  ;;  %15332 = vmatprep.mubr.bf16.mxu1 %v24584_v61  ;;  %v24600_v61 = vld [vmem:[#allocation2 + $0x454] ss:$68 sps:$4 sm:$0xff]   ;;  %v24601_v37 = vld [vmem:[#allocation2 + $0xc60] ss:$68 sps:$4 sm:$0xff]  }
 0xc9c   :  { %13556 = vmatprep.mubr.bf16.mxu0 %v24588_v63 }
 0xc9e   :  { %v27844_v59 = vpop.f32.mrb[220].mxu0 }
 0xc9f   :  { %28881 = vst [vmem:[#allocation55_spill] sm:$0xff] %v27844_v59  ;;  %v13312_v41 = vpop.f32.mrb[221].mxu0 }
 0xca0   :  { %v27846_v54 = vpop.f32.mrb[222].mxu0 }
 0xca1   :  { %28882 = vst [vmem:[#allocation56_spill] sm:$0xff] %v27846_v54  ;;  %v13315_v0 = vpop.f32.mrb[223].mxu0 }
 0xca2   :  { %15333 = vmatmul.mubr.bf16.gmra.mrb[240].mxu1 %v24589_v42  ;;  %v24598_v42 = vld [vmem:[#allocation2 + $0x450] ss:$68 sps:$4 sm:$0xff]  }
 0xca3   :  { %13557 = vmatmul.mubr.bf16.gmra.mrb[136].mxu0 %v24586_v62  ;;  %15340 = vmatprep.mubr.bf16.mxu1 %v24590_v11  ;;  %v24602_v11 = vld [vmem:[#allocation2 + $0xcec] ss:$68 sps:$4 sm:$0xff]  }
 0xca4   :  { %13564 = vmatprep.mubr.bf16.mxu0 %v24594_v40  ;;  %v24606_v40 = vld [vmem:[#allocation2 + $0x4dc] ss:$68 sps:$4 sm:$0xff]  }
 0xca6   :  { %v27848_v4 = vpop.f32.mrb[224].mxu0 }
 0xca7   :  { %28883 = vst [vmem:[#allocation57_spill] sm:$0xff] %v27848_v4  ;;  %v13320_v10 = vpop.f32.mrb[225].mxu0 }
 0xca8   :  { %v27850_v47 = vpop.f32.mrb[226].mxu0 }
 0xca9   :  { %28884 = vst [vmem:[#allocation58_spill] sm:$0xff] %v27850_v47  ;;  %v13323_v32 = vpop.f32.mrb[227].mxu0  ;;  %v24613_v47 = vld [vmem:[#allocation2 + $0x564] ss:$68 sps:$4 sm:$0xff]  }
 0xcaa   :  { %15341 = vmatmul.mubr.bf16.gmra.mrb[244].mxu1 %v24595_v39  ;;  %v24607_v32 = vld [vmem:[#allocation2 + $0xce8] ss:$68 sps:$4 sm:$0xff]  }
 0xcab   :  { %13565 = vmatmul.mubr.bf16.gmra.mrb[140].mxu0 %v24592_v19  ;;  %15348 = vmatprep.mubr.bf16.mxu1 %v24596_v3  ;;  %v24604_v3 = vld [vmem:[#allocation2 + $0x4d8] ss:$68 sps:$4 sm:$0xff]  }
 0xcac   :  { %13572 = vmatprep.mubr.bf16.mxu0 %v24600_v61  ;;  %v24610_v61 = vld [vmem:[#allocation2 + $0xd74] ss:$68 sps:$4 sm:$0xff]  }
 0xcae   :  { %v27852_v63 = vpop.f32.mrb[228].mxu0 }
 0xcaf   :  { %28885 = vst [vmem:[#allocation59_spill] sm:$0xff] %v27852_v63  ;;  %v13328_v62 = vpop.f32.mrb[229].mxu0 }
 0xcb0   :  { %v27854_v41 = vpop.f32.mrb[230].mxu0 }
 0xcb1   :  { %28886 = vst [vmem:[#allocation60_spill] sm:$0xff] %v27854_v41  ;;  %v13331_v0 = vpop.f32.mrb[231].mxu0 }
 0xcb2   :  { %15349 = vmatmul.mubr.bf16.gmra.mrb[248].mxu1 %v24601_v37 }
 0xcb3   :  { %13573 = vmatmul.mubr.bf16.gmra.mrb[144].mxu0 %v24598_v42  ;;  %15356 = vmatprep.mubr.bf16.mxu1 %v24602_v11  ;;  %v24608_v42 = vld [vmem:[#allocation2 + $0xd70] ss:$68 sps:$4 sm:$0xff]  }
 0xcb4   :  { %13580 = vmatprep.mubr.bf16.mxu0 %v24606_v40  ;;  %v24611_v40 = vld [vmem:[#allocation2 + $0x560] ss:$68 sps:$4 sm:$0xff]  }
 0xcb6   :  { %v13334_v10 = vpop.f32.mrb[232].mxu0 }
 0xcb7   :  { %v27857_v39 = vadd.f32 %v27788_v22, %v13334_v10  ;;  %v13336_v19 = vpop.f32.mrb[233].mxu0  ;;  %v24614_v22 = vld [vmem:[#allocation2 + $0xdfc] ss:$68 sps:$4 sm:$0xff]   ;;  %v24618_v10 = vld [vmem:[#allocation2 + $0x5ec] ss:$68 sps:$4 sm:$0xff]  }
 0xcb8   :  { %v13337_v63 = vpop.f32.mrb[234].mxu0 }
 0xcb9   :  { %28887 = vst [vmem:[#allocation61_spill] sm:$0xff] %v27857_v39  ;;  %v27860_v62 = vadd.f32 %v27792_v13, %v13337_v63  ;;  %v13339_v41 = vpop.f32.mrb[235].mxu0  ;;  %v24619_v13 = vld [vmem:[#allocation2 + $0xdf8] ss:$68 sps:$4 sm:$0xff]  }
 0xcba   :  { %15357 = vmatmul.mubr.bf16.gmra.mrb[252].mxu1 %v24607_v32  ;;  %v24616_v41 = vld [vmem:[#allocation2 + $0x5e8] ss:$68 sps:$4 sm:$0xff]  }
 0xcbb   :  { %28888 = vst [vmem:[#allocation62_spill] sm:$0xff] %v27860_v62  ;;  %13581 = vmatmul.mubr.bf16.gmra.mrb[0].mxu0 %v24604_v3  ;;  %15364 = vmatprep.mubr.bf16.mxu1 %v24610_v61  ;;  %v24620_v32 = vld [vmem:[#allocation2 + $0xe84] ss:$68 sps:$4 sm:$0xff]   ;;  %v24624_v3 = vld [vmem:[#allocation2 + $0x674] ss:$68 sps:$4 sm:$0xff]  }
 0xcbc   :  { %13588 = vmatprep.mubr.bf16.mxu0 %v24613_v47 }
 0xcbe   :  { %v27862_v37 = vpop.f32.mrb[236].mxu0 }
 0xcbf   :  { %28889 = vst [vmem:[#allocation63_spill] sm:$0xff] %v27862_v37  ;;  %v13344_v11 = vpop.f32.mrb[237].mxu0 }
 0xcc0   :  { %v27864_v0 = vpop.f32.mrb[238].mxu0 }
 0xcc1   :  { %28890 = vst [vmem:[#allocation64_spill] sm:$0xff] %v27864_v0  ;;  %v13347_v19 = vpop.f32.mrb[239].mxu0  ;;  %v24625_v0 = vld [vmem:[#allocation2 + $0xe80] ss:$68 sps:$4 sm:$0xff]  }
 0xcc2   :  { %15365 = vmatmul.mubr.bf16.gmra.mrb[148].mxu1 %v24608_v42  ;;  %v24622_v42 = vld [vmem:[#allocation2 + $0x670] ss:$68 sps:$4 sm:$0xff]  }
 0xcc3   :  { %13589 = vmatmul.mubr.bf16.gmra.mrb[236].mxu0 %v24611_v40  ;;  %15372 = vmatprep.mubr.bf16.mxu1 %v24614_v22  ;;  %v24626_v40 = vld [vmem:[#allocation2 + $0xf0c] ss:$68 sps:$4 sm:$0xff]  }
 0xcc4   :  { %13596 = vmatprep.mubr.bf16.mxu0 %v24618_v10  ;;  %v24630_v10 = vld [vmem:[#allocation2 + $0x6fc] ss:$68 sps:$4 sm:$0xff]  }
 0xcc6   :  { %v27866_v63 = vpop.f32.mrb[240].mxu0 }
 0xcc7   :  { %28891 = vst [vmem:[#allocation65_spill] sm:$0xff] %v27866_v63  ;;  %v13352_v47 = vpop.f32.mrb[241].mxu0 }
 0xcc8   :  { %v27868_v61 = vpop.f32.mrb[242].mxu0  ;;  %v24631_v47 = vld [vmem:[#allocation2 + $0xf08] ss:$68 sps:$4 sm:$0xff]  }
 0xcc9   :  { %28892 = vst [vmem:[#allocation66_spill] sm:$0xff] %v27868_v61  ;;  %v13355_v11 = vpop.f32.mrb[243].mxu0 }
 0xcca   :  { %15373 = vmatmul.mubr.bf16.gmra.mrb[0].mxu1 %v24619_v13  ;;  %v24628_v13 = vld [vmem:[#allocation2 + $0x6f8] ss:$68 sps:$4 sm:$0xff]  }
 0xccb   :  { %13597 = vmatmul.mubr.bf16.gmra.mrb[8].mxu0 %v24616_v41  ;;  %15380 = vmatprep.mubr.bf16.mxu1 %v24620_v32  ;;  %v24632_v41 = vld [vmem:[#allocation2 + $0xf94] ss:$68 sps:$4 sm:$0xff]  }
 0xccc   :  { %13604 = vmatprep.mubr.bf16.mxu0 %v24624_v3  ;;  %v24636_v3 = vld [vmem:[#allocation2 + $0x784] ss:$68 sps:$4 sm:$0xff]  }
 0xcce   :  { %v27870_v19 = vpop.f32.mrb[244].mxu0 }
 0xccf   :  { %28893 = vst [vmem:[#allocation67_spill] sm:$0xff] %v27870_v19  ;;  %v13360_v22 = vpop.f32.mrb[245].mxu0 }
 0xcd0   :  { %v27872_v37 = vpop.f32.mrb[246].mxu0  ;;  %v24637_v22 = vld [vmem:[#allocation2 + $0xf90] ss:$68 sps:$4 sm:$0xff]  }
 0xcd1   :  { %28894 = vst [vmem:[#allocation68_spill] sm:$0xff] %v27872_v37  ;;  %v13363_v63 = vpop.f32.mrb[247].mxu0 }
 0xcd2   :  { %15381 = vmatmul.mubr.bf16.gmra.mrb[4].mxu1 %v24625_v0  ;;  %v24634_v0 = vld [vmem:[#allocation2 + $0x780] ss:$68 sps:$4 sm:$0xff]  }
 0xcd3   :  { %13605 = vmatmul.mubr.bf16.gmra.mrb[12].mxu0 %v24622_v42  ;;  %15388 = vmatprep.mubr.bf16.mxu1 %v24626_v40  ;;  %v24638_v42 = vld [vmem:[#allocation2 + $0x101c] ss:$68 sps:$4 sm:$0xff]  }
 0xcd4   :  { %13612 = vmatprep.mubr.bf16.mxu0 %v24630_v10  ;;  %v24642_v10 = vld [vmem:[#allocation2 + $0x80c] ss:$68 sps:$4 sm:$0xff]  }
 0xcd6   :  { %v27874_v11 = vpop.f32.mrb[248].mxu0 }
 0xcd7   :  { %28895 = vst [vmem:[#allocation69_spill] sm:$0xff] %v27874_v11  ;;  %v13368_v32 = vpop.f32.mrb[249].mxu0 }
 0xcd8   :  { %v27876_v61 = vpop.f32.mrb[250].mxu0  ;;  %v24643_v32 = vld [vmem:[#allocation2 + $0x1018] ss:$68 sps:$4 sm:$0xff]  }
 0xcd9   :  { %28896 = vst [vmem:[#allocation70_spill] sm:$0xff] %v27876_v61  ;;  %v13371_v19 = vpop.f32.mrb[251].mxu0 }
 0xcda   :  { %15389 = vmatmul.mubr.bf16.gmra.mrb[8].mxu1 %v24631_v47  ;;  %v24640_v47 = vld [vmem:[#allocation2 + $0x808] ss:$68 sps:$4 sm:$0xff]  }
 0xcdb   :  { %13613 = vmatmul.mubr.bf16.gmra.mrb[16].mxu0 %v24628_v13  ;;  %15396 = vmatprep.mubr.bf16.mxu1 %v24632_v41  ;;  %v24644_v13 = vld [vmem:[#allocation2 + $0x10a4] ss:$68 sps:$4 sm:$0xff]  }
 0xcdc   :  { %13620 = vmatprep.mubr.bf16.mxu0 %v24636_v3  ;;  %v24648_v3 = vld [vmem:[#allocation2 + $0x894] ss:$68 sps:$4 sm:$0xff]  }
 0xcde   :  { %v27878_v63 = vpop.f32.mrb[252].mxu0 }
 0xcdf   :  { %28897 = vst [vmem:[#allocation71_spill] sm:$0xff] %v27878_v63  ;;  %v13376_v40 = vpop.f32.mrb[253].mxu0 }
 0xce0   :  { %v27880_v37 = vpop.f32.mrb[254].mxu0  ;;  %v24649_v40 = vld [vmem:[#allocation2 + $0x10a0] ss:$68 sps:$4 sm:$0xff]  }
 0xce1   :  { %28898 = vst [vmem:[#allocation72_spill] sm:$0xff] %v27880_v37  ;;  %v13379_v11 = vpop.f32.mrb[255].mxu0 }
 0xce2   :  { %15397 = vmatmul.mubr.bf16.gmra.mrb[12].mxu1 %v24637_v22  ;;  %v24646_v22 = vld [vmem:[#allocation2 + $0x890] ss:$68 sps:$4 sm:$0xff]  }
 0xce3   :  { %13621 = vmatmul.mubr.bf16.gmra.mrb[20].mxu0 %v24634_v0  ;;  %15404 = vmatprep.mubr.bf16.mxu1 %v24638_v42  ;;  %v24650_v0 = vld [vmem:[#allocation2 + $0x112c] ss:$68 sps:$4 sm:$0xff]  }
 0xce4   :  { %13628 = vmatprep.mubr.bf16.mxu0 %v24642_v10  ;;  %v24654_v10 = vld [vmem:[#allocation2 + $0x91c] ss:$68 sps:$4 sm:$0xff]  }
 0xce6   :  { %v27882_v19 = vpop.f32.mrb[148].mxu0 }
 0xce7   :  { %28899 = vst [vmem:[#allocation73_spill] sm:$0xff] %v27882_v19  ;;  %v13384_v41 = vpop.f32.mrb[149].mxu0 }
 0xce8   :  { %v27884_v61 = vpop.f32.mrb[150].mxu0  ;;  %v24655_v41 = vld [vmem:[#allocation2 + $0x1128] ss:$68 sps:$4 sm:$0xff]  }
 0xce9   :  { %28900 = vst [vmem:[#allocation74_spill] sm:$0xff] %v27884_v61  ;;  %v13387_v63 = vpop.f32.mrb[151].mxu0 }
 0xcea   :  { %15405 = vmatmul.mubr.bf16.gmra.mrb[16].mxu1 %v24643_v32  ;;  %v24652_v32 = vld [vmem:[#allocation2 + $0x918] ss:$68 sps:$4 sm:$0xff]  }
 0xceb   :  { %13629 = vmatmul.mubr.bf16.gmra.mrb[24].mxu0 %v24640_v47  ;;  %15412 = vmatprep.mubr.bf16.mxu1 %v24644_v13  ;;  %v24656_v47 = vld [vmem:[#allocation2 + $0x11b4] ss:$68 sps:$4 sm:$0xff]  }
 0xcec   :  { %13636 = vmatprep.mubr.bf16.mxu0 %v24648_v3  ;;  %v24660_v3 = vld [vmem:[#allocation2 + $0x9a4] ss:$68 sps:$4 sm:$0xff]  }
 0xcee   :  { %v27886_v11 = vpop.f32.mrb[152].mxu0 }
 0xcef   :  { %28901 = vst [vmem:[#allocation75_spill] sm:$0xff] %v27886_v11  ;;  %v13392_v42 = vpop.f32.mrb[153].mxu0 }
 0xcf0   :  { %v27888_v37 = vpop.f32.mrb[154].mxu0  ;;  %v24661_v42 = vld [vmem:[#allocation2 + $0x11b0] ss:$68 sps:$4 sm:$0xff]  }
 0xcf1   :  { %28902 = vst [vmem:[#allocation76_spill] sm:$0xff] %v27888_v37  ;;  %v13395_v19 = vpop.f32.mrb[155].mxu0 }
 0xcf2   :  { %15413 = vmatmul.mubr.bf16.gmra.mrb[20].mxu1 %v24649_v40  ;;  %v24658_v40 = vld [vmem:[#allocation2 + $0x9a0] ss:$68 sps:$4 sm:$0xff]  }
 0xcf3   :  { %13637 = vmatmul.mubr.bf16.gmra.mrb[28].mxu0 %v24646_v22  ;;  %15420 = vmatprep.mubr.bf16.mxu1 %v24650_v0  ;;  %v24662_v22 = vld [vmem:[#allocation2 + $0x123c] ss:$68 sps:$4 sm:$0xff]  }
 0xcf4   :  { %13644 = vmatprep.mubr.bf16.mxu0 %v24654_v10  ;;  %v24666_v10 = vld [vmem:[#allocation2 + $0xa2c] ss:$68 sps:$4 sm:$0xff]  }
 0xcf6   :  { %v27890_v63 = vpop.f32.mrb[156].mxu0 }
 0xcf7   :  { %28903 = vst [vmem:[#allocation77_spill] sm:$0xff] %v27890_v63  ;;  %v13400_v13 = vpop.f32.mrb[157].mxu0 }
 0xcf8   :  { %v27892_v61 = vpop.f32.mrb[158].mxu0  ;;  %v24667_v13 = vld [vmem:[#allocation2 + $0x1238] ss:$68 sps:$4 sm:$0xff]  }
 0xcf9   :  { %28904 = vst [vmem:[#allocation78_spill] sm:$0xff] %v27892_v61  ;;  %v13403_v11 = vpop.f32.mrb[159].mxu0 }
 0xcfa   :  { %15421 = vmatmul.mubr.bf16.gmra.mrb[24].mxu1 %v24655_v41  ;;  %v24664_v41 = vld [vmem:[#allocation2 + $0xa28] ss:$68 sps:$4 sm:$0xff]  }
 0xcfb   :  { %13645 = vmatmul.mubr.bf16.gmra.mrb[32].mxu0 %v24652_v32  ;;  %15428 = vmatprep.mubr.bf16.mxu1 %v24656_v47  ;;  %v24668_v32 = vld [vmem:[#allocation2 + $0x12c4] ss:$68 sps:$4 sm:$0xff]  }
 0xcfc   :  { %13652 = vmatprep.mubr.bf16.mxu0 %v24660_v3  ;;  %v24672_v3 = vld [vmem:[#allocation2 + $0xab4] ss:$68 sps:$4 sm:$0xff]  }
 0xcfe   :  { %v27894_v19 = vpop.f32.mrb[160].mxu0 }
 0xcff   :  { %28905 = vst [vmem:[#allocation79_spill] sm:$0xff] %v27894_v19  ;;  %v13408_v0 = vpop.f32.mrb[161].mxu0 }
 0xd00   :  { %v27896_v37 = vpop.f32.mrb[162].mxu0  ;;  %v24673_v0 = vld [vmem:[#allocation2 + $0x12c0] ss:$68 sps:$4 sm:$0xff]  }
 0xd01   :  { %28906 = vst [vmem:[#allocation80_spill] sm:$0xff] %v27896_v37  ;;  %v13411_v63 = vpop.f32.mrb[163].mxu0 }
 0xd02   :  { %15429 = vmatmul.mubr.bf16.gmra.mrb[28].mxu1 %v24661_v42  ;;  %v24670_v42 = vld [vmem:[#allocation2 + $0xab0] ss:$68 sps:$4 sm:$0xff]  }
 0xd03   :  { %13653 = vmatmul.mubr.bf16.gmra.mrb[36].mxu0 %v24658_v40  ;;  %15436 = vmatprep.mubr.bf16.mxu1 %v24662_v22  ;;  %v24676_v40 = vld [vmem:[#allocation2 + $0x134c] ss:$68 sps:$4 sm:$0xff]  }
 0xd04   :  { %13660 = vmatprep.mubr.bf16.mxu0 %v24666_v10 }
 0xd06   :  { %v27898_v11 = vpop.f32.mrb[164].mxu0 }
 0xd07   :  { %28907 = vst [vmem:[#allocation81_spill] sm:$0xff] %v27898_v11  ;;  %v13416_v47 = vpop.f32.mrb[165].mxu0 }
 0xd08   :  { %v27900_v61 = vpop.f32.mrb[166].mxu0  ;;  %v24674_v47 = vld [vmem:[#allocation2 + $0x1348] ss:$68 sps:$4 sm:$0xff]  }
 0xd09   :  { %28908 = vst [vmem:[#allocation82_spill] sm:$0xff] %v27900_v61  ;;  %v13419_v19 = vpop.f32.mrb[167].mxu0 }
 0xd0a   :  { %15437 = vmatmul.mubr.bf16.gmra.mrb[32].mxu1 %v24667_v13  ;;  %v24677_v19 = vld [vmem:[#allocation2 + $0x13d4] ss:$68 sps:$4 sm:$0xff]  }
 0xd0b   :  { %13661 = vmatmul.mubr.bf16.gmra.mrb[40].mxu0 %v24664_v41  ;;  %15444 = vmatprep.mubr.bf16.mxu1 %v24668_v32 }
 0xd0c   :  { %13668 = vmatprep.mubr.bf16.mxu0 %v24672_v3  ;;  %v24679_v3 = vld [vmem:[#allocation2 + $0x13d0] ss:$68 sps:$4 sm:$0xff]  }
 0xd0e   :  { %v27902_v63 = vpop.f32.mrb[168].mxu0 }
 0xd0f   :  { %v13424_v22 = vpop.f32.mrb[169].mxu0 }
 0xd10   :  { %v27904_v10 = vpop.f32.mrb[170].mxu0  ;;  %v24680_v22 = vld [vmem:[#allocation2 + $0x145c] ss:$68 sps:$4 sm:$0xff]  }
 0xd11   :  { %v13427_v11 = vpop.f32.mrb[171].mxu0 }
 0xd12   :  { %15445 = vmatmul.mubr.bf16.gmra.mrb[36].mxu1 %v24673_v0  ;;  %v24682_v0 = vld [vmem:[#allocation2 + $0x1458] ss:$68 sps:$4 sm:$0xff]  }
 0xd13   :  { %13669 = vmatmul.mubr.bf16.gmra.mrb[44].mxu0 %v24670_v42  ;;  %15452 = vmatprep.mubr.bf16.mxu1 %v24676_v40 }
 0xd16   :  { %v27906_v37 = vpop.f32.mrb[172].mxu0 }
 0xd17   :  { %28909 = vst [vmem:[#allocation83_spill] sm:$0xff] %v27906_v37  ;;  %v13432_v13 = vpop.f32.mrb[173].mxu0 }
 0xd18   :  { %v27908_v41 = vpop.f32.mrb[174].mxu0  ;;  %v24683_v13 = vld [vmem:[#allocation2 + $0x14e4] ss:$68 sps:$4 sm:$0xff]  }
 0xd19   :  { %28910 = vst [vmem:[#allocation84_spill] sm:$0xff] %v27908_v41  ;;  %v13435_v32 = vpop.f32.mrb[175].mxu0 }
 0xd1a   :  { %15453 = vmatmul.mubr.bf16.gmra.mrb[192].mxu1 %v24674_v47 }
 0xd1b   :  { %15460 = vmatprep.mubr.bf16.mxu1 %v24677_v19  ;;  %v24685_v19 = vld [vmem:[#allocation2 + $0x14e0] ss:$68 sps:$4 sm:$0xff]  }
 0xd1e   :  { %v27910_v61 = vpop.f32.mrb[176].mxu0 }
 0xd1f   :  { %28911 = vst [vmem:[#allocation85_spill] sm:$0xff] %v27910_v61  ;;  %v13440_v62 = vpop.f32.mrb[177].mxu0 }
 0xd20   :  { %v27912_v39 = vpop.f32.mrb[178].mxu0  ;;  %v24686_v62 = vld [vmem:[#allocation2 + $0x156c] ss:$68 sps:$4 sm:$0xff]  }
 0xd21   :  { %28912 = vst [vmem:[#allocation86_spill] sm:$0xff] %v27912_v39  ;;  %v13443_v11 = vpop.f32.mrb[179].mxu0 }
 0xd22   :  { %15461 = vmatmul.mubr.bf16.gmra.mrb[44].mxu1 %v24679_v3 }
 0xd23   :  { %15468 = vmatprep.mubr.bf16.mxu1 %v24680_v22  ;;  %v24688_v22 = vld [vmem:[#allocation2 + $0x1568] ss:$68 sps:$4 sm:$0xff]  }
 0xd26   :  { %v27914_v42 = vpop.f32.mrb[180].mxu0 }
 0xd27   :  { %28913 = vst [vmem:[#allocation87_spill] sm:$0xff] %v27914_v42  ;;  %v13448_v40 = vpop.f32.mrb[181].mxu0  ;;  %v28917_v42 = vld [vmem:[#allocation7_spill] sm:$0xff] }
 0xd28   :  { %v27916_v37 = vpop.f32.mrb[182].mxu0 }
 0xd29   :  { %28914 = vst [vmem:[#allocation88_spill] sm:$0xff] %v27916_v37  ;;  %v13451_v32 = vpop.f32.mrb[183].mxu0  ;;  %v24689_v37 = vld [vmem:[#allocation2 + $0x15f4] ss:$68 sps:$4 sm:$0xff]  }
 0xd2a   :  { %15469 = vmatmul.mubr.bf16.gmra.mrb[48].mxu1 %v24682_v0  ;;  %v28919_v0 = vld [vmem:[#allocation8_spill] sm:$0xff] }
 0xd2b   :  { %15476 = vmatprep.mubr.bf16.mxu1 %v24683_v13 }
 0xd2e   :  { %v27918_v47 = vpop.f32.mrb[184].mxu0 }
 0xd2f   :  { %28915 = vst [vmem:[#allocation89_spill] sm:$0xff] %v27918_v47  ;;  %v13456_v61 = vpop.f32.mrb[185].mxu0 }
 0xd30   :  { %v27920_v41 = vpop.f32.mrb[186].mxu0  ;;  %v24691_v61 = vld [vmem:[#allocation2 + $0x15f0] ss:$68 sps:$4 sm:$0xff]  }
 0xd31   :  { %28916 = vst [vmem:[#allocation90_spill] sm:$0xff] %v27920_v41  ;;  %v13459_v11 = vpop.f32.mrb[187].mxu0 }
 0xd32   :  { %15477 = vmatmul.mubr.bf16.gmra.mrb[52].mxu1 %v24685_v19  ;;  %v24692_v11 = vld [vmem:[#allocation2 + $0x167c] ss:$68 sps:$4 sm:$0xff]  }
 0xd33   :  { %15484 = vmatprep.mubr.bf16.mxu1 %v24686_v62 }
 0xd36   :  { %v13462_v3 = vpop.f32.mrb[188].mxu0 }
 0xd37   :  { %v27923_v40 = vadd.f32 %v28917_v42, %v13462_v3  ;;  %v13464_v39 = vpop.f32.mrb[189].mxu0  ;;  %v24694_v42 = vld [vmem:[#allocation2 + $0x1678] ss:$68 sps:$4 sm:$0xff]  }
 0xd38   :  { %v13465_v32 = vpop.f32.mrb[190].mxu0  ;;  %v24695_v39 = vld [vmem:[#allocation2 + $0x1704] ss:$68 sps:$4 sm:$0xff]  }
 0xd39   :  { %28918 = vst [vmem:[#allocation91_spill] sm:$0xff] %v27923_v40  ;;  %v27926_v13 = vadd.f32 %v28919_v0, %v13465_v32  ;;  %v13467_v47 = vpop.f32.mrb[191].mxu0 }
 0xd3a   :  { %15485 = vmatmul.mubr.bf16.gmra.mrb[56].mxu1 %v24688_v22  ;;  %v24698_v22 = vld [vmem:[#allocation2 + $0x178c] ss:$68 sps:$4 sm:$0xff]  }
 0xd3b   :  { %28920 = vst [vmem:[#allocation92_spill] sm:$0xff] %v27926_v13  ;;  %15492 = vmatprep.mubr.bf16.mxu1 %v24689_v37  ;;  %v24697_v37 = vld [vmem:[#allocation2 + $0x1700] ss:$68 sps:$4 sm:$0xff]  }
 0xd3c   :  { %v24704_v13 = vld [vmem:[#allocation2 + $0x189c] ss:$68 sps:$4 sm:$0xff]  }
 0xd3e   :  { %v27928_v4 = vpop.f32.mrb[192].mxu0 }
 0xd3f   :  { %28921 = vst [vmem:[#allocation93_spill] sm:$0xff] %v27928_v4  ;;  %v13472_v19 = vpop.f32.mrb[193].mxu0 }
 0xd40   :  { %v13473_v62 = vpop.f32.mrb[194].mxu0 }
 0xd41   :  { %v13474_v41 = vpop.f32.mrb[195].mxu0  ;;  %v24701_v62 = vld [vmem:[#allocation2 + $0x1814] ss:$68 sps:$4 sm:$0xff]  }
 0xd42   :  { %15493 = vmatmul.mubr.bf16.gmra.mrb[60].mxu1 %v24691_v61  ;;  %v24700_v61 = vld [vmem:[#allocation2 + $0x1788] ss:$68 sps:$4 sm:$0xff]  }
 0xd43   :  { %15500 = vmatprep.mubr.bf16.mxu1 %v24692_v11 }
 0xd46   :  { %v27930_v3 = vpop.f32.mrb[112].mxu0 }
 0xd47   :  { %v13512_v40 = vpop.f32.mrb[113].mxu0 }
 0xd48   :  { %v27932_v54 = vpop.f32.mrb[114].mxu0 }
 0xd49   :  { %v13515_v32 = vpop.f32.mrb[115].mxu0 }
 0xd4a   :  { %15501 = vmatmul.mubr.bf16.gmra.mrb[64].mxu1 %v24694_v42  ;;  %v24703_v42 = vld [vmem:[#allocation2 + $0x1810] ss:$68 sps:$4 sm:$0xff]  }
 0xd4b   :  { %15508 = vmatprep.mubr.bf16.mxu1 %v24695_v39 }
 0xd4e   :  { %v27934_v47 = vpop.f32.mrb[116].mxu0 }
 0xd4f   :  { %v13520_v0 = vpop.f32.mrb[117].mxu0 }
 0xd50   :  { %v27936_v19 = vpop.f32.mrb[118].mxu0 }
 0xd51   :  { %v13523_v41 = vpop.f32.mrb[119].mxu0 }
 0xd52   :  { %15509 = vmatmul.mubr.bf16.gmra.mrb[68].mxu1 %v24697_v37  ;;  %v24706_v37 = vld [vmem:[#allocation2 + $0x1898] ss:$68 sps:$4 sm:$0xff]  }
 0xd53   :  { %15516 = vmatprep.mubr.bf16.mxu1 %v24698_v22 }
 0xd56   :  { %v27938_v11 = vpop.f32.mrb[120].mxu0 }
 0xd57   :  { %v13528_v40 = vpop.f32.mrb[121].mxu0 }
 0xd58   :  { %v27940_v4 = vpop.f32.mrb[122].mxu0 }
 0xd59   :  { %v13531_v32 = vpop.f32.mrb[123].mxu0 }
 0xd5a   :  { %15517 = vmatmul.mubr.bf16.gmra.mrb[72].mxu1 %v24700_v61 }
 0xd5b   :  { %15524 = vmatprep.mubr.bf16.mxu1 %v24701_v62 }
 0xd5e   :  { %v27942_v39 = vpop.f32.mrb[124].mxu0 }
 0xd5f   :  { %v13536_v0 = vpop.f32.mrb[125].mxu0 }
 0xd60   :  { %v27944_v59 = vpop.f32.mrb[126].mxu0 }
 0xd61   :  { %v13539_v41 = vpop.f32.mrb[127].mxu0 }
 0xd62   :  { %15525 = vmatmul.mubr.bf16.gmra.mrb[76].mxu1 %v24703_v42  ;;  %v24710_v42 = vld [vmem:[#allocation2 + $0x19ac] ss:$68 sps:$4 sm:$0xff]  }
 0xd63   :  { %15532 = vmatprep.mubr.bf16.mxu1 %v24704_v13 }
 0xd66   :  { %v27946_v22 = vpop.f32.mrb[128].mxu0 }
 0xd67   :  { %v13544_v40 = vpop.f32.mrb[129].mxu0 }
 0xd68   :  { %v27948_v57 = vpop.f32.mrb[130].mxu0  ;;  %v24712_v40 = vld [vmem:[#allocation2 + $0x19a8] ss:$68 sps:$4 sm:$0xff]  }
 0xd69   :  { %v13547_v32 = vpop.f32.mrb[131].mxu0 }
 0xd6a   :  { %15533 = vmatmul.mubr.bf16.gmra.mrb[80].mxu1 %v24706_v37 }
 0xd6b   :  { %15540 = vmatprep.mubr.bf16.mxu1 %v24709_v30  ;;  %v24713_v30 = vld [vmem:[#allocation2 + $0x1a34] ss:$68 sps:$4 sm:$0xff]  }
 0xd6d   :  { %v27950_v61 = vpop.f32.mrb[236].mxu1 }
 0xd6e   :  { %v15328_v62 = vpop.f32.mrb[237].mxu1  ;;  %v27952_v0 = vpop.f32.mrb[132].mxu0 }
 0xd6f   :  { %v27954_v28 = vpop.f32.mrb[238].mxu1  ;;  %v13552_v13 = vpop.f32.mrb[133].mxu0 }
 0xd70   :  { %v15331_v41 = vpop.f32.mrb[239].mxu1  ;;  %v27956_v44 = vpop.f32.mrb[134].mxu0 }
 0xd71   :  { %v13555_v51 = vpop.f32.mrb[135].mxu0  ;;  %v24716_v41 = vld [vmem:[#allocation2 + $0x1abc] ss:$68 sps:$4 sm:$0xff]  }
 0xd72   :  { %15541 = vmatmul.mubr.bf16.gmra.mrb[236].mxu1 %v24707_v43 }
 0xd73   :  { %15548 = vmatprep.mubr.bf16.mxu1 %v24710_v42  ;;  %v24718_v42 = vld [vmem:[#allocation2 + $0x1ab8] ss:$68 sps:$4 sm:$0xff]  }
 0xd76   :  { %v27958_v32 = vpop.f32.mrb[136].mxu0 }
 0xd77   :  { %v13560_v37 = vpop.f32.mrb[137].mxu0 }
 0xd78   :  { %v27960_v36 = vpop.f32.mrb[138].mxu0  ;;  %v24719_v37 = vld [vmem:[#allocation2 + $0x1b44] ss:$68 sps:$4 sm:$0xff]  }
 0xd79   :  { %v13563_v62 = vpop.f32.mrb[139].mxu0 }
 0xd7a   :  { %15549 = vmatmul.mubr.bf16.gmra.mrb[88].mxu1 %v24712_v40 }
 0xd7b   :  { %15556 = vmatprep.mubr.bf16.mxu1 %v24713_v30  ;;  %v24721_v30 = vld [vmem:[#allocation2 + $0x1b40] ss:$68 sps:$4 sm:$0xff]  }
 0xd7e   :  { %v27962_v14 = vpop.f32.mrb[140].mxu0 }
 0xd7f   :  { %v13568_v13 = vpop.f32.mrb[141].mxu0 }
 0xd80   :  { %v27964_v27 = vpop.f32.mrb[142].mxu0 }
 0xd81   :  { %v13571_v51 = vpop.f32.mrb[143].mxu0 }
 0xd82   :  { %15557 = vmatmul.mubr.bf16.gmra.mrb[92].mxu1 %v24715_v48 }
 0xd83   :  { %15564 = vmatprep.mubr.bf16.mxu1 %v24716_v41 }
 0xd86   :  { %v27966_v43 = vpop.f32.mrb[144].mxu0 }
 0xd87   :  { %v13576_v52 = vpop.f32.mrb[145].mxu0 }
 0xd88   :  { %v27968_v60 = vpop.f32.mrb[146].mxu0  ;;  %v24724_v52 = vld [vmem:[#allocation2 + $0x1bc8] ss:$68 sps:$4 sm:$0xff]  }
 0xd89   :  { %v13579_v62 = vpop.f32.mrb[147].mxu0 }
 0xd8a   :  { %15565 = vmatmul.mubr.bf16.gmra.mrb[96].mxu1 %v24718_v42 }
 0xd8b   :  { %15572 = vmatprep.mubr.bf16.mxu1 %v24719_v37 }
 0xd8e   :  { %v13582_v40 = vpop.f32.mrb[0].mxu0 }
 0xd8f   :  { %v27971_v13 = vadd.f32 %v27724_v15, %v13582_v40  ;;  %v13584_v49 = vpop.f32.mrb[1].mxu0  ;;  %v24727_v40 = vld [vmem:[#allocation2 + $0x1c50] ss:$68 sps:$4 sm:$0xff]  }
 0xd90   :  { %v13585_v51 = vpop.f32.mrb[2].mxu0 }
 0xd91   :  { %v27974_v48 = vadd.f32 %v27726_v34, %v13585_v51  ;;  %v13587_v41 = vpop.f32.mrb[3].mxu0  ;;  %v24728_v51 = vld [vmem:[#allocation2 + $0x1cdc] ss:$68 sps:$4 sm:$0xff]  }
 0xd92   :  { %15573 = vmatmul.mubr.bf16.gmra.mrb[100].mxu1 %v24721_v30 }
 0xd93   :  { %15580 = vmatprep.mubr.bf16.mxu1 %v24722_v8 }
 0xd96   :  { %v13590_v29 = vpop.f32.mrb[236].mxu0 }
 0xd97   :  { %v27977_v42 = vadd.f32 %v13590_v29, %v27728_v50  ;;  %v13592_v37 = vpop.f32.mrb[237].mxu0  ;;  %v24730_v50 = vld [vmem:[#allocation2 + $0x1cd8] ss:$68 sps:$4 sm:$0xff]  }
 0xd98   :  { %v13593_v62 = vpop.f32.mrb[238].mxu0  ;;  %v24731_v37 = vld [vmem:[#allocation2 + $0x1d64] ss:$68 sps:$4 sm:$0xff]  }
 0xd99   :  { %v27980_v15 = vadd.f32 %v13593_v62, %v27730_v5  ;;  %v13595_v49 = vpop.f32.mrb[239].mxu0 }
 0xd9a   :  { %15581 = vmatmul.mubr.bf16.gmra.mrb[104].mxu1 %v24724_v52  ;;  %v24734_v49 = vld [vmem:[#allocation2 + $0x1dec] ss:$68 sps:$4 sm:$0xff]  }
 0xd9b   :  { %15588 = vmatprep.mubr.bf16.mxu1 %v24725_v31  ;;  %v24733_v31 = vld [vmem:[#allocation2 + $0x1d60] ss:$68 sps:$4 sm:$0xff]  }
 0xd9e   :  { %v27982_v34 = vpop.f32.mrb[8].mxu0 }
 0xd9f   :  { %v13600_v30 = vpop.f32.mrb[9].mxu0 }
 0xda0   :  { %v27984_v8 = vpop.f32.mrb[10].mxu0 }
 0xda1   :  { %v13603_v41 = vpop.f32.mrb[11].mxu0 }
 0xda2   :  { %15589 = vmatmul.mubr.bf16.gmra.mrb[108].mxu1 %v24727_v40  ;;  %v24736_v40 = vld [vmem:[#allocation2 + $0x1de8] ss:$68 sps:$4 sm:$0xff]  }
 0xda3   :  { %15596 = vmatprep.mubr.bf16.mxu1 %v24728_v51 }
 0xda6   :  { %v27986_v29 = vpop.f32.mrb[12].mxu0 }
 0xda7   :  { %v13608_v9 = vpop.f32.mrb[13].mxu0 }
 0xda8   :  { %v27988_v5 = vpop.f32.mrb[14].mxu0 }
 0xda9   :  { %v13611_v62 = vpop.f32.mrb[15].mxu0 }
 0xdaa   :  { %15597 = vmatmul.mubr.bf16.gmra.mrb[112].mxu1 %v24730_v50  ;;  %v24739_v50 = vld [vmem:[#allocation2 + $0x1e70] ss:$68 sps:$4 sm:$0xff]  }
 0xdab   :  { %15604 = vmatprep.mubr.bf16.mxu1 %v24731_v37 }
 0xdae   :  { %v27990_v52 = vpop.f32.mrb[16].mxu0 }
 0xdaf   :  { %v13616_v30 = vpop.f32.mrb[17].mxu0 }
 0xdb0   :  { %v27992_v58 = vpop.f32.mrb[18].mxu0 }
 0xdb1   :  { %v13619_v41 = vpop.f32.mrb[19].mxu0 }
 0xdb2   :  { %15605 = vmatmul.mubr.bf16.gmra.mrb[116].mxu1 %v24733_v31  ;;  %v24742_v31 = vld [vmem:[#allocation2 + $0x1ef8] ss:$68 sps:$4 sm:$0xff]  }
 0xdb3   :  { %15612 = vmatprep.mubr.bf16.mxu1 %v24734_v49 }
 0xdb6   :  { %v27994_v51 = vpop.f32.mrb[20].mxu0 }
 0xdb7   :  { %v13624_v9 = vpop.f32.mrb[21].mxu0 }
 0xdb8   :  { %v27996_v56 = vpop.f32.mrb[22].mxu0 }
 0xdb9   :  { %v13627_v62 = vpop.f32.mrb[23].mxu0 }
 0xdba   :  { %15613 = vmatmul.mubr.bf16.gmra.mrb[120].mxu1 %v24736_v40 }
 0xdbb   :  { %15620 = vmatprep.mubr.bf16.mxu1 %v24737_v25  ;;  %v24745_v25 = vld [vmem:[#allocation2 + $0x1f80] ss:$68 sps:$4 sm:$0xff]  }
 0xdbe   :  { %v27998_v37 = vpop.f32.mrb[24].mxu0 }
 0xdbf   :  { %v13632_v30 = vpop.f32.mrb[25].mxu0 }
 0xdc0   :  { %v28000_v18 = vpop.f32.mrb[26].mxu0 }
 0xdc1   :  { %v13635_v41 = vpop.f32.mrb[27].mxu0 }
 0xdc2   :  { %15621 = vmatmul.mubr.bf16.gmra.mrb[124].mxu1 %v24739_v50 }
 0xdc3   :  { %15628 = vmatprep.mubr.bf16.mxu1 %v24740_v38  ;;  %v24748_v38 = vld [vmem:[#allocation2 + $0x2008] ss:$68 sps:$4 sm:$0xff]  }
 0xdc6   :  { %v28002_v49 = vpop.f32.mrb[28].mxu0 }
 0xdc7   :  { %v13640_v9 = vpop.f32.mrb[29].mxu0 }
 0xdc8   :  { %v28004_v23 = vpop.f32.mrb[30].mxu0  ;;  %v24749_v9 = vld [vmem:[#allocation2 + $0x2094] ss:$68 sps:$4 sm:$0xff]  }
 0xdc9   :  { %v13643_v62 = vpop.f32.mrb[31].mxu0 }
 0xdca   :  { %15629 = vmatmul.mubr.bf16.gmra.mrb[128].mxu1 %v24742_v31  ;;  %v24751_v31 = vld [vmem:[#allocation2 + $0x2090] ss:$68 sps:$4 sm:$0xff]  }
 0xdcb   :  { %15636 = vmatprep.mubr.bf16.mxu1 %v24743_v35 }
 0xdce   :  { %v28006_v40 = vpop.f32.mrb[32].mxu0 }
 0xdcf   :  { %v13648_v30 = vpop.f32.mrb[33].mxu0 }
 0xdd0   :  { %v28008_v20 = vpop.f32.mrb[34].mxu0  ;;  %v24752_v30 = vld [vmem:[#allocation2 + $0x211c] ss:$68 sps:$4 sm:$0xff]  }
 0xdd1   :  { %v13651_v41 = vpop.f32.mrb[35].mxu0 }
 0xdd2   :  { %15637 = vmatmul.mubr.bf16.gmra.mrb[132].mxu1 %v24745_v25  ;;  %v24754_v25 = vld [vmem:[#allocation2 + $0x2118] ss:$68 sps:$4 sm:$0xff]  }
 0xdd3   :  { %15644 = vmatprep.mubr.bf16.mxu1 %v24746_v16 }
 0xdd6   :  { %v28010_v50 = vpop.f32.mrb[36].mxu0 }
 0xdd7   :  { %v13656_v53 = vpop.f32.mrb[37].mxu0 }
 0xdd8   :  { %v28012_v7 = vpop.f32.mrb[38].mxu0 }
 0xdd9   :  { %v13659_v62 = vpop.f32.mrb[39].mxu0 }
 0xdda   :  { %15645 = vmatmul.mubr.bf16.gmra.mrb[136].mxu1 %v24748_v38 }
 0xddb   :  { %15652 = vmatprep.mubr.bf16.mxu1 %v24749_v9 }
 0xdde   :  { %v28014_v35 = vpop.f32.mrb[40].mxu0 }
 0xddf   :  { %28922 = vst [vmem:[#allocation94_spill] sm:$0xff] %v28014_v35  ;;  %v13664_v45 = vpop.f32.mrb[41].mxu0  ;;  %v24755_v35 = vld [vmem:[#allocation2 + $0x21a0] ss:$68 sps:$4 sm:$0xff]  }
 0xde0   :  { %v28016_v1 = vpop.f32.mrb[42].mxu0  ;;  %v6671_v45 = vld [vmem:[#allocation2 + $0x2228] sm:$0xff] }
 0xde1   :  { %28923 = vst [vmem:[#allocation95_spill] sm:$0xff] %v28016_v1  ;;  %v13667_v41 = vpop.f32.mrb[43].mxu0  ;;  %v19539_v1 = vcombine.high %v6671_v45, %v6671_v45 }
 0xde2   :  { %15653 = vmatmul.mubr.bf16.gmra.mrb[140].mxu1 %v24751_v31  ;;  %v19538_v31 = vcombine.low %v6671_v45, %v6671_v45  ;;  %v24763_v41 = vld [vmem:[#allocation2 + $0xbc] ss:$68 sps:$4 sm:$0xff]   ;;  %v24771_v45 = vld [vmem:[#allocation2 + $0x1c8] ss:$68 sps:$4 sm:$0xff]  }
 0xde3   :  { %15660 = vmatprep.mubr.bf16.mxu1 %v24752_v30  ;;  %v24762_v30 = vld [vmem:[#allocation2 + $0x34] ss:$68 sps:$4 sm:$0xff]  }
 0xde6   :  { %v13670_v16 = vpop.f32.mrb[44].mxu0 }
 0xde7   :  { %v28019_v53 = vadd.f32 %v27950_v61, %v13670_v16  ;;  %v13672_v6 = vpop.f32.mrb[45].mxu0  ;;  %v24760_v61 = vld [vmem:[#allocation2 + $0x30] ss:$68 sps:$4 sm:$0xff]  }
 0xde8   :  { %v13673_v62 = vpop.f32.mrb[46].mxu0  ;;  %v28924_v6 = vld [vmem:[#allocation9_spill] sm:$0xff]  ;;  %v28925_v16 = vld [vmem:[#allocation10_spill] sm:$0xff] }
 0xde9   :  { %v28022_v38 = vadd.f32 %v27954_v28, %v13673_v62  ;;  %v13675_v9 = vpop.f32.mrb[47].mxu0  ;;  %v24765_v28 = vld [vmem:[#allocation2 + $0xb8] ss:$68 sps:$4 sm:$0xff]   ;;  %v24769_v62 = vld [vmem:[#allocation2 + $0x1cc] ss:$68 sps:$4 sm:$0xff]  }
 0xdea   :  { %15661 = vmatmul.mubr.bf16.gmra.mrb[144].mxu1 %v24754_v25  ;;  %v28927_v25 = vld [vmem:[#allocation12_spill] sm:$0xff]  ;;  %v28928_v9 = vld [vmem:[#allocation13_spill] sm:$0xff] }
 0xdeb   :  { %15668 = vmatprep.mubr.bf16.mxu1 %v24757_v46  ;;  %v24766_v46 = vld [vmem:[#allocation2 + $0x144] ss:$68 sps:$4 sm:$0xff]  }
 0xdf2   :  { %15669 = vmatmul.mubr.bf16.gmra.mrb[40].mxu1 %v24755_v35  ;;  %v24768_v35 = vld [vmem:[#allocation2 + $0x140] ss:$68 sps:$4 sm:$0xff]  }
 0xdf3   :  { %15676 = vmatprep.mubr.bf16.mxu1 %v19539_v1  ;;  %v28926_v1 = vld [vmem:[#allocation11_spill] sm:$0xff] }
 0xdfa   :  { %15677 = vmatmul.mubr.bf16.gmra.mrb[152].mxu1 %v19538_v31  ;;  %v28929_v31 = vld [vmem:[#allocation14_spill] sm:$0xff] }
 0xdfb   :  { %15716 = vmatprep.mubr.bf16.mxu1 %v24762_v30  ;;  %v24772_v30 = vld [vmem:[#allocation2 + $0x254] ss:$68 sps:$4 sm:$0xff]  }
 0xe02   :  { %15717 = vmatmul.mubr.bf16.vlgmr.msra.gmra.mrb[156].mxu1 %v24760_v61  ;;  %v28930_v61 = vld [vmem:[#allocation15_spill] sm:$0xff] }
 0xe03   :  { %16237 = vmatpush1.bf16.msra.mxu1 %v28924_v6  ;;  %15724 = vmatprep.mubr.bf16.mxu1 %v24763_v41  ;;  %v24774_v41 = vld [vmem:[#allocation2 + $0x250] ss:$68 sps:$4 sm:$0xff]   ;;  %v28931_v6 = vld [vmem:[#allocation16_spill] sm:$0xff] }
 0xe04   :  { %16238 = vmatprep.subr.bf16.mxu1 %v28710_v12 }
 0xe07   :  { %16239 = vmatpush1.bf16.msra.mxu1 %v28925_v16  ;;  %v28932_v16 = vld [vmem:[#allocation17_spill] sm:$0xff] }
 0xe08   :  { %16240 = vmatprep.subr.bf16.mxu1 %v28710_v12 }
 0xe0a   :  { %15725 = vmatmul.mubr.bf16.gmra.mrb[160].mxu1 %v24765_v28  ;;  %v24775_v28 = vld [vmem:[#allocation2 + $0x2dc] ss:$68 sps:$4 sm:$0xff]  }
 0xe0b   :  { %16241 = vmatpush1.bf16.msra.mxu1 %v28926_v1  ;;  %15732 = vmatprep.mubr.bf16.mxu1 %v24766_v46  ;;  %v24777_v46 = vld [vmem:[#allocation2 + $0x2d8] ss:$68 sps:$4 sm:$0xff]   ;;  %v28933_v1 = vld [vmem:[#allocation18_spill] sm:$0xff] }
 0xe0c   :  { %16242 = vmatprep.subr.bf16.mxu1 %v28710_v12 }
 0xe0f   :  { %16243 = vmatpush1.bf16.msra.mxu1 %v28927_v25  ;;  %v28934_v25 = vld [vmem:[#allocation19_spill] sm:$0xff] }
 0xe10   :  { %16244 = vmatprep.subr.bf16.mxu1 %v28710_v12 }
 0xe12   :  { %15733 = vmatmul.mubr.bf16.gmra.mrb[164].mxu1 %v24768_v35  ;;  %v24778_v35 = vld [vmem:[#allocation2 + $0x364] ss:$68 sps:$4 sm:$0xff]  }
 0xe13   :  { %16245 = vmatpush1.bf16.msra.mxu1 %v28928_v9  ;;  %15740 = vmatprep.mubr.bf16.mxu1 %v24769_v62  ;;  %v24780_v62 = vld [vmem:[#allocation2 + $0x360] ss:$68 sps:$4 sm:$0xff]  }
 0xe14   :  { %16246 = vmatprep.subr.bf16.mxu1 %v28710_v12  ;;  %v28935_v9 = vld [vmem:[#allocation20_spill] sm:$0xff] }
 0xe17   :  { %16247 = vmatpush1.bf16.msra.mxu1 %v28929_v31  ;;  %v28936_v31 = vld [vmem:[#allocation21_spill] sm:$0xff] }
 0xe18   :  { %16248 = vmatprep.subr.bf16.mxu1 %v28710_v12 }
 0xe1a   :  { %15741 = vmatmul.mubr.bf16.gmra.mrb[168].mxu1 %v24771_v45  ;;  %v24781_v45 = vld [vmem:[#allocation2 + $0x3ec] ss:$68 sps:$4 sm:$0xff]  }
 0xe1b   :  { %16249 = vmatpush1.bf16.msra.mxu1 %v28930_v61  ;;  %15748 = vmatprep.mubr.bf16.mxu1 %v24772_v30  ;;  %v24783_v30 = vld [vmem:[#allocation2 + $0x3e8] ss:$68 sps:$4 sm:$0xff]  }
 0xe1c   :  { %16250 = vmatprep.subr.bf16.mxu1 %v28710_v12  ;;  %v28937_v61 = vld [vmem:[#allocation22_spill] sm:$0xff] }
 0xe1f   :  { %16251 = vmatpush1.bf16.msra.mxu1 %v28931_v6  ;;  %v24786_v6 = vld [vmem:[#allocation2 + $0x470] ss:$68 sps:$4 sm:$0xff]  }
 0xe20   :  { %16252 = vmatprep.subr.bf16.mxu1 %v28710_v12 }
 0xe22   :  { %15749 = vmatmul.mubr.bf16.gmra.mrb[172].mxu1 %v24774_v41  ;;  %v24784_v41 = vld [vmem:[#allocation2 + $0x474] ss:$68 sps:$4 sm:$0xff]  }
 0xe23   :  { %16253 = vmatpush1.bf16.msra.mxu1 %v28932_v16  ;;  %15756 = vmatprep.mubr.bf16.mxu1 %v24775_v28  ;;  %v24789_v28 = vld [vmem:[#allocation2 + $0x4fc] ss:$68 sps:$4 sm:$0xff]   ;;  %v28938_v16 = vmov 0.0  }
 0xe24   :  { %16254 = vmatprep.subr.bf16.mxu1 %v28710_v12 }
 0xe27   :  { %16255 = vmatpush1.bf16.msra.mxu1 %v28933_v1  ;;  %v24790_v1 = vld [vmem:[#allocation2 + $0x584] ss:$68 sps:$4 sm:$0xff]  }
 0xe28   :  { %16256 = vmatprep.subr.bf16.mxu1 %v28710_v12 }
 0xe2a   :  { %15757 = vmatmul.mubr.bf16.gmra.mrb[176].mxu1 %v24777_v46  ;;  %v24787_v46 = vld [vmem:[#allocation2 + $0x4f8] ss:$68 sps:$4 sm:$0xff]  }
 0xe2b   :  { %16257 = vmatpush1.bf16.msra.mxu1 %v28934_v25  ;;  %15764 = vmatprep.mubr.bf16.mxu1 %v24778_v35  ;;  %v24792_v35 = vld [vmem:[#allocation2 + $0x580] ss:$68 sps:$4 sm:$0xff]   ;;  %v24793_v25 = vld [vmem:[#allocation2 + $0x60c] ss:$68 sps:$4 sm:$0xff]  }
 0xe2c   :  { %16258 = vmatprep.subr.bf16.mxu1 %v28710_v12 }
 0xe2f   :  { %16259 = vmatpush1.bf16.msra.mxu1 %v28935_v9  ;;  %v24799_v9 = vld [vmem:[#allocation2 + $0x71c] ss:$68 sps:$4 sm:$0xff]  }
 0xe30   :  { %16260 = vmatprep.subr.bf16.mxu1 %v28710_v12 }
 0xe32   :  { %15765 = vmatmul.mubr.bf16.gmra.mrb[180].mxu1 %v24780_v62  ;;  %v24796_v62 = vld [vmem:[#allocation2 + $0x694] ss:$68 sps:$4 sm:$0xff]  }
 0xe33   :  { %16261 = vmatpush1.bf16.msra.mxu1 %v28936_v31  ;;  %15772 = vmatprep.mubr.bf16.mxu1 %v24781_v45  ;;  %v24802_v45 = vld [vmem:[#allocation2 + $0x7a4] ss:$68 sps:$4 sm:$0xff]  }
 0xe34   :  { %16262 = vmatprep.subr.bf16.mxu1 %v28710_v12  ;;  %v24804_v31 = vld [vmem:[#allocation2 + $0x7a0] ss:$68 sps:$4 sm:$0xff]  }
 0xe37   :  { %16263 = vmatpush1.bf16.msra.mxu1 %v28937_v61  ;;  %v24807_v61 = vld [vmem:[#allocation2 + $0x828] ss:$68 sps:$4 sm:$0xff]  }
 0xe38   :  { %16264 = vmatprep.subr.bf16.mxu1 %v28710_v12 }
 0xe3a   :  { %15773 = vmatmul.mubr.bf16.gmra.mrb[184].mxu1 %v24783_v30  ;;  %v24805_v30 = vld [vmem:[#allocation2 + $0x82c] ss:$68 sps:$4 sm:$0xff]  }
 0xe3b   :  { %16265 = vmatpush1.bf16.msra.mxu1 %v27647_v55  ;;  %15780 = vmatprep.mubr.bf16.mxu1 %v24784_v41  ;;  %v24795_v55 = vld [vmem:[#allocation2 + $0x608] ss:$68 sps:$4 sm:$0xff]   ;;  %v24808_v41 = vld [vmem:[#allocation2 + $0x8b4] ss:$68 sps:$4 sm:$0xff]  }
 0xe3c   :  { %16266 = vmatprep.subr.bf16.mxu1 %v28710_v12  ;;  %v24798_v12 = vld [vmem:[#allocation2 + $0x690] ss:$68 sps:$4 sm:$0xff]  }
 0xe3f   :  { %16267 = vmatpush1.bf16.msra.mxu1 %v27649_v21  ;;  %v24801_v21 = vld [vmem:[#allocation2 + $0x718] ss:$68 sps:$4 sm:$0xff]  }
 0xe40   :  { %20459 = vmatprep.subr.bf16.mxu1 %v28938_v16 }
 0xe42   :  { %15781 = vmatmul.mubr.bf16.gmra.mrb[188].mxu1 %v24786_v6  ;;  %v24810_v6 = vld [vmem:[#allocation2 + $0x8b0] ss:$68 sps:$4 sm:$0xff]  }
 0xe43   :  { %15788 = vmatprep.mubr.bf16.mxu1 %v24789_v28  ;;  %v24811_v28 = vld [vmem:[#allocation2 + $0x93c] ss:$68 sps:$4 sm:$0xff]  }
 0xe4a   :  { %15789 = vmatmul.mubr.bf16.gmra.mrb[84].mxu1 %v24787_v46  ;;  %v24813_v46 = vld [vmem:[#allocation2 + $0x938] ss:$68 sps:$4 sm:$0xff]  }
 0xe4b   :  { %15796 = vmatprep.mubr.bf16.mxu1 %v24790_v1  ;;  %v24814_v1 = vld [vmem:[#allocation2 + $0x9c4] ss:$68 sps:$4 sm:$0xff]  }
 0xe52   :  { %15797 = vmatmul.mubr.bf16.gmra.mrb[196].mxu1 %v24792_v35  ;;  %v24816_v35 = vld [vmem:[#allocation2 + $0x9c0] ss:$68 sps:$4 sm:$0xff]  }
 0xe53   :  { %15804 = vmatprep.mubr.bf16.mxu1 %v24793_v25  ;;  %v24817_v25 = vld [vmem:[#allocation2 + $0xa4c] ss:$68 sps:$4 sm:$0xff]  }
 0xe5a   :  { %15805 = vmatmul.mubr.bf16.gmra.mrb[200].mxu1 %v24795_v55  ;;  %v24819_v55 = vld [vmem:[#allocation2 + $0xa48] ss:$68 sps:$4 sm:$0xff]  }
 0xe5b   :  { %15812 = vmatprep.mubr.bf16.mxu1 %v24796_v62  ;;  %v24822_v62 = vld [vmem:[#allocation2 + $0xad4] ss:$68 sps:$4 sm:$0xff]  }
 0xe62   :  { %15813 = vmatmul.mubr.bf16.gmra.mrb[204].mxu1 %v24798_v12 }
 0xe63   :  { %15820 = vmatprep.mubr.bf16.mxu1 %v24799_v9 }
 0xe6a   :  { %15821 = vmatmul.mubr.bf16.gmra.mrb[208].mxu1 %v24801_v21  ;;  %v24820_v21 = vld [vmem:[#allocation2 + $0xad0] ss:$68 sps:$4 sm:$0xff]  }
 0xe6b   :  { %15828 = vmatprep.mubr.bf16.mxu1 %v24802_v45 }
 0xe72   :  { %15829 = vmatmul.mubr.bf16.gmra.mrb[212].mxu1 %v24804_v31 }
 0xe73   :  { %15836 = vmatprep.mubr.bf16.mxu1 %v24805_v30  ;;  %v24823_v30 = vld [vmem:[#allocation2 + $0xb5c] ss:$68 sps:$4 sm:$0xff]  }
 0xe7a   :  { %15837 = vmatmul.mubr.bf16.gmra.mrb[216].mxu1 %v24807_v61 }
 0xe7b   :  { %15844 = vmatprep.mubr.bf16.mxu1 %v24808_v41 }
 0xe82   :  { %15845 = vmatmul.mubr.bf16.gmra.mrb[220].mxu1 %v24810_v6  ;;  %v24825_v6 = vld [vmem:[#allocation2 + $0xb58] ss:$68 sps:$4 sm:$0xff]  }
 0xe83   :  { %15852 = vmatprep.mubr.bf16.mxu1 %v24811_v28  ;;  %v24826_v28 = vld [vmem:[#allocation2 + $0xbe4] ss:$68 sps:$4 sm:$0xff]  }
 0xe8a   :  { %15853 = vmatmul.mubr.bf16.gmra.mrb[224].mxu1 %v24813_v46  ;;  %v24828_v46 = vld [vmem:[#allocation2 + $0xbe0] ss:$68 sps:$4 sm:$0xff]  }
 0xe8b   :  { %15860 = vmatprep.mubr.bf16.mxu1 %v24814_v1  ;;  %v24829_v1 = vld [vmem:[#allocation2 + $0xc6c] ss:$68 sps:$4 sm:$0xff]  }
 0xe92   :  { %15861 = vmatmul.mubr.bf16.gmra.mrb[228].mxu1 %v24816_v35  ;;  %v24877_v35 = vld [vmem:[#allocation2 + $0xb38] ss:$68 sps:$4 sm:$0xff]  }
 0xe93   :  { %15868 = vmatprep.mubr.bf16.mxu1 %v24817_v25  ;;  %v24879_v25 = vld [vmem:[#allocation2 + $0xb3c] ss:$68 sps:$4 sm:$0xff]  }
 0xe94   :  { %13676 = vmatprep.mubr.bf16.mxu0 %v24879_v25  ;;  %v24903_v25 = vld [vmem:[#allocation2 + $0xd5c] ss:$68 sps:$4 sm:$0xff]  }
 0xe95   :  { %13677 = vmatmul.mubr.bf16.gmra.mrb[48].mxu0 %v24877_v35  ;;  %v24901_v35 = vld [vmem:[#allocation2 + $0xd58] ss:$68 sps:$4 sm:$0xff]  }
 0xe9a   :  { %15869 = vmatmul.mubr.bf16.gmra.mrb[232].mxu1 %v24819_v55  ;;  %v24832_v55 = vld [vmem:[#allocation2 + $0xcf4] ss:$68 sps:$4 sm:$0xff]  }
 0xe9b   :  { %15876 = vmatprep.mubr.bf16.mxu1 %v24822_v62  ;;  %v24883_v62 = vld [vmem:[#allocation2 + $0xbc0] ss:$68 sps:$4 sm:$0xff]  }
 0xe9d   :  { %v15630_v12 = vpop.f32.mrb[128].mxu1 }
 0xe9e   :  { %v15632_v9 = vpop.f32.mrb[129].mxu1  ;;  %v28057_v45 = vadd.f32 %v15630_v12, %v27902_v63  ;;  %v24831_v63 = vld [vmem:[#allocation2 + $0xc68] ss:$68 sps:$4 sm:$0xff]   ;;  %v24834_v12 = vld [vmem:[#allocation2 + $0xcf0] ss:$68 sps:$4 sm:$0xff]  }
 0xe9f   :  { %v15633_v31 = vpop.f32.mrb[130].mxu1  ;;  %v24837_v9 = vld [vmem:[#allocation2 + $0xd7c] ss:$68 sps:$4 sm:$0xff]  }
 0xea0   :  { %28939 = vst [vmem:[#allocation96_spill] sm:$0xff] %v28057_v45  ;;  %v15635_v61 = vpop.f32.mrb[131].mxu1  ;;  %v28060_v41 = vadd.f32 %v15633_v31, %v27904_v10  ;;  %v24885_v10 = vld [vmem:[#allocation2 + $0xbc4] ss:$68 sps:$4 sm:$0xff]   ;;  %v24891_v31 = vld [vmem:[#allocation2 + $0xc4c] ss:$68 sps:$4 sm:$0xff]  }
 0xea1   :  { %13684 = vmatprep.mubr.bf16.mxu0 %v24885_v10  ;;  %v24838_v61 = vld [vmem:[#allocation2 + $0xe04] ss:$68 sps:$4 sm:$0xff]   ;;  %v24847_v10 = vld [vmem:[#allocation2 + $0xf9c] ss:$68 sps:$4 sm:$0xff]  }
 0xea2   :  { %28940 = vst [vmem:[#allocation97_spill] sm:$0xff] %v28060_v41  ;;  %15877 = vmatmul.mubr.bf16.gmra.mrb[128].mxu1 %v24820_v21  ;;  %13685 = vmatmul.mubr.bf16.gmra.mrb[52].mxu0 %v24883_v62  ;;  %v24889_v21 = vld [vmem:[#allocation2 + $0xc48] ss:$68 sps:$4 sm:$0xff]   ;;  %v24846_v62 = vld [vmem:[#allocation2 + $0xf10] ss:$68 sps:$4 sm:$0xff]  }
 0xea3   :  { %15884 = vmatprep.mubr.bf16.mxu1 %v24823_v30  ;;  %13692 = vmatprep.mubr.bf16.mxu0 %v24891_v31  ;;  %v24835_v30 = vld [vmem:[#allocation2 + $0xd78] ss:$68 sps:$4 sm:$0xff]   ;;  %v24853_v31 = vld [vmem:[#allocation2 + $0x10ac] ss:$68 sps:$4 sm:$0xff]   ;;  %v24937_v45 = vld [vmem:[#allocation2 + $0x1ce4] ss:$68 sps:$4 sm:$0xff]  }
 0xea4   :  { %v24936_v41 = vld [vmem:[#allocation2 + $0x1c58] ss:$68 sps:$4 sm:$0xff]  }
 0xeaa   :  { %15885 = vmatmul.mubr.bf16.gmra.mrb[240].mxu1 %v24825_v6  ;;  %13693 = vmatmul.mubr.bf16.gmra.mrb[56].mxu0 %v24889_v21  ;;  %v24895_v6 = vld [vmem:[#allocation2 + $0xcd0] ss:$68 sps:$4 sm:$0xff]   ;;  %v24852_v21 = vld [vmem:[#allocation2 + $0x1020] ss:$68 sps:$4 sm:$0xff]  }
 0xeab   :  { %15892 = vmatprep.mubr.bf16.mxu1 %v24826_v28  ;;  %v24897_v28 = vld [vmem:[#allocation2 + $0xcd4] ss:$68 sps:$4 sm:$0xff]  }
 0xeac   :  { %13700 = vmatprep.mubr.bf16.mxu0 %v24897_v28  ;;  %v24859_v28 = vld [vmem:[#allocation2 + $0x11bc] ss:$68 sps:$4 sm:$0xff]  }
 0xeb2   :  { %15893 = vmatmul.mubr.bf16.gmra.mrb[244].mxu1 %v24828_v46  ;;  %13701 = vmatmul.mubr.bf16.gmra.mrb[60].mxu0 %v24895_v6  ;;  %v24840_v46 = vld [vmem:[#allocation2 + $0xe00] ss:$68 sps:$4 sm:$0xff]   ;;  %v24858_v6 = vld [vmem:[#allocation2 + $0x1130] ss:$68 sps:$4 sm:$0xff]  }
 0xeb3   :  { %15900 = vmatprep.mubr.bf16.mxu1 %v24829_v1  ;;  %v24841_v1 = vld [vmem:[#allocation2 + $0xe8c] ss:$68 sps:$4 sm:$0xff]   ;;  %13708 = vmatprep.mubr.bf16.mxu0 %v24903_v25 }
 0xeb4   :  { %v24865_v25 = vld [vmem:[#allocation2 + $0x12cc] ss:$68 sps:$4 sm:$0xff]  }
 0xeba   :  { %15901 = vmatmul.mubr.bf16.gmra.mrb[248].mxu1 %v24831_v63  ;;  %13709 = vmatmul.mubr.bf16.gmra.mrb[64].mxu0 %v24901_v35  ;;  %v24843_v63 = vld [vmem:[#allocation2 + $0xe88] ss:$68 sps:$4 sm:$0xff]   ;;  %v24864_v35 = vld [vmem:[#allocation2 + $0x1240] ss:$68 sps:$4 sm:$0xff]  }
 0xebb   :  { %15908 = vmatprep.mubr.bf16.mxu1 %v24832_v55  ;;  %v24844_v55 = vld [vmem:[#allocation2 + $0xf14] ss:$68 sps:$4 sm:$0xff]  }
 0xec2   :  { %15909 = vmatmul.mubr.bf16.gmra.mrb[252].mxu1 %v24834_v12  ;;  %v24849_v12 = vld [vmem:[#allocation2 + $0xf98] ss:$68 sps:$4 sm:$0xff]  }
 0xec3   :  { %15916 = vmatprep.mubr.bf16.mxu1 %v24837_v9  ;;  %v24850_v9 = vld [vmem:[#allocation2 + $0x1024] ss:$68 sps:$4 sm:$0xff]  }
 0xeca   :  { %15917 = vmatmul.mubr.bf16.gmra.mrb[148].mxu1 %v24835_v30  ;;  %v24855_v30 = vld [vmem:[#allocation2 + $0x10a8] ss:$68 sps:$4 sm:$0xff]  }
 0xecb   :  { %15924 = vmatprep.mubr.bf16.mxu1 %v24838_v61  ;;  %v24856_v61 = vld [vmem:[#allocation2 + $0x1134] ss:$68 sps:$4 sm:$0xff]  }
 0xed2   :  { %15925 = vmatmul.mubr.bf16.gmra.mrb[0].mxu1 %v24840_v46  ;;  %v24861_v46 = vld [vmem:[#allocation2 + $0x11b8] ss:$68 sps:$4 sm:$0xff]  }
 0xed3   :  { %15932 = vmatprep.mubr.bf16.mxu1 %v24841_v1  ;;  %v24862_v1 = vld [vmem:[#allocation2 + $0x1244] ss:$68 sps:$4 sm:$0xff]  }
 0xeda   :  { %15933 = vmatmul.mubr.bf16.gmra.mrb[4].mxu1 %v24843_v63  ;;  %v24867_v63 = vld [vmem:[#allocation2 + $0x12c8] ss:$68 sps:$4 sm:$0xff]  }
 0xedb   :  { %15940 = vmatprep.mubr.bf16.mxu1 %v24844_v55  ;;  %v24870_v55 = vld [vmem:[#allocation2 + $0x1354] ss:$68 sps:$4 sm:$0xff]  }
 0xee2   :  { %15941 = vmatmul.mubr.bf16.gmra.mrb[8].mxu1 %v24846_v62  ;;  %v24868_v62 = vld [vmem:[#allocation2 + $0x1350] ss:$68 sps:$4 sm:$0xff]  }
 0xee3   :  { %15948 = vmatprep.mubr.bf16.mxu1 %v24847_v10  ;;  %v24871_v10 = vld [vmem:[#allocation2 + $0x13dc] ss:$68 sps:$4 sm:$0xff]  }
 0xeea   :  { %15949 = vmatmul.mubr.bf16.gmra.mrb[12].mxu1 %v24849_v12  ;;  %v24873_v12 = vld [vmem:[#allocation2 + $0x13d8] ss:$68 sps:$4 sm:$0xff]  }
 0xeeb   :  { %15956 = vmatprep.mubr.bf16.mxu1 %v24850_v9  ;;  %v24874_v9 = vld [vmem:[#allocation2 + $0x1464] ss:$68 sps:$4 sm:$0xff]  }
 0xef2   :  { %15957 = vmatmul.mubr.bf16.gmra.mrb[16].mxu1 %v24852_v21  ;;  %v24876_v21 = vld [vmem:[#allocation2 + $0x1460] ss:$68 sps:$4 sm:$0xff]  }
 0xef3   :  { %15964 = vmatprep.mubr.bf16.mxu1 %v24853_v31  ;;  %v24880_v31 = vld [vmem:[#allocation2 + $0x14ec] ss:$68 sps:$4 sm:$0xff]  }
 0xefa   :  { %15965 = vmatmul.mubr.bf16.gmra.mrb[20].mxu1 %v24855_v30  ;;  %v24882_v30 = vld [vmem:[#allocation2 + $0x14e8] ss:$68 sps:$4 sm:$0xff]  }
 0xefb   :  { %15972 = vmatprep.mubr.bf16.mxu1 %v24856_v61  ;;  %v24886_v61 = vld [vmem:[#allocation2 + $0x1574] ss:$68 sps:$4 sm:$0xff]  }
 0xf02   :  { %15973 = vmatmul.mubr.bf16.gmra.mrb[24].mxu1 %v24858_v6  ;;  %v24888_v6 = vld [vmem:[#allocation2 + $0x1570] ss:$68 sps:$4 sm:$0xff]  }
 0xf03   :  { %15980 = vmatprep.mubr.bf16.mxu1 %v24859_v28  ;;  %v24892_v28 = vld [vmem:[#allocation2 + $0x15fc] ss:$68 sps:$4 sm:$0xff]  }
 0xf0a   :  { %15981 = vmatmul.mubr.bf16.gmra.mrb[28].mxu1 %v24861_v46  ;;  %v24894_v46 = vld [vmem:[#allocation2 + $0x15f8] ss:$68 sps:$4 sm:$0xff]  }
 0xf0b   :  { %15988 = vmatprep.mubr.bf16.mxu1 %v24862_v1  ;;  %v24898_v1 = vld [vmem:[#allocation2 + $0x1684] ss:$68 sps:$4 sm:$0xff]  }
 0xf12   :  { %15989 = vmatmul.mubr.bf16.gmra.mrb[32].mxu1 %v24864_v35  ;;  %v24900_v35 = vld [vmem:[#allocation2 + $0x1680] ss:$68 sps:$4 sm:$0xff]  }
 0xf13   :  { %15996 = vmatprep.mubr.bf16.mxu1 %v24865_v25  ;;  %v24904_v25 = vld [vmem:[#allocation2 + $0x170c] ss:$68 sps:$4 sm:$0xff]  }
 0xf1a   :  { %15997 = vmatmul.mubr.bf16.gmra.mrb[36].mxu1 %v24867_v63  ;;  %v24906_v63 = vld [vmem:[#allocation2 + $0x1708] ss:$68 sps:$4 sm:$0xff]  }
 0xf1b   :  { %16004 = vmatprep.mubr.bf16.mxu1 %v24870_v55  ;;  %v24907_v55 = vld [vmem:[#allocation2 + $0x1794] ss:$68 sps:$4 sm:$0xff]  }
 0xf22   :  { %16005 = vmatmul.mubr.bf16.gmra.mrb[192].mxu1 %v24868_v62  ;;  %v24909_v62 = vld [vmem:[#allocation2 + $0x1790] ss:$68 sps:$4 sm:$0xff]  }
 0xf23   :  { %16012 = vmatprep.mubr.bf16.mxu1 %v24871_v10  ;;  %v24910_v10 = vld [vmem:[#allocation2 + $0x181c] ss:$68 sps:$4 sm:$0xff]  }
 0xf2a   :  { %16013 = vmatmul.mubr.bf16.gmra.mrb[44].mxu1 %v24873_v12  ;;  %v24912_v12 = vld [vmem:[#allocation2 + $0x1818] ss:$68 sps:$4 sm:$0xff]  }
 0xf2b   :  { %16020 = vmatprep.mubr.bf16.mxu1 %v24874_v9  ;;  %v24913_v9 = vld [vmem:[#allocation2 + $0x18a4] ss:$68 sps:$4 sm:$0xff]  }
 0xf32   :  { %16021 = vmatmul.mubr.bf16.gmra.mrb[48].mxu1 %v24876_v21  ;;  %v24915_v21 = vld [vmem:[#allocation2 + $0x18a0] ss:$68 sps:$4 sm:$0xff]  }
 0xf33   :  { %16028 = vmatprep.mubr.bf16.mxu1 %v24880_v31  ;;  %v24918_v31 = vld [vmem:[#allocation2 + $0x192c] ss:$68 sps:$4 sm:$0xff]  }
 0xf3a   :  { %16029 = vmatmul.mubr.bf16.gmra.mrb[52].mxu1 %v24882_v30  ;;  %v24916_v30 = vld [vmem:[#allocation2 + $0x1928] ss:$68 sps:$4 sm:$0xff]  }
 0xf3b   :  { %16036 = vmatprep.mubr.bf16.mxu1 %v24886_v61  ;;  %v24919_v61 = vld [vmem:[#allocation2 + $0x19b4] ss:$68 sps:$4 sm:$0xff]  }
 0xf42   :  { %16037 = vmatmul.mubr.bf16.gmra.mrb[56].mxu1 %v24888_v6  ;;  %v24921_v6 = vld [vmem:[#allocation2 + $0x19b0] ss:$68 sps:$4 sm:$0xff]  }
 0xf43   :  { %16044 = vmatprep.mubr.bf16.mxu1 %v24892_v28  ;;  %v24922_v28 = vld [vmem:[#allocation2 + $0x1a3c] ss:$68 sps:$4 sm:$0xff]  }
 0xf4a   :  { %16045 = vmatmul.mubr.bf16.gmra.mrb[60].mxu1 %v24894_v46  ;;  %v24924_v46 = vld [vmem:[#allocation2 + $0x1a38] ss:$68 sps:$4 sm:$0xff]  }
 0xf4b   :  { %16052 = vmatprep.mubr.bf16.mxu1 %v24898_v1  ;;  %v24925_v1 = vld [vmem:[#allocation2 + $0x1ac4] ss:$68 sps:$4 sm:$0xff]  }
 0xf52   :  { %16053 = vmatmul.mubr.bf16.gmra.mrb[64].mxu1 %v24900_v35 }
 0xf53   :  { %16060 = vmatprep.mubr.bf16.mxu1 %v24904_v25 }
 0xf5a   :  { %16061 = vmatmul.mubr.bf16.gmra.mrb[68].mxu1 %v24906_v63 }
 0xf5b   :  { %16068 = vmatprep.mubr.bf16.mxu1 %v24907_v55  ;;  %v24927_v55 = vld [vmem:[#allocation2 + $0x1ac0] ss:$68 sps:$4 sm:$0xff]  }
 0xf62   :  { %16069 = vmatmul.mubr.bf16.gmra.mrb[72].mxu1 %v24909_v62 }
 0xf63   :  { %16076 = vmatprep.mubr.bf16.mxu1 %v24910_v10  ;;  %v24928_v10 = vld [vmem:[#allocation2 + $0x1b4c] ss:$68 sps:$4 sm:$0xff]  }
 0xf68   :  { %v28062_v35 = vpop.f32.mrb[48].mxu0 }
 0xf69   :  { %v13680_v25 = vpop.f32.mrb[49].mxu0 }
 0xf6a   :  { %16077 = vmatmul.mubr.bf16.gmra.mrb[76].mxu1 %v24912_v12  ;;  %v28064_v63 = vpop.f32.mrb[50].mxu0  ;;  %v24933_v25 = vld [vmem:[#allocation2 + $0x1bd0] ss:$68 sps:$4 sm:$0xff]  }
 0xf6b   :  { %16084 = vmatprep.mubr.bf16.mxu1 %v24913_v9  ;;  %v13683_v62 = vpop.f32.mrb[51].mxu0 }
 0xf6c   :  { %v24934_v62 = vld [vmem:[#allocation2 + $0x1c5c] ss:$68 sps:$4 sm:$0xff]  }
 0xf72   :  { %16085 = vmatmul.mubr.bf16.gmra.mrb[80].mxu1 %v24915_v21 }
 0xf73   :  { %16092 = vmatprep.mubr.bf16.mxu1 %v24918_v31 }
 0xf75   :  { %v28066_v12 = vpop.f32.mrb[52].mxu0 }
 0xf76   :  { %v13688_v9 = vpop.f32.mrb[53].mxu0 }
 0xf77   :  { %v28068_v21 = vpop.f32.mrb[54].mxu0 }
 0xf78   :  { %v13691_v31 = vpop.f32.mrb[55].mxu0 }
 0xf7a   :  { %16093 = vmatmul.mubr.bf16.gmra.mrb[236].mxu1 %v24916_v30  ;;  %v24930_v30 = vld [vmem:[#allocation2 + $0x1b48] ss:$68 sps:$4 sm:$0xff]  }
 0xf7b   :  { %16100 = vmatprep.mubr.bf16.mxu1 %v24919_v61  ;;  %v24931_v61 = vld [vmem:[#allocation2 + $0x1bd4] ss:$68 sps:$4 sm:$0xff]  }
 0xf82   :  { %16101 = vmatmul.mubr.bf16.gmra.mrb[88].mxu1 %v24921_v6  ;;  %v28070_v6 = vpop.f32.mrb[56].mxu0 }
 0xf83   :  { %16108 = vmatprep.mubr.bf16.mxu1 %v24922_v28  ;;  %28941 = vst [vmem:[#allocation98_spill] sm:$0xff] %v28070_v6  ;;  %v13696_v28 = vpop.f32.mrb[57].mxu0  ;;  %v24940_v6 = vld [vmem:[#allocation2 + $0x1d6c] ss:$68 sps:$4 sm:$0xff]  }
 0xf8a   :  { %16109 = vmatmul.mubr.bf16.gmra.mrb[92].mxu1 %v24924_v46  ;;  %v28072_v46 = vpop.f32.mrb[58].mxu0 }
 0xf8b   :  { %16116 = vmatprep.mubr.bf16.mxu1 %v24925_v1  ;;  %28942 = vst [vmem:[#allocation99_spill] sm:$0xff] %v28072_v46  ;;  %v13699_v1 = vpop.f32.mrb[59].mxu0  ;;  %v24939_v46 = vld [vmem:[#allocation2 + $0x1ce0] ss:$68 sps:$4 sm:$0xff]  }
 0xf92   :  { %16117 = vmatmul.mubr.bf16.gmra.mrb[96].mxu1 %v24927_v55  ;;  %v28074_v55 = vpop.f32.mrb[60].mxu0 }
 0xf93   :  { %16124 = vmatprep.mubr.bf16.mxu1 %v24928_v10  ;;  %v13704_v10 = vpop.f32.mrb[61].mxu0 }
 0xf94   :  { %v28076_v9 = vpop.f32.mrb[62].mxu0  ;;  %v24945_v10 = vld [vmem:[#allocation2 + $0x1df0] ss:$68 sps:$4 sm:$0xff]  }
 0xf95   :  { %28943 = vst [vmem:[#allocation100_spill] sm:$0xff] %v28076_v9  ;;  %v13707_v31 = vpop.f32.mrb[63].mxu0  ;;  %v24951_v9 = vld [vmem:[#allocation2 + $0x1f04] ss:$68 sps:$4 sm:$0xff]  }
 0xf96   :  { %v24946_v31 = vld [vmem:[#allocation2 + $0x1e7c] ss:$68 sps:$4 sm:$0xff]  }
 0xf9a   :  { %16125 = vmatmul.mubr.bf16.gmra.mrb[100].mxu1 %v24930_v30  ;;  %v28078_v30 = vpop.f32.mrb[64].mxu0 }
 0xf9b   :  { %16132 = vmatprep.mubr.bf16.mxu1 %v24931_v61  ;;  %28944 = vst [vmem:[#allocation101_spill] sm:$0xff] %v28078_v30  ;;  %v13712_v61 = vpop.f32.mrb[65].mxu0 }
 0xf9c   :  { %v28080_v28 = vpop.f32.mrb[66].mxu0 }
 0xf9d   :  { %28945 = vst [vmem:[#allocation102_spill] sm:$0xff] %v28080_v28  ;;  %v13715_v1 = vpop.f32.mrb[67].mxu0  ;;  %v24949_v28 = vld [vmem:[#allocation2 + $0x1f00] ss:$68 sps:$4 sm:$0xff]  }
 0xfa2   :  { %16133 = vmatmul.mubr.bf16.gmra.mrb[104].mxu1 %v24933_v25  ;;  %v24942_v25 = vld [vmem:[#allocation2 + $0x1d68] ss:$68 sps:$4 sm:$0xff]  }
 0xfa3   :  { %16140 = vmatprep.mubr.bf16.mxu1 %v24934_v62  ;;  %v24943_v62 = vld [vmem:[#allocation2 + $0x1df4] ss:$68 sps:$4 sm:$0xff]  }
 0xfaa   :  { %16141 = vmatmul.mubr.bf16.gmra.mrb[108].mxu1 %v24936_v41  ;;  %v24948_v41 = vld [vmem:[#allocation2 + $0x1e78] ss:$68 sps:$4 sm:$0xff]  }
 0xfab   :  { %16148 = vmatprep.mubr.bf16.mxu1 %v24937_v45 }
 0xfb2   :  { %16149 = vmatmul.mubr.bf16.gmra.mrb[112].mxu1 %v24939_v46 }
 0xfb3   :  { %16156 = vmatprep.mubr.bf16.mxu1 %v24940_v6  ;;  %v24952_v6 = vld [vmem:[#allocation2 + $0x1f8c] ss:$68 sps:$4 sm:$0xff]  }
 0xfba   :  { %16157 = vmatmul.mubr.bf16.gmra.mrb[116].mxu1 %v24942_v25 }
 0xfbb   :  { %16164 = vmatprep.mubr.bf16.mxu1 %v24943_v62  ;;  %v24954_v62 = vld [vmem:[#allocation2 + $0x1f88] ss:$68 sps:$4 sm:$0xff]  }
 0xfc2   :  { %16165 = vmatmul.mubr.bf16.gmra.mrb[120].mxu1 %v24945_v10  ;;  %v24955_v10 = vld [vmem:[#allocation2 + $0x2014] ss:$68 sps:$4 sm:$0xff]  }
 0xfc3   :  { %16172 = vmatprep.mubr.bf16.mxu1 %v24946_v31  ;;  %v24957_v31 = vld [vmem:[#allocation2 + $0x2010] ss:$68 sps:$4 sm:$0xff]  }
 0xfca   :  { %16173 = vmatmul.mubr.bf16.gmra.mrb[124].mxu1 %v24948_v41  ;;  %v24960_v41 = vld [vmem:[#allocation2 + $0x2098] ss:$68 sps:$4 sm:$0xff]  }
 0xfcb   :  { %16180 = vmatprep.mubr.bf16.mxu1 %v24951_v9  ;;  %v24958_v9 = vld [vmem:[#allocation2 + $0x209c] ss:$68 sps:$4 sm:$0xff]  }
 0xfcd   :  { %v15966_v45 = vpop.f32.mrb[20].mxu1 }
 0xfce   :  { %v15968_v61 = vpop.f32.mrb[21].mxu1  ;;  %v28083_v1 = vadd.f32 %v15966_v45, %v27782_v17  ;;  %v24963_v17 = vld [vmem:[#allocation2 + $0x2120] ss:$68 sps:$4 sm:$0xff]   ;;  %v24966_v45 = vld [vmem:[#allocation2 + $0x21ac] ss:$68 sps:$4 sm:$0xff]  }
 0xfcf   :  { %v15969_v46 = vpop.f32.mrb[22].mxu1  ;;  %v24961_v61 = vld [vmem:[#allocation2 + $0x2124] ss:$68 sps:$4 sm:$0xff]  }
 0xfd0   :  { %v15971_v30 = vpop.f32.mrb[23].mxu1  ;;  %v28086_v25 = vadd.f32 %v15969_v46, %v27785_v26  ;;  %v6672_v26 = vld [vmem:[#allocation2 + $0x2230] sm:$0xff] }
 0xfd1   :  { %v24964_v30 = vld [vmem:[#allocation2 + $0x21a8] ss:$68 sps:$4 sm:$0xff]   ;;  %v19540_v46 = vcombine.low %v6672_v26, %v6672_v26 }
 0xfd2   :  { %16181 = vmatmul.mubr.bf16.gmra.mrb[20].mxu1 %v24949_v28  ;;  %v19541_v28 = vcombine.high %v6672_v26, %v6672_v26  ;;  %v24980_v26 = vld [vmem:[#allocation2 + $0x1d0] ss:$68 sps:$4 sm:$0xff]  }
 0xfd3   :  { %16188 = vmatprep.mubr.bf16.mxu1 %v24952_v6  ;;  %v24971_v6 = vld [vmem:[#allocation2 + $0x3c] ss:$68 sps:$4 sm:$0xff]  }
 0xfda   :  { %16189 = vmatmul.mubr.bf16.gmra.mrb[132].mxu1 %v24954_v62  ;;  %v5384_v62 = vmax.f32 %v27651_v2, 0.0  ;;  %v24981_v2 = vld [vmem:[#allocation2 + $0x25c] ss:$68 sps:$4 sm:$0xff]  }
 0xfdb   :  { %16196 = vmatprep.mubr.bf16.mxu1 %v24955_v10  ;;  %v24969_v10 = vld [vmem:[#allocation2 + $0x38] ss:$68 sps:$4 sm:$0xff]  }
 0xfe2   :  { %16197 = vmatmul.mubr.bf16.gmra.mrb[136].mxu1 %v24957_v31  ;;  %v5513_v31 = vpack.c.bf16 %v5384_v62, %v5384_v62  ;;  %v24987_v62 = vld [vmem:[#allocation2 + $0x36c] ss:$68 sps:$4 sm:$0xff]  }
 0xfe3   :  { %16204 = vmatprep.mubr.bf16.mxu1 %v24958_v9  ;;  %v24972_v9 = vld [vmem:[#allocation2 + $0xc4] ss:$68 sps:$4 sm:$0xff]  }
 0xfea   :  { %16205 = vmatmul.mubr.bf16.gmra.mrb[140].mxu1 %v24960_v41  ;;  %v12370_v41 = vsel %vm2996_vm0, %v5513_v31, 0  ;;  %v24990_v31 = vld [vmem:[#allocation2 + $0x3f4] ss:$68 sps:$4 sm:$0xff]  }
 0xfeb   :  { %16212 = vmatprep.mubr.bf16.mxu1 %v24961_v61  ;;  %v24974_v61 = vld [vmem:[#allocation2 + $0xc0] ss:$68 sps:$4 sm:$0xff]  }
 0xff2   :  { %16213 = vmatmul.mubr.bf16.gmra.mrb[144].mxu1 %v24963_v17  ;;  %v24975_v17 = vld [vmem:[#allocation2 + $0x14c] ss:$68 sps:$4 sm:$0xff]  }
 0xff3   :  { %16220 = vmatprep.mubr.bf16.mxu1 %v24966_v45  ;;  %v24977_v45 = vld [vmem:[#allocation2 + $0x148] ss:$68 sps:$4 sm:$0xff]  }
 0xffa   :  { %16221 = vmatmul.mubr.bf16.gmra.mrb[40].mxu1 %v24964_v30  ;;  %v24978_v30 = vld [vmem:[#allocation2 + $0x1d4] ss:$68 sps:$4 sm:$0xff]  }
 0xffb   :  { %16228 = vmatprep.mubr.bf16.mxu1 %v19541_v28  ;;  %v24983_v28 = vld [vmem:[#allocation2 + $0x258] ss:$68 sps:$4 sm:$0xff]  }
0x1002   :  { %16229 = vmatmul.mubr.bf16.gmra.mrb[152].mxu1 %v19540_v46  ;;  %v24984_v46 = vld [vmem:[#allocation2 + $0x2e4] ss:$68 sps:$4 sm:$0xff]  }
0x1003   :  { %16268 = vmatprep.mubr.bf16.mxu1 %v24971_v6  ;;  %v24986_v6 = vld [vmem:[#allocation2 + $0x2e0] ss:$68 sps:$4 sm:$0xff]  }
0x100a   :  { %16269 = vmatmul.mubr.bf16.vlgmr.msra.gmra.mrb[156].mxu1 %v24969_v10  ;;  %v24989_v10 = vld [vmem:[#allocation2 + $0x368] ss:$68 sps:$4 sm:$0xff]  }
0x100b   :  { %20460 = vmatpush3.bf16.msra.mxu1 %v12370_v41  ;;  %16276 = vmatprep.mubr.bf16.mxu1 %v24972_v9  ;;  %v24992_v9 = vld [vmem:[#allocation2 + $0x3f0] ss:$68 sps:$4 sm:$0xff]   ;;  %v24993_v41 = vld [vmem:[#allocation2 + $0x47c] ss:$68 sps:$4 sm:$0xff]  }
0x1012   :  { %16277 = vmatmul.mubr.bf16.gmra.mrb[160].mxu1 %v24974_v61  ;;  %v24995_v61 = vld [vmem:[#allocation2 + $0x478] ss:$68 sps:$4 sm:$0xff]  }
0x1013   :  { %16284 = vmatprep.mubr.bf16.mxu1 %v24975_v17  ;;  %v24998_v17 = vld [vmem:[#allocation2 + $0x504] ss:$68 sps:$4 sm:$0xff]  }
0x101a   :  { %16285 = vmatmul.mubr.bf16.gmra.mrb[164].mxu1 %v24977_v45  ;;  %v24996_v45 = vld [vmem:[#allocation2 + $0x500] ss:$68 sps:$4 sm:$0xff]  }
0x101b   :  { %16292 = vmatprep.mubr.bf16.mxu1 %v24978_v30  ;;  %v24999_v30 = vld [vmem:[#allocation2 + $0x58c] ss:$68 sps:$4 sm:$0xff]  }
0x1022   :  { %16293 = vmatmul.mubr.bf16.gmra.mrb[168].mxu1 %v24980_v26  ;;  %v25001_v26 = vld [vmem:[#allocation2 + $0x588] ss:$68 sps:$4 sm:$0xff]  }
0x1023   :  { %16300 = vmatprep.mubr.bf16.mxu1 %v24981_v2  ;;  %v25002_v2 = vld [vmem:[#allocation2 + $0x614] ss:$68 sps:$4 sm:$0xff]  }
0x102a   :  { %16301 = vmatmul.mubr.bf16.gmra.mrb[172].mxu1 %v24983_v28  ;;  %v25004_v28 = vld [vmem:[#allocation2 + $0x610] ss:$68 sps:$4 sm:$0xff]  }
0x102b   :  { %16308 = vmatprep.mubr.bf16.mxu1 %v24984_v46  ;;  %v25005_v46 = vld [vmem:[#allocation2 + $0x69c] ss:$68 sps:$4 sm:$0xff]  }
0x1032   :  { %16309 = vmatmul.mubr.bf16.gmra.mrb[176].mxu1 %v24986_v6  ;;  %v25007_v6 = vld [vmem:[#allocation2 + $0x698] ss:$68 sps:$4 sm:$0xff]  }
0x1033   :  { %16316 = vmatprep.mubr.bf16.mxu1 %v24987_v62  ;;  %v25008_v62 = vld [vmem:[#allocation2 + $0x724] ss:$68 sps:$4 sm:$0xff]  }
0x103a   :  { %16317 = vmatmul.mubr.bf16.gmra.mrb[180].mxu1 %v24989_v10  ;;  %v25010_v10 = vld [vmem:[#allocation2 + $0x720] ss:$68 sps:$4 sm:$0xff]  }
0x103b   :  { %16324 = vmatprep.mubr.bf16.mxu1 %v24990_v31  ;;  %v25011_v31 = vld [vmem:[#allocation2 + $0x7ac] ss:$68 sps:$4 sm:$0xff]  }
0x1042   :  { %16325 = vmatmul.mubr.bf16.gmra.mrb[184].mxu1 %v24992_v9  ;;  %v25013_v9 = vld [vmem:[#allocation2 + $0x7a8] ss:$68 sps:$4 sm:$0xff]  }
0x1043   :  { %16332 = vmatprep.mubr.bf16.mxu1 %v24993_v41  ;;  %v25014_v41 = vld [vmem:[#allocation2 + $0x834] ss:$68 sps:$4 sm:$0xff]  }
0x104a   :  { %16333 = vmatmul.mubr.bf16.gmra.mrb[188].mxu1 %v24995_v61  ;;  %v25016_v61 = vld [vmem:[#allocation2 + $0x830] ss:$68 sps:$4 sm:$0xff]  }
0x104b   :  { %16340 = vmatprep.mubr.bf16.mxu1 %v24998_v17  ;;  %v25017_v17 = vld [vmem:[#allocation2 + $0x8bc] ss:$68 sps:$4 sm:$0xff]  }
0x1052   :  { %16341 = vmatmul.mubr.bf16.gmra.mrb[84].mxu1 %v24996_v45  ;;  %v25019_v45 = vld [vmem:[#allocation2 + $0x8b8] ss:$68 sps:$4 sm:$0xff]  }
0x1053   :  { %16348 = vmatprep.mubr.bf16.mxu1 %v24999_v30  ;;  %v25020_v30 = vld [vmem:[#allocation2 + $0x944] ss:$68 sps:$4 sm:$0xff]  }
0x105a   :  { %16349 = vmatmul.mubr.bf16.gmra.mrb[196].mxu1 %v25001_v26  ;;  %v25022_v26 = vld [vmem:[#allocation2 + $0x940] ss:$68 sps:$4 sm:$0xff]  }
0x105b   :  { %16356 = vmatprep.mubr.bf16.mxu1 %v25002_v2  ;;  %v25023_v2 = vld [vmem:[#allocation2 + $0x9cc] ss:$68 sps:$4 sm:$0xff]  }
0x1062   :  { %16357 = vmatmul.mubr.bf16.gmra.mrb[200].mxu1 %v25004_v28  ;;  %v25025_v28 = vld [vmem:[#allocation2 + $0x9c8] ss:$68 sps:$4 sm:$0xff]  }
0x1063   :  { %16364 = vmatprep.mubr.bf16.mxu1 %v25005_v46  ;;  %v25026_v46 = vld [vmem:[#allocation2 + $0xa54] ss:$68 sps:$4 sm:$0xff]  }
0x106a   :  { %16365 = vmatmul.mubr.bf16.gmra.mrb[204].mxu1 %v25007_v6  ;;  %v25028_v6 = vld [vmem:[#allocation2 + $0xa50] ss:$68 sps:$4 sm:$0xff]  }
0x106b   :  { %16372 = vmatprep.mubr.bf16.mxu1 %v25008_v62  ;;  %v25031_v62 = vld [vmem:[#allocation2 + $0xadc] ss:$68 sps:$4 sm:$0xff]  }
0x1072   :  { %16373 = vmatmul.mubr.bf16.gmra.mrb[208].mxu1 %v25010_v10  ;;  %v25029_v10 = vld [vmem:[#allocation2 + $0xad8] ss:$68 sps:$4 sm:$0xff]  }
0x1073   :  { %16380 = vmatprep.mubr.bf16.mxu1 %v25011_v31  ;;  %v25032_v31 = vld [vmem:[#allocation2 + $0xb64] ss:$68 sps:$4 sm:$0xff]  }
0x107a   :  { %16381 = vmatmul.mubr.bf16.gmra.mrb[212].mxu1 %v25013_v9  ;;  %v25034_v9 = vld [vmem:[#allocation2 + $0xb60] ss:$68 sps:$4 sm:$0xff]  }
0x107b   :  { %16388 = vmatprep.mubr.bf16.mxu1 %v25014_v41  ;;  %v25035_v41 = vld [vmem:[#allocation2 + $0xbec] ss:$68 sps:$4 sm:$0xff]  }
0x1082   :  { %16389 = vmatmul.mubr.bf16.gmra.mrb[216].mxu1 %v25016_v61  ;;  %v25037_v61 = vld [vmem:[#allocation2 + $0xbe8] ss:$68 sps:$4 sm:$0xff]  }
0x1083   :  { %16396 = vmatprep.mubr.bf16.mxu1 %v25017_v17  ;;  %v25038_v17 = vld [vmem:[#allocation2 + $0xc74] ss:$68 sps:$4 sm:$0xff]  }
0x108a   :  { %16397 = vmatmul.mubr.bf16.gmra.mrb[220].mxu1 %v25019_v45  ;;  %v25040_v45 = vld [vmem:[#allocation2 + $0xc70] ss:$68 sps:$4 sm:$0xff]  }
0x108b   :  { %16404 = vmatprep.mubr.bf16.mxu1 %v25020_v30  ;;  %v25041_v30 = vld [vmem:[#allocation2 + $0xcfc] ss:$68 sps:$4 sm:$0xff]  }
0x1092   :  { %16405 = vmatmul.mubr.bf16.gmra.mrb[224].mxu1 %v25022_v26  ;;  %v25043_v26 = vld [vmem:[#allocation2 + $0xcf8] ss:$68 sps:$4 sm:$0xff]  }
0x1093   :  { %16412 = vmatprep.mubr.bf16.mxu1 %v25023_v2  ;;  %v25046_v2 = vld [vmem:[#allocation2 + $0xd84] ss:$68 sps:$4 sm:$0xff]  }
0x109a   :  { %16413 = vmatmul.mubr.bf16.gmra.mrb[228].mxu1 %v25025_v28  ;;  %v25044_v28 = vld [vmem:[#allocation2 + $0xd80] ss:$68 sps:$4 sm:$0xff]  }
0x109b   :  { %16420 = vmatprep.mubr.bf16.mxu1 %v25026_v46  ;;  %v25047_v46 = vld [vmem:[#allocation2 + $0xe0c] ss:$68 sps:$4 sm:$0xff]  }
0x10a2   :  { %16421 = vmatmul.mubr.bf16.gmra.mrb[232].mxu1 %v25028_v6  ;;  %v25049_v6 = vld [vmem:[#allocation2 + $0xe08] ss:$68 sps:$4 sm:$0xff]  }
0x10a3   :  { %16428 = vmatprep.mubr.bf16.mxu1 %v25031_v62  ;;  %v25050_v62 = vld [vmem:[#allocation2 + $0xe94] ss:$68 sps:$4 sm:$0xff]  }
0x10aa   :  { %16429 = vmatmul.mubr.bf16.gmra.mrb[128].mxu1 %v25029_v10  ;;  %v25052_v10 = vld [vmem:[#allocation2 + $0xe90] ss:$68 sps:$4 sm:$0xff]  }
0x10ab   :  { %16436 = vmatprep.mubr.bf16.mxu1 %v25032_v31  ;;  %v25053_v31 = vld [vmem:[#allocation2 + $0xf1c] ss:$68 sps:$4 sm:$0xff]  }
0x10b2   :  { %16437 = vmatmul.mubr.bf16.gmra.mrb[240].mxu1 %v25034_v9  ;;  %v25055_v9 = vld [vmem:[#allocation2 + $0xf18] ss:$68 sps:$4 sm:$0xff]  }
0x10b3   :  { %16444 = vmatprep.mubr.bf16.mxu1 %v25035_v41  ;;  %v25056_v41 = vld [vmem:[#allocation2 + $0xfa4] ss:$68 sps:$4 sm:$0xff]  }
0x10ba   :  { %16445 = vmatmul.mubr.bf16.gmra.mrb[244].mxu1 %v25037_v61  ;;  %v25058_v61 = vld [vmem:[#allocation2 + $0xfa0] ss:$68 sps:$4 sm:$0xff]  }
0x10bb   :  { %16452 = vmatprep.mubr.bf16.mxu1 %v25038_v17  ;;  %v25059_v17 = vld [vmem:[#allocation2 + $0x102c] ss:$68 sps:$4 sm:$0xff]  }
0x10c2   :  { %16453 = vmatmul.mubr.bf16.gmra.mrb[248].mxu1 %v25040_v45  ;;  %v25061_v45 = vld [vmem:[#allocation2 + $0x1028] ss:$68 sps:$4 sm:$0xff]  }
0x10c3   :  { %16460 = vmatprep.mubr.bf16.mxu1 %v25041_v30  ;;  %v25064_v30 = vld [vmem:[#allocation2 + $0x10b4] ss:$68 sps:$4 sm:$0xff]  }
0x10ca   :  { %16461 = vmatmul.mubr.bf16.gmra.mrb[252].mxu1 %v25043_v26 }
0x10cb   :  { %16468 = vmatprep.mubr.bf16.mxu1 %v25046_v2 }
0x10d2   :  { %16469 = vmatmul.mubr.bf16.gmra.mrb[148].mxu1 %v25044_v28  ;;  %v25062_v28 = vld [vmem:[#allocation2 + $0x10b0] ss:$68 sps:$4 sm:$0xff]  }
0x10d3   :  { %16476 = vmatprep.mubr.bf16.mxu1 %v25047_v46 }
0x10da   :  { %16477 = vmatmul.mubr.bf16.gmra.mrb[0].mxu1 %v25049_v6 }
0x10db   :  { %16484 = vmatprep.mubr.bf16.mxu1 %v25050_v62  ;;  %v25065_v62 = vld [vmem:[#allocation2 + $0x113c] ss:$68 sps:$4 sm:$0xff]  }
0x10e2   :  { %16485 = vmatmul.mubr.bf16.gmra.mrb[4].mxu1 %v25052_v10 }
0x10e3   :  { %16492 = vmatprep.mubr.bf16.mxu1 %v25053_v31 }
0x10ea   :  { %16493 = vmatmul.mubr.bf16.gmra.mrb[8].mxu1 %v25055_v9  ;;  %v25067_v9 = vld [vmem:[#allocation2 + $0x1138] ss:$68 sps:$4 sm:$0xff]  }
0x10eb   :  { %16500 = vmatprep.mubr.bf16.mxu1 %v25056_v41  ;;  %v25068_v41 = vld [vmem:[#allocation2 + $0x11c4] ss:$68 sps:$4 sm:$0xff]  }
0x10f2   :  { %16501 = vmatmul.mubr.bf16.gmra.mrb[12].mxu1 %v25058_v61  ;;  %v25070_v61 = vld [vmem:[#allocation2 + $0x11c0] ss:$68 sps:$4 sm:$0xff]  }
0x10f3   :  { %16508 = vmatprep.mubr.bf16.mxu1 %v25059_v17  ;;  %v25071_v17 = vld [vmem:[#allocation2 + $0x124c] ss:$68 sps:$4 sm:$0xff]  }
0x10fa   :  { %16509 = vmatmul.mubr.bf16.gmra.mrb[16].mxu1 %v25061_v45  ;;  %v25073_v45 = vld [vmem:[#allocation2 + $0x1248] ss:$68 sps:$4 sm:$0xff]  }
0x10fb   :  { %16516 = vmatprep.mubr.bf16.mxu1 %v25064_v30  ;;  %v25074_v30 = vld [vmem:[#allocation2 + $0x12d4] ss:$68 sps:$4 sm:$0xff]  }
0x10fd   :  { %v16302_v26 = vpop.f32.mrb[172].mxu1 }
0x10fe   :  { %v16304_v2 = vpop.f32.mrb[173].mxu1  ;;  %v28091_v46 = vadd.f32 %v16302_v26, %v27946_v22  ;;  %v25076_v22 = vld [vmem:[#allocation2 + $0x12d0] ss:$68 sps:$4 sm:$0xff]   ;;  %v25079_v26 = vld [vmem:[#allocation2 + $0x135c] ss:$68 sps:$4 sm:$0xff]  }
0x10ff   :  { %v16305_v6 = vpop.f32.mrb[174].mxu1  ;;  %v25080_v2 = vld [vmem:[#allocation2 + $0x13e4] ss:$68 sps:$4 sm:$0xff]  }
0x1100   :  { %v16307_v10 = vpop.f32.mrb[175].mxu1  ;;  %v28094_v31 = vadd.f32 %v16305_v6, %v27948_v57  ;;  %v25077_v57 = vld [vmem:[#allocation2 + $0x1358] ss:$68 sps:$4 sm:$0xff]   ;;  %v25083_v6 = vld [vmem:[#allocation2 + $0x146c] ss:$68 sps:$4 sm:$0xff]  }
0x1101   :  { %v25086_v10 = vld [vmem:[#allocation2 + $0x14f4] ss:$68 sps:$4 sm:$0xff]  }
0x1102   :  { %16517 = vmatmul.mubr.bf16.gmra.mrb[172].mxu1 %v25062_v28  ;;  %v25082_v28 = vld [vmem:[#allocation2 + $0x13e0] ss:$68 sps:$4 sm:$0xff]  }
0x1103   :  { %16524 = vmatprep.mubr.bf16.mxu1 %v25065_v62  ;;  %v25085_v62 = vld [vmem:[#allocation2 + $0x1468] ss:$68 sps:$4 sm:$0xff]  }
0x110a   :  { %16525 = vmatmul.mubr.bf16.gmra.mrb[24].mxu1 %v25067_v9  ;;  %v25088_v9 = vld [vmem:[#allocation2 + $0x14f0] ss:$68 sps:$4 sm:$0xff]  }
0x110b   :  { %16532 = vmatprep.mubr.bf16.mxu1 %v25068_v41  ;;  %v25089_v41 = vld [vmem:[#allocation2 + $0x157c] ss:$68 sps:$4 sm:$0xff]  }
0x1112   :  { %16533 = vmatmul.mubr.bf16.gmra.mrb[28].mxu1 %v25070_v61  ;;  %v25091_v61 = vld [vmem:[#allocation2 + $0x1578] ss:$68 sps:$4 sm:$0xff]  }
0x1113   :  { %16540 = vmatprep.mubr.bf16.mxu1 %v25071_v17  ;;  %v25092_v17 = vld [vmem:[#allocation2 + $0x1604] ss:$68 sps:$4 sm:$0xff]  }
0x111a   :  { %16541 = vmatmul.mubr.bf16.gmra.mrb[32].mxu1 %v25073_v45  ;;  %v25094_v45 = vld [vmem:[#allocation2 + $0x1600] ss:$68 sps:$4 sm:$0xff]  }
0x111b   :  { %16548 = vmatprep.mubr.bf16.mxu1 %v25074_v30  ;;  %v25095_v30 = vld [vmem:[#allocation2 + $0x168c] ss:$68 sps:$4 sm:$0xff]  }
0x1122   :  { %16549 = vmatmul.mubr.bf16.gmra.mrb[36].mxu1 %v25076_v22  ;;  %v25097_v22 = vld [vmem:[#allocation2 + $0x1688] ss:$68 sps:$4 sm:$0xff]  }
0x1123   :  { %16556 = vmatprep.mubr.bf16.mxu1 %v25079_v26  ;;  %v25098_v26 = vld [vmem:[#allocation2 + $0x1714] ss:$68 sps:$4 sm:$0xff]  }
0x112a   :  { %16557 = vmatmul.mubr.bf16.gmra.mrb[192].mxu1 %v25077_v57  ;;  %v25100_v57 = vld [vmem:[#allocation2 + $0x1710] ss:$68 sps:$4 sm:$0xff]  }
0x112b   :  { %16564 = vmatprep.mubr.bf16.mxu1 %v25080_v2  ;;  %v25101_v2 = vld [vmem:[#allocation2 + $0x179c] ss:$68 sps:$4 sm:$0xff]  }
0x1132   :  { %16565 = vmatmul.mubr.bf16.gmra.mrb[44].mxu1 %v25082_v28  ;;  %v25103_v28 = vld [vmem:[#allocation2 + $0x1798] ss:$68 sps:$4 sm:$0xff]  }
0x1133   :  { %16572 = vmatprep.mubr.bf16.mxu1 %v25083_v6  ;;  %v25104_v6 = vld [vmem:[#allocation2 + $0x1824] ss:$68 sps:$4 sm:$0xff]  }
0x113a   :  { %16573 = vmatmul.mubr.bf16.gmra.mrb[48].mxu1 %v25085_v62  ;;  %v25106_v62 = vld [vmem:[#allocation2 + $0x1820] ss:$68 sps:$4 sm:$0xff]  }
0x113b   :  { %16580 = vmatprep.mubr.bf16.mxu1 %v25086_v10  ;;  %v25107_v10 = vld [vmem:[#allocation2 + $0x18ac] ss:$68 sps:$4 sm:$0xff]  }
0x1142   :  { %16581 = vmatmul.mubr.bf16.gmra.mrb[52].mxu1 %v25088_v9  ;;  %v25109_v9 = vld [vmem:[#allocation2 + $0x18a8] ss:$68 sps:$4 sm:$0xff]  }
0x1143   :  { %16588 = vmatprep.mubr.bf16.mxu1 %v25089_v41  ;;  %v25112_v41 = vld [vmem:[#allocation2 + $0x1934] ss:$68 sps:$4 sm:$0xff]  }
0x114a   :  { %16589 = vmatmul.mubr.bf16.gmra.mrb[56].mxu1 %v25091_v61  ;;  %v25110_v61 = vld [vmem:[#allocation2 + $0x1930] ss:$68 sps:$4 sm:$0xff]  }
0x114b   :  { %16596 = vmatprep.mubr.bf16.mxu1 %v25092_v17  ;;  %v25113_v17 = vld [vmem:[#allocation2 + $0x19bc] ss:$68 sps:$4 sm:$0xff]  }
0x1152   :  { %16597 = vmatmul.mubr.bf16.gmra.mrb[60].mxu1 %v25094_v45  ;;  %v25115_v45 = vld [vmem:[#allocation2 + $0x19b8] ss:$68 sps:$4 sm:$0xff]  }
0x1153   :  { %16604 = vmatprep.mubr.bf16.mxu1 %v25095_v30  ;;  %v25116_v30 = vld [vmem:[#allocation2 + $0x1a44] ss:$68 sps:$4 sm:$0xff]  }
0x115a   :  { %16605 = vmatmul.mubr.bf16.gmra.mrb[64].mxu1 %v25097_v22  ;;  %v25118_v22 = vld [vmem:[#allocation2 + $0x1a40] ss:$68 sps:$4 sm:$0xff]  }
0x115b   :  { %16612 = vmatprep.mubr.bf16.mxu1 %v25098_v26  ;;  %v25119_v26 = vld [vmem:[#allocation2 + $0x1acc] ss:$68 sps:$4 sm:$0xff]  }
0x1162   :  { %16613 = vmatmul.mubr.bf16.gmra.mrb[68].mxu1 %v25100_v57  ;;  %v25121_v57 = vld [vmem:[#allocation2 + $0x1ac8] ss:$68 sps:$4 sm:$0xff]  }
0x1163   :  { %16620 = vmatprep.mubr.bf16.mxu1 %v25101_v2  ;;  %v25122_v2 = vld [vmem:[#allocation2 + $0x1b54] ss:$68 sps:$4 sm:$0xff]  }
0x116a   :  { %16621 = vmatmul.mubr.bf16.gmra.mrb[72].mxu1 %v25103_v28  ;;  %v25124_v28 = vld [vmem:[#allocation2 + $0x1b50] ss:$68 sps:$4 sm:$0xff]  }
0x116b   :  { %16628 = vmatprep.mubr.bf16.mxu1 %v25104_v6  ;;  %v25125_v6 = vld [vmem:[#allocation2 + $0x1bdc] ss:$68 sps:$4 sm:$0xff]  }
0x1172   :  { %16629 = vmatmul.mubr.bf16.gmra.mrb[76].mxu1 %v25106_v62  ;;  %v25127_v62 = vld [vmem:[#allocation2 + $0x1bd8] ss:$68 sps:$4 sm:$0xff]  }
0x1173   :  { %16636 = vmatprep.mubr.bf16.mxu1 %v25107_v10  ;;  %v25128_v10 = vld [vmem:[#allocation2 + $0x1c64] ss:$68 sps:$4 sm:$0xff]  }
0x117a   :  { %16637 = vmatmul.mubr.bf16.gmra.mrb[80].mxu1 %v25109_v9  ;;  %v25130_v9 = vld [vmem:[#allocation2 + $0x1c60] ss:$68 sps:$4 sm:$0xff]  }
0x117b   :  { %16644 = vmatprep.mubr.bf16.mxu1 %v25112_v41  ;;  %v25131_v41 = vld [vmem:[#allocation2 + $0x1cec] ss:$68 sps:$4 sm:$0xff]  }
0x1182   :  { %16645 = vmatmul.mubr.bf16.gmra.mrb[236].mxu1 %v25110_v61  ;;  %v25133_v61 = vld [vmem:[#allocation2 + $0x1ce8] ss:$68 sps:$4 sm:$0xff]  }
0x1183   :  { %16652 = vmatprep.mubr.bf16.mxu1 %v25113_v17  ;;  %v25134_v17 = vld [vmem:[#allocation2 + $0x1d74] ss:$68 sps:$4 sm:$0xff]  }
0x118a   :  { %16653 = vmatmul.mubr.bf16.gmra.mrb[88].mxu1 %v25115_v45  ;;  %v25136_v45 = vld [vmem:[#allocation2 + $0x1d70] ss:$68 sps:$4 sm:$0xff]  }
0x118b   :  { %16660 = vmatprep.mubr.bf16.mxu1 %v25116_v30  ;;  %v25137_v30 = vld [vmem:[#allocation2 + $0x1dfc] ss:$68 sps:$4 sm:$0xff]  }
0x1192   :  { %16661 = vmatmul.mubr.bf16.gmra.mrb[92].mxu1 %v25118_v22  ;;  %v25139_v22 = vld [vmem:[#allocation2 + $0x1df8] ss:$68 sps:$4 sm:$0xff]  }
0x1193   :  { %16668 = vmatprep.mubr.bf16.mxu1 %v25119_v26  ;;  %v25140_v26 = vld [vmem:[#allocation2 + $0x1e84] ss:$68 sps:$4 sm:$0xff]  }
0x119a   :  { %16669 = vmatmul.mubr.bf16.gmra.mrb[96].mxu1 %v25121_v57  ;;  %v25142_v57 = vld [vmem:[#allocation2 + $0x1e80] ss:$68 sps:$4 sm:$0xff]  }
0x119b   :  { %16676 = vmatprep.mubr.bf16.mxu1 %v25122_v2  ;;  %v25145_v2 = vld [vmem:[#allocation2 + $0x1f0c] ss:$68 sps:$4 sm:$0xff]  }
0x11a2   :  { %16677 = vmatmul.mubr.bf16.gmra.mrb[100].mxu1 %v25124_v28  ;;  %v25143_v28 = vld [vmem:[#allocation2 + $0x1f08] ss:$68 sps:$4 sm:$0xff]  }
0x11a3   :  { %16684 = vmatprep.mubr.bf16.mxu1 %v25125_v6  ;;  %v25146_v6 = vld [vmem:[#allocation2 + $0x1f94] ss:$68 sps:$4 sm:$0xff]  }
0x11aa   :  { %16685 = vmatmul.mubr.bf16.gmra.mrb[104].mxu1 %v25127_v62  ;;  %v25148_v62 = vld [vmem:[#allocation2 + $0x1f90] ss:$68 sps:$4 sm:$0xff]  }
0x11ab   :  { %16692 = vmatprep.mubr.bf16.mxu1 %v25128_v10  ;;  %v25149_v10 = vld [vmem:[#allocation2 + $0x201c] ss:$68 sps:$4 sm:$0xff]  }
0x11b2   :  { %16693 = vmatmul.mubr.bf16.gmra.mrb[108].mxu1 %v25130_v9  ;;  %v25151_v9 = vld [vmem:[#allocation2 + $0x2018] ss:$68 sps:$4 sm:$0xff]  }
0x11b3   :  { %16700 = vmatprep.mubr.bf16.mxu1 %v25131_v41  ;;  %v25152_v41 = vld [vmem:[#allocation2 + $0x20a4] ss:$68 sps:$4 sm:$0xff]  }
0x11ba   :  { %16701 = vmatmul.mubr.bf16.gmra.mrb[112].mxu1 %v25133_v61  ;;  %v25154_v61 = vld [vmem:[#allocation2 + $0x20a0] ss:$68 sps:$4 sm:$0xff]  }
0x11bb   :  { %16708 = vmatprep.mubr.bf16.mxu1 %v25134_v17  ;;  %v25155_v17 = vld [vmem:[#allocation2 + $0x212c] ss:$68 sps:$4 sm:$0xff]  }
0x11c2   :  { %16709 = vmatmul.mubr.bf16.gmra.mrb[116].mxu1 %v25136_v45  ;;  %v25157_v45 = vld [vmem:[#allocation2 + $0x2128] ss:$68 sps:$4 sm:$0xff]  }
0x11c3   :  { %16716 = vmatprep.mubr.bf16.mxu1 %v25137_v30  ;;  %v25160_v30 = vld [vmem:[#allocation2 + $0x21b4] ss:$68 sps:$4 sm:$0xff]  }
0x11ca   :  { %16717 = vmatmul.mubr.bf16.gmra.mrb[120].mxu1 %v25139_v22  ;;  %v6673_v22 = vld [vmem:[#allocation2 + $0x2238] sm:$0xff] }
0x11cb   :  { %16724 = vmatprep.mubr.bf16.mxu1 %v25140_v26  ;;  %v25158_v26 = vld [vmem:[#allocation2 + $0x21b0] ss:$68 sps:$4 sm:$0xff]  }
0x11d2   :  { %16725 = vmatmul.mubr.bf16.gmra.mrb[124].mxu1 %v25142_v57  ;;  %v19543_v57 = vcombine.high %v6673_v22, %v6673_v22 }
0x11d3   :  { %16732 = vmatprep.mubr.bf16.mxu1 %v25145_v2  ;;  %v19542_v2 = vcombine.low %v6673_v22, %v6673_v22 }
0x11da   :  { %16733 = vmatmul.mubr.bf16.gmra.mrb[20].mxu1 %v25143_v28  ;;  %v25163_v28 = vld [vmem:[#allocation2 + $0x40] ss:$68 sps:$4 sm:$0xff]  }
0x11db   :  { %16740 = vmatprep.mubr.bf16.mxu1 %v25146_v6  ;;  %v25164_v6 = vld [vmem:[#allocation2 + $0xc8] ss:$68 sps:$4 sm:$0xff]  }
0x11e2   :  { %16741 = vmatmul.mubr.bf16.gmra.mrb[132].mxu1 %v25148_v62  ;;  %v25165_v62 = vld [vmem:[#allocation2 + $0x150] ss:$68 sps:$4 sm:$0xff]  }
0x11e3   :  { %16748 = vmatprep.mubr.bf16.mxu1 %v25149_v10  ;;  %v25166_v10 = vld [vmem:[#allocation2 + $0x1d8] ss:$68 sps:$4 sm:$0xff]  }
0x11ea   :  { %16749 = vmatmul.mubr.bf16.gmra.mrb[136].mxu1 %v25151_v9 }
0x11eb   :  { %16756 = vmatprep.mubr.bf16.mxu1 %v25152_v41 }
0x11f2   :  { %16757 = vmatmul.mubr.bf16.gmra.mrb[140].mxu1 %v25154_v61  ;;  %v25167_v61 = vld [vmem:[#allocation2 + $0x260] ss:$68 sps:$4 sm:$0xff]  }
0x11f3   :  { %16764 = vmatprep.mubr.bf16.mxu1 %v25155_v17 }
0x11fa   :  { %16765 = vmatmul.mubr.bf16.gmra.mrb[144].mxu1 %v25157_v45 }
0x11fb   :  { %16772 = vmatprep.mubr.bf16.mxu1 %v25160_v30 }
0x1202   :  { %16773 = vmatmul.mubr.bf16.gmra.mrb[40].mxu1 %v25158_v26  ;;  %v25168_v26 = vld [vmem:[#allocation2 + $0x2e8] ss:$68 sps:$4 sm:$0xff]  }
0x1203   :  { %16780 = vmatprep.mubr.bf16.mxu1 %v19543_v57  ;;  %v25169_v57 = vld [vmem:[#allocation2 + $0x370] ss:$68 sps:$4 sm:$0xff]  }
0x120a   :  { %16781 = vmatmul.mubr.bf16.gmra.mrb[152].mxu1 %v19542_v2  ;;  %v25172_v2 = vld [vmem:[#allocation2 + $0x508] ss:$68 sps:$4 sm:$0xff]  }
0x120b   :  { %20461 = vmatprep.mubr.msk.bf16.mxu1 %vm25283_vm1, %v28938_v16 }
0x1212   :  { %20462 = vmatmul.mubr.msk.bf16.vlgmr.msra.gmra.mrb[156].mxu1 %vm2608_vm2, %v25163_v28  ;;  %v25173_v28 = vld [vmem:[#allocation2 + $0x590] ss:$68 sps:$4 sm:$0xff]  }
0x1213   :  { %20465 = vmatprep.mubr.msk.bf16.mxu1 %vm25283_vm1, %v28938_v16 }
0x121a   :  { %20466 = vmatmul.mubr.msk.bf16.gmra.mrb[160].mxu1 %vm2608_vm2, %v25164_v6  ;;  %v25174_v6 = vld [vmem:[#allocation2 + $0x618] ss:$68 sps:$4 sm:$0xff]  }
0x121b   :  { %20469 = vmatprep.mubr.msk.bf16.mxu1 %vm25283_vm1, %v28938_v16 }
0x1222   :  { %20470 = vmatmul.mubr.msk.bf16.gmra.mrb[164].mxu1 %vm2608_vm2, %v25165_v62  ;;  %v25175_v62 = vld [vmem:[#allocation2 + $0x6a0] ss:$68 sps:$4 sm:$0xff]  }
0x1223   :  { %20473 = vmatprep.mubr.msk.bf16.mxu1 %vm25283_vm1, %v28938_v16 }
0x122a   :  { %20474 = vmatmul.mubr.msk.bf16.gmra.mrb[168].mxu1 %vm2608_vm2, %v25166_v10  ;;  %v25176_v10 = vld [vmem:[#allocation2 + $0x728] ss:$68 sps:$4 sm:$0xff]  }
0x122b   :  { %20477 = vmatprep.mubr.msk.bf16.mxu1 %vm25283_vm1, %v28938_v16 }
0x122d   :  { %v16606_v9 = vpop.f32.mrb[64].mxu1 }
0x122e   :  { %v16608_v41 = vpop.f32.mrb[65].mxu1  ;;  %v28111_v17 = vadd.f32 %v16606_v9, %v27836_v24  ;;  %v25170_v24 = vld [vmem:[#allocation2 + $0x3f8] ss:$68 sps:$4 sm:$0xff]   ;;  %v25177_v9 = vld [vmem:[#allocation2 + $0x7b0] ss:$68 sps:$4 sm:$0xff]  }
0x122f   :  { %v16609_v45 = vpop.f32.mrb[66].mxu1  ;;  %v25178_v41 = vld [vmem:[#allocation2 + $0x838] ss:$68 sps:$4 sm:$0xff]  }
0x1230   :  { %v16611_v30 = vpop.f32.mrb[67].mxu1  ;;  %v28114_v22 = vadd.f32 %v16609_v45, %v27838_v33  ;;  %v25171_v33 = vld [vmem:[#allocation2 + $0x480] ss:$68 sps:$4 sm:$0xff]   ;;  %v25180_v45 = vld [vmem:[#allocation2 + $0x948] ss:$68 sps:$4 sm:$0xff]  }
0x1231   :  { %v25181_v30 = vld [vmem:[#allocation2 + $0x9d0] ss:$68 sps:$4 sm:$0xff]  }
0x1232   :  { %20478 = vmatmul.mubr.msk.bf16.gmra.mrb[64].mxu1 %vm2608_vm2, %v25167_v61  ;;  %v25179_v61 = vld [vmem:[#allocation2 + $0x8c0] ss:$68 sps:$4 sm:$0xff]  }
0x1233   :  { %20481 = vmatprep.mubr.msk.bf16.mxu1 %vm25283_vm1, %v28938_v16 }
0x123a   :  { %20482 = vmatmul.mubr.msk.bf16.gmra.mrb[176].mxu1 %vm2608_vm2, %v25168_v26  ;;  %v25182_v26 = vld [vmem:[#allocation2 + $0xa58] ss:$68 sps:$4 sm:$0xff]  }
0x123b   :  { %20485 = vmatprep.mubr.msk.bf16.mxu1 %vm25283_vm1, %v28938_v16 }
0x1242   :  { %20486 = vmatmul.mubr.msk.bf16.gmra.mrb[180].mxu1 %vm2608_vm2, %v25169_v57  ;;  %v25183_v57 = vld [vmem:[#allocation2 + $0xae0] ss:$68 sps:$4 sm:$0xff]  }
0x1243   :  { %20489 = vmatprep.mubr.msk.bf16.mxu1 %vm25283_vm1, %v28938_v16 }
0x124a   :  { %20490 = vmatmul.mubr.msk.bf16.gmra.mrb[184].mxu1 %vm2608_vm2, %v25170_v24  ;;  %v25184_v24 = vld [vmem:[#allocation2 + $0xb68] ss:$68 sps:$4 sm:$0xff]  }
0x124b   :  { %20493 = vmatprep.mubr.msk.bf16.mxu1 %vm25283_vm1, %v28938_v16 }
0x1252   :  { %20494 = vmatmul.mubr.msk.bf16.gmra.mrb[188].mxu1 %vm2608_vm2, %v25171_v33  ;;  %v25185_v33 = vld [vmem:[#allocation2 + $0xbf0] ss:$68 sps:$4 sm:$0xff]  }
0x1253   :  { %20497 = vmatprep.mubr.msk.bf16.mxu1 %vm25283_vm1, %v28938_v16 }
0x125a   :  { %20498 = vmatmul.mubr.msk.bf16.gmra.mrb[84].mxu1 %vm2608_vm2, %v25172_v2  ;;  %v25186_v2 = vld [vmem:[#allocation2 + $0xc78] ss:$68 sps:$4 sm:$0xff]  }
0x125b   :  { %20501 = vmatprep.mubr.msk.bf16.mxu1 %vm25283_vm1, %v28938_v16 }
0x1262   :  { %20502 = vmatmul.mubr.msk.bf16.gmra.mrb[196].mxu1 %vm2608_vm2, %v25173_v28  ;;  %v25187_v28 = vld [vmem:[#allocation2 + $0xd00] ss:$68 sps:$4 sm:$0xff]  }
0x1263   :  { %20505 = vmatprep.mubr.msk.bf16.mxu1 %vm25283_vm1, %v28938_v16 }
0x126a   :  { %20506 = vmatmul.mubr.msk.bf16.gmra.mrb[200].mxu1 %vm2608_vm2, %v25174_v6  ;;  %v25188_v6 = vld [vmem:[#allocation2 + $0xd88] ss:$68 sps:$4 sm:$0xff]  }
0x126b   :  { %20509 = vmatprep.mubr.msk.bf16.mxu1 %vm25283_vm1, %v28938_v16 }
0x1272   :  { %20510 = vmatmul.mubr.msk.bf16.gmra.mrb[204].mxu1 %vm2608_vm2, %v25175_v62  ;;  %v25189_v62 = vld [vmem:[#allocation2 + $0xe10] ss:$68 sps:$4 sm:$0xff]  }
0x1273   :  { %20513 = vmatprep.mubr.msk.bf16.mxu1 %vm25283_vm1, %v28938_v16 }
0x127a   :  { %20514 = vmatmul.mubr.msk.bf16.gmra.mrb[208].mxu1 %vm2608_vm2, %v25176_v10 }
0x127b   :  { %20517 = vmatprep.mubr.msk.bf16.mxu1 %vm25283_vm1, %v28938_v16 }
0x1282   :  { %20518 = vmatmul.mubr.msk.bf16.gmra.mrb[212].mxu1 %vm2608_vm2, %v25177_v9 }
0x1283   :  { %20521 = vmatprep.mubr.msk.bf16.mxu1 %vm25283_vm1, %v28938_v16 }
0x128a   :  { %20522 = vmatmul.mubr.msk.bf16.gmra.mrb[216].mxu1 %vm2608_vm2, %v25178_v41 }
0x128b   :  { %20525 = vmatprep.mubr.msk.bf16.mxu1 %vm25283_vm1, %v28938_v16 }
0x1292   :  { %20526 = vmatmul.mubr.msk.bf16.gmra.mrb[220].mxu1 %vm2608_vm2, %v25179_v61  ;;  %v25190_v61 = vld [vmem:[#allocation2 + $0xe98] ss:$68 sps:$4 sm:$0xff]  }
0x1293   :  { %20529 = vmatprep.mubr.msk.bf16.mxu1 %vm25283_vm1, %v28938_v16 }
0x129a   :  { %20530 = vmatmul.mubr.msk.bf16.gmra.mrb[224].mxu1 %vm2608_vm2, %v25180_v45 }
0x129b   :  { %20533 = vmatprep.mubr.msk.bf16.mxu1 %vm25283_vm1, %v28938_v16 }
0x12a2   :  { %20534 = vmatmul.mubr.msk.bf16.gmra.mrb[228].mxu1 %vm2608_vm2, %v25181_v30 }
0x12a3   :  { %20537 = vmatprep.mubr.msk.bf16.mxu1 %vm25283_vm1, %v28938_v16 }
0x12aa   :  { %20538 = vmatmul.mubr.msk.bf16.gmra.mrb[232].mxu1 %vm2608_vm2, %v25182_v26 }
0x12ab   :  { %20541 = vmatprep.mubr.msk.bf16.mxu1 %vm25283_vm1, %v28938_v16 }
0x12b2   :  { %20542 = vmatmul.mubr.msk.bf16.gmra.mrb[128].mxu1 %vm2608_vm2, %v25183_v57 }
0x12b3   :  { %20545 = vmatprep.mubr.msk.bf16.mxu1 %vm25283_vm1, %v28938_v16 }
0x12ba   :  { %20546 = vmatmul.mubr.msk.bf16.gmra.mrb[240].mxu1 %vm2608_vm2, %v25184_v24 }
0x12bb   :  { %20549 = vmatprep.mubr.msk.bf16.mxu1 %vm25283_vm1, %v28938_v16 }
0x12c2   :  { %20550 = vmatmul.mubr.msk.bf16.gmra.mrb[244].mxu1 %vm2608_vm2, %v25185_v33 }
0x12c3   :  { %20553 = vmatprep.mubr.msk.bf16.mxu1 %vm25283_vm1, %v28938_v16 }
0x12ca   :  { %20554 = vmatmul.mubr.msk.bf16.gmra.mrb[248].mxu1 %vm2608_vm2, %v25186_v2 }
0x12cb   :  { %20557 = vmatprep.mubr.msk.bf16.mxu1 %vm25283_vm1, %v28938_v16 }
0x12d2   :  { %20558 = vmatmul.mubr.msk.bf16.gmra.mrb[252].mxu1 %vm2608_vm2, %v25187_v28 }
0x12d3   :  { %20561 = vmatprep.mubr.msk.bf16.mxu1 %vm25283_vm1, %v28938_v16 }
0x12da   :  { %20562 = vmatmul.mubr.msk.bf16.gmra.mrb[148].mxu1 %vm2608_vm2, %v25188_v6 }
0x12db   :  { %20565 = vmatprep.mubr.msk.bf16.mxu1 %vm25283_vm1, %v28938_v16 }
0x12e2   :  { %20566 = vmatmul.mubr.msk.bf16.gmra.mrb[0].mxu1 %vm2608_vm2, %v25189_v62 }
0x12e3   :  { %20569 = vmatprep.mubr.msk.bf16.mxu1 %vm25283_vm1, %v28938_v16 }
0x12e5   :  { %v16822_v10 = vpop.f32.mrb[156].mxu1 }
0x12e6   :  { %v20889_v9 = vadd.f32 %v16822_v10, %v27930_v3  ;;  %v20463_v41 = vpop.f32.mrb[157].mxu1  ;;  %v25191_v3 = vld [vmem:[#allocation2 + $0xf20] ss:$68 sps:$4 sm:$0xff]  }
0x12e7   :  { %v16825_v45 = vpop.f32.mrb[158].mxu1 }
0x12e8   :  { %v20890_v30 = vadd.f32 %v16825_v45, %v27932_v54  ;;  %v20464_v26 = vpop.f32.mrb[159].mxu1  ;;  %v17340_v57 = vmax.f32 %v20889_v9, 0.0 }
0x12ea   :  { %v17341_v24 = vmax.f32 %v20890_v30, 0.0  ;;  %20570 = vmatmul.mubr.msk.bf16.gmra.mrb[4].mxu1 %vm2608_vm2, %v25190_v61 }
0x12eb   :  { %20573 = vmatprep.mubr.msk.bf16.mxu1 %vm25283_vm1, %v28938_v16 }
0x12ec   :  { %v28190_v33 = vpack.c.bf16 %v17341_v24, %v17340_v57 }
0x12ed   :  { %v16830_v2 = vpop.f32.mrb[160].mxu1 }
0x12ee   :  { %v20891_v28 = vadd.f32 %v16830_v2, %v27934_v47  ;;  %v20467_v6 = vpop.f32.mrb[161].mxu1  ;;  %v25192_v47 = vld [vmem:[#allocation2 + $0xfa8] ss:$68 sps:$4 sm:$0xff]  }
0x12ef   :  { %v16833_v62 = vpop.f32.mrb[162].mxu1 }
0x12f0   :  { %v20892_v10 = vadd.f32 %v16833_v62, %v27936_v19  ;;  %v20468_v41 = vpop.f32.mrb[163].mxu1  ;;  %v17342_v54 = vmax.f32 %v20891_v28, 0.0 }
0x12f2   :  { %v17343_v45 = vmax.f32 %v20892_v10, 0.0  ;;  %20574 = vmatmul.mubr.msk.bf16.gmra.mrb[8].mxu1 %vm2608_vm2, %v25191_v3 }
0x12f3   :  { %20577 = vmatprep.mubr.msk.bf16.mxu1 %vm25283_vm1, %v28938_v16 }
0x12f4   :  { %v28197_v9 = vpack.c.bf16 %v17343_v45, %v17342_v54 }
0x12f5   :  { %v16838_v61 = vpop.f32.mrb[164].mxu1 }
0x12f6   :  { %v20893_v30 = vadd.f32 %v16838_v61, %v27938_v11  ;;  %v20471_v26 = vpop.f32.mrb[165].mxu1  ;;  %v25193_v11 = vld [vmem:[#allocation2 + $0x1030] ss:$68 sps:$4 sm:$0xff]  }
0x12f7   :  { %v16841_v57 = vpop.f32.mrb[166].mxu1 }
0x12f8   :  { %v20894_v24 = vadd.f32 %v16841_v57, %v27940_v4  ;;  %v20472_v2 = vpop.f32.mrb[167].mxu1  ;;  %v17344_v19 = vmax.f32 %v20893_v30, 0.0 }
0x12fa   :  { %v17345_v6 = vmax.f32 %v20894_v24, 0.0  ;;  %20578 = vmatmul.mubr.msk.bf16.gmra.mrb[12].mxu1 %vm2608_vm2, %v25192_v47 }
0x12fb   :  { %20581 = vmatprep.mubr.msk.bf16.mxu1 %vm25283_vm1, %v28938_v16 }
0x12fc   :  { %v28204_v28 = vpack.c.bf16 %v17345_v6, %v17344_v19 }
0x12fd   :  { %v16846_v3 = vpop.f32.mrb[168].mxu1 }
0x12fe   :  { %v20895_v62 = vadd.f32 %v16846_v3, %v27942_v39  ;;  %v20475_v10 = vpop.f32.mrb[169].mxu1  ;;  %v25194_v39 = vld [vmem:[#allocation2 + $0x10b8] ss:$68 sps:$4 sm:$0xff]  }
0x12ff   :  { %v16849_v41 = vpop.f32.mrb[170].mxu1 }
0x1300   :  { %v20896_v54 = vadd.f32 %v16849_v41, %v27944_v59  ;;  %v20476_v45 = vpop.f32.mrb[171].mxu1  ;;  %v17346_v4 = vmax.f32 %v20895_v62, 0.0 }
0x1302   :  { %v17347_v61 = vmax.f32 %v20896_v54, 0.0  ;;  %20582 = vmatmul.mubr.msk.bf16.gmra.mrb[16].mxu1 %vm2608_vm2, %v25193_v11 }
0x1303   :  { %20585 = vmatprep.mubr.msk.bf16.mxu1 %vm25283_vm1, %v28938_v16 }
0x1304   :  { %v28211_v30 = vpack.c.bf16 %v17347_v61, %v17346_v4 }
0x1305   :  { %v16854_v26 = vpop.f32.mrb[64].mxu1 }
0x1306   :  { %v20898_v47 = vadd.f32 %v28091_v46, %v16854_v26  ;;  %v20479_v57 = vpop.f32.mrb[65].mxu1  ;;  %v25195_v46 = vld [vmem:[#allocation2 + $0x1140] ss:$68 sps:$4 sm:$0xff]  }
0x1307   :  { %v16857_v24 = vpop.f32.mrb[66].mxu1 }
0x1308   :  { %v20900_v2 = vadd.f32 %v28094_v31, %v16857_v24  ;;  %v20480_v19 = vpop.f32.mrb[67].mxu1  ;;  %v17348_v59 = vmax.f32 %v20898_v47, 0.0 }
0x130a   :  { %v17349_v6 = vmax.f32 %v20900_v2, 0.0  ;;  %20586 = vmatmul.mubr.msk.bf16.gmra.mrb[172].mxu1 %vm2608_vm2, %v25194_v39 }
0x130b   :  { %20589 = vmatprep.mubr.msk.bf16.mxu1 %vm25283_vm1, %v28938_v16 }
0x130c   :  { %v28218_v3 = vpack.c.bf16 %v17349_v6, %v17348_v59 }
0x130d   :  { %v16862_v62 = vpop.f32.mrb[176].mxu1 }
0x130e   :  { %v20901_v10 = vadd.f32 %v16862_v62, %v27952_v0  ;;  %v20483_v11 = vpop.f32.mrb[177].mxu1  ;;  %v25196_v0 = vld [vmem:[#allocation2 + $0x11c8] ss:$68 sps:$4 sm:$0xff]  }
0x130f   :  { %v16865_v41 = vpop.f32.mrb[178].mxu1 }
0x1310   :  { %v20902_v54 = vadd.f32 %v16865_v41, %v27956_v44  ;;  %v20484_v45 = vpop.f32.mrb[179].mxu1  ;;  %v17350_v31 = vmax.f32 %v20901_v10, 0.0 }
0x1312   :  { %v17351_v4 = vmax.f32 %v20902_v54, 0.0  ;;  %20590 = vmatmul.mubr.msk.bf16.gmra.mrb[24].mxu1 %vm2608_vm2, %v25195_v46 }
0x1313   :  { %20593 = vmatprep.mubr.msk.bf16.mxu1 %vm25283_vm1, %v28938_v16 }
0x1314   :  { %v28225_v61 = vpack.c.bf16 %v17351_v4, %v17350_v31 }
0x1315   :  { %v16870_v26 = vpop.f32.mrb[180].mxu1 }
0x1316   :  { %v20903_v47 = vadd.f32 %v16870_v26, %v27958_v32  ;;  %v20487_v57 = vpop.f32.mrb[181].mxu1  ;;  %v25197_v32 = vld [vmem:[#allocation2 + $0x1250] ss:$68 sps:$4 sm:$0xff]  }
0x1317   :  { %v16873_v39 = vpop.f32.mrb[182].mxu1 }
0x1318   :  { %v20904_v24 = vadd.f32 %v16873_v39, %v27960_v36  ;;  %v20488_v2 = vpop.f32.mrb[183].mxu1  ;;  %v17352_v44 = vmax.f32 %v20903_v47, 0.0 }
0x131a   :  { %v17353_v19 = vmax.f32 %v20904_v24, 0.0  ;;  %20594 = vmatmul.mubr.msk.bf16.gmra.mrb[28].mxu1 %vm2608_vm2, %v25196_v0 }
0x131b   :  { %20597 = vmatprep.mubr.msk.bf16.mxu1 %vm25283_vm1, %v28938_v16 }
0x131c   :  { %v28232_v59 = vpack.c.bf16 %v17353_v19, %v17352_v44  ;;  %v25217_v44 = vld [vmem:[%s28617_s3 + $0x4] ss:$36 sps:$4 sm:$0xff]  }
0x131d   :  { %v16878_v6 = vpop.f32.mrb[184].mxu1  ;;  %17685 = vmatprep.mubr.bf16.mxu0 %v25217_v44 }
0x131e   :  { %v20905_v62 = vadd.f32 %v16878_v6, %v27962_v14  ;;  %v20491_v10 = vpop.f32.mrb[185].mxu1  ;;  %v25198_v14 = vld [vmem:[#allocation2 + $0x12d8] ss:$68 sps:$4 sm:$0xff]   ;;  %v25199_v6 = vld [vmem:[#allocation2 + $0x1360] ss:$68 sps:$4 sm:$0xff]  }
0x131f   :  { %v16881_v11 = vpop.f32.mrb[186].mxu1 }
0x1320   :  { %v20906_v46 = vadd.f32 %v16881_v11, %v27964_v27  ;;  %v20492_v41 = vpop.f32.mrb[187].mxu1  ;;  %v17354_v36 = vmax.f32 %v20905_v62, 0.0 }
0x1322   :  { %v17355_v54 = vmax.f32 %v20906_v46, 0.0  ;;  %20598 = vmatmul.mubr.msk.bf16.gmra.mrb[32].mxu1 %vm2608_vm2, %v25197_v32 }
0x1323   :  { %20601 = vmatprep.mubr.msk.bf16.mxu1 %vm25283_vm1, %v28938_v16 }
0x1324   :  { %v28239_v45 = vpack.c.bf16 %v17355_v54, %v17354_v36  ;;  %v25200_v54 = vld [vmem:[#allocation2 + $0x13e8] ss:$68 sps:$4 sm:$0xff]  }
0x1325   :  { %v16886_v31 = vpop.f32.mrb[188].mxu1 }
0x1326   :  { %v20907_v4 = vadd.f32 %v16886_v31, %v27966_v43  ;;  %v20495_v26 = vpop.f32.mrb[189].mxu1 }
0x1327   :  { %v16889_v47 = vpop.f32.mrb[190].mxu1 }
0x1328   :  { %v20908_v57 = vadd.f32 %v16889_v47, %v27968_v60  ;;  %v20496_v0 = vpop.f32.mrb[191].mxu1  ;;  %v17356_v27 = vmax.f32 %v20907_v4, 0.0 }
0x1329   :  { %v25201_v0 = vld [vmem:[#allocation2 + $0x1470] ss:$68 sps:$4 sm:$0xff]  }
0x132a   :  { %v17357_v39 = vmax.f32 %v20908_v57, 0.0  ;;  %20602 = vmatmul.mubr.msk.bf16.gmra.mrb[36].mxu1 %vm2608_vm2, %v25198_v14 }
0x132b   :  { %20605 = vmatprep.mubr.msk.bf16.mxu1 %vm25283_vm1, %v28938_v16 }
0x132c   :  { %v17477_v24 = vpack.c.bf16 %v17357_v39, %v17356_v27 }
0x132d   :  { %v16894_v2 = vpop.f32.mrb[84].mxu1 }
0x132e   :  { %v20910_v43 = vadd.f32 %v27971_v13, %v16894_v2  ;;  %v20499_v19 = vpop.f32.mrb[85].mxu1  ;;  %19826 = vmatprep.subr.bf16.mxu0 %v17477_v24 }
0x132f   :  { %v16897_v60 = vpop.f32.mrb[86].mxu1  ;;  %19827 = vmatpush3.bf16.msra.mxu0 %v28190_v33  ;;  %v25202_v19 = vld [vmem:[#allocation2 + $0x14f8] ss:$68 sps:$4 sm:$0xff]  }
0x1330   :  { %v20912_v62 = vadd.f32 %v27974_v48, %v16897_v60  ;;  %v20500_v10 = vpop.f32.mrb[87].mxu1  ;;  %v17358_v32 = vmax.f32 %v20910_v43, 0.0 }
0x1332   :  { %v17359_v11 = vmax.f32 %v20912_v62, 0.0  ;;  %20606 = vmatmul.mubr.msk.bf16.gmra.mrb[192].mxu1 %vm2608_vm2, %v25199_v6 }
0x1333   :  { %20609 = vmatprep.mubr.msk.bf16.mxu1 %vm25283_vm1, %v28938_v16 }
0x1334   :  { %v17478_v46 = vpack.c.bf16 %v17359_v11, %v17358_v32 }
0x1335   :  { %v16902_v41 = vpop.f32.mrb[196].mxu1 }
0x1336   :  { %v20914_v13 = vadd.f32 %v27977_v42, %v16902_v41  ;;  %v20503_v36 = vpop.f32.mrb[197].mxu1  ;;  %19828 = vmatprep.subr.bf16.mxu0 %v17478_v46  ;;  %v25203_v46 = vld [vmem:[#allocation2 + $0x1580] ss:$68 sps:$4 sm:$0xff]  }
0x1337   :  { %v16905_v31 = vpop.f32.mrb[198].mxu1  ;;  %19829 = vmatpush3.bf16.msra.mxu0 %v28197_v9 }
0x1338   :  { %v20916_v48 = vadd.f32 %v27980_v15, %v16905_v31  ;;  %v20504_v33 = vpop.f32.mrb[199].mxu1  ;;  %v17360_v4 = vmax.f32 %v20914_v13, 0.0 }
0x1339   :  { %v25204_v33 = vld [vmem:[#allocation2 + $0x1608] ss:$68 sps:$4 sm:$0xff]  }
0x133a   :  { %v17361_v26 = vmax.f32 %v20916_v48, 0.0  ;;  %20610 = vmatmul.mubr.msk.bf16.gmra.mrb[44].mxu1 %vm2608_vm2, %v25200_v54 }
0x133b   :  { %20613 = vmatprep.mubr.msk.bf16.mxu1 %vm25283_vm1, %v28938_v16 }
0x133c   :  { %v17479_v14 = vpack.c.bf16 %v17361_v26, %v17360_v4 }
0x133d   :  { %v16910_v47 = vpop.f32.mrb[200].mxu1 }
0x133e   :  { %v20917_v42 = vadd.f32 %v16910_v47, %v27982_v34  ;;  %v20507_v57 = vpop.f32.mrb[201].mxu1  ;;  %19830 = vmatprep.subr.bf16.mxu0 %v17479_v14 }
0x133f   :  { %v16913_v27 = vpop.f32.mrb[202].mxu1  ;;  %19831 = vmatpush3.bf16.msra.mxu0 %v28204_v28 }
0x1340   :  { %v20918_v15 = vadd.f32 %v16913_v27, %v27984_v8  ;;  %v20508_v9 = vpop.f32.mrb[203].mxu1  ;;  %v17362_v39 = vmax.f32 %v20917_v42, 0.0 }
0x1342   :  { %v17363_v24 = vmax.f32 %v20918_v15, 0.0  ;;  %20614 = vmatmul.mubr.msk.bf16.gmra.mrb[48].mxu1 %vm2608_vm2, %v25201_v0  ;;  %v25205_v0 = vld [vmem:[#allocation2 + $0x1690] ss:$68 sps:$4 sm:$0xff]  }
0x1343   :  { %20617 = vmatprep.mubr.msk.bf16.mxu1 %vm25283_vm1, %v28938_v16 }
0x1344   :  { %v17480_v2 = vpack.c.bf16 %v17363_v24, %v17362_v39 }
0x1345   :  { %v16918_v44 = vpop.f32.mrb[204].mxu1 }
0x1346   :  { %v20919_v34 = vadd.f32 %v16918_v44, %v27986_v29  ;;  %v20511_v43 = vpop.f32.mrb[205].mxu1  ;;  %19832 = vmatprep.subr.bf16.mxu0 %v17480_v2  ;;  %v25206_v44 = vld [vmem:[#allocation2 + $0x1718] ss:$68 sps:$4 sm:$0xff]  }
0x1347   :  { %v16921_v6 = vpop.f32.mrb[206].mxu1  ;;  %19833 = vmatpush3.bf16.msra.mxu0 %v28211_v30 }
0x1348   :  { %v20920_v8 = vadd.f32 %v16921_v6, %v27988_v5  ;;  %v20512_v28 = vpop.f32.mrb[207].mxu1  ;;  %v17364_v60 = vmax.f32 %v20919_v34, 0.0 }
0x134a   :  { %v17365_v62 = vmax.f32 %v20920_v8, 0.0  ;;  %20618 = vmatmul.mubr.msk.bf16.gmra.mrb[52].mxu1 %vm2608_vm2, %v25202_v19 }
0x134b   :  { %20621 = vmatprep.mubr.msk.bf16.mxu1 %vm25283_vm1, %v28938_v16 }
0x134c   :  { %v17481_v10 = vpack.c.bf16 %v17365_v62, %v17364_v60  ;;  %v25207_v62 = vld [vmem:[#allocation2 + $0x17a0] ss:$68 sps:$4 sm:$0xff]  }
0x134d   :  { %v16926_v32 = vpop.f32.mrb[208].mxu1 }
0x134e   :  { %v20921_v29 = vadd.f32 %v16926_v32, %v27990_v52  ;;  %v20515_v11 = vpop.f32.mrb[209].mxu1  ;;  %19834 = vmatprep.subr.bf16.mxu0 %v17481_v10 }
0x134f   :  { %v16929_v41 = vpop.f32.mrb[210].mxu1  ;;  %19835 = vmatpush3.bf16.msra.mxu0 %v28218_v3 }
0x1350   :  { %v20922_v5 = vadd.f32 %v16929_v41, %v27992_v58  ;;  %v20516_v30 = vpop.f32.mrb[211].mxu1  ;;  %v17366_v13 = vmax.f32 %v20921_v29, 0.0 }
0x1352   :  { %v17367_v36 = vmax.f32 %v20922_v5, 0.0  ;;  %20622 = vmatmul.mubr.msk.bf16.gmra.mrb[56].mxu1 %vm2608_vm2, %v25203_v46 }
0x1353   :  { %20625 = vmatprep.mubr.msk.bf16.mxu1 %vm25283_vm1, %v28938_v16 }
0x1354   :  { %v17482_v54 = vpack.c.bf16 %v17367_v36, %v17366_v13 }
0x1355   :  { %v16934_v31 = vpop.f32.mrb[212].mxu1 }
0x1356   :  { %v20923_v52 = vadd.f32 %v16934_v31, %v27994_v51  ;;  %v20519_v48 = vpop.f32.mrb[213].mxu1  ;;  %19836 = vmatprep.subr.bf16.mxu0 %v17482_v54 }
0x1357   :  { %v16937_v4 = vpop.f32.mrb[214].mxu1  ;;  %19837 = vmatpush3.bf16.msra.mxu0 %v28225_v61  ;;  %v28946_v48 = vld [vmem:[#allocation94_spill] sm:$0xff] }
0x1358   :  { %v20924_v58 = vadd.f32 %v16937_v4, %v27996_v56  ;;  %v20520_v3 = vpop.f32.mrb[215].mxu1  ;;  %v17368_v26 = vmax.f32 %v20923_v52, 0.0 }
0x1359   :  { %v28947_v3 = vld [vmem:[#allocation95_spill] sm:$0xff] }
0x135a   :  { %v17369_v14 = vmax.f32 %v20924_v58, 0.0  ;;  %20626 = vmatmul.mubr.msk.bf16.gmra.mrb[60].mxu1 %vm2608_vm2, %v25204_v33 }
0x135b   :  { %20629 = vmatprep.mubr.msk.bf16.mxu1 %vm25283_vm1, %v28938_v16 }
0x135c   :  { %v17483_v47 = vpack.c.bf16 %v17369_v14, %v17368_v26 }
0x135d   :  { %v16942_v42 = vpop.f32.mrb[216].mxu1 }
0x135e   :  { %v20925_v51 = vadd.f32 %v16942_v42, %v27998_v37  ;;  %v20523_v57 = vpop.f32.mrb[217].mxu1  ;;  %19838 = vmatprep.subr.bf16.mxu0 %v17483_v47 }
0x135f   :  { %v16945_v27 = vpop.f32.mrb[218].mxu1  ;;  %19839 = vmatpush3.bf16.msra.mxu0 %v28232_v59  ;;  %v25215_v59 = vld [vmem:[%s28617_s3] ss:$36 sps:$4 sm:$0xff]  }
0x1360   :  { %v20926_v56 = vadd.f32 %v16945_v27, %v28000_v18  ;;  %v20524_v61 = vpop.f32.mrb[219].mxu1  ;;  %v17370_v15 = vmax.f32 %v20925_v51, 0.0  ;;  %v25210_v27 = vld [vmem:[#allocation2 + $0x1938] ss:$68 sps:$4 sm:$0xff]  }
0x1362   :  { %v17371_v9 = vmax.f32 %v20926_v56, 0.0  ;;  %20630 = vmatmul.mubr.msk.bf16.gmra.mrb[156].mxu1 %vm2608_vm2, %v25205_v0 }
0x1363   :  { %20633 = vmatprep.mubr.msk.bf16.mxu1 %vm25283_vm1, %v28938_v16 }
0x1364   :  { %v17484_v39 = vpack.c.bf16 %v17371_v9, %v17370_v15 }
0x1365   :  { %v16950_v24 = vpop.f32.mrb[220].mxu1 }
0x1366   :  { %v20927_v37 = vadd.f32 %v16950_v24, %v28002_v49  ;;  %v20527_v2 = vpop.f32.mrb[221].mxu1  ;;  %19840 = vmatprep.subr.bf16.mxu0 %v17484_v39 }
0x1367   :  { %v16953_v18 = vpop.f32.mrb[222].mxu1  ;;  %19841 = vmatpush3.bf16.msra.mxu0 %v28239_v45 }
0x1368   :  { %v20928_v34 = vadd.f32 %v16953_v18, %v28004_v23  ;;  %v20528_v43 = vpop.f32.mrb[223].mxu1  ;;  %v17372_v19 = vmax.f32 %v20927_v37, 0.0 }
0x136a   :  { %v17373_v6 = vmax.f32 %v20928_v34, 0.0  ;;  %20634 = vmatmul.mubr.msk.bf16.gmra.mrb[68].mxu1 %vm2608_vm2, %v25206_v44  ;;  %17686 = vmatmul.mubr.bf16.vlgmr.msra.gmra.mrb[68].mxu0 %v25215_v59 }
0x136b   :  { %20637 = vmatprep.mubr.msk.bf16.mxu1 %vm25283_vm1, %v28938_v16 }
0x136c   :  { %v28300_v49 = vpack.c.bf16 %v17373_v6, %v17372_v19 }
0x136d   :  { %v16958_v8 = vpop.f32.mrb[224].mxu1 }
0x136e   :  { %v20929_v28 = vadd.f32 %v16958_v8, %v28006_v40  ;;  %v20531_v60 = vpop.f32.mrb[225].mxu1  ;;  %v25208_v40 = vld [vmem:[#allocation2 + $0x1828] ss:$68 sps:$4 sm:$0xff]  }
0x136f   :  { %v16961_v10 = vpop.f32.mrb[226].mxu1 }
0x1370   :  { %v20930_v45 = vadd.f32 %v16961_v10, %v28008_v20  ;;  %v20532_v23 = vpop.f32.mrb[227].mxu1  ;;  %v17374_v32 = vmax.f32 %v20929_v28, 0.0 }
0x1372   :  { %v17375_v29 = vmax.f32 %v20930_v45, 0.0  ;;  %20638 = vmatmul.mubr.msk.bf16.gmra.mrb[72].mxu1 %vm2608_vm2, %v25207_v62 }
0x1373   :  { %20641 = vmatprep.mubr.msk.bf16.mxu1 %vm25283_vm1, %v28938_v16 }
0x1374   :  { %v28307_v11 = vpack.c.bf16 %v17375_v29, %v17374_v32  ;;  %v28948_v29 = vld [vmem:[#allocation98_spill] sm:$0xff] }
0x1375   :  { %v16966_v46 = vpop.f32.mrb[228].mxu1 }
0x1376   :  { %v20931_v41 = vadd.f32 %v16966_v46, %v28010_v50  ;;  %v20535_v5 = vpop.f32.mrb[229].mxu1  ;;  %v25209_v50 = vld [vmem:[#allocation2 + $0x18b0] ss:$68 sps:$4 sm:$0xff]  }
0x1377   :  { %v16969_v30 = vpop.f32.mrb[230].mxu1 }
0x1378   :  { %v20932_v13 = vadd.f32 %v16969_v30, %v28012_v7  ;;  %v20536_v36 = vpop.f32.mrb[231].mxu1  ;;  %v17376_v20 = vmax.f32 %v20931_v41, 0.0 }
0x137a   :  { %v17377_v54 = vmax.f32 %v20932_v13, 0.0  ;;  %20642 = vmatmul.mubr.msk.bf16.gmra.mrb[76].mxu1 %vm2608_vm2, %v25208_v40  ;;  %v28949_v40 = vld [vmem:[#allocation99_spill] sm:$0xff] }
0x137b   :  { %20645 = vmatprep.mubr.msk.bf16.mxu1 %vm25283_vm1, %v28938_v16 }
0x137c   :  { %v28314_v31 = vpack.c.bf16 %v17377_v54, %v17376_v20 }
0x137d   :  { %v16974_v52 = vpop.f32.mrb[232].mxu1 }
0x137e   :  { %v20933_v33 = vadd.f32 %v16974_v52, %v28946_v48  ;;  %v20539_v4 = vpop.f32.mrb[233].mxu1  ;;  %v25233_v52 = vld [vmem:[%s28617_s3 + $0x4c] ss:$36 sps:$4 sm:$0xff]  }
0x137f   :  { %v16977_v58 = vpop.f32.mrb[234].mxu1  ;;  %v25214_v4 = vld [vmem:[#allocation2 + $0x1b58] ss:$68 sps:$4 sm:$0xff]   ;;  %17693 = vmatprep.mubr.bf16.mxu0 %v25233_v52 }
0x1380   :  { %v20934_v26 = vadd.f32 %v16977_v58, %v28947_v3  ;;  %v20540_v14 = vpop.f32.mrb[235].mxu1  ;;  %v17378_v7 = vmax.f32 %v20933_v33, 0.0  ;;  %v28950_v3 = vld [vmem:[#allocation100_spill] sm:$0xff] }
0x1381   :  { %v25221_v52 = vld [vmem:[#allocation2 + $0x1d78] ss:$68 sps:$4 sm:$0xff]  }
0x1382   :  { %v17379_v47 = vmax.f32 %v20934_v26, 0.0  ;;  %20646 = vmatmul.mubr.msk.bf16.gmra.mrb[80].mxu1 %vm2608_vm2, %v25209_v50  ;;  %v25231_v50 = vld [vmem:[%s28617_s3 + $0x48] ss:$36 sps:$4 sm:$0xff]  }
0x1383   :  { %20649 = vmatprep.mubr.msk.bf16.mxu1 %vm25283_vm1, %v28938_v16  ;;  %17694 = vmatmul.mubr.bf16.gmra.mrb[72].mxu0 %v25231_v50 }
0x1384   :  { %v28321_v42 = vpack.c.bf16 %v17379_v47, %v17378_v7 }
0x1385   :  { %v16982_v51 = vpop.f32.mrb[128].mxu1 }
0x1386   :  { %v20936_v57 = vadd.f32 %v28019_v53, %v16982_v51  ;;  %v20543_v0 = vpop.f32.mrb[129].mxu1  ;;  %v25211_v53 = vld [vmem:[#allocation2 + $0x19c0] ss:$68 sps:$4 sm:$0xff]  }
0x1387   :  { %v16985_v56 = vpop.f32.mrb[130].mxu1  ;;  %v28951_v0 = vld [vmem:[#allocation101_spill] sm:$0xff] }
0x1388   :  { %v20938_v61 = vadd.f32 %v28022_v38, %v16985_v56  ;;  %v20544_v15 = vpop.f32.mrb[131].mxu1  ;;  %v17380_v9 = vmax.f32 %v20936_v57, 0.0  ;;  %v25236_v57 = vld [vmem:[%s28617_s3 + $0xc] ss:$36 sps:$4 sm:$0xff]  }
0x1389   :  { %17734 = vmatprep.mubr.bf16.mxu0 %v25236_v57 }
0x138a   :  { %v17381_v39 = vmax.f32 %v20938_v61, 0.0  ;;  %20650 = vmatmul.mubr.msk.bf16.gmra.mrb[236].mxu1 %vm2608_vm2, %v25210_v27  ;;  %v25218_v61 = vld [vmem:[#allocation2 + $0x1be0] ss:$68 sps:$4 sm:$0xff]  }
0x138b   :  { %20653 = vmatprep.mubr.msk.bf16.mxu1 %vm25283_vm1, %v28938_v16 }
0x138c   :  { %v28328_v24 = vpack.c.bf16 %v17381_v39, %v17380_v9  ;;  %v28952_v9 = vld [vmem:[#allocation102_spill] sm:$0xff] }
0x138d   :  { %v16990_v37 = vpop.f32.mrb[240].mxu1 }
0x138e   :  { %v20939_v2 = vadd.f32 %v16990_v37, %v28062_v35  ;;  %v20547_v44 = vpop.f32.mrb[241].mxu1  ;;  %v25212_v35 = vld [vmem:[#allocation2 + $0x1a48] ss:$68 sps:$4 sm:$0xff]  }
0x138f   :  { %v16993_v59 = vpop.f32.mrb[242].mxu1 }
0x1390   :  { %v20940_v18 = vadd.f32 %v16993_v59, %v28064_v63  ;;  %v20548_v34 = vpop.f32.mrb[243].mxu1  ;;  %v17382_v38 = vmax.f32 %v20939_v2, 0.0 }
0x1392   :  { %v17383_v43 = vmax.f32 %v20940_v18, 0.0  ;;  %20654 = vmatmul.mubr.msk.bf16.gmra.mrb[88].mxu1 %vm2608_vm2, %v25211_v53  ;;  %v28953_v18 = vld [vmem:[#allocation23_spill] sm:$0xff] }
0x1393   :  { %20657 = vmatprep.mubr.msk.bf16.mxu1 %vm25283_vm1, %v28938_v16 }
0x1394   :  { %v28335_v19 = vpack.c.bf16 %v17383_v43, %v17382_v38  ;;  %v25219_v43 = vld [vmem:[#allocation2 + $0x1c68] ss:$68 sps:$4 sm:$0xff]  }
0x1395   :  { %v16998_v6 = vpop.f32.mrb[244].mxu1 }
0x1396   :  { %v20941_v8 = vadd.f32 %v16998_v6, %v28066_v12  ;;  %v20551_v28 = vpop.f32.mrb[245].mxu1  ;;  %v25213_v12 = vld [vmem:[#allocation2 + $0x1ad0] ss:$68 sps:$4 sm:$0xff]  }
0x1397   :  { %v17001_v60 = vpop.f32.mrb[246].mxu1 }
0x1398   :  { %v20942_v62 = vadd.f32 %v17001_v60, %v28068_v21  ;;  %v20552_v10 = vpop.f32.mrb[247].mxu1  ;;  %v17384_v63 = vmax.f32 %v20941_v8, 0.0 }
0x139a   :  { %v17385_v45 = vmax.f32 %v20942_v62, 0.0  ;;  %20658 = vmatmul.mubr.msk.bf16.gmra.mrb[92].mxu1 %vm2608_vm2, %v25212_v35 }
0x139b   :  { %20661 = vmatprep.mubr.msk.bf16.mxu1 %vm25283_vm1, %v28938_v16 }
0x139c   :  { %v28342_v23 = vpack.c.bf16 %v17385_v45, %v17384_v63  ;;  %v28955_v63 = vld [vmem:[#allocation25_spill] sm:$0xff] }
0x139d   :  { %v17006_v32 = vpop.f32.mrb[248].mxu1 }
0x139e   :  { %v20943_v46 = vadd.f32 %v17006_v32, %v28948_v29  ;;  %v20555_v41 = vpop.f32.mrb[249].mxu1  ;;  %v25220_v29 = vld [vmem:[#allocation2 + $0x1cf0] ss:$68 sps:$4 sm:$0xff]  }
0x139f   :  { %v17009_v5 = vpop.f32.mrb[250].mxu1 }
0x13a0   :  { %v20944_v30 = vadd.f32 %v17009_v5, %v28949_v40  ;;  %v20556_v13 = vpop.f32.mrb[251].mxu1  ;;  %v17386_v21 = vmax.f32 %v20943_v46, 0.0 }
0x13a2   :  { %v17387_v36 = vmax.f32 %v20944_v30, 0.0  ;;  %20662 = vmatmul.mubr.msk.bf16.gmra.mrb[96].mxu1 %vm2608_vm2, %v25213_v12 }
0x13a3   :  { %20665 = vmatprep.mubr.msk.bf16.mxu1 %vm25283_vm1, %v28938_v16 }
0x13a4   :  { %v28349_v20 = vpack.c.bf16 %v17387_v36, %v17386_v21  ;;  %v28957_v21 = vld [vmem:[#allocation27_spill] sm:$0xff] }
0x13a5   :  { %v17014_v54 = vpop.f32.mrb[252].mxu1 }
0x13a6   :  { %v20945_v48 = vadd.f32 %v17014_v54, %v28074_v55  ;;  %v20559_v33 = vpop.f32.mrb[253].mxu1 }
0x13a7   :  { %v17017_v58 = vpop.f32.mrb[254].mxu1 }
0x13a8   :  { %v20946_v26 = vadd.f32 %v17017_v58, %v28950_v3  ;;  %v20560_v14 = vpop.f32.mrb[255].mxu1  ;;  %v17388_v7 = vmax.f32 %v20945_v48, 0.0 }
0x13a9   :  { %v28959_v14 = vld [vmem:[#allocation29_spill] sm:$0xff] }
0x13aa   :  { %v17389_v47 = vmax.f32 %v20946_v26, 0.0  ;;  %20666 = vmatmul.mubr.msk.bf16.gmra.mrb[100].mxu1 %vm2608_vm2, %v25214_v4 }
0x13ab   :  { %20669 = vmatprep.mubr.msk.bf16.mxu1 %vm25283_vm1, %v28938_v16 }
0x13ac   :  { %v17493_v55 = vpack.c.bf16 %v17389_v47, %v17388_v7 }
0x13ad   :  { %v17022_v51 = vpop.f32.mrb[148].mxu1 }
0x13ae   :  { %v20947_v27 = vadd.f32 %v17022_v51, %v28951_v0  ;;  %v20563_v56 = vpop.f32.mrb[149].mxu1  ;;  %19854 = vmatprep.subr.bf16.mxu0 %v17493_v55  ;;  %v25222_v55 = vld [vmem:[#allocation2 + $0x1e00] ss:$68 sps:$4 sm:$0xff]  }
0x13af   :  { %v17025_v15 = vpop.f32.mrb[150].mxu1  ;;  %19855 = vmatpush3.bf16.msra.mxu0 %v28300_v49  ;;  %v28954_v49 = vld [vmem:[#allocation24_spill] sm:$0xff] }
0x13b0   :  { %v20948_v39 = vadd.f32 %v17025_v15, %v28952_v9  ;;  %v20564_v37 = vpop.f32.mrb[151].mxu1  ;;  %v17390_v2 = vmax.f32 %v20947_v27, 0.0  ;;  %v28961_v9 = vld [vmem:[#allocation31_spill] sm:$0xff] }
0x13b2   :  { %v17391_v44 = vmax.f32 %v20948_v39, 0.0  ;;  %20670 = vmatmul.mubr.msk.bf16.gmra.mrb[104].mxu1 %vm2608_vm2, %v25218_v61 }
0x13b3   :  { %20673 = vmatprep.mubr.msk.bf16.mxu1 %vm25283_vm1, %v28938_v16 }
0x13b4   :  { %v17494_v53 = vpack.c.bf16 %v17391_v44, %v17390_v2  ;;  %v25223_v2 = vld [vmem:[#allocation2 + $0x1e88] ss:$68 sps:$4 sm:$0xff]  }
0x13b5   :  { %v17030_v59 = vpop.f32.mrb[0].mxu1 }
0x13b6   :  { %v20949_v34 = vadd.f32 %v17030_v59, %v28953_v18  ;;  %v20567_v38 = vpop.f32.mrb[1].mxu1  ;;  %19856 = vmatprep.subr.bf16.mxu0 %v17494_v53 }
0x13b7   :  { %v17033_v6 = vpop.f32.mrb[2].mxu1  ;;  %19857 = vmatpush3.bf16.msra.mxu0 %v28307_v11  ;;  %v28956_v11 = vld [vmem:[#allocation26_spill] sm:$0xff] }
0x13b8   :  { %v20950_v8 = vadd.f32 %v17033_v6, %v28954_v49  ;;  %v20568_v28 = vpop.f32.mrb[3].mxu1  ;;  %v17392_v35 = vmax.f32 %v20949_v34, 0.0 }
0x13ba   :  { %v17393_v60 = vmax.f32 %v20950_v8, 0.0  ;;  %20674 = vmatmul.mubr.msk.bf16.gmra.mrb[108].mxu1 %vm2608_vm2, %v25219_v43  ;;  %v25224_v8 = vld [vmem:[#allocation2 + $0x1f10] ss:$68 sps:$4 sm:$0xff]  }
0x13bb   :  { %20677 = vmatprep.mubr.msk.bf16.mxu1 %vm25283_vm1, %v28938_v16 }
0x13bc   :  { %v17495_v62 = vpack.c.bf16 %v17393_v60, %v17392_v35 }
0x13bd   :  { %v17038_v10 = vpop.f32.mrb[4].mxu1 }
0x13be   :  { %v20951_v45 = vadd.f32 %v17038_v10, %v28955_v63  ;;  %v20571_v32 = vpop.f32.mrb[5].mxu1  ;;  %19858 = vmatprep.subr.bf16.mxu0 %v17495_v62 }
0x13bf   :  { %v17041_v46 = vpop.f32.mrb[6].mxu1  ;;  %19859 = vmatpush3.bf16.msra.mxu0 %v28314_v31  ;;  %v28958_v31 = vld [vmem:[#allocation28_spill] sm:$0xff] }
0x13c0   :  { %v20952_v41 = vadd.f32 %v17041_v46, %v28956_v11  ;;  %v20572_v12 = vpop.f32.mrb[7].mxu1  ;;  %v17394_v5 = vmax.f32 %v20951_v45, 0.0  ;;  %v28963_v45 = vld [vmem:[#allocation33_spill] sm:$0xff]  ;;  %v28964_v46 = vld [vmem:[#allocation34_spill] sm:$0xff] }
0x13c2   :  { %v17395_v40 = vmax.f32 %v20952_v41, 0.0  ;;  %20678 = vmatmul.mubr.msk.bf16.gmra.mrb[112].mxu1 %vm2608_vm2, %v25220_v29  ;;  %v25225_v29 = vld [vmem:[#allocation2 + $0x1f98] ss:$68 sps:$4 sm:$0xff]  }
0x13c3   :  { %20681 = vmatprep.mubr.msk.bf16.mxu1 %vm25283_vm1, %v28938_v16 }
0x13c4   :  { %v17496_v30 = vpack.c.bf16 %v17395_v40, %v17394_v5 }
0x13c5   :  { %v17046_v13 = vpop.f32.mrb[8].mxu1 }
0x13c6   :  { %v20953_v36 = vadd.f32 %v17046_v13, %v28957_v21  ;;  %v20575_v54 = vpop.f32.mrb[9].mxu1  ;;  %19860 = vmatprep.subr.bf16.mxu0 %v17496_v30  ;;  %v28965_v13 = vld [vmem:[#allocation35_spill] sm:$0xff] }
0x13c7   :  { %v17049_v48 = vpop.f32.mrb[10].mxu1  ;;  %19861 = vmatpush3.bf16.msra.mxu0 %v28321_v42  ;;  %v28960_v42 = vld [vmem:[#allocation30_spill] sm:$0xff]  ;;  %v25226_v54 = vld [vmem:[#allocation2 + $0x2020] ss:$68 sps:$4 sm:$0xff]  }
0x13c8   :  { %v20954_v33 = vadd.f32 %v17049_v48, %v28958_v31  ;;  %v20576_v4 = vpop.f32.mrb[11].mxu1  ;;  %v17396_v50 = vmax.f32 %v20953_v36, 0.0 }
0x13ca   :  { %v17397_v58 = vmax.f32 %v20954_v33, 0.0  ;;  %20682 = vmatmul.mubr.msk.bf16.gmra.mrb[116].mxu1 %vm2608_vm2, %v25221_v52 }
0x13cb   :  { %20685 = vmatprep.mubr.msk.bf16.mxu1 %vm25283_vm1, %v28938_v16 }
0x13cc   :  { %v17497_v3 = vpack.c.bf16 %v17397_v58, %v17396_v50 }
0x13cd   :  { %v17054_v26 = vpop.f32.mrb[12].mxu1 }
0x13ce   :  { %v20955_v7 = vadd.f32 %v17054_v26, %v28959_v14  ;;  %v20579_v47 = vpop.f32.mrb[13].mxu1  ;;  %19862 = vmatprep.subr.bf16.mxu0 %v17497_v3  ;;  %v28967_v3 = vld [vmem:[#allocation37_spill] sm:$0xff] }
0x13cf   :  { %v17057_v51 = vpop.f32.mrb[14].mxu1  ;;  %19863 = vmatpush3.bf16.msra.mxu0 %v28328_v24  ;;  %v28962_v24 = vld [vmem:[#allocation32_spill] sm:$0xff] }
0x13d0   :  { %v20956_v57 = vadd.f32 %v17057_v51, %v28960_v42  ;;  %v20580_v0 = vpop.f32.mrb[15].mxu1  ;;  %v17398_v27 = vmax.f32 %v20955_v7, 0.0  ;;  %v25227_v7 = vld [vmem:[#allocation2 + $0x20a8] ss:$68 sps:$4 sm:$0xff]  }
0x13d2   :  { %v17399_v56 = vmax.f32 %v20956_v57, 0.0  ;;  %20686 = vmatmul.mubr.msk.bf16.gmra.mrb[120].mxu1 %vm2608_vm2, %v25222_v55  ;;  %v28968_v55 = vld [vmem:[#allocation38_spill] sm:$0xff] }
0x13d3   :  { %20689 = vmatprep.mubr.msk.bf16.mxu1 %vm25283_vm1, %v28938_v16 }
0x13d4   :  { %v17498_v61 = vpack.c.bf16 %v17399_v56, %v17398_v27 }
0x13d5   :  { %v17062_v15 = vpop.f32.mrb[16].mxu1 }
0x13d6   :  { %v20957_v39 = vadd.f32 %v17062_v15, %v28961_v9  ;;  %v20583_v37 = vpop.f32.mrb[17].mxu1  ;;  %19864 = vmatprep.subr.bf16.mxu0 %v17498_v61  ;;  %v28969_v61 = vld [vmem:[#allocation39_spill] sm:$0xff] }
0x13d7   :  { %v17065_v44 = vpop.f32.mrb[18].mxu1  ;;  %19865 = vmatpush3.bf16.msra.mxu0 %v28335_v19 }
0x13d8   :  { %v20958_v53 = vadd.f32 %v17065_v44, %v28962_v24  ;;  %v20584_v59 = vpop.f32.mrb[19].mxu1  ;;  %v17400_v18 = vmax.f32 %v20957_v39, 0.0  ;;  %v25228_v39 = vld [vmem:[#allocation2 + $0x2130] ss:$68 sps:$4 sm:$0xff]  }
0x13d9   :  { %v25237_v59 = vld [vmem:[%s28617_s3 + $0x50] ss:$36 sps:$4 sm:$0xff]  }
0x13da   :  { %v17401_v34 = vmax.f32 %v20958_v53, 0.0  ;;  %20690 = vmatmul.mubr.msk.bf16.gmra.mrb[124].mxu1 %vm2608_vm2, %v25223_v2  ;;  %v28970_v2 = vld [vmem:[#allocation40_spill] sm:$0xff]  ;;  %v25239_v53 = vld [vmem:[%s28617_s3 + $0x54] ss:$36 sps:$4 sm:$0xff]  }
0x13db   :  { %20693 = vmatprep.mubr.msk.bf16.mxu1 %vm25283_vm1, %v28938_v16 }
0x13dc   :  { %v17499_v38 = vpack.c.bf16 %v17401_v34, %v17400_v18 }
0x13dd   :  { %v17070_v43 = vpop.f32.mrb[172].mxu1 }
0x13de   :  { %v20960_v6 = vadd.f32 %v28083_v1, %v17070_v43  ;;  %v20587_v49 = vpop.f32.mrb[173].mxu1  ;;  %19866 = vmatprep.subr.bf16.mxu0 %v17499_v38 }
0x13df   :  { %v17073_v28 = vpop.f32.mrb[174].mxu1  ;;  %19867 = vmatpush3.bf16.msra.mxu0 %v28342_v23  ;;  %v25234_v23 = vld [vmem:[%s28617_s3 + $0x8] ss:$36 sps:$4 sm:$0xff]  }
0x13e0   :  { %v20962_v19 = vadd.f32 %v28086_v25, %v17073_v28  ;;  %v20588_v35 = vpop.f32.mrb[175].mxu1  ;;  %v17402_v60 = vmax.f32 %v20960_v6, 0.0  ;;  %v28971_v6 = vld [vmem:[#allocation41_spill] sm:$0xff]  ;;  %v25229_v28 = vld [vmem:[#allocation2 + $0x21b8] ss:$68 sps:$4 sm:$0xff]  }
0x13e1   :  { %v28972_v35 = vld [vmem:[#allocation42_spill] sm:$0xff] }
0x13e2   :  { %v17403_v62 = vmax.f32 %v20962_v19, 0.0  ;;  %20694 = vmatmul.mubr.msk.bf16.gmra.mrb[20].mxu1 %vm2608_vm2, %v25224_v8 }
0x13e3   :  { %20697 = vmatprep.mubr.msk.bf16.mxu1 %vm25283_vm1, %v28938_v16 }
0x13e4   :  { %v17500_v10 = vpack.c.bf16 %v17403_v62, %v17402_v60 }
0x13e5   :  { %v17078_v63 = vpop.f32.mrb[24].mxu1 }
0x13e6   :  { %v20963_v1 = vadd.f32 %v17078_v63, %v28963_v45  ;;  %v20591_v32 = vpop.f32.mrb[25].mxu1  ;;  %19868 = vmatprep.subr.bf16.mxu0 %v17500_v10  ;;  %v25242_v10 = vld [vmem:[%s28617_s3 + $0x14] ss:$36 sps:$4 sm:$0xff]  }
0x13e7   :  { %v17081_v25 = vpop.f32.mrb[26].mxu1  ;;  %19869 = vmatpush3.bf16.msra.mxu0 %v28349_v20  ;;  %v28966_v20 = vld [vmem:[#allocation36_spill] sm:$0xff] }
0x13e8   :  { %v20964_v11 = vadd.f32 %v17081_v25, %v28964_v46  ;;  %v20592_v41 = vpop.f32.mrb[27].mxu1  ;;  %v17404_v12 = vmax.f32 %v20963_v1, 0.0  ;;  %v25230_v46 = vld [vmem:[#allocation2 + $0x2240] ss:$0 sps:$4 sm:$0xff]  }
0x13e9   :  { %v28974_v41 = vld [vmem:[#allocation44_spill] sm:$0xff] }
0x13ea   :  { %v17405_v5 = vmax.f32 %v20964_v11, 0.0  ;;  %20698 = vmatmul.mubr.msk.bf16.gmra.mrb[132].mxu1 %vm2608_vm2, %v25225_v29  ;;  %17735 = vmatmul.mubr.bf16.vlgmr.msra.gmra.mrb[76].mxu0 %v25234_v23  ;;  %v28973_v29 = vld [vmem:[#allocation43_spill] sm:$0xff] }
0x13eb   :  { %20701 = vmatprep.mubr.msk.bf16.mxu1 %vm25283_vm1, %v28938_v16  ;;  %17742 = vmatprep.mubr.bf16.mxu0 %v25239_v53 }
0x13ec   :  { %v28416_v40 = vpack.c.bf16 %v17405_v5, %v17404_v12 }
0x13ed   :  { %v17086_v30 = vpop.f32.mrb[28].mxu1 }
0x13ee   :  { %v20965_v21 = vadd.f32 %v17086_v30, %v28965_v13  ;;  %v20595_v36 = vpop.f32.mrb[29].mxu1 }
0x13ef   :  { %v17089_v52 = vpop.f32.mrb[30].mxu1 }
0x13f0   :  { %v20966_v48 = vadd.f32 %v17089_v52, %v28966_v20  ;;  %v20596_v31 = vpop.f32.mrb[31].mxu1  ;;  %v17406_v33 = vmax.f32 %v20965_v21, 0.0 }
0x13f2   :  { %v17407_v4 = vmax.f32 %v20966_v48, 0.0  ;;  %20702 = vmatmul.mubr.msk.bf16.gmra.mrb[136].mxu1 %vm2608_vm2, %v25226_v54  ;;  %17743 = vmatmul.mubr.bf16.gmra.mrb[80].mxu0 %v25237_v59  ;;  %v28975_v54 = vld [vmem:[#allocation45_spill] sm:$0xff]  ;;  %v28976_v48 = vld [vmem:[#allocation46_spill] sm:$0xff] }
0x13f3   :  { %20705 = vmatprep.mubr.msk.bf16.mxu1 %vm25283_vm1, %v28938_v16  ;;  %17783 = vmatprep.mubr.bf16.mxu0 %v25242_v10 }
0x13f4   :  { %v28423_v50 = vpack.c.bf16 %v17407_v4, %v17406_v33 }
0x13f5   :  { %v17094_v58 = vpop.f32.mrb[32].mxu1 }
0x13f6   :  { %v20967_v26 = vadd.f32 %v17094_v58, %v28967_v3  ;;  %v20599_v14 = vpop.f32.mrb[33].mxu1 }
0x13f7   :  { %v17097_v47 = vpop.f32.mrb[34].mxu1  ;;  %v28977_v14 = vld [vmem:[#allocation47_spill] sm:$0xff] }
0x13f8   :  { %v20968_v51 = vadd.f32 %v17097_v47, %v28968_v55  ;;  %v20600_v42 = vpop.f32.mrb[35].mxu1  ;;  %v17408_v57 = vmax.f32 %v20967_v26, 0.0 }
0x13fa   :  { %v17409_v0 = vmax.f32 %v20968_v51, 0.0  ;;  %20706 = vmatmul.mubr.msk.bf16.gmra.mrb[140].mxu1 %vm2608_vm2, %v25227_v7  ;;  %v28978_v51 = vld [vmem:[#allocation48_spill] sm:$0xff] }
0x13fb   :  { %20709 = vmatprep.mubr.msk.bf16.mxu1 %vm25283_vm1, %v28938_v16 }
0x13fc   :  { %v28430_v27 = vpack.c.bf16 %v17409_v0, %v17408_v57 }
0x13fd   :  { %v17102_v56 = vpop.f32.mrb[36].mxu1 }
0x13fe   :  { %v20969_v15 = vadd.f32 %v17102_v56, %v28969_v61  ;;  %v20603_v9 = vpop.f32.mrb[37].mxu1 }
0x13ff   :  { %v17105_v37 = vpop.f32.mrb[38].mxu1  ;;  %v28979_v9 = vld [vmem:[#allocation49_spill] sm:$0xff] }
0x1400   :  { %v20970_v44 = vadd.f32 %v17105_v37, %v28970_v2  ;;  %v20604_v24 = vpop.f32.mrb[39].mxu1  ;;  %v17410_v18 = vmax.f32 %v20969_v15, 0.0 }
0x1402   :  { %v17411_v34 = vmax.f32 %v20970_v44, 0.0  ;;  %20710 = vmatmul.mubr.msk.bf16.gmra.mrb[144].mxu1 %vm2608_vm2, %v25228_v39  ;;  %v28980_v44 = vld [vmem:[#allocation50_spill] sm:$0xff] }
0x1403   :  { %20713 = vmatprep.mubr.msk.bf16.mxu1 %vm25283_vm1, %v28938_v16 }
0x1404   :  { %v28443_v38 = vpack.c.bf16 %v17411_v34, %v17410_v18 }
0x1405   :  { %v17110_v43 = vpop.f32.mrb[192].mxu1 }
0x1406   :  { %v20972_v49 = vadd.f32 %v28971_v6, %v17110_v43  ;;  %v20607_v8 = vpop.f32.mrb[193].mxu1  ;;  %v28981_v6 = vld [vmem:[#allocation51_spill] sm:$0xff] }
0x1407   :  { %v17113_v19 = vpop.f32.mrb[194].mxu1 }
0x1408   :  { %v20974_v60 = vadd.f32 %v28972_v35, %v17113_v19  ;;  %v20608_v62 = vpop.f32.mrb[195].mxu1  ;;  %v17412_v63 = vmax.f32 %v20972_v49, 0.0  ;;  %v28982_v19 = vld [vmem:[#allocation52_spill] sm:$0xff] }
0x140a   :  { %v17413_v45 = vmax.f32 %v20974_v60, 0.0  ;;  %20714 = vmatmul.mubr.msk.bf16.gmra.mrb[40].mxu1 %vm2608_vm2, %v25229_v28 }
0x140b   :  { %20717 = vmatprep.mubr.msk.bf16.mxu1 %vm25283_vm1, %v28938_v16 }
0x140c   :  { %v28453_v1 = vpack.c.bf16 %v17413_v45, %v17412_v63 }
0x140d   :  { %v17118_v32 = vpop.f32.mrb[44].mxu1 }
0x140e   :  { %v20976_v23 = vadd.f32 %v17118_v32, %v28973_v29  ;;  %v20611_v25 = vpop.f32.mrb[45].mxu1 }
0x140f   :  { %v17121_v11 = vpop.f32.mrb[46].mxu1 }
0x1410   :  { %v20978_v12 = vadd.f32 %v17121_v11, %v28974_v41  ;;  %v20612_v5 = vpop.f32.mrb[47].mxu1  ;;  %v17414_v30 = vmax.f32 %v20976_v23, 0.0 }
0x1411   :  { %v28983_v5 = vld [vmem:[#allocation53_spill] sm:$0xff] }
0x1412   :  { %v17415_v13 = vmax.f32 %v20978_v12, 0.0  ;;  %20718 = vmatmul.mubr.msk.bf16.gmra.mrb[152].mxu1 %vm2608_vm2, %v25230_v46 }
0x1414   :  { %v28458_v21 = vpack.c.bf16 %v17415_v13, %v17414_v30 }
0x1415   :  { %v17126_v36 = vpop.f32.mrb[48].mxu1 }
0x1416   :  { %v20979_v16 = vadd.f32 %v17126_v36, %v28975_v54  ;;  %v20615_v52 = vpop.f32.mrb[49].mxu1 }
0x1417   :  { %v17129_v20 = vpop.f32.mrb[50].mxu1 }
0x1418   :  { %v20980_v31 = vadd.f32 %v17129_v20, %v28976_v48  ;;  %v20616_v33 = vpop.f32.mrb[51].mxu1  ;;  %v17416_v4 = vmax.f32 %v20979_v16, 0.0 }
0x141a   :  { %v17417_v58 = vmax.f32 %v20980_v31, 0.0 }
0x141c   :  { %v28462_v3 = vpack.c.bf16 %v17417_v58, %v17416_v4  ;;  %v28986_v58 = vld [vmem:[#allocation56_spill] sm:$0xff] }
0x141d   :  { %v17134_v26 = vpop.f32.mrb[52].mxu1 }
0x141e   :  { %v20981_v7 = vadd.f32 %v17134_v26, %v28977_v14  ;;  %v20619_v47 = vpop.f32.mrb[53].mxu1 }
0x141f   :  { %v17137_v55 = vpop.f32.mrb[54].mxu1 }
0x1420   :  { %v20982_v42 = vadd.f32 %v17137_v55, %v28978_v51  ;;  %v20620_v57 = vpop.f32.mrb[55].mxu1  ;;  %v17418_v0 = vmax.f32 %v20981_v7, 0.0  ;;  %v28987_v51 = vld [vmem:[#allocation57_spill] sm:$0xff] }
0x1422   :  { %v17419_v56 = vmax.f32 %v20982_v42, 0.0 }
0x1424   :  { %v28466_v61 = vpack.c.bf16 %v17419_v56, %v17418_v0  ;;  %v28988_v56 = vld [vmem:[#allocation58_spill] sm:$0xff] }
0x1425   :  { %v17142_v15 = vpop.f32.mrb[56].mxu1 }
0x1426   :  { %v20983_v39 = vadd.f32 %v17142_v15, %v28979_v9  ;;  %v20623_v37 = vpop.f32.mrb[57].mxu1 }
0x1427   :  { %v17145_v2 = vpop.f32.mrb[58].mxu1 }
0x1428   :  { %v20984_v24 = vadd.f32 %v17145_v2, %v28980_v44  ;;  %v20624_v53 = vpop.f32.mrb[59].mxu1  ;;  %v17420_v59 = vmax.f32 %v20983_v39, 0.0  ;;  %v28989_v44 = vld [vmem:[#allocation59_spill] sm:$0xff] }
0x142a   :  { %v17421_v18 = vmax.f32 %v20984_v24, 0.0 }
0x142c   :  { %v17509_v34 = vpack.c.bf16 %v17421_v18, %v17420_v59  ;;  %v28990_v18 = vld [vmem:[#allocation60_spill] sm:$0xff] }
0x142d   :  { %v17150_v43 = vpop.f32.mrb[60].mxu1 }
0x142e   :  { %v20985_v49 = vadd.f32 %v17150_v43, %v28981_v6  ;;  %v20627_v8 = vpop.f32.mrb[61].mxu1  ;;  %19882 = vmatprep.subr.bf16.mxu0 %v17509_v34 }
0x142f   :  { %v17153_v28 = vpop.f32.mrb[62].mxu1  ;;  %19883 = vmatpush3.bf16.msra.mxu0 %v28416_v40 }
0x1430   :  { %v20986_v35 = vadd.f32 %v17153_v28, %v28982_v19  ;;  %v20628_v60 = vpop.f32.mrb[63].mxu1  ;;  %v17422_v62 = vmax.f32 %v20985_v49, 0.0  ;;  %v28991_v28 = vld [vmem:[#allocation61_spill] sm:$0xff] }
0x1432   :  { %v17423_v10 = vmax.f32 %v20986_v35, 0.0 }
0x1434   :  { %v17510_v63 = vpack.c.bf16 %v17423_v10, %v17422_v62  ;;  %v28992_v62 = vld [vmem:[#allocation62_spill] sm:$0xff] }
0x1435   :  { %v17158_v45 = vpop.f32.mrb[156].mxu1 }
0x1436   :  { %v20988_v32 = vadd.f32 %v28111_v17, %v17158_v45  ;;  %v20631_v29 = vpop.f32.mrb[157].mxu1  ;;  %19884 = vmatprep.subr.bf16.mxu0 %v17510_v63  ;;  %v28984_v17 = vld [vmem:[#allocation54_spill] sm:$0xff] }
0x1437   :  { %v17161_v23 = vpop.f32.mrb[158].mxu1  ;;  %19885 = vmatpush3.bf16.msra.mxu0 %v28423_v50 }
0x1438   :  { %v20990_v25 = vadd.f32 %v28114_v22, %v17161_v23  ;;  %v20632_v46 = vpop.f32.mrb[159].mxu1  ;;  %v17424_v11 = vmax.f32 %v20988_v32, 0.0  ;;  %v28985_v22 = vld [vmem:[#allocation55_spill] sm:$0xff] }
0x1439   :  { %v28993_v23 = vld [vmem:[#allocation63_spill] sm:$0xff] }
0x143a   :  { %v17425_v41 = vmax.f32 %v20990_v25, 0.0 }
0x143c   :  { %v17511_v40 = vpack.c.bf16 %v17425_v41, %v17424_v11  ;;  %v25240_v11 = vld [vmem:[%s28617_s3 + $0x10] ss:$36 sps:$4 sm:$0xff]  }
0x143d   :  { %v17166_v12 = vpop.f32.mrb[68].mxu1 }
0x143e   :  { %v20991_v30 = vadd.f32 %v17166_v12, %v28983_v5  ;;  %v20635_v13 = vpop.f32.mrb[69].mxu1  ;;  %19886 = vmatprep.subr.bf16.mxu0 %v17511_v40  ;;  %v28994_v40 = vld [vmem:[#allocation64_spill] sm:$0xff] }
0x143f   :  { %v17169_v36 = vpop.f32.mrb[70].mxu1  ;;  %19887 = vmatpush3.bf16.msra.mxu0 %v28430_v27 }
0x1440   :  { %v20992_v54 = vadd.f32 %v17169_v36, %v28984_v17  ;;  %v20636_v16 = vpop.f32.mrb[71].mxu1  ;;  %v17426_v52 = vmax.f32 %v20991_v30, 0.0 }
0x1442   :  { %v17427_v20 = vmax.f32 %v20992_v54, 0.0  ;;  %v28995_v54 = vld [vmem:[#allocation65_spill] sm:$0xff] }
0x1444   :  { %v17512_v50 = vpack.c.bf16 %v17427_v20, %v17426_v52 }
0x1445   :  { %v17174_v48 = vpop.f32.mrb[72].mxu1 }
0x1446   :  { %v20993_v31 = vadd.f32 %v17174_v48, %v28985_v22  ;;  %v20639_v33 = vpop.f32.mrb[73].mxu1  ;;  %19888 = vmatprep.subr.bf16.mxu0 %v17512_v50  ;;  %v25248_v50 = vld [vmem:[%s28617_s3 + $0x1c] ss:$36 sps:$4 sm:$0xff]  }
0x1447   :  { %v17177_v4 = vpop.f32.mrb[74].mxu1  ;;  %19889 = vmatpush3.bf16.msra.mxu0 %v28443_v38  ;;  %v28996_v48 = vld [vmem:[#allocation66_spill] sm:$0xff] }
0x1448   :  { %v20994_v26 = vadd.f32 %v17177_v4, %v28986_v58  ;;  %v20640_v14 = vpop.f32.mrb[75].mxu1  ;;  %v17428_v7 = vmax.f32 %v20993_v31, 0.0 }
0x1449   :  { %v28997_v14 = vld [vmem:[#allocation67_spill] sm:$0xff] }
0x144a   :  { %v17429_v47 = vmax.f32 %v20994_v26, 0.0 }
0x144c   :  { %v17513_v27 = vpack.c.bf16 %v17429_v47, %v17428_v7 }
0x144d   :  { %v17182_v55 = vpop.f32.mrb[76].mxu1 }
0x144e   :  { %v20995_v42 = vadd.f32 %v17182_v55, %v28987_v51  ;;  %v20643_v57 = vpop.f32.mrb[77].mxu1  ;;  %19890 = vmatprep.subr.bf16.mxu0 %v17513_v27  ;;  %v28998_v55 = vld [vmem:[#allocation68_spill] sm:$0xff] }
0x144f   :  { %v17185_v0 = vpop.f32.mrb[78].mxu1  ;;  %19891 = vmatpush3.bf16.msra.mxu0 %v28453_v1 }
0x1450   :  { %v20996_v15 = vadd.f32 %v17185_v0, %v28988_v56  ;;  %v20644_v9 = vpop.f32.mrb[79].mxu1  ;;  %v17430_v39 = vmax.f32 %v20995_v42, 0.0  ;;  %v19842_v56 = vpop.f32.mrb[68].mxu0 }
0x1452   :  { %v17431_v37 = vmax.f32 %v20996_v15, 0.0  ;;  %v19843_v15 = vpop.f32.mrb[69].mxu0 }
0x1454   :  { %v17514_v38 = vpack.c.bf16 %v17431_v37, %v17430_v39  ;;  %v28516_v39 = vadd.f32 %v19843_v15, %v19842_v56  ;;  %v19845_v37 = vpop.f32.mrb[70].mxu0  ;;  %v29008_v56 = vld [vmem:[#allocation78_spill] sm:$0xff] }
0x1455   :  { %v17190_v2 = vpop.f32.mrb[80].mxu1 }
0x1456   :  { %v20997_v24 = vadd.f32 %v17190_v2, %v28989_v44  ;;  %v20647_v53 = vpop.f32.mrb[81].mxu1  ;;  %19892 = vmatprep.subr.bf16.mxu0 %v17514_v38  ;;  %v19846_v2 = vpop.f32.mrb[71].mxu0  ;;  %v28999_v44 = vld [vmem:[#allocation69_spill] sm:$0xff] }
0x1457   :  { %v17193_v59 = vpop.f32.mrb[82].mxu1  ;;  %19893 = vmatpush3.bf16.msra.mxu0 %v28458_v21 }
0x1458   :  { %v20998_v34 = vadd.f32 %v17193_v59, %v28990_v18  ;;  %v20648_v43 = vpop.f32.mrb[83].mxu1  ;;  %v17432_v6 = vmax.f32 %v20997_v24, 0.0  ;;  %v28519_v59 = vadd.f32 %v19846_v2, %v19845_v37  ;;  %v19848_v18 = vpop.f32.mrb[72].mxu0 }
0x1459   :  { %v19849_v43 = vpop.f32.mrb[73].mxu0 }
0x145a   :  { %v17433_v49 = vmax.f32 %v20998_v34, 0.0 }
0x145c   :  { %v17515_v1 = vpack.c.bf16 %v17433_v49, %v17432_v6  ;;  %v29000_v6 = vld [vmem:[#allocation70_spill] sm:$0xff] }
0x145d   :  { %v17198_v8 = vpop.f32.mrb[236].mxu1 }
0x145e   :  { %v21000_v19 = vadd.f32 %v28991_v28, %v17198_v8  ;;  %v20651_v35 = vpop.f32.mrb[237].mxu1  ;;  %19894 = vmatprep.subr.bf16.mxu0 %v17515_v1  ;;  %v28522_v8 = vadd.f32 %v19849_v43, %v19848_v18  ;;  %v19851_v28 = vpop.f32.mrb[74].mxu0 }
0x145f   :  { %v17201_v60 = vpop.f32.mrb[238].mxu1  ;;  %19895 = vmatpush3.bf16.msra.mxu0 %v28462_v3  ;;  %v25245_v3 = vld [vmem:[%s28617_s3 + $0x5c] ss:$36 sps:$4 sm:$0xff]  }
0x1460   :  { %v21002_v10 = vadd.f32 %v28992_v62, %v17201_v60  ;;  %v20652_v63 = vpop.f32.mrb[239].mxu1  ;;  %v17434_v45 = vmax.f32 %v21000_v19, 0.0  ;;  %v19852_v19 = vpop.f32.mrb[75].mxu0 }
0x1461   :  { %v28524_v62 = vadd.f32 %v19852_v19, %v19851_v28 }
0x1462   :  { %v17435_v32 = vmax.f32 %v21002_v10, 0.0 }
0x1464   :  { %v17516_v21 = vpack.c.bf16 %v17435_v32, %v17434_v45  ;;  %v29001_v45 = vld [vmem:[#allocation71_spill] sm:$0xff] }
0x1465   :  { %v17206_v29 = vpop.f32.mrb[88].mxu1 }
0x1466   :  { %v21003_v25 = vadd.f32 %v17206_v29, %v28993_v23  ;;  %v20655_v46 = vpop.f32.mrb[89].mxu1  ;;  %19896 = vmatprep.subr.bf16.mxu0 %v17516_v21  ;;  %v29002_v23 = vld [vmem:[#allocation72_spill] sm:$0xff] }
0x1467   :  { %v17209_v41 = vpop.f32.mrb[90].mxu1  ;;  %19897 = vmatpush3.bf16.msra.mxu0 %v28466_v61  ;;  %v25243_v61 = vld [vmem:[%s28617_s3 + $0x58] ss:$36 sps:$4 sm:$0xff]  }
0x1468   :  { %v21004_v12 = vadd.f32 %v17209_v41, %v28994_v40  ;;  %v20656_v5 = vpop.f32.mrb[91].mxu1  ;;  %v17436_v30 = vmax.f32 %v21003_v25, 0.0 }
0x146a   :  { %v17437_v13 = vmax.f32 %v21004_v12, 0.0  ;;  %17784 = vmatmul.mubr.bf16.vlgmr.msra.gmra.mrb[84].mxu0 %v25240_v11  ;;  %v29003_v12 = vld [vmem:[#allocation73_spill] sm:$0xff] }
0x146b   :  { %17791 = vmatprep.mubr.bf16.mxu0 %v25245_v3 }
0x146c   :  { %v28500_v36 = vpack.c.bf16 %v17437_v13, %v17436_v30 }
0x146d   :  { %v17214_v17 = vpop.f32.mrb[92].mxu1 }
0x146e   :  { %v21005_v16 = vadd.f32 %v17214_v17, %v28995_v54  ;;  %v20659_v52 = vpop.f32.mrb[93].mxu1  ;;  %v29004_v17 = vld [vmem:[#allocation74_spill] sm:$0xff] }
0x146f   :  { %v17217_v20 = vpop.f32.mrb[94].mxu1 }
0x1470   :  { %v21006_v22 = vadd.f32 %v17217_v20, %v28996_v48  ;;  %v20660_v31 = vpop.f32.mrb[95].mxu1  ;;  %v17438_v33 = vmax.f32 %v21005_v16, 0.0  ;;  %v29005_v48 = vld [vmem:[#allocation75_spill] sm:$0xff] }
0x1472   :  { %v17439_v4 = vmax.f32 %v21006_v22, 0.0  ;;  %17792 = vmatmul.mubr.bf16.gmra.mrb[88].mxu0 %v25243_v61 }
0x1473   :  { %17832 = vmatprep.mubr.bf16.mxu0 %v25248_v50 }
0x1474   :  { %v28510_v58 = vpack.c.bf16 %v17439_v4, %v17438_v33  ;;  %v29006_v4 = vld [vmem:[#allocation76_spill] sm:$0xff] }
0x1475   :  { %v17222_v26 = vpop.f32.mrb[96].mxu1 }
0x1476   :  { %v21007_v7 = vadd.f32 %v17222_v26, %v28997_v14  ;;  %v20663_v47 = vpop.f32.mrb[97].mxu1 }
0x1477   :  { %v17225_v27 = vpop.f32.mrb[98].mxu1 }
0x1478   :  { %v21008_v51 = vadd.f32 %v17225_v27, %v28998_v55  ;;  %v20664_v42 = vpop.f32.mrb[99].mxu1  ;;  %v17440_v57 = vmax.f32 %v21007_v7, 0.0 }
0x147a   :  { %v17441_v0 = vmax.f32 %v21008_v51, 0.0  ;;  %v29007_v51 = vld [vmem:[#allocation77_spill] sm:$0xff] }
0x147c   :  { %v28514_v9 = vpack.c.bf16 %v17441_v0, %v17440_v57 }
0x147d   :  { %v17230_v38 = vpop.f32.mrb[100].mxu1 }
0x147e   :  { %v21009_v24 = vadd.f32 %v17230_v38, %v28999_v44  ;;  %v20667_v53 = vpop.f32.mrb[101].mxu1 }
0x147f   :  { %v17233_v34 = vpop.f32.mrb[102].mxu1  ;;  %v29009_v53 = vld [vmem:[#allocation79_spill] sm:$0xff] }
0x1480   :  { %v21010_v49 = vadd.f32 %v17233_v34, %v29000_v6  ;;  %v20668_v1 = vpop.f32.mrb[103].mxu1  ;;  %v17442_v35 = vmax.f32 %v21009_v24, 0.0  ;;  %v29010_v6 = vld [vmem:[#allocation80_spill] sm:$0xff] }
0x1482   :  { %v17443_v60 = vmax.f32 %v21010_v49, 0.0 }
0x1484   :  { %v28526_v10 = vpack.c.bf16 %v17443_v60, %v17442_v35 }
0x1485   :  { %v17238_v63 = vpop.f32.mrb[104].mxu1 }
0x1486   :  { %v21011_v32 = vadd.f32 %v17238_v63, %v29001_v45  ;;  %v20671_v21 = vpop.f32.mrb[105].mxu1  ;;  %v29011_v63 = vld [vmem:[#allocation81_spill] sm:$0xff] }
0x1487   :  { %v17241_v29 = vpop.f32.mrb[106].mxu1 }
0x1488   :  { %v21012_v25 = vadd.f32 %v17241_v29, %v29002_v23  ;;  %v20672_v46 = vpop.f32.mrb[107].mxu1  ;;  %v17444_v11 = vmax.f32 %v21011_v32, 0.0  ;;  %v29012_v29 = vld [vmem:[#allocation82_spill] sm:$0xff] }
0x148a   :  { %v17445_v41 = vmax.f32 %v21012_v25, 0.0 }
0x148c   :  { %v28530_v3 = vpack.c.bf16 %v17445_v41, %v17444_v11 }
0x148d   :  { %v17246_v40 = vpop.f32.mrb[108].mxu1 }
0x148e   :  { %v21013_v5 = vadd.f32 %v17246_v40, %v29003_v12  ;;  %v20675_v30 = vpop.f32.mrb[109].mxu1  ;;  %v29013_v12 = vld [vmem:[#allocation96_spill] sm:$0xff] }
0x148f   :  { %v17249_v13 = vpop.f32.mrb[110].mxu1 }
0x1490   :  { %v21014_v54 = vadd.f32 %v17249_v13, %v29004_v17  ;;  %v20676_v16 = vpop.f32.mrb[111].mxu1  ;;  %v17446_v52 = vmax.f32 %v21013_v5, 0.0  ;;  %v29014_v17 = vld [vmem:[#allocation97_spill] sm:$0xff] }
0x1492   :  { %v17447_v61 = vmax.f32 %v21014_v54, 0.0 }
0x1494   :  { %v28534_v20 = vpack.c.bf16 %v17447_v61, %v17446_v52 }
0x1495   :  { %v17254_v50 = vpop.f32.mrb[112].mxu1 }
0x1496   :  { %v21015_v22 = vadd.f32 %v17254_v50, %v29005_v48  ;;  %v20679_v31 = vpop.f32.mrb[113].mxu1 }
0x1497   :  { %v17257_v33 = vpop.f32.mrb[114].mxu1 }
0x1498   :  { %v21016_v26 = vadd.f32 %v17257_v33, %v29006_v4  ;;  %v20680_v14 = vpop.f32.mrb[115].mxu1  ;;  %v17448_v7 = vmax.f32 %v21015_v22, 0.0  ;;  %v29015_v22 = vld [vmem:[#allocation83_spill] sm:$0xff] }
0x149a   :  { %v17449_v47 = vmax.f32 %v21016_v26, 0.0 }
0x149c   :  { %v28538_v27 = vpack.c.bf16 %v17449_v47, %v17448_v7  ;;  %v29016_v47 = vld [vmem:[#allocation84_spill] sm:$0xff] }
0x149d   :  { %v17262_v55 = vpop.f32.mrb[116].mxu1 }
0x149e   :  { %v21017_v42 = vadd.f32 %v17262_v55, %v29007_v51  ;;  %v20683_v57 = vpop.f32.mrb[117].mxu1 }
0x149f   :  { %v17265_v0 = vpop.f32.mrb[118].mxu1 }
0x14a0   :  { %v21018_v15 = vadd.f32 %v17265_v0, %v29008_v56  ;;  %v20684_v37 = vpop.f32.mrb[119].mxu1  ;;  %v17450_v38 = vmax.f32 %v21017_v42, 0.0 }
0x14a2   :  { %v17451_v2 = vmax.f32 %v21018_v15, 0.0 }
0x14a4   :  { %v28542_v44 = vpack.c.bf16 %v17451_v2, %v17450_v38  ;;  %v29017_v2 = vld [vmem:[#allocation85_spill] sm:$0xff] }
0x14a5   :  { %v17270_v24 = vpop.f32.mrb[120].mxu1 }
0x14a6   :  { %v21019_v18 = vadd.f32 %v17270_v24, %v29009_v53  ;;  %v20687_v34 = vpop.f32.mrb[121].mxu1 }
0x14a7   :  { %v17273_v43 = vpop.f32.mrb[122].mxu1 }
0x14a8   :  { %v21020_v49 = vadd.f32 %v17273_v43, %v29010_v6  ;;  %v20688_v1 = vpop.f32.mrb[123].mxu1  ;;  %v17452_v28 = vmax.f32 %v21019_v18, 0.0  ;;  %v29018_v18 = vld [vmem:[#allocation86_spill] sm:$0xff] }
0x14aa   :  { %v17453_v19 = vmax.f32 %v21020_v49, 0.0 }
0x14ac   :  { %v17525_v35 = vpack.c.bf16 %v17453_v19, %v17452_v28  ;;  %v29019_v28 = vld [vmem:[#allocation87_spill] sm:$0xff] }
0x14ad   :  { %v17278_v60 = vpop.f32.mrb[124].mxu1 }
0x14ae   :  { %v21021_v45 = vadd.f32 %v17278_v60, %v29011_v63  ;;  %v20691_v32 = vpop.f32.mrb[125].mxu1  ;;  %19910 = vmatprep.subr.bf16.mxu0 %v17525_v35  ;;  %v29020_v60 = vld [vmem:[#allocation88_spill] sm:$0xff] }
0x14af   :  { %v17281_v21 = vpop.f32.mrb[126].mxu1  ;;  %19911 = vmatpush3.bf16.msra.mxu0 %v28500_v36 }
0x14b0   :  { %v21022_v23 = vadd.f32 %v17281_v21, %v29012_v29  ;;  %v20692_v25 = vpop.f32.mrb[127].mxu1  ;;  %v17454_v46 = vmax.f32 %v21021_v45, 0.0 }
0x14b2   :  { %v17455_v11 = vmax.f32 %v21022_v23, 0.0  ;;  %v29021_v23 = vld [vmem:[#allocation89_spill] sm:$0xff] }
0x14b4   :  { %v17526_v41 = vpack.c.bf16 %v17455_v11, %v17454_v46 }
0x14b5   :  { %v17286_v40 = vpop.f32.mrb[20].mxu1 }
0x14b6   :  { %v21024_v5 = vadd.f32 %v29013_v12, %v17286_v40  ;;  %v20695_v30 = vpop.f32.mrb[21].mxu1  ;;  %19912 = vmatprep.subr.bf16.mxu0 %v17526_v41  ;;  %v29022_v12 = vld [vmem:[#allocation90_spill] sm:$0xff] }
0x14b7   :  { %v17289_v13 = vpop.f32.mrb[22].mxu1  ;;  %19913 = vmatpush3.bf16.msra.mxu0 %v28510_v58 }
0x14b8   :  { %v21026_v54 = vadd.f32 %v29014_v17, %v17289_v13  ;;  %v20696_v16 = vpop.f32.mrb[23].mxu1  ;;  %v17456_v52 = vmax.f32 %v21024_v5, 0.0 }
0x14ba   :  { %v17457_v61 = vmax.f32 %v21026_v54, 0.0 }
0x14bc   :  { %v17527_v36 = vpack.c.bf16 %v17457_v61, %v17456_v52 }
0x14bd   :  { %v17294_v50 = vpop.f32.mrb[132].mxu1  ;;  %v19870_v48 = vpop.f32.mrb[76].mxu0 }
0x14be   :  { %v21027_v31 = vadd.f32 %v17294_v50, %v29015_v22  ;;  %v20699_v33 = vpop.f32.mrb[133].mxu1  ;;  %19914 = vmatprep.subr.bf16.mxu0 %v17527_v36  ;;  %v19871_v4 = vpop.f32.mrb[77].mxu0  ;;  %v29023_v22 = vld [vmem:[#allocation91_spill] sm:$0xff] }
0x14bf   :  { %v17297_v26 = vpop.f32.mrb[134].mxu1  ;;  %19915 = vmatpush3.bf16.msra.mxu0 %v28514_v9  ;;  %v19872_v14 = vadd.f32 %v19871_v4, %v19870_v48  ;;  %v19873_v7 = vpop.f32.mrb[78].mxu0  ;;  %v29024_v4 = vld [vmem:[#allocation92_spill] sm:$0xff] }
0x14c0   :  { %v21028_v58 = vadd.f32 %v17297_v26, %v29016_v47  ;;  %v20700_v55 = vpop.f32.mrb[135].mxu1  ;;  %v19874_v51 = vpop.f32.mrb[79].mxu0  ;;  %v17458_v0 = vmax.f32 %v21027_v31, 0.0 }
0x14c1   :  { %v28556_v42 = vadd.f32 %v19872_v14, %v28516_v39  ;;  %v19875_v57 = vadd.f32 %v19874_v51, %v19873_v7 }
0x14c2   :  { %v17459_v56 = vmax.f32 %v21028_v58, 0.0 }
0x14c3   :  { %v28559_v15 = vadd.f32 %v19875_v57, %v28519_v59 }
0x14c4   :  { %v17528_v37 = vpack.c.bf16 %v17459_v56, %v17458_v0 }
0x14c5   :  { %v17302_v38 = vpop.f32.mrb[136].mxu1  ;;  %v19876_v11 = vpop.f32.mrb[80].mxu0 }
0x14c6   :  { %v21029_v24 = vadd.f32 %v17302_v38, %v29017_v2  ;;  %v20703_v9 = vpop.f32.mrb[137].mxu1  ;;  %19916 = vmatprep.subr.bf16.mxu0 %v17528_v37  ;;  %v19877_v40 = vpop.f32.mrb[81].mxu0 }
0x14c7   :  { %v17305_v53 = vpop.f32.mrb[138].mxu1  ;;  %19917 = vmatpush3.bf16.msra.mxu0 %v28526_v10  ;;  %v19879_v13 = vpop.f32.mrb[82].mxu0  ;;  %v25253_v9 = vld [vmem:[%s28617_s3 + $0x68] ss:$36 sps:$4 sm:$0xff]  }
0x14c8   :  { %v21030_v34 = vadd.f32 %v17305_v53, %v29018_v18  ;;  %v20704_v43 = vpop.f32.mrb[139].mxu1  ;;  %v17460_v39 = vmax.f32 %v21029_v24, 0.0  ;;  %v19880_v17 = vpop.f32.mrb[83].mxu0  ;;  %v25249_v24 = vld [vmem:[%s28617_s3 + $0x60] ss:$36 sps:$4 sm:$0xff]  }
0x14c9   :  { %v19881_v61 = vadd.f32 %v19880_v17, %v19879_v13 }
0x14ca   :  { %v17461_v6 = vmax.f32 %v21030_v34, 0.0 }
0x14cb   :  { %v17748_v50 = vadd.f32 %v19881_v61, %v28524_v62  ;;  %v25246_v62 = vld [vmem:[%s28617_s3 + $0x18] ss:$36 sps:$4 sm:$0xff]  }
0x14cc   :  { %v17529_v49 = vpack.c.bf16 %v17461_v6, %v17460_v39 }
0x14cd   :  { %v17310_v1 = vpop.f32.mrb[140].mxu1 }
0x14ce   :  { %v21031_v19 = vadd.f32 %v17310_v1, %v29019_v28  ;;  %v20707_v59 = vpop.f32.mrb[141].mxu1  ;;  %19918 = vmatprep.subr.bf16.mxu0 %v17529_v49 }
0x14cf   :  { %v17313_v35 = vpop.f32.mrb[142].mxu1  ;;  %19919 = vmatpush3.bf16.msra.mxu0 %v28530_v3  ;;  %v19878_v3 = vadd.f32 %v19877_v40, %v19876_v11 }
0x14d0   :  { %v21032_v63 = vadd.f32 %v17313_v35, %v29020_v60  ;;  %v20708_v45 = vpop.f32.mrb[143].mxu1  ;;  %v17462_v32 = vmax.f32 %v21031_v19, 0.0 }
0x14d1   :  { %v17745_v52 = vadd.f32 %v19878_v3, %v28522_v8  ;;  %v29025_v8 = vld [vmem:[#allocation93_spill] sm:$0xff] }
0x14d2   :  { %v17463_v21 = vmax.f32 %v21032_v63, 0.0 }
0x14d4   :  { %v17530_v10 = vpack.c.bf16 %v17463_v21, %v17462_v32 }
0x14d5   :  { %v17318_v29 = vpop.f32.mrb[144].mxu1 }
0x14d6   :  { %v21033_v25 = vadd.f32 %v17318_v29, %v29021_v23  ;;  %v20711_v46 = vpop.f32.mrb[145].mxu1  ;;  %19920 = vmatprep.subr.bf16.mxu0 %v17530_v10 }
0x14d7   :  { %v17321_v41 = vpop.f32.mrb[146].mxu1  ;;  %19921 = vmatpush3.bf16.msra.mxu0 %v28534_v20 }
0x14d8   :  { %v21034_v5 = vadd.f32 %v17321_v41, %v29022_v12  ;;  %v20712_v30 = vpop.f32.mrb[147].mxu1  ;;  %v17464_v54 = vmax.f32 %v21033_v25, 0.0 }
0x14da   :  { %v17465_v16 = vmax.f32 %v21034_v5, 0.0 }
0x14dc   :  { %v17531_v36 = vpack.c.bf16 %v17465_v16, %v17464_v54 }
0x14dd   :  { %v17326_v48 = vpop.f32.mrb[40].mxu1 }
0x14de   :  { %v21036_v31 = vadd.f32 %v29023_v22, %v17326_v48  ;;  %v20715_v33 = vpop.f32.mrb[41].mxu1  ;;  %19922 = vmatprep.subr.bf16.mxu0 %v17531_v36 }
0x14df   :  { %v17329_v20 = vpop.f32.mrb[42].mxu1  ;;  %19923 = vmatpush3.bf16.msra.mxu0 %v28538_v27  ;;  %v25251_v27 = vld [vmem:[%s28617_s3 + $0x64] ss:$36 sps:$4 sm:$0xff]  }
0x14e0   :  { %v21038_v26 = vadd.f32 %v29024_v4, %v17329_v20  ;;  %v20716_v14 = vpop.f32.mrb[43].mxu1  ;;  %v17466_v7 = vmax.f32 %v21036_v31, 0.0 }
0x14e2   :  { %v17467_v47 = vmax.f32 %v21038_v26, 0.0 }
0x14e4   :  { %v17532_v58 = vpack.c.bf16 %v17467_v47, %v17466_v7 }
0x14e5   :  { %v17334_v55 = vpop.f32.mrb[152].mxu1 }
0x14e6   :  { %v21039_v51 = vadd.f32 %v17334_v55, %v29025_v8  ;;  %v20719_v57 = vpop.f32.mrb[153].mxu1  ;;  %19924 = vmatprep.subr.bf16.mxu0 %v17532_v58 }
0x14e7   :  { %v17337_v0 = vpop.f32.mrb[154].mxu1  ;;  %19925 = vmatpush3.bf16.msra.mxu0 %v28542_v44  ;;  %v25252_v44 = vld [vmem:[%s28617_s3 + $0x20] ss:$36 sps:$4 sm:$0xff]  }
0x14e8   :  { %v17468_v56 = vmax.f32 %v21039_v51, 0.0  ;;  %v20720_v37 = vpop.f32.mrb[155].mxu1 }
0x14ea   :  { %v17533_v38 = vpack.c.bf16 %v17468_v56, %v17468_v56  ;;  %17833 = vmatmul.mubr.bf16.vlgmr.msra.gmra.mrb[92].mxu0 %v25246_v62 }
0x14eb   :  { %17840 = vmatprep.mubr.bf16.mxu0 %v25251_v27 }
0x14ec   :  { %23072 = vmatprep.subr.msk.bf16.mxu0 %vm2996_vm0, %v17533_v38  ;;  %v17651_v2 = vsel %vm2996_vm0, %v17533_v38, 0 }
0x14ed   :  { %20722 = vmatpush3.bf16.msra.mxu0 %v17651_v2 }
0x14f2   :  { %17841 = vmatmul.mubr.bf16.gmra.mrb[96].mxu0 %v25249_v24 }
0x14f3   :  { %20723 = vmatprep.mubr.msk.bf16.mxu0 %vm2608_vm2, %v25252_v44 }
0x14fa   :  { %20724 = vmatmul.mubr.msk.bf16.vlgmr.msra.gmra.mrb[100].mxu0 %vm2608_vm2, %v25253_v9 }
0x153d   :  { %v19898_v53 = vpop.f32.mrb[84].mxu0 }
0x153e   :  { %v19899_v18 = vpop.f32.mrb[85].mxu0 }
0x153f   :  { %v19900_v34 = vadd.f32 %v19899_v18, %v19898_v53  ;;  %v19901_v43 = vpop.f32.mrb[86].mxu0 }
0x1540   :  { %v19902_v39 = vpop.f32.mrb[87].mxu0 }
0x1541   :  { %v17786_v6 = vadd.f32 %v19900_v34, %v28556_v42  ;;  %v19903_v49 = vadd.f32 %v19902_v39, %v19901_v43 }
0x1543   :  { %v17789_v1 = vadd.f32 %v19903_v49, %v28559_v15 }
0x1545   :  { %v19904_v28 = vpop.f32.mrb[88].mxu0 }
0x1546   :  { %v19905_v19 = vpop.f32.mrb[89].mxu0 }
0x1547   :  { %v19906_v59 = vadd.f32 %v19905_v19, %v19904_v28  ;;  %v19907_v35 = vpop.f32.mrb[90].mxu0 }
0x1548   :  { %v19908_v60 = vpop.f32.mrb[91].mxu0 }
0x1549   :  { %v17794_v63 = vadd.f32 %v19906_v59, %v17745_v52  ;;  %v19909_v45 = vadd.f32 %v19908_v60, %v19907_v35 }
0x154b   :  { %v17797_v32 = vadd.f32 %v19909_v45, %v17748_v50 }
0x15bd   :  { %v19926_v21 = vpop.f32.mrb[92].mxu0 }
0x15be   :  { %v19927_v10 = vpop.f32.mrb[93].mxu0 }
0x15bf   :  { %v19928_v29 = vadd.f32 %v19927_v10, %v19926_v21  ;;  %v19929_v23 = vpop.f32.mrb[94].mxu0 }
0x15c0   :  { %v19930_v25 = vpop.f32.mrb[95].mxu0 }
0x15c1   :  { %v19931_v46 = vadd.f32 %v19930_v25, %v19929_v23  ;;  %v17835_v11 = vadd.f32 %v19928_v29, %v17786_v6 }
0x15c3   :  { %v17838_v41 = vadd.f32 %v19931_v46, %v17789_v1 }
0x15c5   :  { %v19932_v42 = vpop.f32.mrb[96].mxu0 }
0x15c6   :  { %v19933_v40 = vpop.f32.mrb[97].mxu0 }
0x15c7   :  { %v19934_v12 = vadd.f32 %v19933_v40, %v19932_v42  ;;  %v19935_v15 = vpop.f32.mrb[98].mxu0 }
0x15c8   :  { %v19936_v5 = vpop.f32.mrb[99].mxu0 }
0x15c9   :  { %v19937_v30 = vadd.f32 %v19936_v5, %v19935_v15  ;;  %v17843_v3 = vadd.f32 %v19934_v12, %v17794_v63 }
0x15cb   :  { %v17846_v13 = vadd.f32 %v19937_v30, %v17797_v32 }
0x15cd   :  { %v20725_v17 = vpop.f32.mrb[100].mxu0 }
0x15ce   :  { %v17892_v54 = vadd.f32 %v20725_v17, %v17843_v3  ;;  %v17883_v16 = vpop.f32.mrb[101].mxu0 }
0x15cf   :  { %v17884_v52 = vadd.f32 %v17883_v16, %v17835_v11  ;;  %v20726_v61 = vpop.f32.mrb[102].mxu0 }
0x15d0   :  { %17900 = vst.msk [vmem:[%s28618_s4 + $0x10] sm:$0xff] %vm2608_vm2, %v17892_v54  ;;  %v17895_v36 = vadd.f32 %v20726_v61, %v17846_v13  ;;  %v17886_v50 = vpop.f32.mrb[103].mxu0 }
0x15d1   :  { %17898 = vst.msk [vmem:[%s28618_s4] sm:$0xff] %vm2608_vm2, %v17884_v52  ;;  %v17887_v48 = vadd.f32 %v17886_v50, %v17838_v41 }
0x15d2   :  { %17901 = vst.msk [vmem:[%s28618_s4 + $0x18] sm:$0xff] %vm2608_vm2, %v17895_v36 }
0x15d3   :  { %17899 = vst.msk [vmem:[%s28618_s4 + $0x8] sm:$0xff] %vm2608_vm2, %v17887_v48 }
0x15d4   :  { %17906 = vsyncpa [#allocation3], 1 }

</bundles_post_ra>
